<compile_context>
chip_gen: v7x
topology: tpu7x:2x2x1
jax: 0.10.0
libtpu: 0.0.40
codegen_flags: <defaults>
</compile_context>

<pallas_src>
import functools

import jax
import jax.numpy as jnp
from jax import lax
from jax.experimental import pallas as pl
from jax.experimental.pallas import tpu as pltpu

FEATURE_DIM = 16
D_MODEL = 64
NHEAD = 4
HEAD_DIM = D_MODEL // NHEAD
NUM_LAYERS = 2
D_FF = 2048          # PyTorch TransformerEncoderLayer default dim_feedforward
EPS = 1e-5           # PyTorch layer_norm_eps default


def _layer_norm(x, w, b):
    mean = jnp.mean(x, axis=-1, keepdims=True)
    var = jnp.mean((x - mean) ** 2, axis=-1, keepdims=True)
    return (x - mean) * lax.rsqrt(var + EPS) * w + b


# ---------------------------------------------------------------------------
# Fused forward kernel.  Single program, no grid; everything VMEM-resident.
#   inputs (all pre-packed / pre-transposed by the wrapper):
#     x        : (B*S, F)
#     in_w_t   : (F, D)        in_b   : (1, D)
#     wq/wk/wv : (L*H, D, HD)  per-layer-per-head projection weights
#     bqkv     : (L*H, 3, HD)  rows = [bq, bk, bv]
#     wo       : (L*H, HD, D)  per-head slice of out-proj weight
#     small    : (L, 6, D)     rows = [bo, n1w, n1b, b2, n2w, n2b]
#     w1_t     : (L, D, D_FF)  b1 : (L, 1, D_FF)   w2_t : (L, D_FF, D)
#     out_w_t  : (D, F)        out_b : (1, F)
#   output     : (B, F)   (projection of the last token per batch element)
# ---------------------------------------------------------------------------
def _fwd_kernel(x_ref, inw_ref, inb_ref,
                wq_ref, wk_ref, wv_ref, bqkv_ref, wo_ref,
                small_ref, w1_ref, b1_ref, w2_ref,
                outw_ref, outb_ref, o_ref, *, batch, seq):
    m = batch * seq
    scale = 1.0 / (HEAD_DIM ** 0.5)

    x = x_ref[...].astype(jnp.float32)                                  # (M, F)
    h = jnp.dot(x, inw_ref[...], preferred_element_type=jnp.float32) + inb_ref[...]

    for l in range(NUM_LAYERS):
        small = small_ref[l]                                            # (6, D)

        # ---- self attention (per-head weights, batched-over-B einsums) ----
        attn = small[0:1, :]                                            # out-proj bias
        for hd in range(NHEAD):
            i = l * NHEAD + hd
            bqkv = bqkv_ref[i]                                          # (3, HD)
            qh = jnp.dot(h, wq_ref[i], preferred_element_type=jnp.float32) + bqkv[0:1, :]
            kh = jnp.dot(h, wk_ref[i], preferred_element_type=jnp.float32) + bqkv[1:2, :]
            vh = jnp.dot(h, wv_ref[i], preferred_element_type=jnp.float32) + bqkv[2:3, :]
            q3 = qh.reshape(batch, seq, HEAD_DIM)
            k3 = kh.reshape(batch, seq, HEAD_DIM)
            v3 = vh.reshape(batch, seq, HEAD_DIM)
            s = jnp.einsum("bqd,bkd->bqk", q3, k3,
                           preferred_element_type=jnp.float32) * scale  # (B,S,S)
            s = s - jnp.max(s, axis=-1, keepdims=True)
            p = jnp.exp(s)
            p = p / jnp.sum(p, axis=-1, keepdims=True)
            o3 = jnp.einsum("bqk,bkd->bqd", p, v3,
                            preferred_element_type=jnp.float32)         # (B,S,HD)
            oh = o3.reshape(m, HEAD_DIM)
            attn = attn + jnp.dot(oh, wo_ref[i],
                                  preferred_element_type=jnp.float32)   # (M, D)

        # post-norm (norm_first=False); dropout identity in eval mode
        h = _layer_norm(h + attn, small[1:2, :], small[2:3, :])

        # ---- feed-forward (relu, torch default) ----
        f1 = jnp.dot(h, w1_ref[l], preferred_element_type=jnp.float32) + b1_ref[l]
        f1 = jnp.maximum(f1, 0.0)
        f2 = jnp.dot(f1, w2_ref[l], preferred_element_type=jnp.float32) + small[3:4, :]
        h = _layer_norm(h + f2, small[4:5, :], small[5:6, :])

    # last token of each batch element (rows b*seq + seq-1 of the flat (M,D) h)
    last = jnp.concatenate(
        [h[b * seq + seq - 1: b * seq + seq, :] for b in range(batch)], axis=0)
    out = jnp.dot(last, outw_ref[...], preferred_element_type=jnp.float32) + outb_ref[...]
    o_ref[...] = out.astype(o_ref.dtype)


# ---------------------------------------------------------------------------
# Wrapper: pack / pre-transpose parameters (free, done by XLA once) and call
# the fused kernel exactly once.
# ---------------------------------------------------------------------------
def _pack_params(params):
    wq_h, wk_h, wv_h, bqkv_h, wo_h = [], [], [], [], []
    small, w1t, b1, w2t = [], [], [], []
    for lp in params["layers"]:
        wqkv, bqkv = lp["wqkv"], lp["bqkv"]
        wq, wk, wv = (wqkv[:D_MODEL], wqkv[D_MODEL:2 * D_MODEL], wqkv[2 * D_MODEL:])
        bq, bk, bv = (bqkv[:D_MODEL], bqkv[D_MODEL:2 * D_MODEL], bqkv[2 * D_MODEL:])
        for hd in range(NHEAD):
            sl = slice(hd * HEAD_DIM, (hd + 1) * HEAD_DIM)
            wq_h.append(wq[sl].T)                       # (D, HD)
            wk_h.append(wk[sl].T)
            wv_h.append(wv[sl].T)
            bqkv_h.append(jnp.stack([bq[sl], bk[sl], bv[sl]]))   # (3, HD)
            wo_h.append(lp["wo"][:, sl].T)              # (HD, D)
        small.append(jnp.stack([lp["bo"], lp["n1w"], lp["n1b"],
                                lp["b2"], lp["n2w"], lp["n2b"]]))  # (6, D)
        w1t.append(lp["w1"].T)                          # (D, D_FF)
        b1.append(lp["b1"].reshape(1, D_FF))
        w2t.append(lp["w2"].T)                          # (D_FF, D)
    return (
        params["in_w"].T, params["in_b"].reshape(1, D_MODEL),
        jnp.stack(wq_h), jnp.stack(wk_h), jnp.stack(wv_h),
        jnp.stack(bqkv_h), jnp.stack(wo_h),
        jnp.stack(small), jnp.stack(w1t), jnp.stack(b1), jnp.stack(w2t),
        params["out_w"].T, params["out_b"].reshape(1, -1),
    )


def transformer_predictor_forward(params, x):
    B, S, F = x.shape
    xf = x.reshape(B * S, F)
    packed = _pack_params(params)
    kernel = functools.partial(_fwd_kernel, batch=B, seq=S)
    vmem = pl.BlockSpec(memory_space=pltpu.MemorySpace.VMEM)
    return pl.pallas_call(
        kernel,
        out_shape=jax.ShapeDtypeStruct((B, F), x.dtype),
        in_specs=[vmem] * (1 + len(packed)),
        out_specs=vmem,
    )(xf, *packed)


# ---------------------------------------------------------------------------
# Parameters (deterministic synthetic init, PyTorch weight layouts)
# ---------------------------------------------------------------------------
def init_params(key, feature_dim):
    def nrm(k, shape, scale=0.02):
        return scale * jax.random.normal(k, shape, jnp.float32)

    keys = iter(jax.random.split(key, 64))
    params = {
        "in_w": nrm(next(keys), (D_MODEL, feature_dim)),
        "in_b": nrm(next(keys), (D_MODEL,)),
        "out_w": nrm(next(keys), (feature_dim, D_MODEL)),
        "out_b": nrm(next(keys), (feature_dim,)),
        "layers": [],
    }
    for _ in range(NUM_LAYERS):
        params["layers"].append({
            "wqkv": nrm(next(keys), (3 * D_MODEL, D_MODEL)),
            "bqkv": nrm(next(keys), (3 * D_MODEL,)),
            "wo":   nrm(next(keys), (D_MODEL, D_MODEL)),
            "bo":   nrm(next(keys), (D_MODEL,)),
            "n1w":  jnp.ones((D_MODEL,), jnp.float32),
            "n1b":  jnp.zeros((D_MODEL,), jnp.float32),
            "w1":   nrm(next(keys), (D_FF, D_MODEL)),
            "b1":   nrm(next(keys), (D_FF,)),
            "w2":   nrm(next(keys), (D_MODEL, D_FF)),
            "b2":   nrm(next(keys), (D_MODEL,)),
            "n2w":  jnp.ones((D_MODEL,), jnp.float32),
            "n2b":  jnp.zeros((D_MODEL,), jnp.float32),
        })
    return params


# Pure-JAX reference (PyTorch semantics) for a sanity check.
def _reference_forward(params, x):
    def lin(v, w, b):
        return jnp.matmul(v, w.T, precision="highest") + b

    B, S, _ = x.shape
    h = lin(x, params["in_w"], params["in_b"])
    for lp in params["layers"]:
        qkv = lin(h, lp["wqkv"], lp["bqkv"])
        q, k, v = (qkv[..., :D_MODEL], qkv[..., D_MODEL:2 * D_MODEL],
                   qkv[..., 2 * D_MODEL:])

        def heads(t):
            return t.reshape(B, S, NHEAD, HEAD_DIM).transpose(0, 2, 1, 3)

        qh, kh, vh = heads(q), heads(k), heads(v)
        s = jnp.einsum("bhqd,bhkd->bhqk", qh, kh, precision="highest")
        s = s * (1.0 / (HEAD_DIM ** 0.5))
        p = jax.nn.softmax(s, axis=-1)
        o = jnp.einsum("bhqk,bhkd->bhqd", p, vh, precision="highest")
        o = o.transpose(0, 2, 1, 3).reshape(B, S, D_MODEL)
        attn = lin(o, lp["wo"], lp["bo"])
        h = _layer_norm(h + attn, lp["n1w"], lp["n1b"])
        f = jnp.maximum(lin(h, lp["w1"], lp["b1"]), 0.0)
        f = lin(f, lp["w2"], lp["b2"])
        h = _layer_norm(h + f, lp["n2w"], lp["n2b"])
    return lin(h[:, -1, :], params["out_w"], params["out_b"])


if __name__ == "__main__":
    key = jax.random.PRNGKey(0)
    k_x, k_p = jax.random.split(key)
    B, S = 2, 8
    x = jax.random.normal(k_x, (B, S, FEATURE_DIM), jnp.float32)
    params = init_params(k_p, FEATURE_DIM)

    out = transformer_predictor_forward(params, x)
    out = jax.block_until_ready(out)
    assert out.shape == (B, FEATURE_DIM)

    ref = _reference_forward(params, x)
    err = float(jnp.max(jnp.abs(out - ref)))
    assert err < 2e-2, f"max abs error vs reference: {err}"

    print("KERNEL_OK")
</pallas_src>

<mosaic_0001>
module attributes {stable_mosaic.version = 11 : i64} {
  func.func @_fwd_kernel(%arg0: memref<16x16xf32, #tpu.memory_space<vmem>>, %arg1: memref<16x64xf32, #tpu.memory_space<vmem>>, %arg2: memref<1x64xf32, #tpu.memory_space<vmem>>, %arg3: memref<8x64x16xf32, #tpu.memory_space<vmem>>, %arg4: memref<8x64x16xf32, #tpu.memory_space<vmem>>, %arg5: memref<8x64x16xf32, #tpu.memory_space<vmem>>, %arg6: memref<8x3x16xf32, #tpu.memory_space<vmem>>, %arg7: memref<8x16x64xf32, #tpu.memory_space<vmem>>, %arg8: memref<2x6x64xf32, #tpu.memory_space<vmem>>, %arg9: memref<2x64x2048xf32, #tpu.memory_space<vmem>>, %arg10: memref<2x1x2048xf32, #tpu.memory_space<vmem>>, %arg11: memref<2x2048x64xf32, #tpu.memory_space<vmem>>, %arg12: memref<64x16xf32, #tpu.memory_space<vmem>>, %arg13: memref<1x16xf32, #tpu.memory_space<vmem>>, %arg14: memref<2x16xf32, #tpu.memory_space<vmem>>) attributes {dimension_semantics = [], scalar_prefetch = 0 : i64, scratch_operands = 0 : i64, tpu.core_type = #tpu.core_type<tc>} {
    %c0 = arith.constant 0 : index
    %c0_0 = arith.constant 0 : index
    %0 = vector.load %arg0[%c0, %c0_0] : memref<16x16xf32, #tpu.memory_space<vmem>>, vector<16x16xf32>
    %c0_1 = arith.constant 0 : index
    %c0_2 = arith.constant 0 : index
    %1 = vector.load %arg1[%c0_1, %c0_2] : memref<16x64xf32, #tpu.memory_space<vmem>>, vector<16x64xf32>
    %cst = arith.constant dense<0.000000e+00> : vector<16x64xf32>
    %2 = tpu.matmul %0, %1, %cst {dimension_numbers = #tpu.dot_dimension_numbers<[1], [0], [0], [1], [0, 0, 1, 1], [], []>} : vector<16x16xf32>, vector<16x64xf32>, vector<16x64xf32> -> vector<16x64xf32>
    %c0_3 = arith.constant 0 : index
    %c0_4 = arith.constant 0 : index
    %3 = vector.load %arg2[%c0_3, %c0_4] : memref<1x64xf32, #tpu.memory_space<vmem>>, vector<1x64xf32>
    %4 = vector.broadcast %3 : vector<1x64xf32> to vector<16x64xf32>
    %5 = arith.addf %2, %4 : vector<16x64xf32>
    %c0_5 = arith.constant 0 : index
    %c0_6 = arith.constant 0 : index
    %c0_7 = arith.constant 0 : index
    %6 = vector.load %arg8[%c0_5, %c0_6, %c0_7] : memref<2x6x64xf32, #tpu.memory_space<vmem>>, vector<1x6x64xf32>
    %7 = vector.shape_cast %6 : vector<1x6x64xf32> to vector<6x64xf32>
    %8 = vector.extract_strided_slice %7 {offsets = [0, 0], sizes = [1, 64], strides = [1, 1]} : vector<6x64xf32> to vector<1x64xf32>
    %c0_8 = arith.constant 0 : index
    %c0_9 = arith.constant 0 : index
    %c0_10 = arith.constant 0 : index
    %9 = vector.load %arg6[%c0_8, %c0_9, %c0_10] : memref<8x3x16xf32, #tpu.memory_space<vmem>>, vector<1x3x16xf32>
    %10 = vector.shape_cast %9 : vector<1x3x16xf32> to vector<3x16xf32>
    %c0_11 = arith.constant 0 : index
    %c0_12 = arith.constant 0 : index
    %c0_13 = arith.constant 0 : index
    %11 = vector.load %arg3[%c0_11, %c0_12, %c0_13] : memref<8x64x16xf32, #tpu.memory_space<vmem>>, vector<1x64x16xf32>
    %12 = vector.shape_cast %11 : vector<1x64x16xf32> to vector<64x16xf32>
    %cst_14 = arith.constant dense<0.000000e+00> : vector<16x16xf32>
    %13 = tpu.matmul %5, %12, %cst_14 {dimension_numbers = #tpu.dot_dimension_numbers<[1], [0], [0], [1], [0, 0, 1, 1], [], []>} : vector<16x64xf32>, vector<64x16xf32>, vector<16x16xf32> -> vector<16x16xf32>
    %14 = vector.extract_strided_slice %10 {offsets = [0, 0], sizes = [1, 16], strides = [1, 1]} : vector<3x16xf32> to vector<1x16xf32>
    %15 = vector.broadcast %14 : vector<1x16xf32> to vector<16x16xf32>
    %16 = arith.addf %13, %15 : vector<16x16xf32>
    %c0_15 = arith.constant 0 : index
    %c0_16 = arith.constant 0 : index
    %c0_17 = arith.constant 0 : index
    %17 = vector.load %arg4[%c0_15, %c0_16, %c0_17] : memref<8x64x16xf32, #tpu.memory_space<vmem>>, vector<1x64x16xf32>
    %18 = vector.shape_cast %17 : vector<1x64x16xf32> to vector<64x16xf32>
    %cst_18 = arith.constant dense<0.000000e+00> : vector<16x16xf32>
    %19 = tpu.matmul %5, %18, %cst_18 {dimension_numbers = #tpu.dot_dimension_numbers<[1], [0], [0], [1], [0, 0, 1, 1], [], []>} : vector<16x64xf32>, vector<64x16xf32>, vector<16x16xf32> -> vector<16x16xf32>
    %20 = vector.extract_strided_slice %10 {offsets = [1, 0], sizes = [1, 16], strides = [1, 1]} : vector<3x16xf32> to vector<1x16xf32>
    %21 = vector.broadcast %20 : vector<1x16xf32> to vector<16x16xf32>
    %22 = arith.addf %19, %21 : vector<16x16xf32>
    %c0_19 = arith.constant 0 : index
    %c0_20 = arith.constant 0 : index
    %c0_21 = arith.constant 0 : index
    %23 = vector.load %arg5[%c0_19, %c0_20, %c0_21] : memref<8x64x16xf32, #tpu.memory_space<vmem>>, vector<1x64x16xf32>
    %24 = vector.shape_cast %23 : vector<1x64x16xf32> to vector<64x16xf32>
    %cst_22 = arith.constant dense<0.000000e+00> : vector<16x16xf32>
    %25 = tpu.matmul %5, %24, %cst_22 {dimension_numbers = #tpu.dot_dimension_numbers<[1], [0], [0], [1], [0, 0, 1, 1], [], []>} : vector<16x64xf32>, vector<64x16xf32>, vector<16x16xf32> -> vector<16x16xf32>
    %26 = vector.extract_strided_slice %10 {offsets = [2, 0], sizes = [1, 16], strides = [1, 1]} : vector<3x16xf32> to vector<1x16xf32>
    %27 = vector.broadcast %26 : vector<1x16xf32> to vector<16x16xf32>
    %28 = arith.addf %25, %27 : vector<16x16xf32>
    %29 = vector.shape_cast %16 : vector<16x16xf32> to vector<2x8x16xf32>
    %30 = vector.shape_cast %22 : vector<16x16xf32> to vector<2x8x16xf32>
    %31 = vector.shape_cast %28 : vector<16x16xf32> to vector<2x8x16xf32>
    "tpu.trace_start"() <{level = 10 : i32, message = "bqd,bkd->bqk"}> : () -> ()
    %cst_23 = arith.constant dense<0.000000e+00> : vector<2x8x8xf32>
    %32 = tpu.matmul %29, %30, %cst_23 {dimension_numbers = #tpu.dot_dimension_numbers<[2], [2], [1], [1], [0, 0, 0, 1, 1, 1], [0], [0]>} : vector<2x8x16xf32>, vector<2x8x16xf32>, vector<2x8x8xf32> -> vector<2x8x8xf32>
    "tpu.trace_stop"() : () -> ()
    %cst_24 = arith.constant 2.500000e-01 : f32
    %33 = vector.broadcast %cst_24 : f32 to vector<2x8x8xf32>
    %34 = arith.mulf %32, %33 : vector<2x8x8xf32>
    %cst_25 = arith.constant dense<0xFF800000> : vector<2x8xf32>
    %35 = vector.multi_reduction <maximumf>, %34, %cst_25 [2] : vector<2x8x8xf32> to vector<2x8xf32>
    %36 = vector.shape_cast %35 : vector<2x8xf32> to vector<2x8x1xf32>
    %37 = vector.broadcast %36 : vector<2x8x1xf32> to vector<2x8x8xf32>
    %38 = arith.subf %34, %37 : vector<2x8x8xf32>
    %39 = math.exp %38 : vector<2x8x8xf32>
    %cst_26 = arith.constant dense<0.000000e+00> : vector<2x8xf32>
    %40 = vector.multi_reduction <add>, %39, %cst_26 [2] : vector<2x8x8xf32> to vector<2x8xf32>
    %41 = vector.shape_cast %40 : vector<2x8xf32> to vector<2x8x1xf32>
    %42 = vector.broadcast %41 : vector<2x8x1xf32> to vector<2x8x8xf32>
    %43 = arith.divf %39, %42 : vector<2x8x8xf32>
    "tpu.trace_start"() <{level = 10 : i32, message = "bqk,bkd->bqd"}> : () -> ()
    %cst_27 = arith.constant dense<0.000000e+00> : vector<2x8x16xf32>
    %44 = tpu.matmul %43, %31, %cst_27 {dimension_numbers = #tpu.dot_dimension_numbers<[2], [1], [1], [2], [0, 0, 0, 1, 1, 2], [0], [0]>} : vector<2x8x8xf32>, vector<2x8x16xf32>, vector<2x8x16xf32> -> vector<2x8x16xf32>
    "tpu.trace_stop"() : () -> ()
    %45 = vector.shape_cast %44 : vector<2x8x16xf32> to vector<16x16xf32>
    %c0_28 = arith.constant 0 : index
    %c0_29 = arith.constant 0 : index
    %c0_30 = arith.constant 0 : index
    %46 = vector.load %arg7[%c0_28, %c0_29, %c0_30] : memref<8x16x64xf32, #tpu.memory_space<vmem>>, vector<1x16x64xf32>
    %47 = vector.shape_cast %46 : vector<1x16x64xf32> to vector<16x64xf32>
    %cst_31 = arith.constant dense<0.000000e+00> : vector<16x64xf32>
    %48 = tpu.matmul %45, %47, %cst_31 {dimension_numbers = #tpu.dot_dimension_numbers<[1], [0], [0], [1], [0, 0, 1, 1], [], []>} : vector<16x16xf32>, vector<16x64xf32>, vector<16x64xf32> -> vector<16x64xf32>
    %49 = vector.broadcast %8 : vector<1x64xf32> to vector<16x64xf32>
    %50 = arith.addf %49, %48 : vector<16x64xf32>
    %c1 = arith.constant 1 : index
    %c0_32 = arith.constant 0 : index
    %c0_33 = arith.constant 0 : index
    %51 = vector.load %arg6[%c1, %c0_32, %c0_33] : memref<8x3x16xf32, #tpu.memory_space<vmem>>, vector<1x3x16xf32>
    %52 = vector.shape_cast %51 : vector<1x3x16xf32> to vector<3x16xf32>
    %c1_34 = arith.constant 1 : index
    %c0_35 = arith.constant 0 : index
    %c0_36 = arith.constant 0 : index
    %53 = vector.load %arg3[%c1_34, %c0_35, %c0_36] : memref<8x64x16xf32, #tpu.memory_space<vmem>>, vector<1x64x16xf32>
    %54 = vector.shape_cast %53 : vector<1x64x16xf32> to vector<64x16xf32>
    %cst_37 = arith.constant dense<0.000000e+00> : vector<16x16xf32>
    %55 = tpu.matmul %5, %54, %cst_37 {dimension_numbers = #tpu.dot_dimension_numbers<[1], [0], [0], [1], [0, 0, 1, 1], [], []>} : vector<16x64xf32>, vector<64x16xf32>, vector<16x16xf32> -> vector<16x16xf32>
    %56 = vector.extract_strided_slice %52 {offsets = [0, 0], sizes = [1, 16], strides = [1, 1]} : vector<3x16xf32> to vector<1x16xf32>
    %57 = vector.broadcast %56 : vector<1x16xf32> to vector<16x16xf32>
    %58 = arith.addf %55, %57 : vector<16x16xf32>
    %c1_38 = arith.constant 1 : index
    %c0_39 = arith.constant 0 : index
    %c0_40 = arith.constant 0 : index
    %59 = vector.load %arg4[%c1_38, %c0_39, %c0_40] : memref<8x64x16xf32, #tpu.memory_space<vmem>>, vector<1x64x16xf32>
    %60 = vector.shape_cast %59 : vector<1x64x16xf32> to vector<64x16xf32>
    %cst_41 = arith.constant dense<0.000000e+00> : vector<16x16xf32>
    %61 = tpu.matmul %5, %60, %cst_41 {dimension_numbers = #tpu.dot_dimension_numbers<[1], [0], [0], [1], [0, 0, 1, 1], [], []>} : vector<16x64xf32>, vector<64x16xf32>, vector<16x16xf32> -> vector<16x16xf32>
    %62 = vector.extract_strided_slice %52 {offsets = [1, 0], sizes = [1, 16], strides = [1, 1]} : vector<3x16xf32> to vector<1x16xf32>
    %63 = vector.broadcast %62 : vector<1x16xf32> to vector<16x16xf32>
    %64 = arith.addf %61, %63 : vector<16x16xf32>
    %c1_42 = arith.constant 1 : index
    %c0_43 = arith.constant 0 : index
    %c0_44 = arith.constant 0 : index
    %65 = vector.load %arg5[%c1_42, %c0_43, %c0_44] : memref<8x64x16xf32, #tpu.memory_space<vmem>>, vector<1x64x16xf32>
    %66 = vector.shape_cast %65 : vector<1x64x16xf32> to vector<64x16xf32>
    %cst_45 = arith.constant dense<0.000000e+00> : vector<16x16xf32>
    %67 = tpu.matmul %5, %66, %cst_45 {dimension_numbers = #tpu.dot_dimension_numbers<[1], [0], [0], [1], [0, 0, 1, 1], [], []>} : vector<16x64xf32>, vector<64x16xf32>, vector<16x16xf32> -> vector<16x16xf32>
    %68 = vector.extract_strided_slice %52 {offsets = [2, 0], sizes = [1, 16], strides = [1, 1]} : vector<3x16xf32> to vector<1x16xf32>
    %69 = vector.broadcast %68 : vector<1x16xf32> to vector<16x16xf32>
    %70 = arith.addf %67, %69 : vector<16x16xf32>
    %71 = vector.shape_cast %58 : vector<16x16xf32> to vector<2x8x16xf32>
    %72 = vector.shape_cast %64 : vector<16x16xf32> to vector<2x8x16xf32>
    %73 = vector.shape_cast %70 : vector<16x16xf32> to vector<2x8x16xf32>
    "tpu.trace_start"() <{level = 10 : i32, message = "bqd,bkd->bqk"}> : () -> ()
    %cst_46 = arith.constant dense<0.000000e+00> : vector<2x8x8xf32>
    %74 = tpu.matmul %71, %72, %cst_46 {dimension_numbers = #tpu.dot_dimension_numbers<[2], [2], [1], [1], [0, 0, 0, 1, 1, 1], [0], [0]>} : vector<2x8x16xf32>, vector<2x8x16xf32>, vector<2x8x8xf32> -> vector<2x8x8xf32>
    "tpu.trace_stop"() : () -> ()
    %cst_47 = arith.constant 2.500000e-01 : f32
    %75 = vector.broadcast %cst_47 : f32 to vector<2x8x8xf32>
    %76 = arith.mulf %74, %75 : vector<2x8x8xf32>
    %cst_48 = arith.constant dense<0xFF800000> : vector<2x8xf32>
    %77 = vector.multi_reduction <maximumf>, %76, %cst_48 [2] : vector<2x8x8xf32> to vector<2x8xf32>
    %78 = vector.shape_cast %77 : vector<2x8xf32> to vector<2x8x1xf32>
    %79 = vector.broadcast %78 : vector<2x8x1xf32> to vector<2x8x8xf32>
    %80 = arith.subf %76, %79 : vector<2x8x8xf32>
    %81 = math.exp %80 : vector<2x8x8xf32>
    %cst_49 = arith.constant dense<0.000000e+00> : vector<2x8xf32>
    %82 = vector.multi_reduction <add>, %81, %cst_49 [2] : vector<2x8x8xf32> to vector<2x8xf32>
    %83 = vector.shape_cast %82 : vector<2x8xf32> to vector<2x8x1xf32>
    %84 = vector.broadcast %83 : vector<2x8x1xf32> to vector<2x8x8xf32>
    %85 = arith.divf %81, %84 : vector<2x8x8xf32>
    "tpu.trace_start"() <{level = 10 : i32, message = "bqk,bkd->bqd"}> : () -> ()
    %cst_50 = arith.constant dense<0.000000e+00> : vector<2x8x16xf32>
    %86 = tpu.matmul %85, %73, %cst_50 {dimension_numbers = #tpu.dot_dimension_numbers<[2], [1], [1], [2], [0, 0, 0, 1, 1, 2], [0], [0]>} : vector<2x8x8xf32>, vector<2x8x16xf32>, vector<2x8x16xf32> -> vector<2x8x16xf32>
    "tpu.trace_stop"() : () -> ()
    %87 = vector.shape_cast %86 : vector<2x8x16xf32> to vector<16x16xf32>
    %c1_51 = arith.constant 1 : index
    %c0_52 = arith.constant 0 : index
    %c0_53 = arith.constant 0 : index
    %88 = vector.load %arg7[%c1_51, %c0_52, %c0_53] : memref<8x16x64xf32, #tpu.memory_space<vmem>>, vector<1x16x64xf32>
    %89 = vector.shape_cast %88 : vector<1x16x64xf32> to vector<16x64xf32>
    %cst_54 = arith.constant dense<0.000000e+00> : vector<16x64xf32>
    %90 = tpu.matmul %87, %89, %cst_54 {dimension_numbers = #tpu.dot_dimension_numbers<[1], [0], [0], [1], [0, 0, 1, 1], [], []>} : vector<16x16xf32>, vector<16x64xf32>, vector<16x64xf32> -> vector<16x64xf32>
    %91 = arith.addf %50, %90 : vector<16x64xf32>
    %c2 = arith.constant 2 : index
    %c0_55 = arith.constant 0 : index
    %c0_56 = arith.constant 0 : index
    %92 = vector.load %arg6[%c2, %c0_55, %c0_56] : memref<8x3x16xf32, #tpu.memory_space<vmem>>, vector<1x3x16xf32>
    %93 = vector.shape_cast %92 : vector<1x3x16xf32> to vector<3x16xf32>
    %c2_57 = arith.constant 2 : index
    %c0_58 = arith.constant 0 : index
    %c0_59 = arith.constant 0 : index
    %94 = vector.load %arg3[%c2_57, %c0_58, %c0_59] : memref<8x64x16xf32, #tpu.memory_space<vmem>>, vector<1x64x16xf32>
    %95 = vector.shape_cast %94 : vector<1x64x16xf32> to vector<64x16xf32>
    %cst_60 = arith.constant dense<0.000000e+00> : vector<16x16xf32>
    %96 = tpu.matmul %5, %95, %cst_60 {dimension_numbers = #tpu.dot_dimension_numbers<[1], [0], [0], [1], [0, 0, 1, 1], [], []>} : vector<16x64xf32>, vector<64x16xf32>, vector<16x16xf32> -> vector<16x16xf32>
    %97 = vector.extract_strided_slice %93 {offsets = [0, 0], sizes = [1, 16], strides = [1, 1]} : vector<3x16xf32> to vector<1x16xf32>
    %98 = vector.broadcast %97 : vector<1x16xf32> to vector<16x16xf32>
    %99 = arith.addf %96, %98 : vector<16x16xf32>
    %c2_61 = arith.constant 2 : index
    %c0_62 = arith.constant 0 : index
    %c0_63 = arith.constant 0 : index
    %100 = vector.load %arg4[%c2_61, %c0_62, %c0_63] : memref<8x64x16xf32, #tpu.memory_space<vmem>>, vector<1x64x16xf32>
    %101 = vector.shape_cast %100 : vector<1x64x16xf32> to vector<64x16xf32>
    %cst_64 = arith.constant dense<0.000000e+00> : vector<16x16xf32>
    %102 = tpu.matmul %5, %101, %cst_64 {dimension_numbers = #tpu.dot_dimension_numbers<[1], [0], [0], [1], [0, 0, 1, 1], [], []>} : vector<16x64xf32>, vector<64x16xf32>, vector<16x16xf32> -> vector<16x16xf32>
    %103 = vector.extract_strided_slice %93 {offsets = [1, 0], sizes = [1, 16], strides = [1, 1]} : vector<3x16xf32> to vector<1x16xf32>
    %104 = vector.broadcast %103 : vector<1x16xf32> to vector<16x16xf32>
    %105 = arith.addf %102, %104 : vector<16x16xf32>
    %c2_65 = arith.constant 2 : index
    %c0_66 = arith.constant 0 : index
    %c0_67 = arith.constant 0 : index
    %106 = vector.load %arg5[%c2_65, %c0_66, %c0_67] : memref<8x64x16xf32, #tpu.memory_space<vmem>>, vector<1x64x16xf32>
    %107 = vector.shape_cast %106 : vector<1x64x16xf32> to vector<64x16xf32>
    %cst_68 = arith.constant dense<0.000000e+00> : vector<16x16xf32>
    %108 = tpu.matmul %5, %107, %cst_68 {dimension_numbers = #tpu.dot_dimension_numbers<[1], [0], [0], [1], [0, 0, 1, 1], [], []>} : vector<16x64xf32>, vector<64x16xf32>, vector<16x16xf32> -> vector<16x16xf32>
    %109 = vector.extract_strided_slice %93 {offsets = [2, 0], sizes = [1, 16], strides = [1, 1]} : vector<3x16xf32> to vector<1x16xf32>
    %110 = vector.broadcast %109 : vector<1x16xf32> to vector<16x16xf32>
    %111 = arith.addf %108, %110 : vector<16x16xf32>
    %112 = vector.shape_cast %99 : vector<16x16xf32> to vector<2x8x16xf32>
    %113 = vector.shape_cast %105 : vector<16x16xf32> to vector<2x8x16xf32>
    %114 = vector.shape_cast %111 : vector<16x16xf32> to vector<2x8x16xf32>
    "tpu.trace_start"() <{level = 10 : i32, message = "bqd,bkd->bqk"}> : () -> ()
    %cst_69 = arith.constant dense<0.000000e+00> : vector<2x8x8xf32>
    %115 = tpu.matmul %112, %113, %cst_69 {dimension_numbers = #tpu.dot_dimension_numbers<[2], [2], [1], [1], [0, 0, 0, 1, 1, 1], [0], [0]>} : vector<2x8x16xf32>, vector<2x8x16xf32>, vector<2x8x8xf32> -> vector<2x8x8xf32>
    "tpu.trace_stop"() : () -> ()
    %cst_70 = arith.constant 2.500000e-01 : f32
    %116 = vector.broadcast %cst_70 : f32 to vector<2x8x8xf32>
    %117 = arith.mulf %115, %116 : vector<2x8x8xf32>
    %cst_71 = arith.constant dense<0xFF800000> : vector<2x8xf32>
    %118 = vector.multi_reduction <maximumf>, %117, %cst_71 [2] : vector<2x8x8xf32> to vector<2x8xf32>
    %119 = vector.shape_cast %118 : vector<2x8xf32> to vector<2x8x1xf32>
    %120 = vector.broadcast %119 : vector<2x8x1xf32> to vector<2x8x8xf32>
    %121 = arith.subf %117, %120 : vector<2x8x8xf32>
    %122 = math.exp %121 : vector<2x8x8xf32>
    %cst_72 = arith.constant dense<0.000000e+00> : vector<2x8xf32>
    %123 = vector.multi_reduction <add>, %122, %cst_72 [2] : vector<2x8x8xf32> to vector<2x8xf32>
    %124 = vector.shape_cast %123 : vector<2x8xf32> to vector<2x8x1xf32>
    %125 = vector.broadcast %124 : vector<2x8x1xf32> to vector<2x8x8xf32>
    %126 = arith.divf %122, %125 : vector<2x8x8xf32>
    "tpu.trace_start"() <{level = 10 : i32, message = "bqk,bkd->bqd"}> : () -> ()
    %cst_73 = arith.constant dense<0.000000e+00> : vector<2x8x16xf32>
    %127 = tpu.matmul %126, %114, %cst_73 {dimension_numbers = #tpu.dot_dimension_numbers<[2], [1], [1], [2], [0, 0, 0, 1, 1, 2], [0], [0]>} : vector<2x8x8xf32>, vector<2x8x16xf32>, vector<2x8x16xf32> -> vector<2x8x16xf32>
    "tpu.trace_stop"() : () -> ()
    %128 = vector.shape_cast %127 : vector<2x8x16xf32> to vector<16x16xf32>
    %c2_74 = arith.constant 2 : index
    %c0_75 = arith.constant 0 : index
    %c0_76 = arith.constant 0 : index
    %129 = vector.load %arg7[%c2_74, %c0_75, %c0_76] : memref<8x16x64xf32, #tpu.memory_space<vmem>>, vector<1x16x64xf32>
    %130 = vector.shape_cast %129 : vector<1x16x64xf32> to vector<16x64xf32>
    %cst_77 = arith.constant dense<0.000000e+00> : vector<16x64xf32>
    %131 = tpu.matmul %128, %130, %cst_77 {dimension_numbers = #tpu.dot_dimension_numbers<[1], [0], [0], [1], [0, 0, 1, 1], [], []>} : vector<16x16xf32>, vector<16x64xf32>, vector<16x64xf32> -> vector<16x64xf32>
    %132 = arith.addf %91, %131 : vector<16x64xf32>
    %c3 = arith.constant 3 : index
    %c0_78 = arith.constant 0 : index
    %c0_79 = arith.constant 0 : index
    %133 = vector.load %arg6[%c3, %c0_78, %c0_79] : memref<8x3x16xf32, #tpu.memory_space<vmem>>, vector<1x3x16xf32>
    %134 = vector.shape_cast %133 : vector<1x3x16xf32> to vector<3x16xf32>
    %c3_80 = arith.constant 3 : index
    %c0_81 = arith.constant 0 : index
    %c0_82 = arith.constant 0 : index
    %135 = vector.load %arg3[%c3_80, %c0_81, %c0_82] : memref<8x64x16xf32, #tpu.memory_space<vmem>>, vector<1x64x16xf32>
    %136 = vector.shape_cast %135 : vector<1x64x16xf32> to vector<64x16xf32>
    %cst_83 = arith.constant dense<0.000000e+00> : vector<16x16xf32>
    %137 = tpu.matmul %5, %136, %cst_83 {dimension_numbers = #tpu.dot_dimension_numbers<[1], [0], [0], [1], [0, 0, 1, 1], [], []>} : vector<16x64xf32>, vector<64x16xf32>, vector<16x16xf32> -> vector<16x16xf32>
    %138 = vector.extract_strided_slice %134 {offsets = [0, 0], sizes = [1, 16], strides = [1, 1]} : vector<3x16xf32> to vector<1x16xf32>
    %139 = vector.broadcast %138 : vector<1x16xf32> to vector<16x16xf32>
    %140 = arith.addf %137, %139 : vector<16x16xf32>
    %c3_84 = arith.constant 3 : index
    %c0_85 = arith.constant 0 : index
    %c0_86 = arith.constant 0 : index
    %141 = vector.load %arg4[%c3_84, %c0_85, %c0_86] : memref<8x64x16xf32, #tpu.memory_space<vmem>>, vector<1x64x16xf32>
    %142 = vector.shape_cast %141 : vector<1x64x16xf32> to vector<64x16xf32>
    %cst_87 = arith.constant dense<0.000000e+00> : vector<16x16xf32>
    %143 = tpu.matmul %5, %142, %cst_87 {dimension_numbers = #tpu.dot_dimension_numbers<[1], [0], [0], [1], [0, 0, 1, 1], [], []>} : vector<16x64xf32>, vector<64x16xf32>, vector<16x16xf32> -> vector<16x16xf32>
    %144 = vector.extract_strided_slice %134 {offsets = [1, 0], sizes = [1, 16], strides = [1, 1]} : vector<3x16xf32> to vector<1x16xf32>
    %145 = vector.broadcast %144 : vector<1x16xf32> to vector<16x16xf32>
    %146 = arith.addf %143, %145 : vector<16x16xf32>
    %c3_88 = arith.constant 3 : index
    %c0_89 = arith.constant 0 : index
    %c0_90 = arith.constant 0 : index
    %147 = vector.load %arg5[%c3_88, %c0_89, %c0_90] : memref<8x64x16xf32, #tpu.memory_space<vmem>>, vector<1x64x16xf32>
    %148 = vector.shape_cast %147 : vector<1x64x16xf32> to vector<64x16xf32>
    %cst_91 = arith.constant dense<0.000000e+00> : vector<16x16xf32>
    %149 = tpu.matmul %5, %148, %cst_91 {dimension_numbers = #tpu.dot_dimension_numbers<[1], [0], [0], [1], [0, 0, 1, 1], [], []>} : vector<16x64xf32>, vector<64x16xf32>, vector<16x16xf32> -> vector<16x16xf32>
    %150 = vector.extract_strided_slice %134 {offsets = [2, 0], sizes = [1, 16], strides = [1, 1]} : vector<3x16xf32> to vector<1x16xf32>
    %151 = vector.broadcast %150 : vector<1x16xf32> to vector<16x16xf32>
    %152 = arith.addf %149, %151 : vector<16x16xf32>
    %153 = vector.shape_cast %140 : vector<16x16xf32> to vector<2x8x16xf32>
    %154 = vector.shape_cast %146 : vector<16x16xf32> to vector<2x8x16xf32>
    %155 = vector.shape_cast %152 : vector<16x16xf32> to vector<2x8x16xf32>
    "tpu.trace_start"() <{level = 10 : i32, message = "bqd,bkd->bqk"}> : () -> ()
    %cst_92 = arith.constant dense<0.000000e+00> : vector<2x8x8xf32>
    %156 = tpu.matmul %153, %154, %cst_92 {dimension_numbers = #tpu.dot_dimension_numbers<[2], [2], [1], [1], [0, 0, 0, 1, 1, 1], [0], [0]>} : vector<2x8x16xf32>, vector<2x8x16xf32>, vector<2x8x8xf32> -> vector<2x8x8xf32>
    "tpu.trace_stop"() : () -> ()
    %cst_93 = arith.constant 2.500000e-01 : f32
    %157 = vector.broadcast %cst_93 : f32 to vector<2x8x8xf32>
    %158 = arith.mulf %156, %157 : vector<2x8x8xf32>
    %cst_94 = arith.constant dense<0xFF800000> : vector<2x8xf32>
    %159 = vector.multi_reduction <maximumf>, %158, %cst_94 [2] : vector<2x8x8xf32> to vector<2x8xf32>
    %160 = vector.shape_cast %159 : vector<2x8xf32> to vector<2x8x1xf32>
    %161 = vector.broadcast %160 : vector<2x8x1xf32> to vector<2x8x8xf32>
    %162 = arith.subf %158, %161 : vector<2x8x8xf32>
    %163 = math.exp %162 : vector<2x8x8xf32>
    %cst_95 = arith.constant dense<0.000000e+00> : vector<2x8xf32>
    %164 = vector.multi_reduction <add>, %163, %cst_95 [2] : vector<2x8x8xf32> to vector<2x8xf32>
    %165 = vector.shape_cast %164 : vector<2x8xf32> to vector<2x8x1xf32>
    %166 = vector.broadcast %165 : vector<2x8x1xf32> to vector<2x8x8xf32>
    %167 = arith.divf %163, %166 : vector<2x8x8xf32>
    "tpu.trace_start"() <{level = 10 : i32, message = "bqk,bkd->bqd"}> : () -> ()
    %cst_96 = arith.constant dense<0.000000e+00> : vector<2x8x16xf32>
    %168 = tpu.matmul %167, %155, %cst_96 {dimension_numbers = #tpu.dot_dimension_numbers<[2], [1], [1], [2], [0, 0, 0, 1, 1, 2], [0], [0]>} : vector<2x8x8xf32>, vector<2x8x16xf32>, vector<2x8x16xf32> -> vector<2x8x16xf32>
    "tpu.trace_stop"() : () -> ()
    %169 = vector.shape_cast %168 : vector<2x8x16xf32> to vector<16x16xf32>
    %c3_97 = arith.constant 3 : index
    %c0_98 = arith.constant 0 : index
    %c0_99 = arith.constant 0 : index
    %170 = vector.load %arg7[%c3_97, %c0_98, %c0_99] : memref<8x16x64xf32, #tpu.memory_space<vmem>>, vector<1x16x64xf32>
    %171 = vector.shape_cast %170 : vector<1x16x64xf32> to vector<16x64xf32>
    %cst_100 = arith.constant dense<0.000000e+00> : vector<16x64xf32>
    %172 = tpu.matmul %169, %171, %cst_100 {dimension_numbers = #tpu.dot_dimension_numbers<[1], [0], [0], [1], [0, 0, 1, 1], [], []>} : vector<16x16xf32>, vector<16x64xf32>, vector<16x64xf32> -> vector<16x64xf32>
    %173 = arith.addf %132, %172 : vector<16x64xf32>
    %174 = arith.addf %5, %173 : vector<16x64xf32>
    %175 = vector.extract_strided_slice %7 {offsets = [1, 0], sizes = [1, 64], strides = [1, 1]} : vector<6x64xf32> to vector<1x64xf32>
    %176 = vector.extract_strided_slice %7 {offsets = [2, 0], sizes = [1, 64], strides = [1, 1]} : vector<6x64xf32> to vector<1x64xf32>
    %cst_101 = arith.constant dense<0.000000e+00> : vector<16xf32>
    %177 = vector.multi_reduction <add>, %174, %cst_101 [1] : vector<16x64xf32> to vector<16xf32>
    %178 = vector.shape_cast %177 : vector<16xf32> to vector<16x1xf32>
    %cst_102 = arith.constant 6.400000e+01 : f32
    %179 = vector.broadcast %cst_102 : f32 to vector<16x1xf32>
    %180 = arith.divf %178, %179 : vector<16x1xf32>
    %181 = vector.broadcast %180 : vector<16x1xf32> to vector<16x64xf32>
    %182 = arith.subf %174, %181 : vector<16x64xf32>
    %183 = arith.mulf %182, %182 : vector<16x64xf32>
    %cst_103 = arith.constant dense<0.000000e+00> : vector<16xf32>
    %184 = vector.multi_reduction <add>, %183, %cst_103 [1] : vector<16x64xf32> to vector<16xf32>
    %185 = vector.shape_cast %184 : vector<16xf32> to vector<16x1xf32>
    %cst_104 = arith.constant 6.400000e+01 : f32
    %186 = vector.broadcast %cst_104 : f32 to vector<16x1xf32>
    %187 = arith.divf %185, %186 : vector<16x1xf32>
    %188 = vector.broadcast %180 : vector<16x1xf32> to vector<16x64xf32>
    %189 = arith.subf %174, %188 : vector<16x64xf32>
    %cst_105 = arith.constant 9.99999974E-6 : f32
    %190 = vector.broadcast %cst_105 : f32 to vector<16x1xf32>
    %191 = arith.addf %187, %190 : vector<16x1xf32>
    %192 = math.rsqrt %191 : vector<16x1xf32>
    %193 = vector.broadcast %192 : vector<16x1xf32> to vector<16x64xf32>
    %194 = arith.mulf %189, %193 : vector<16x64xf32>
    %195 = vector.broadcast %175 : vector<1x64xf32> to vector<16x64xf32>
    %196 = arith.mulf %194, %195 : vector<16x64xf32>
    %197 = vector.broadcast %176 : vector<1x64xf32> to vector<16x64xf32>
    %198 = arith.addf %196, %197 : vector<16x64xf32>
    %c0_106 = arith.constant 0 : index
    %c0_107 = arith.constant 0 : index
    %c0_108 = arith.constant 0 : index
    %199 = vector.load %arg9[%c0_106, %c0_107, %c0_108] : memref<2x64x2048xf32, #tpu.memory_space<vmem>>, vector<1x64x2048xf32>
    %200 = vector.shape_cast %199 : vector<1x64x2048xf32> to vector<64x2048xf32>
    %cst_109 = arith.constant dense<0.000000e+00> : vector<16x2048xf32>
    %201 = tpu.matmul %198, %200, %cst_109 {dimension_numbers = #tpu.dot_dimension_numbers<[1], [0], [0], [1], [0, 0, 1, 1], [], []>} : vector<16x64xf32>, vector<64x2048xf32>, vector<16x2048xf32> -> vector<16x2048xf32>
    %c0_110 = arith.constant 0 : index
    %c0_111 = arith.constant 0 : index
    %c0_112 = arith.constant 0 : index
    %202 = vector.load %arg10[%c0_110, %c0_111, %c0_112] : memref<2x1x2048xf32, #tpu.memory_space<vmem>>, vector<1x1x2048xf32>
    %203 = vector.shape_cast %202 : vector<1x1x2048xf32> to vector<1x2048xf32>
    %204 = vector.broadcast %203 : vector<1x2048xf32> to vector<16x2048xf32>
    %205 = arith.addf %201, %204 : vector<16x2048xf32>
    %cst_113 = arith.constant 0.000000e+00 : f32
    %206 = vector.broadcast %cst_113 : f32 to vector<16x2048xf32>
    %207 = arith.maximumf %205, %206 : vector<16x2048xf32>
    %c0_114 = arith.constant 0 : index
    %c0_115 = arith.constant 0 : index
    %c0_116 = arith.constant 0 : index
    %208 = vector.load %arg11[%c0_114, %c0_115, %c0_116] : memref<2x2048x64xf32, #tpu.memory_space<vmem>>, vector<1x2048x64xf32>
    %209 = vector.shape_cast %208 : vector<1x2048x64xf32> to vector<2048x64xf32>
    %cst_117 = arith.constant dense<0.000000e+00> : vector<16x64xf32>
    %210 = tpu.matmul %207, %209, %cst_117 {dimension_numbers = #tpu.dot_dimension_numbers<[1], [0], [0], [1], [0, 0, 1, 1], [], []>} : vector<16x2048xf32>, vector<2048x64xf32>, vector<16x64xf32> -> vector<16x64xf32>
    %211 = vector.extract_strided_slice %7 {offsets = [3, 0], sizes = [1, 64], strides = [1, 1]} : vector<6x64xf32> to vector<1x64xf32>
    %212 = vector.broadcast %211 : vector<1x64xf32> to vector<16x64xf32>
    %213 = arith.addf %210, %212 : vector<16x64xf32>
    %214 = arith.addf %198, %213 : vector<16x64xf32>
    %215 = vector.extract_strided_slice %7 {offsets = [4, 0], sizes = [1, 64], strides = [1, 1]} : vector<6x64xf32> to vector<1x64xf32>
    %216 = vector.extract_strided_slice %7 {offsets = [5, 0], sizes = [1, 64], strides = [1, 1]} : vector<6x64xf32> to vector<1x64xf32>
    %cst_118 = arith.constant dense<0.000000e+00> : vector<16xf32>
    %217 = vector.multi_reduction <add>, %214, %cst_118 [1] : vector<16x64xf32> to vector<16xf32>
    %218 = vector.shape_cast %217 : vector<16xf32> to vector<16x1xf32>
    %cst_119 = arith.constant 6.400000e+01 : f32
    %219 = vector.broadcast %cst_119 : f32 to vector<16x1xf32>
    %220 = arith.divf %218, %219 : vector<16x1xf32>
    %221 = vector.broadcast %220 : vector<16x1xf32> to vector<16x64xf32>
    %222 = arith.subf %214, %221 : vector<16x64xf32>
    %223 = arith.mulf %222, %222 : vector<16x64xf32>
    %cst_120 = arith.constant dense<0.000000e+00> : vector<16xf32>
    %224 = vector.multi_reduction <add>, %223, %cst_120 [1] : vector<16x64xf32> to vector<16xf32>
    %225 = vector.shape_cast %224 : vector<16xf32> to vector<16x1xf32>
    %cst_121 = arith.constant 6.400000e+01 : f32
    %226 = vector.broadcast %cst_121 : f32 to vector<16x1xf32>
    %227 = arith.divf %225, %226 : vector<16x1xf32>
    %228 = vector.broadcast %220 : vector<16x1xf32> to vector<16x64xf32>
    %229 = arith.subf %214, %228 : vector<16x64xf32>
    %cst_122 = arith.constant 9.99999974E-6 : f32
    %230 = vector.broadcast %cst_122 : f32 to vector<16x1xf32>
    %231 = arith.addf %227, %230 : vector<16x1xf32>
    %232 = math.rsqrt %231 : vector<16x1xf32>
    %233 = vector.broadcast %232 : vector<16x1xf32> to vector<16x64xf32>
    %234 = arith.mulf %229, %233 : vector<16x64xf32>
    %235 = vector.broadcast %215 : vector<1x64xf32> to vector<16x64xf32>
    %236 = arith.mulf %234, %235 : vector<16x64xf32>
    %237 = vector.broadcast %216 : vector<1x64xf32> to vector<16x64xf32>
    %238 = arith.addf %236, %237 : vector<16x64xf32>
    %c1_123 = arith.constant 1 : index
    %c0_124 = arith.constant 0 : index
    %c0_125 = arith.constant 0 : index
    %239 = vector.load %arg8[%c1_123, %c0_124, %c0_125] : memref<2x6x64xf32, #tpu.memory_space<vmem>>, vector<1x6x64xf32>
    %240 = vector.shape_cast %239 : vector<1x6x64xf32> to vector<6x64xf32>
    %241 = vector.extract_strided_slice %240 {offsets = [0, 0], sizes = [1, 64], strides = [1, 1]} : vector<6x64xf32> to vector<1x64xf32>
    %c4 = arith.constant 4 : index
    %c0_126 = arith.constant 0 : index
    %c0_127 = arith.constant 0 : index
    %242 = vector.load %arg6[%c4, %c0_126, %c0_127] : memref<8x3x16xf32, #tpu.memory_space<vmem>>, vector<1x3x16xf32>
    %243 = vector.shape_cast %242 : vector<1x3x16xf32> to vector<3x16xf32>
    %c4_128 = arith.constant 4 : index
    %c0_129 = arith.constant 0 : index
    %c0_130 = arith.constant 0 : index
    %244 = vector.load %arg3[%c4_128, %c0_129, %c0_130] : memref<8x64x16xf32, #tpu.memory_space<vmem>>, vector<1x64x16xf32>
    %245 = vector.shape_cast %244 : vector<1x64x16xf32> to vector<64x16xf32>
    %cst_131 = arith.constant dense<0.000000e+00> : vector<16x16xf32>
    %246 = tpu.matmul %238, %245, %cst_131 {dimension_numbers = #tpu.dot_dimension_numbers<[1], [0], [0], [1], [0, 0, 1, 1], [], []>} : vector<16x64xf32>, vector<64x16xf32>, vector<16x16xf32> -> vector<16x16xf32>
    %247 = vector.extract_strided_slice %243 {offsets = [0, 0], sizes = [1, 16], strides = [1, 1]} : vector<3x16xf32> to vector<1x16xf32>
    %248 = vector.broadcast %247 : vector<1x16xf32> to vector<16x16xf32>
    %249 = arith.addf %246, %248 : vector<16x16xf32>
    %c4_132 = arith.constant 4 : index
    %c0_133 = arith.constant 0 : index
    %c0_134 = arith.constant 0 : index
    %250 = vector.load %arg4[%c4_132, %c0_133, %c0_134] : memref<8x64x16xf32, #tpu.memory_space<vmem>>, vector<1x64x16xf32>
    %251 = vector.shape_cast %250 : vector<1x64x16xf32> to vector<64x16xf32>
    %cst_135 = arith.constant dense<0.000000e+00> : vector<16x16xf32>
    %252 = tpu.matmul %238, %251, %cst_135 {dimension_numbers = #tpu.dot_dimension_numbers<[1], [0], [0], [1], [0, 0, 1, 1], [], []>} : vector<16x64xf32>, vector<64x16xf32>, vector<16x16xf32> -> vector<16x16xf32>
    %253 = vector.extract_strided_slice %243 {offsets = [1, 0], sizes = [1, 16], strides = [1, 1]} : vector<3x16xf32> to vector<1x16xf32>
    %254 = vector.broadcast %253 : vector<1x16xf32> to vector<16x16xf32>
    %255 = arith.addf %252, %254 : vector<16x16xf32>
    %c4_136 = arith.constant 4 : index
    %c0_137 = arith.constant 0 : index
    %c0_138 = arith.constant 0 : index
    %256 = vector.load %arg5[%c4_136, %c0_137, %c0_138] : memref<8x64x16xf32, #tpu.memory_space<vmem>>, vector<1x64x16xf32>
    %257 = vector.shape_cast %256 : vector<1x64x16xf32> to vector<64x16xf32>
    %cst_139 = arith.constant dense<0.000000e+00> : vector<16x16xf32>
    %258 = tpu.matmul %238, %257, %cst_139 {dimension_numbers = #tpu.dot_dimension_numbers<[1], [0], [0], [1], [0, 0, 1, 1], [], []>} : vector<16x64xf32>, vector<64x16xf32>, vector<16x16xf32> -> vector<16x16xf32>
    %259 = vector.extract_strided_slice %243 {offsets = [2, 0], sizes = [1, 16], strides = [1, 1]} : vector<3x16xf32> to vector<1x16xf32>
    %260 = vector.broadcast %259 : vector<1x16xf32> to vector<16x16xf32>
    %261 = arith.addf %258, %260 : vector<16x16xf32>
    %262 = vector.shape_cast %249 : vector<16x16xf32> to vector<2x8x16xf32>
    %263 = vector.shape_cast %255 : vector<16x16xf32> to vector<2x8x16xf32>
    %264 = vector.shape_cast %261 : vector<16x16xf32> to vector<2x8x16xf32>
    "tpu.trace_start"() <{level = 10 : i32, message = "bqd,bkd->bqk"}> : () -> ()
    %cst_140 = arith.constant dense<0.000000e+00> : vector<2x8x8xf32>
    %265 = tpu.matmul %262, %263, %cst_140 {dimension_numbers = #tpu.dot_dimension_numbers<[2], [2], [1], [1], [0, 0, 0, 1, 1, 1], [0], [0]>} : vector<2x8x16xf32>, vector<2x8x16xf32>, vector<2x8x8xf32> -> vector<2x8x8xf32>
    "tpu.trace_stop"() : () -> ()
    %cst_141 = arith.constant 2.500000e-01 : f32
    %266 = vector.broadcast %cst_141 : f32 to vector<2x8x8xf32>
    %267 = arith.mulf %265, %266 : vector<2x8x8xf32>
    %cst_142 = arith.constant dense<0xFF800000> : vector<2x8xf32>
    %268 = vector.multi_reduction <maximumf>, %267, %cst_142 [2] : vector<2x8x8xf32> to vector<2x8xf32>
    %269 = vector.shape_cast %268 : vector<2x8xf32> to vector<2x8x1xf32>
    %270 = vector.broadcast %269 : vector<2x8x1xf32> to vector<2x8x8xf32>
    %271 = arith.subf %267, %270 : vector<2x8x8xf32>
    %272 = math.exp %271 : vector<2x8x8xf32>
    %cst_143 = arith.constant dense<0.000000e+00> : vector<2x8xf32>
    %273 = vector.multi_reduction <add>, %272, %cst_143 [2] : vector<2x8x8xf32> to vector<2x8xf32>
    %274 = vector.shape_cast %273 : vector<2x8xf32> to vector<2x8x1xf32>
    %275 = vector.broadcast %274 : vector<2x8x1xf32> to vector<2x8x8xf32>
    %276 = arith.divf %272, %275 : vector<2x8x8xf32>
    "tpu.trace_start"() <{level = 10 : i32, message = "bqk,bkd->bqd"}> : () -> ()
    %cst_144 = arith.constant dense<0.000000e+00> : vector<2x8x16xf32>
    %277 = tpu.matmul %276, %264, %cst_144 {dimension_numbers = #tpu.dot_dimension_numbers<[2], [1], [1], [2], [0, 0, 0, 1, 1, 2], [0], [0]>} : vector<2x8x8xf32>, vector<2x8x16xf32>, vector<2x8x16xf32> -> vector<2x8x16xf32>
    "tpu.trace_stop"() : () -> ()
    %278 = vector.shape_cast %277 : vector<2x8x16xf32> to vector<16x16xf32>
    %c4_145 = arith.constant 4 : index
    %c0_146 = arith.constant 0 : index
    %c0_147 = arith.constant 0 : index
    %279 = vector.load %arg7[%c4_145, %c0_146, %c0_147] : memref<8x16x64xf32, #tpu.memory_space<vmem>>, vector<1x16x64xf32>
    %280 = vector.shape_cast %279 : vector<1x16x64xf32> to vector<16x64xf32>
    %cst_148 = arith.constant dense<0.000000e+00> : vector<16x64xf32>
    %281 = tpu.matmul %278, %280, %cst_148 {dimension_numbers = #tpu.dot_dimension_numbers<[1], [0], [0], [1], [0, 0, 1, 1], [], []>} : vector<16x16xf32>, vector<16x64xf32>, vector<16x64xf32> -> vector<16x64xf32>
    %282 = vector.broadcast %241 : vector<1x64xf32> to vector<16x64xf32>
    %283 = arith.addf %282, %281 : vector<16x64xf32>
    %c5 = arith.constant 5 : index
    %c0_149 = arith.constant 0 : index
    %c0_150 = arith.constant 0 : index
    %284 = vector.load %arg6[%c5, %c0_149, %c0_150] : memref<8x3x16xf32, #tpu.memory_space<vmem>>, vector<1x3x16xf32>
    %285 = vector.shape_cast %284 : vector<1x3x16xf32> to vector<3x16xf32>
    %c5_151 = arith.constant 5 : index
    %c0_152 = arith.constant 0 : index
    %c0_153 = arith.constant 0 : index
    %286 = vector.load %arg3[%c5_151, %c0_152, %c0_153] : memref<8x64x16xf32, #tpu.memory_space<vmem>>, vector<1x64x16xf32>
    %287 = vector.shape_cast %286 : vector<1x64x16xf32> to vector<64x16xf32>
    %cst_154 = arith.constant dense<0.000000e+00> : vector<16x16xf32>
    %288 = tpu.matmul %238, %287, %cst_154 {dimension_numbers = #tpu.dot_dimension_numbers<[1], [0], [0], [1], [0, 0, 1, 1], [], []>} : vector<16x64xf32>, vector<64x16xf32>, vector<16x16xf32> -> vector<16x16xf32>
    %289 = vector.extract_strided_slice %285 {offsets = [0, 0], sizes = [1, 16], strides = [1, 1]} : vector<3x16xf32> to vector<1x16xf32>
    %290 = vector.broadcast %289 : vector<1x16xf32> to vector<16x16xf32>
    %291 = arith.addf %288, %290 : vector<16x16xf32>
    %c5_155 = arith.constant 5 : index
    %c0_156 = arith.constant 0 : index
    %c0_157 = arith.constant 0 : index
    %292 = vector.load %arg4[%c5_155, %c0_156, %c0_157] : memref<8x64x16xf32, #tpu.memory_space<vmem>>, vector<1x64x16xf32>
    %293 = vector.shape_cast %292 : vector<1x64x16xf32> to vector<64x16xf32>
    %cst_158 = arith.constant dense<0.000000e+00> : vector<16x16xf32>
    %294 = tpu.matmul %238, %293, %cst_158 {dimension_numbers = #tpu.dot_dimension_numbers<[1], [0], [0], [1], [0, 0, 1, 1], [], []>} : vector<16x64xf32>, vector<64x16xf32>, vector<16x16xf32> -> vector<16x16xf32>
    %295 = vector.extract_strided_slice %285 {offsets = [1, 0], sizes = [1, 16], strides = [1, 1]} : vector<3x16xf32> to vector<1x16xf32>
    %296 = vector.broadcast %295 : vector<1x16xf32> to vector<16x16xf32>
    %297 = arith.addf %294, %296 : vector<16x16xf32>
    %c5_159 = arith.constant 5 : index
    %c0_160 = arith.constant 0 : index
    %c0_161 = arith.constant 0 : index
    %298 = vector.load %arg5[%c5_159, %c0_160, %c0_161] : memref<8x64x16xf32, #tpu.memory_space<vmem>>, vector<1x64x16xf32>
    %299 = vector.shape_cast %298 : vector<1x64x16xf32> to vector<64x16xf32>
    %cst_162 = arith.constant dense<0.000000e+00> : vector<16x16xf32>
    %300 = tpu.matmul %238, %299, %cst_162 {dimension_numbers = #tpu.dot_dimension_numbers<[1], [0], [0], [1], [0, 0, 1, 1], [], []>} : vector<16x64xf32>, vector<64x16xf32>, vector<16x16xf32> -> vector<16x16xf32>
    %301 = vector.extract_strided_slice %285 {offsets = [2, 0], sizes = [1, 16], strides = [1, 1]} : vector<3x16xf32> to vector<1x16xf32>
    %302 = vector.broadcast %301 : vector<1x16xf32> to vector<16x16xf32>
    %303 = arith.addf %300, %302 : vector<16x16xf32>
    %304 = vector.shape_cast %291 : vector<16x16xf32> to vector<2x8x16xf32>
    %305 = vector.shape_cast %297 : vector<16x16xf32> to vector<2x8x16xf32>
    %306 = vector.shape_cast %303 : vector<16x16xf32> to vector<2x8x16xf32>
    "tpu.trace_start"() <{level = 10 : i32, message = "bqd,bkd->bqk"}> : () -> ()
    %cst_163 = arith.constant dense<0.000000e+00> : vector<2x8x8xf32>
    %307 = tpu.matmul %304, %305, %cst_163 {dimension_numbers = #tpu.dot_dimension_numbers<[2], [2], [1], [1], [0, 0, 0, 1, 1, 1], [0], [0]>} : vector<2x8x16xf32>, vector<2x8x16xf32>, vector<2x8x8xf32> -> vector<2x8x8xf32>
    "tpu.trace_stop"() : () -> ()
    %cst_164 = arith.constant 2.500000e-01 : f32
    %308 = vector.broadcast %cst_164 : f32 to vector<2x8x8xf32>
    %309 = arith.mulf %307, %308 : vector<2x8x8xf32>
    %cst_165 = arith.constant dense<0xFF800000> : vector<2x8xf32>
    %310 = vector.multi_reduction <maximumf>, %309, %cst_165 [2] : vector<2x8x8xf32> to vector<2x8xf32>
    %311 = vector.shape_cast %310 : vector<2x8xf32> to vector<2x8x1xf32>
    %312 = vector.broadcast %311 : vector<2x8x1xf32> to vector<2x8x8xf32>
    %313 = arith.subf %309, %312 : vector<2x8x8xf32>
    %314 = math.exp %313 : vector<2x8x8xf32>
    %cst_166 = arith.constant dense<0.000000e+00> : vector<2x8xf32>
    %315 = vector.multi_reduction <add>, %314, %cst_166 [2] : vector<2x8x8xf32> to vector<2x8xf32>
    %316 = vector.shape_cast %315 : vector<2x8xf32> to vector<2x8x1xf32>
    %317 = vector.broadcast %316 : vector<2x8x1xf32> to vector<2x8x8xf32>
    %318 = arith.divf %314, %317 : vector<2x8x8xf32>
    "tpu.trace_start"() <{level = 10 : i32, message = "bqk,bkd->bqd"}> : () -> ()
    %cst_167 = arith.constant dense<0.000000e+00> : vector<2x8x16xf32>
    %319 = tpu.matmul %318, %306, %cst_167 {dimension_numbers = #tpu.dot_dimension_numbers<[2], [1], [1], [2], [0, 0, 0, 1, 1, 2], [0], [0]>} : vector<2x8x8xf32>, vector<2x8x16xf32>, vector<2x8x16xf32> -> vector<2x8x16xf32>
    "tpu.trace_stop"() : () -> ()
    %320 = vector.shape_cast %319 : vector<2x8x16xf32> to vector<16x16xf32>
    %c5_168 = arith.constant 5 : index
    %c0_169 = arith.constant 0 : index
    %c0_170 = arith.constant 0 : index
    %321 = vector.load %arg7[%c5_168, %c0_169, %c0_170] : memref<8x16x64xf32, #tpu.memory_space<vmem>>, vector<1x16x64xf32>
    %322 = vector.shape_cast %321 : vector<1x16x64xf32> to vector<16x64xf32>
    %cst_171 = arith.constant dense<0.000000e+00> : vector<16x64xf32>
    %323 = tpu.matmul %320, %322, %cst_171 {dimension_numbers = #tpu.dot_dimension_numbers<[1], [0], [0], [1], [0, 0, 1, 1], [], []>} : vector<16x16xf32>, vector<16x64xf32>, vector<16x64xf32> -> vector<16x64xf32>
    %324 = arith.addf %283, %323 : vector<16x64xf32>
    %c6 = arith.constant 6 : index
    %c0_172 = arith.constant 0 : index
    %c0_173 = arith.constant 0 : index
    %325 = vector.load %arg6[%c6, %c0_172, %c0_173] : memref<8x3x16xf32, #tpu.memory_space<vmem>>, vector<1x3x16xf32>
    %326 = vector.shape_cast %325 : vector<1x3x16xf32> to vector<3x16xf32>
    %c6_174 = arith.constant 6 : index
    %c0_175 = arith.constant 0 : index
    %c0_176 = arith.constant 0 : index
    %327 = vector.load %arg3[%c6_174, %c0_175, %c0_176] : memref<8x64x16xf32, #tpu.memory_space<vmem>>, vector<1x64x16xf32>
    %328 = vector.shape_cast %327 : vector<1x64x16xf32> to vector<64x16xf32>
    %cst_177 = arith.constant dense<0.000000e+00> : vector<16x16xf32>
    %329 = tpu.matmul %238, %328, %cst_177 {dimension_numbers = #tpu.dot_dimension_numbers<[1], [0], [0], [1], [0, 0, 1, 1], [], []>} : vector<16x64xf32>, vector<64x16xf32>, vector<16x16xf32> -> vector<16x16xf32>
    %330 = vector.extract_strided_slice %326 {offsets = [0, 0], sizes = [1, 16], strides = [1, 1]} : vector<3x16xf32> to vector<1x16xf32>
    %331 = vector.broadcast %330 : vector<1x16xf32> to vector<16x16xf32>
    %332 = arith.addf %329, %331 : vector<16x16xf32>
    %c6_178 = arith.constant 6 : index
    %c0_179 = arith.constant 0 : index
    %c0_180 = arith.constant 0 : index
    %333 = vector.load %arg4[%c6_178, %c0_179, %c0_180] : memref<8x64x16xf32, #tpu.memory_space<vmem>>, vector<1x64x16xf32>
    %334 = vector.shape_cast %333 : vector<1x64x16xf32> to vector<64x16xf32>
    %cst_181 = arith.constant dense<0.000000e+00> : vector<16x16xf32>
    %335 = tpu.matmul %238, %334, %cst_181 {dimension_numbers = #tpu.dot_dimension_numbers<[1], [0], [0], [1], [0, 0, 1, 1], [], []>} : vector<16x64xf32>, vector<64x16xf32>, vector<16x16xf32> -> vector<16x16xf32>
    %336 = vector.extract_strided_slice %326 {offsets = [1, 0], sizes = [1, 16], strides = [1, 1]} : vector<3x16xf32> to vector<1x16xf32>
    %337 = vector.broadcast %336 : vector<1x16xf32> to vector<16x16xf32>
    %338 = arith.addf %335, %337 : vector<16x16xf32>
    %c6_182 = arith.constant 6 : index
    %c0_183 = arith.constant 0 : index
    %c0_184 = arith.constant 0 : index
    %339 = vector.load %arg5[%c6_182, %c0_183, %c0_184] : memref<8x64x16xf32, #tpu.memory_space<vmem>>, vector<1x64x16xf32>
    %340 = vector.shape_cast %339 : vector<1x64x16xf32> to vector<64x16xf32>
    %cst_185 = arith.constant dense<0.000000e+00> : vector<16x16xf32>
    %341 = tpu.matmul %238, %340, %cst_185 {dimension_numbers = #tpu.dot_dimension_numbers<[1], [0], [0], [1], [0, 0, 1, 1], [], []>} : vector<16x64xf32>, vector<64x16xf32>, vector<16x16xf32> -> vector<16x16xf32>
    %342 = vector.extract_strided_slice %326 {offsets = [2, 0], sizes = [1, 16], strides = [1, 1]} : vector<3x16xf32> to vector<1x16xf32>
    %343 = vector.broadcast %342 : vector<1x16xf32> to vector<16x16xf32>
    %344 = arith.addf %341, %343 : vector<16x16xf32>
    %345 = vector.shape_cast %332 : vector<16x16xf32> to vector<2x8x16xf32>
    %346 = vector.shape_cast %338 : vector<16x16xf32> to vector<2x8x16xf32>
    %347 = vector.shape_cast %344 : vector<16x16xf32> to vector<2x8x16xf32>
    "tpu.trace_start"() <{level = 10 : i32, message = "bqd,bkd->bqk"}> : () -> ()
    %cst_186 = arith.constant dense<0.000000e+00> : vector<2x8x8xf32>
    %348 = tpu.matmul %345, %346, %cst_186 {dimension_numbers = #tpu.dot_dimension_numbers<[2], [2], [1], [1], [0, 0, 0, 1, 1, 1], [0], [0]>} : vector<2x8x16xf32>, vector<2x8x16xf32>, vector<2x8x8xf32> -> vector<2x8x8xf32>
    "tpu.trace_stop"() : () -> ()
    %cst_187 = arith.constant 2.500000e-01 : f32
    %349 = vector.broadcast %cst_187 : f32 to vector<2x8x8xf32>
    %350 = arith.mulf %348, %349 : vector<2x8x8xf32>
    %cst_188 = arith.constant dense<0xFF800000> : vector<2x8xf32>
    %351 = vector.multi_reduction <maximumf>, %350, %cst_188 [2] : vector<2x8x8xf32> to vector<2x8xf32>
    %352 = vector.shape_cast %351 : vector<2x8xf32> to vector<2x8x1xf32>
    %353 = vector.broadcast %352 : vector<2x8x1xf32> to vector<2x8x8xf32>
    %354 = arith.subf %350, %353 : vector<2x8x8xf32>
    %355 = math.exp %354 : vector<2x8x8xf32>
    %cst_189 = arith.constant dense<0.000000e+00> : vector<2x8xf32>
    %356 = vector.multi_reduction <add>, %355, %cst_189 [2] : vector<2x8x8xf32> to vector<2x8xf32>
    %357 = vector.shape_cast %356 : vector<2x8xf32> to vector<2x8x1xf32>
    %358 = vector.broadcast %357 : vector<2x8x1xf32> to vector<2x8x8xf32>
    %359 = arith.divf %355, %358 : vector<2x8x8xf32>
    "tpu.trace_start"() <{level = 10 : i32, message = "bqk,bkd->bqd"}> : () -> ()
    %cst_190 = arith.constant dense<0.000000e+00> : vector<2x8x16xf32>
    %360 = tpu.matmul %359, %347, %cst_190 {dimension_numbers = #tpu.dot_dimension_numbers<[2], [1], [1], [2], [0, 0, 0, 1, 1, 2], [0], [0]>} : vector<2x8x8xf32>, vector<2x8x16xf32>, vector<2x8x16xf32> -> vector<2x8x16xf32>
    "tpu.trace_stop"() : () -> ()
    %361 = vector.shape_cast %360 : vector<2x8x16xf32> to vector<16x16xf32>
    %c6_191 = arith.constant 6 : index
    %c0_192 = arith.constant 0 : index
    %c0_193 = arith.constant 0 : index
    %362 = vector.load %arg7[%c6_191, %c0_192, %c0_193] : memref<8x16x64xf32, #tpu.memory_space<vmem>>, vector<1x16x64xf32>
    %363 = vector.shape_cast %362 : vector<1x16x64xf32> to vector<16x64xf32>
    %cst_194 = arith.constant dense<0.000000e+00> : vector<16x64xf32>
    %364 = tpu.matmul %361, %363, %cst_194 {dimension_numbers = #tpu.dot_dimension_numbers<[1], [0], [0], [1], [0, 0, 1, 1], [], []>} : vector<16x16xf32>, vector<16x64xf32>, vector<16x64xf32> -> vector<16x64xf32>
    %365 = arith.addf %324, %364 : vector<16x64xf32>
    %c7 = arith.constant 7 : index
    %c0_195 = arith.constant 0 : index
    %c0_196 = arith.constant 0 : index
    %366 = vector.load %arg6[%c7, %c0_195, %c0_196] : memref<8x3x16xf32, #tpu.memory_space<vmem>>, vector<1x3x16xf32>
    %367 = vector.shape_cast %366 : vector<1x3x16xf32> to vector<3x16xf32>
    %c7_197 = arith.constant 7 : index
    %c0_198 = arith.constant 0 : index
    %c0_199 = arith.constant 0 : index
    %368 = vector.load %arg3[%c7_197, %c0_198, %c0_199] : memref<8x64x16xf32, #tpu.memory_space<vmem>>, vector<1x64x16xf32>
    %369 = vector.shape_cast %368 : vector<1x64x16xf32> to vector<64x16xf32>
    %cst_200 = arith.constant dense<0.000000e+00> : vector<16x16xf32>
    %370 = tpu.matmul %238, %369, %cst_200 {dimension_numbers = #tpu.dot_dimension_numbers<[1], [0], [0], [1], [0, 0, 1, 1], [], []>} : vector<16x64xf32>, vector<64x16xf32>, vector<16x16xf32> -> vector<16x16xf32>
    %371 = vector.extract_strided_slice %367 {offsets = [0, 0], sizes = [1, 16], strides = [1, 1]} : vector<3x16xf32> to vector<1x16xf32>
    %372 = vector.broadcast %371 : vector<1x16xf32> to vector<16x16xf32>
    %373 = arith.addf %370, %372 : vector<16x16xf32>
    %c7_201 = arith.constant 7 : index
    %c0_202 = arith.constant 0 : index
    %c0_203 = arith.constant 0 : index
    %374 = vector.load %arg4[%c7_201, %c0_202, %c0_203] : memref<8x64x16xf32, #tpu.memory_space<vmem>>, vector<1x64x16xf32>
    %375 = vector.shape_cast %374 : vector<1x64x16xf32> to vector<64x16xf32>
    %cst_204 = arith.constant dense<0.000000e+00> : vector<16x16xf32>
    %376 = tpu.matmul %238, %375, %cst_204 {dimension_numbers = #tpu.dot_dimension_numbers<[1], [0], [0], [1], [0, 0, 1, 1], [], []>} : vector<16x64xf32>, vector<64x16xf32>, vector<16x16xf32> -> vector<16x16xf32>
    %377 = vector.extract_strided_slice %367 {offsets = [1, 0], sizes = [1, 16], strides = [1, 1]} : vector<3x16xf32> to vector<1x16xf32>
    %378 = vector.broadcast %377 : vector<1x16xf32> to vector<16x16xf32>
    %379 = arith.addf %376, %378 : vector<16x16xf32>
    %c7_205 = arith.constant 7 : index
    %c0_206 = arith.constant 0 : index
    %c0_207 = arith.constant 0 : index
    %380 = vector.load %arg5[%c7_205, %c0_206, %c0_207] : memref<8x64x16xf32, #tpu.memory_space<vmem>>, vector<1x64x16xf32>
    %381 = vector.shape_cast %380 : vector<1x64x16xf32> to vector<64x16xf32>
    %cst_208 = arith.constant dense<0.000000e+00> : vector<16x16xf32>
    %382 = tpu.matmul %238, %381, %cst_208 {dimension_numbers = #tpu.dot_dimension_numbers<[1], [0], [0], [1], [0, 0, 1, 1], [], []>} : vector<16x64xf32>, vector<64x16xf32>, vector<16x16xf32> -> vector<16x16xf32>
    %383 = vector.extract_strided_slice %367 {offsets = [2, 0], sizes = [1, 16], strides = [1, 1]} : vector<3x16xf32> to vector<1x16xf32>
    %384 = vector.broadcast %383 : vector<1x16xf32> to vector<16x16xf32>
    %385 = arith.addf %382, %384 : vector<16x16xf32>
    %386 = vector.shape_cast %373 : vector<16x16xf32> to vector<2x8x16xf32>
    %387 = vector.shape_cast %379 : vector<16x16xf32> to vector<2x8x16xf32>
    %388 = vector.shape_cast %385 : vector<16x16xf32> to vector<2x8x16xf32>
    "tpu.trace_start"() <{level = 10 : i32, message = "bqd,bkd->bqk"}> : () -> ()
    %cst_209 = arith.constant dense<0.000000e+00> : vector<2x8x8xf32>
    %389 = tpu.matmul %386, %387, %cst_209 {dimension_numbers = #tpu.dot_dimension_numbers<[2], [2], [1], [1], [0, 0, 0, 1, 1, 1], [0], [0]>} : vector<2x8x16xf32>, vector<2x8x16xf32>, vector<2x8x8xf32> -> vector<2x8x8xf32>
    "tpu.trace_stop"() : () -> ()
    %cst_210 = arith.constant 2.500000e-01 : f32
    %390 = vector.broadcast %cst_210 : f32 to vector<2x8x8xf32>
    %391 = arith.mulf %389, %390 : vector<2x8x8xf32>
    %cst_211 = arith.constant dense<0xFF800000> : vector<2x8xf32>
    %392 = vector.multi_reduction <maximumf>, %391, %cst_211 [2] : vector<2x8x8xf32> to vector<2x8xf32>
    %393 = vector.shape_cast %392 : vector<2x8xf32> to vector<2x8x1xf32>
    %394 = vector.broadcast %393 : vector<2x8x1xf32> to vector<2x8x8xf32>
    %395 = arith.subf %391, %394 : vector<2x8x8xf32>
    %396 = math.exp %395 : vector<2x8x8xf32>
    %cst_212 = arith.constant dense<0.000000e+00> : vector<2x8xf32>
    %397 = vector.multi_reduction <add>, %396, %cst_212 [2] : vector<2x8x8xf32> to vector<2x8xf32>
    %398 = vector.shape_cast %397 : vector<2x8xf32> to vector<2x8x1xf32>
    %399 = vector.broadcast %398 : vector<2x8x1xf32> to vector<2x8x8xf32>
    %400 = arith.divf %396, %399 : vector<2x8x8xf32>
    "tpu.trace_start"() <{level = 10 : i32, message = "bqk,bkd->bqd"}> : () -> ()
    %cst_213 = arith.constant dense<0.000000e+00> : vector<2x8x16xf32>
    %401 = tpu.matmul %400, %388, %cst_213 {dimension_numbers = #tpu.dot_dimension_numbers<[2], [1], [1], [2], [0, 0, 0, 1, 1, 2], [0], [0]>} : vector<2x8x8xf32>, vector<2x8x16xf32>, vector<2x8x16xf32> -> vector<2x8x16xf32>
    "tpu.trace_stop"() : () -> ()
    %402 = vector.shape_cast %401 : vector<2x8x16xf32> to vector<16x16xf32>
    %c7_214 = arith.constant 7 : index
    %c0_215 = arith.constant 0 : index
    %c0_216 = arith.constant 0 : index
    %403 = vector.load %arg7[%c7_214, %c0_215, %c0_216] : memref<8x16x64xf32, #tpu.memory_space<vmem>>, vector<1x16x64xf32>
    %404 = vector.shape_cast %403 : vector<1x16x64xf32> to vector<16x64xf32>
    %cst_217 = arith.constant dense<0.000000e+00> : vector<16x64xf32>
    %405 = tpu.matmul %402, %404, %cst_217 {dimension_numbers = #tpu.dot_dimension_numbers<[1], [0], [0], [1], [0, 0, 1, 1], [], []>} : vector<16x16xf32>, vector<16x64xf32>, vector<16x64xf32> -> vector<16x64xf32>
    %406 = arith.addf %365, %405 : vector<16x64xf32>
    %407 = arith.addf %238, %406 : vector<16x64xf32>
    %408 = vector.extract_strided_slice %240 {offsets = [1, 0], sizes = [1, 64], strides = [1, 1]} : vector<6x64xf32> to vector<1x64xf32>
    %409 = vector.extract_strided_slice %240 {offsets = [2, 0], sizes = [1, 64], strides = [1, 1]} : vector<6x64xf32> to vector<1x64xf32>
    %cst_218 = arith.constant dense<0.000000e+00> : vector<16xf32>
    %410 = vector.multi_reduction <add>, %407, %cst_218 [1] : vector<16x64xf32> to vector<16xf32>
    %411 = vector.shape_cast %410 : vector<16xf32> to vector<16x1xf32>
    %cst_219 = arith.constant 6.400000e+01 : f32
    %412 = vector.broadcast %cst_219 : f32 to vector<16x1xf32>
    %413 = arith.divf %411, %412 : vector<16x1xf32>
    %414 = vector.broadcast %413 : vector<16x1xf32> to vector<16x64xf32>
    %415 = arith.subf %407, %414 : vector<16x64xf32>
    %416 = arith.mulf %415, %415 : vector<16x64xf32>
    %cst_220 = arith.constant dense<0.000000e+00> : vector<16xf32>
    %417 = vector.multi_reduction <add>, %416, %cst_220 [1] : vector<16x64xf32> to vector<16xf32>
    %418 = vector.shape_cast %417 : vector<16xf32> to vector<16x1xf32>
    %cst_221 = arith.constant 6.400000e+01 : f32
    %419 = vector.broadcast %cst_221 : f32 to vector<16x1xf32>
    %420 = arith.divf %418, %419 : vector<16x1xf32>
    %421 = vector.broadcast %413 : vector<16x1xf32> to vector<16x64xf32>
    %422 = arith.subf %407, %421 : vector<16x64xf32>
    %cst_222 = arith.constant 9.99999974E-6 : f32
    %423 = vector.broadcast %cst_222 : f32 to vector<16x1xf32>
    %424 = arith.addf %420, %423 : vector<16x1xf32>
    %425 = math.rsqrt %424 : vector<16x1xf32>
    %426 = vector.broadcast %425 : vector<16x1xf32> to vector<16x64xf32>
    %427 = arith.mulf %422, %426 : vector<16x64xf32>
    %428 = vector.broadcast %408 : vector<1x64xf32> to vector<16x64xf32>
    %429 = arith.mulf %427, %428 : vector<16x64xf32>
    %430 = vector.broadcast %409 : vector<1x64xf32> to vector<16x64xf32>
    %431 = arith.addf %429, %430 : vector<16x64xf32>
    %c1_223 = arith.constant 1 : index
    %c0_224 = arith.constant 0 : index
    %c0_225 = arith.constant 0 : index
    %432 = vector.load %arg9[%c1_223, %c0_224, %c0_225] : memref<2x64x2048xf32, #tpu.memory_space<vmem>>, vector<1x64x2048xf32>
    %433 = vector.shape_cast %432 : vector<1x64x2048xf32> to vector<64x2048xf32>
    %cst_226 = arith.constant dense<0.000000e+00> : vector<16x2048xf32>
    %434 = tpu.matmul %431, %433, %cst_226 {dimension_numbers = #tpu.dot_dimension_numbers<[1], [0], [0], [1], [0, 0, 1, 1], [], []>} : vector<16x64xf32>, vector<64x2048xf32>, vector<16x2048xf32> -> vector<16x2048xf32>
    %c1_227 = arith.constant 1 : index
    %c0_228 = arith.constant 0 : index
    %c0_229 = arith.constant 0 : index
    %435 = vector.load %arg10[%c1_227, %c0_228, %c0_229] : memref<2x1x2048xf32, #tpu.memory_space<vmem>>, vector<1x1x2048xf32>
    %436 = vector.shape_cast %435 : vector<1x1x2048xf32> to vector<1x2048xf32>
    %437 = vector.broadcast %436 : vector<1x2048xf32> to vector<16x2048xf32>
    %438 = arith.addf %434, %437 : vector<16x2048xf32>
    %cst_230 = arith.constant 0.000000e+00 : f32
    %439 = vector.broadcast %cst_230 : f32 to vector<16x2048xf32>
    %440 = arith.maximumf %438, %439 : vector<16x2048xf32>
    %c1_231 = arith.constant 1 : index
    %c0_232 = arith.constant 0 : index
    %c0_233 = arith.constant 0 : index
    %441 = vector.load %arg11[%c1_231, %c0_232, %c0_233] : memref<2x2048x64xf32, #tpu.memory_space<vmem>>, vector<1x2048x64xf32>
    %442 = vector.shape_cast %441 : vector<1x2048x64xf32> to vector<2048x64xf32>
    %cst_234 = arith.constant dense<0.000000e+00> : vector<16x64xf32>
    %443 = tpu.matmul %440, %442, %cst_234 {dimension_numbers = #tpu.dot_dimension_numbers<[1], [0], [0], [1], [0, 0, 1, 1], [], []>} : vector<16x2048xf32>, vector<2048x64xf32>, vector<16x64xf32> -> vector<16x64xf32>
    %444 = vector.extract_strided_slice %240 {offsets = [3, 0], sizes = [1, 64], strides = [1, 1]} : vector<6x64xf32> to vector<1x64xf32>
    %445 = vector.broadcast %444 : vector<1x64xf32> to vector<16x64xf32>
    %446 = arith.addf %443, %445 : vector<16x64xf32>
    %447 = arith.addf %431, %446 : vector<16x64xf32>
    %448 = vector.extract_strided_slice %240 {offsets = [4, 0], sizes = [1, 64], strides = [1, 1]} : vector<6x64xf32> to vector<1x64xf32>
    %449 = vector.extract_strided_slice %240 {offsets = [5, 0], sizes = [1, 64], strides = [1, 1]} : vector<6x64xf32> to vector<1x64xf32>
    %cst_235 = arith.constant dense<0.000000e+00> : vector<16xf32>
    %450 = vector.multi_reduction <add>, %447, %cst_235 [1] : vector<16x64xf32> to vector<16xf32>
    %451 = vector.shape_cast %450 : vector<16xf32> to vector<16x1xf32>
    %cst_236 = arith.constant 6.400000e+01 : f32
    %452 = vector.broadcast %cst_236 : f32 to vector<16x1xf32>
    %453 = arith.divf %451, %452 : vector<16x1xf32>
    %454 = vector.broadcast %453 : vector<16x1xf32> to vector<16x64xf32>
    %455 = arith.subf %447, %454 : vector<16x64xf32>
    %456 = arith.mulf %455, %455 : vector<16x64xf32>
    %cst_237 = arith.constant dense<0.000000e+00> : vector<16xf32>
    %457 = vector.multi_reduction <add>, %456, %cst_237 [1] : vector<16x64xf32> to vector<16xf32>
    %458 = vector.shape_cast %457 : vector<16xf32> to vector<16x1xf32>
    %cst_238 = arith.constant 6.400000e+01 : f32
    %459 = vector.broadcast %cst_238 : f32 to vector<16x1xf32>
    %460 = arith.divf %458, %459 : vector<16x1xf32>
    %461 = vector.broadcast %453 : vector<16x1xf32> to vector<16x64xf32>
    %462 = arith.subf %447, %461 : vector<16x64xf32>
    %cst_239 = arith.constant 9.99999974E-6 : f32
    %463 = vector.broadcast %cst_239 : f32 to vector<16x1xf32>
    %464 = arith.addf %460, %463 : vector<16x1xf32>
    %465 = math.rsqrt %464 : vector<16x1xf32>
    %466 = vector.broadcast %465 : vector<16x1xf32> to vector<16x64xf32>
    %467 = arith.mulf %462, %466 : vector<16x64xf32>
    %468 = vector.broadcast %448 : vector<1x64xf32> to vector<16x64xf32>
    %469 = arith.mulf %467, %468 : vector<16x64xf32>
    %470 = vector.broadcast %449 : vector<1x64xf32> to vector<16x64xf32>
    %471 = arith.addf %469, %470 : vector<16x64xf32>
    %472 = vector.extract_strided_slice %471 {offsets = [7, 0], sizes = [1, 64], strides = [1, 1]} : vector<16x64xf32> to vector<1x64xf32>
    %473 = vector.extract_strided_slice %471 {offsets = [15, 0], sizes = [1, 64], strides = [1, 1]} : vector<16x64xf32> to vector<1x64xf32>
    %474 = tpu.concatenate %472, %473 in 0 : vector<1x64xf32>, vector<1x64xf32> -> vector<2x64xf32>
    %c0_240 = arith.constant 0 : index
    %c0_241 = arith.constant 0 : index
    %475 = vector.load %arg12[%c0_240, %c0_241] : memref<64x16xf32, #tpu.memory_space<vmem>>, vector<64x16xf32>
    %cst_242 = arith.constant dense<0.000000e+00> : vector<2x16xf32>
    %476 = tpu.matmul %474, %475, %cst_242 {dimension_numbers = #tpu.dot_dimension_numbers<[1], [0], [0], [1], [0, 0, 1, 1], [], []>} : vector<2x64xf32>, vector<64x16xf32>, vector<2x16xf32> -> vector<2x16xf32>
    %c0_243 = arith.constant 0 : index
    %c0_244 = arith.constant 0 : index
    %477 = vector.load %arg13[%c0_243, %c0_244] : memref<1x16xf32, #tpu.memory_space<vmem>>, vector<1x16xf32>
    %478 = vector.broadcast %477 : vector<1x16xf32> to vector<2x16xf32>
    %479 = arith.addf %476, %478 : vector<2x16xf32>
    %c0_245 = arith.constant 0 : index
    %c0_246 = arith.constant 0 : index
    %480 = vector.load %arg14[%c0_245, %c0_246] : memref<2x16xf32, #tpu.memory_space<vmem>>, vector<2x16xf32>
    tpu.vector_store %arg14[%c0_245, %c0_246], %479 {strides = array<i32>} : memref<2x16xf32, #tpu.memory_space<vmem>>, vector<2x16xf32>,
    return
  }
}

</mosaic_0001>

<bundles_post_ra>
// kernel: tpu_custom_call.1
= control target key start
LH: loop header
LB: loop body
LE: loop exit
PB: predicated region body
PF: predicated region fallthrough
CT: control target
= control target key end

     0   :  { %vm59_vm0 = vcmask 130048   ;;  %s16905_s0 = inlined_call_operand.vmem [shape: f32[16,16], index: 0, kind: input, shape index: {}]   ;;  %s16906_s1 = inlined_call_operand.vmem [shape: f32[16,64], index: 1, kind: input, shape index: {}]   ;;  %s16907_s2 = inlined_call_operand.vmem [shape: f32[1,64], index: 2, kind: input, shape index: {}]   ;;  %s16908_s3 = inlined_call_operand.vmem [shape: f32[8,64,16], index: 3, kind: input, shape index: {}]   ;;  %s16909_s4 = inlined_call_operand.vmem [shape: f32[8,64,16], index: 4, kind: input, shape index: {}]   ;;  %s16910_s5 = inlined_call_operand.vmem [shape: f32[8,64,16], index: 5, kind: input, shape index: {}]   ;;  %s16911_s6 = inlined_call_operand.vmem [shape: f32[8,3,16], index: 6, kind: input, shape index: {}]   ;;  %s16912_s7 = inlined_call_operand.vmem [shape: f32[8,16,64], index: 7, kind: input, shape index: {}]   ;;  %s16913_s8 = inlined_call_operand.vmem [shape: f32[2,6,64], index: 8, kind: input, shape index: {}]   ;;  %s16914_s9 = inlined_call_operand.vmem [shape: f32[2,64,2048], index: 9, kind: input, shape index: {}]   ;;  %s16915_s10 = inlined_call_operand.vmem [shape: f32[2,1,2048], index: 10, kind: input, shape index: {}]   ;;  %s16916_s11 = inlined_call_operand.vmem [shape: f32[2,2048,64], index: 11, kind: input, shape index: {}]   ;;  %s16917_s12 = inlined_call_operand.vmem [shape: f32[64,16], index: 12, kind: input, shape index: {}]   ;;  %s16918_s13 = inlined_call_operand.vmem [shape: f32[1,16], index: 13, kind: input, shape index: {}]   ;;  %s16919_s14 = inlined_call_operand.hbm [shape: f32[2,16], index: 14, kind: output, shape index: {}]  }
   0x1   :  { %v50_v0 = vld [vmem:[%s16906_s1] sm:$0xff]  ;;  %v51_v1 = vld [vmem:[%s16906_s1 + $0x8] sm:$0xff]  ;;  %v145_v9 = vld [vmem:[%s16908_s3 + $0x10] sm:$0xff] }
   0x2   :  { %v48_v2 = vld [vmem:[%s16905_s0] sm:$0xff]  ;;  %v11661_v3 = vpack.c.bf16 %v51_v1, %v50_v0  ;;  %v144_v5 = vld [vmem:[%s16908_s3 + $0x8] sm:$0xff]  ;;  %v146_v11 = vld [vmem:[%s16908_s3 + $0x18] sm:$0xff] }
   0x3   :  { %10967 = vmatprep.mubr.msk.f32.mxu1 %vm59_vm0, %v48_v2  ;;  %v143_v4 = vld [vmem:[%s16908_s3] sm:$0xff]  ;;  %v238_v8 = vld [vmem:[%s16909_s4 + $0x8] sm:$0xff]  ;;  %v239_v12 = vld [vmem:[%s16909_s4 + $0x10] sm:$0xff]  ;;  %v11669_v17 = vpack.c.bf16 %v146_v11, %v145_v9 }
   0x4   :  { %v11665_v6 = vpack.c.bf16 %v144_v5, %v143_v4  ;;  %v237_v7 = vld [vmem:[%s16909_s4] sm:$0xff]  ;;  %11662 = vmatprep.subr.bf16.mxu1 %v11661_v3  ;;  %v240_v13 = vld [vmem:[%s16909_s4 + $0x18] sm:$0xff]  ;;  %v49_v14 = vld [vmem:[%s16905_s0 + $0x8] sm:$0xff] }
   0x5   :  { %v11681_v10 = vpack.c.bf16 %v238_v8, %v237_v7  ;;  %11664 = vmatpush3.bf16.msra.mxu1 %v11661_v3  ;;  %v11685_v15 = vpack.c.bf16 %v240_v13, %v239_v12  ;;  %v241_v16 = vld [vmem:[%s16909_s4 + $0x20] sm:$0xff]  ;;  %v242_v18 = vld [vmem:[%s16909_s4 + $0x28] sm:$0xff] }
   0x6   :  { %11666 = vmatprep.subr.bf16.mxu1 %v11665_v6 }
   0x7   :  { %11682 = vmatprep.subr.bf16.mxu0 %v11681_v10 }
   0x8   :  { %19 = vsyncpa [#allocation3], 0  ;;  %11684 = vmatpush3.bf16.msra.mxu0 %v11681_v10  ;;  %v147_v19 = vld [vmem:[%s16908_s3 + $0x20] sm:$0xff]  ;;  %v148_v20 = vld [vmem:[%s16908_s3 + $0x28] sm:$0xff]  ;;  %10968 = vmatmul.mubr.msk.f32.vlgmr.msra.gmra.mrb[0].mxu1 %vm59_vm0, %v49_v14  ;;  %v11689_v21 = vpack.c.bf16 %v242_v18, %v241_v16  ;;  %vm155_vm1 = vcmask 523264   ;;  %v12987_v46 = vmov 0.0   ;;  %v151_v47 = vlaneseq }
   0x9   :  { %11686 = vmatprep.subr.bf16.mxu0 %v11685_v15  ;;  %11668 = vmatpush3.bf16.msra.mxu1 %v11665_v6  ;;  %v11673_v22 = vpack.c.bf16 %v148_v20, %v147_v19  ;;  %v149_v23 = vld [vmem:[%s16908_s3 + $0x30] sm:$0xff]  ;;  %v150_v24 = vld [vmem:[%s16908_s3 + $0x38] sm:$0xff]  ;;  %v324_v29 = vld [vmem:[%s16910_s5] sm:$0xff]  ;;  %vm12988_vm2 = vmmov 0   ;;  %vm565_vm3 = vcmask 64512   ;;  %vm9175_vm4 = vcmask 1040384  }
   0xa   :  { %11670 = vmatprep.subr.bf16.mxu1 %v11669_v17  ;;  %v11677_v25 = vpack.c.bf16 %v150_v24, %v149_v23  ;;  %v243_v26 = vld [vmem:[%s16909_s4 + $0x30] sm:$0xff]  ;;  %v244_v27 = vld [vmem:[%s16909_s4 + $0x38] sm:$0xff]  ;;  %v325_v30 = vld [vmem:[%s16910_s5 + $0x8] sm:$0xff]  ;;  %v13174_v48 = vshrl.u32 %v151_v47, 7  ;;  %vm9265_vm5 = vcmask 123904  }
   0xb   :  { %v11693_v28 = vpack.c.bf16 %v244_v27, %v243_v26  ;;  %v11697_v31 = vpack.c.bf16 %v325_v30, %v324_v29  ;;  %v9281_v32 = vld [vmem:[%s16907_s2] ss:$0 sm:$0xff]  ;;  %v326_v34 = vld [vmem:[%s16910_s5 + $0x10] sm:$0xff]  ;;  %v327_v35 = vld [vmem:[%s16910_s5 + $0x18] sm:$0xff] }
   0xc   :  { %11688 = vmatpush3.bf16.msra.mxu0 %v11685_v15  ;;  %v11701_v39 = vpack.c.bf16 %v327_v35, %v326_v34  ;;  %v328_v40 = vld [vmem:[%s16910_s5 + $0x20] sm:$0xff]  ;;  %v329_v41 = vld [vmem:[%s16910_s5 + $0x28] sm:$0xff]  ;;  %v330_v43 = vld [vmem:[%s16910_s5 + $0x30] sm:$0xff]  ;;  %v13177_v49 = vsub.s32 1, %v13174_v48  ;;  %v13183_v51 = vsub.s32 0, %v13174_v48  ;;  %v13194_v62 = vsub.s32 2, %v13174_v48 }
   0xd   :  { %11690 = vmatprep.subr.bf16.mxu0 %v11689_v21  ;;  %11672 = vmatpush3.bf16.msra.mxu1 %v11669_v17  ;;  %v11705_v42 = vpack.c.bf16 %v329_v41, %v328_v40  ;;  %v331_v44 = vld [vmem:[%s16910_s5 + $0x38] sm:$0xff]  ;;  %v142_v50 = vld [vmem:[%s16911_s6] sm:$0x7]  ;;  %v9301_v29 = vld [vmem:[%s16908_s3 + $0x50] sm:$0xff] }
   0xe   :  { %11674 = vmatprep.subr.bf16.mxu1 %v11673_v22  ;;  %v11709_v45 = vpack.c.bf16 %v331_v44, %v330_v43  ;;  %v248_v52 = vrot.slane %v142_v50, %v13177_v49  ;;  %v154_v55 = vrot.slane %v142_v50, %v13183_v51  ;;  %v335_v63 = vrot.slane %v142_v50, %v13194_v62  ;;  %v9299_v24 = vld [vmem:[%s16908_s3 + $0x40] sm:$0xff]  ;;  %v9302_v30 = vld [vmem:[%s16908_s3 + $0x58] sm:$0xff]  ;;  %v9304_v35 = vld [vmem:[%s16908_s3 + $0x68] sm:$0xff] }
   0xf   :  { %v9303_v34 = vld [vmem:[%s16908_s3 + $0x60] sm:$0xff]  ;;  %v9306_v40 = vld [vmem:[%s16908_s3 + $0x78] sm:$0xff]  ;;  %v9320_v43 = vld [vmem:[%s16910_s5 + $0x48] sm:$0xff] }
  0x10   :  { %11692 = vmatpush3.bf16.msra.mxu0 %v11689_v21  ;;  %v9322_v47 = vld [vmem:[%s16910_s5 + $0x58] sm:$0xff] }
  0x11   :  { %11676 = vmatpush3.bf16.msra.mxu1 %v11673_v22  ;;  %11694 = vmatprep.subr.bf16.mxu0 %v11693_v28 }
  0x12   :  { %11678 = vmatprep.subr.bf16.mxu1 %v11677_v25 }
  0x14   :  { %11696 = vmatpush3.bf16.msra.mxu0 %v11693_v28 }
  0x15   :  { %11680 = vmatpush3.bf16.msra.mxu1 %v11677_v25  ;;  %11027 = vmatprep.subr.mxu0 %v12987_v46  ;;  %v9300_v25 = vld [vmem:[%s16908_s3 + $0x48] sm:$0xff] }
  0x16   :  { %11698 = vmatprep.subr.bf16.mxu1 %v11697_v31  ;;  %v11717_v28 = vpack.c.bf16 %v9300_v25, %v9299_v24 }
  0xdb   :  { %v10969_v33 = vpop.f32.mrb[0].mxu1 }
  0xdc   :  { %v132_v36 = vpop.f32.mrb[1].mxu1  ;;  %v13145_v38 = vadd.f32 %v10969_v33, %v9281_v32  ;;  %v11721_v33 = vpack.c.bf16 %v9302_v30, %v9301_v29 }
  0xdd   :  { %v13143_v37 = vadd.f32 %v9281_v32, %v132_v36  ;;  %v11725_v36 = vpack.c.bf16 %v9304_v35, %v9303_v34  ;;  %v9315_v35 = vld [vmem:[%s16909_s4 + $0x70] sm:$0xff] }
  0xdf   :  { %10986 = vmatprep.mubr.msk.f32.mxu1 %vm155_vm1, %v13143_v37  ;;  %11005 = vmatprep.mubr.msk.f32.mxu0 %vm155_vm1, %v13143_v37 }
  0xe0   :  { %10987 = vmatmul.mubr.msk.f32.vlgmr.msra.gmra.mrb[2].mxu1 %vm155_vm1, %v13145_v38  ;;  %11006 = vmatmul.mubr.msk.f32.vlgmr.msra.gmra.mrb[0].mxu0 %vm155_vm1, %v13145_v38 }
  0xe1   :  { %11700 = vmatpush3.bf16.msra.mxu1 %v11697_v31  ;;  %11024 = vmatprep.mubr.msk.f32.mxu1 %vm155_vm1, %v13143_v37 }
  0xe2   :  { %11702 = vmatprep.subr.bf16.mxu1 %v11701_v39  ;;  %11029 = vmatprep.mubr.msk.f32.mxu0 %vm12988_vm2, %v12987_v46 }
  0xe5   :  { %11704 = vmatpush3.bf16.msra.mxu1 %v11701_v39  ;;  %v9305_v39 = vld [vmem:[%s16908_s3 + $0x70] sm:$0xff] }
  0xe6   :  { %11706 = vmatprep.subr.bf16.mxu1 %v11705_v42  ;;  %v11729_v41 = vpack.c.bf16 %v9306_v40, %v9305_v39 }
  0xe9   :  { %11708 = vmatpush3.bf16.msra.mxu1 %v11705_v42  ;;  %v9319_v42 = vld [vmem:[%s16910_s5 + $0x40] sm:$0xff] }
  0xea   :  { %11710 = vmatprep.subr.bf16.mxu1 %v11709_v45  ;;  %v11749_v44 = vpack.c.bf16 %v9320_v43, %v9319_v42  ;;  %v9298_v42 = vld [vmem:[%s16911_s6 + $0x4] sm:$0x7] }
  0xeb   :  { %v1013_v43 = vrot.slane %v9298_v42, %v13194_v62 }
  0xed   :  { %11712 = vmatpush3.bf16.msra.mxu1 %v11709_v45  ;;  %v9321_v45 = vld [vmem:[%s16910_s5 + $0x50] sm:$0xff] }
  0xee   :  { %v11753_v50 = vpack.c.bf16 %v9322_v47, %v9321_v45 }
  0xf0   :  { %11025 = vmatmul.mubr.msk.f32.vlgmr.msra.gmra.mrb[4].mxu1 %vm155_vm1, %v13145_v38 }
 0x1b3   :  { %v10988_v53 = vpop.f32.mrb[2].mxu1  ;;  %v11007_v54 = vpop.f32.mrb[0].mxu0 }
 0x1b4   :  { %v228_v56 = vpop.f32.mrb[3].mxu1  ;;  %v315_v57 = vpop.f32.mrb[1].mxu0  ;;  %v321_v60 = vadd.f32 %v11007_v54, %v248_v52  ;;  %v234_v61 = vadd.f32 %v10988_v53, %v154_v55  ;;  %v9324_v53 = vld [vmem:[%s16910_s5 + $0x68] sm:$0xff] }
 0x1b5   :  { %v316_v58 = vadd.f32 %v315_v57, %v248_v52  ;;  %v229_v59 = vadd.f32 %v228_v56, %v154_v55  ;;  %v9323_v52 = vld [vmem:[%s16910_s5 + $0x60] sm:$0xff]  ;;  %v9325_v55 = vld [vmem:[%s16910_s5 + $0x70] sm:$0xff]  ;;  %v9326_v56 = vld [vmem:[%s16910_s5 + $0x78] sm:$0xff] }
 0x1b6   :  { %v11757_v54 = vpack.c.bf16 %v9324_v53, %v9323_v52  ;;  %v11761_v57 = vpack.c.bf16 %v9326_v56, %v9325_v55  ;;  %v13375_v53 = vld [vmem:[%s16911_s6 + $0x8] sm:$0x7] }
 0x1b7   :  { %11028 = vmatpush3.xpose.msk.msra.mxu0 %vm59_vm0, %v316_v58  ;;  %v9340_v58 = vld [vmem:[%s16908_s3 + $0x80] sm:$0xff] }
 0x1b8   :  { %11032 = vmatprep.subr.mxu0 %v12987_v46 }
 0x1ba   :  { %11030 = vmatmul.mubr.msk.f32.vlgmr.msra.gmra.mrb[2].mxu0 %vm59_vm0, %v229_v59  ;;  %v9341_v59 = vld [vmem:[%s16908_s3 + $0x88] sm:$0xff] }
 0x1bb   :  { %11033 = vmatpush3.xpose.msk.msra.mxu0 %vm59_vm0, %v321_v60  ;;  %11034 = vmatprep.mubr.msk.f32.mxu0 %vm12988_vm2, %v12987_v46  ;;  %v11769_v60 = vpack.c.bf16 %v9341_v59, %v9340_v58  ;;  %v925_v59 = vrot.slane %v9298_v42, %v13177_v49 }
 0x1bc   :  { %11037 = vmatprep.subr.mxu0 %v12987_v46 }
 0x1be   :  { %11035 = vmatmul.mubr.msk.f32.vlgmr.msra.gmra.mrb[4].mxu0 %vm59_vm0, %v234_v61  ;;  %v9342_v61 = vld [vmem:[%s16908_s3 + $0x90] sm:$0xff] }
 0x1bf   :  { %11039 = vmatprep.mubr.msk.f32.mxu0 %vm12988_vm2, %v12987_v46 }
 0x1c3   :  { %v11026_v0 = vpop.f32.mrb[4].mxu1 }
 0x1c4   :  { %v408_v1 = vadd.f32 %v11026_v0, %v335_v63  ;;  %v402_v2 = vpop.f32.mrb[5].mxu1 }
 0x1c5   :  { %v403_v3 = vadd.f32 %v402_v2, %v335_v63  ;;  %v9343_v63 = vld [vmem:[%s16908_s3 + $0x98] sm:$0xff]  ;;  %v9345_v2 = vld [vmem:[%s16908_s3 + $0xa8] sm:$0xff] }
 0x1c6   :  { %v11773_v0 = vpack.c.bf16 %v9343_v63, %v9342_v61  ;;  %v837_v61 = vrot.slane %v9298_v42, %v13183_v51 }
 0x1c7   :  { %11038 = vmatpush3.msra.mxu0 %v403_v3 }
 0x1c8   :  { %11042 = vmatprep.subr.mxu0 %v12987_v46 }
 0x28d   :  { %v483_v4 = vpop.f32.mrb[2].mxu0 }
 0x28e   :  { %v563_v5 = vmul.f32 0.25, %v483_v4  ;;  %v11031_v6 = vpop.f32.mrb[3].mxu0  ;;  %v9346_v4 = vld [vmem:[%s16908_s3 + $0xb0] sm:$0xff] }
 0x290   :  { %v566_v7 = vsel %vm565_vm3, %v563_v5, -inf }
 0x291   :  { %567 = vmax.xlane.f32.xlu0 %v566_v7  ;;  %v559_v8 = vpop.f32.mrb[4].mxu0  ;;  %v9360_v7 = vld [vmem:[%s16910_s5 + $0x80] sm:$0xff] }
 0x292   :  { %v564_v9 = vmul.f32 0.25, %v559_v8  ;;  %v11036_v10 = vpop.f32.mrb[5].mxu0  ;;  %v9361_v8 = vld [vmem:[%s16910_s5 + $0x88] sm:$0xff] }
 0x293   :  { %v9362_v10 = vld [vmem:[%s16910_s5 + $0x90] sm:$0xff] }
 0x294   :  { %v569_v11 = vsel %vm565_vm3, %v564_v9, -inf }
 0x295   :  { %570 = vmax.xlane.f32.xlu0 %v569_v11  ;;  %v9363_v11 = vld [vmem:[%s16910_s5 + $0x98] sm:$0xff] }
 0x31e   :  { %v568_v12 = vpop.xlane.xlu0 %567 }
 0x31f   :  { %v572_v13 = vsub.f32 %v563_v5, %v568_v12  ;;  %v9347_v5 = vld [vmem:[%s16908_s3 + $0xb8] sm:$0xff]  ;;  %v11805_v12 = vpack.c.bf16 %v9363_v11, %v9362_v10 }
 0x320   :  { %v11781_v6 = vpack.c.bf16 %v9347_v5, %v9346_v4 }
 0x321   :  { %v574_v14 = vmul.f32 1.442695, %v572_v13  ;;  %v9364_v13 = vld [vmem:[%s16910_s5 + $0xa0] sm:$0xff] }
 0x322   :  { %v571_v15 = vpop.xlane.xlu0 %570 }
 0x323   :  { %12881 = vpow2.f32 %v574_v14  ;;  %v573_v16 = vsub.f32 %v564_v9, %v571_v15  ;;  %v11801_v9 = vpack.c.bf16 %v9361_v8, %v9360_v7  ;;  %v9365_v14 = vld [vmem:[%s16910_s5 + $0xa8] sm:$0xff] }
 0x324   :  { %v11809_v15 = vpack.c.bf16 %v9365_v14, %v9364_v13 }
 0x325   :  { %v576_v17 = vmul.f32 1.442695, %v573_v16  ;;  %v9366_v16 = vld [vmem:[%s16910_s5 + $0xb0] sm:$0xff] }
 0x327   :  { %12883 = vpow2.f32 %v576_v17  ;;  %v9367_v17 = vld [vmem:[%s16910_s5 + $0xb8] sm:$0xff] }
 0x32d   :  { %v12882_v18 = vpop.eup %12881 }
 0x32e   :  { %v578_v19 = vsel %vm565_vm3, %v12882_v18, 0.0 }
 0x32f   :  { %579 = vadd.xlane.f32.xlu1 %v578_v19  ;;  %v734_v19 = vld [vmem:[%s16912_s7] sm:$0xff] }
 0x331   :  { %v12884_v20 = vpop.eup %12883 }
 0x332   :  { %v581_v21 = vsel %vm565_vm3, %v12884_v20, 0.0 }
 0x333   :  { %582 = vadd.xlane.f32.xlu1 %v581_v21 }
 0x3bc   :  { %v580_v22 = vpop.xlane.xlu1 %579 }
 0x3bd   :  { %12885 = vrcp.f32 %v580_v22  ;;  %v9309_v22 = vld [vmem:[%s16909_s4 + $0x40] sm:$0xff] }
 0x3c0   :  { %v583_v23 = vpop.xlane.xlu1 %582 }
 0x3c1   :  { %12887 = vrcp.f32 %v583_v23  ;;  %v9310_v23 = vld [vmem:[%s16909_s4 + $0x48] sm:$0xff] }
 0x3c2   :  { %v11733_v24 = vpack.c.bf16 %v9310_v23, %v9309_v22 }
 0x3c7   :  { %v12886_v26 = vpop.eup %12885 }
 0x3c8   :  { %v585_v27 = vmul.f32 %v12886_v26, %v12882_v18  ;;  %v11813_v18 = vpack.c.bf16 %v9367_v17, %v9366_v16  ;;  %v9311_v26 = vld [vmem:[%s16909_s4 + $0x50] sm:$0xff] }
 0x3ca   :  { %11040 = vmatmul.mubr.msk.f32.vlgmr.msra.gmra.mrb[6].mxu0 %vm565_vm3, %v585_v27  ;;  %v9312_v27 = vld [vmem:[%s16909_s4 + $0x58] sm:$0xff] }
 0x3cb   :  { %v12888_v31 = vpop.eup %12887  ;;  %11043 = vmatpush3.msra.mxu0 %v408_v1  ;;  %11044 = vmatprep.mubr.msk.f32.mxu0 %vm12988_vm2, %v12987_v46  ;;  %v9344_v1 = vld [vmem:[%s16908_s3 + $0xa0] sm:$0xff]  ;;  %v11737_v29 = vpack.c.bf16 %v9312_v27, %v9311_v26 }
 0x3cc   :  { %v587_v32 = vmul.f32 %v12888_v31, %v12884_v20  ;;  %11718 = vmatprep.subr.bf16.mxu0 %v11717_v28  ;;  %v11777_v3 = vpack.c.bf16 %v9345_v2, %v9344_v1  ;;  %v735_v20 = vld [vmem:[%s16912_s7 + $0x8] sm:$0xff]  ;;  %v9313_v31 = vld [vmem:[%s16909_s4 + $0x60] sm:$0xff] }
 0x3cd   :  { %v11713_v21 = vpack.c.bf16 %v735_v20, %v734_v19 }
 0x3ce   :  { %11045 = vmatmul.mubr.msk.f32.vlgmr.msra.gmra.mrb[8].mxu0 %vm565_vm3, %v587_v32  ;;  %v9314_v32 = vld [vmem:[%s16909_s4 + $0x68] sm:$0xff] }
 0x3cf   :  { %11720 = vmatpush3.bf16.msra.mxu0 %v11717_v28  ;;  %11070 = vmatprep.mubr.msk.f32.mxu0 %vm155_vm1, %v13143_v37  ;;  %v11741_v34 = vpack.c.bf16 %v9314_v32, %v9313_v31  ;;  %v9350_v32 = vld [vmem:[%s16909_s4 + $0x80] sm:$0xff] }
 0x3d0   :  { %11722 = vmatprep.subr.bf16.mxu0 %v11721_v33  ;;  %11714 = vmatprep.subr.bf16.mxu1 %v11713_v21 }
 0x3d1   :  { %11716 = vmatpush3.bf16.msra.mxu1 %v11713_v21 }
 0x3d2   :  { %11734 = vmatprep.subr.bf16.mxu1 %v11733_v24 }
 0x3d3   :  { %11724 = vmatpush3.bf16.msra.mxu0 %v11721_v33 }
 0x3d4   :  { %11726 = vmatprep.subr.bf16.mxu0 %v11725_v36 }
 0x3d7   :  { %11728 = vmatpush3.bf16.msra.mxu0 %v11725_v36  ;;  %v9316_v36 = vld [vmem:[%s16909_s4 + $0x78] sm:$0xff] }
 0x3d8   :  { %11730 = vmatprep.subr.bf16.mxu0 %v11729_v41  ;;  %v11745_v39 = vpack.c.bf16 %v9316_v36, %v9315_v35  ;;  %v9352_v36 = vld [vmem:[%s16909_s4 + $0x90] sm:$0xff] }
 0x3db   :  { %11732 = vmatpush3.bf16.msra.mxu0 %v11729_v41 }
 0x3dc   :  { %11750 = vmatprep.subr.bf16.mxu0 %v11749_v44 }
 0x3de   :  { %11071 = vmatmul.mubr.msk.f32.vlgmr.msra.gmra.mrb[10].mxu0 %vm155_vm1, %v13145_v38 }
 0x3df   :  { %11752 = vmatpush3.bf16.msra.mxu0 %v11749_v44  ;;  %11108 = vmatprep.mubr.msk.f32.mxu0 %vm155_vm1, %v13143_v37 }
 0x3e0   :  { %11754 = vmatprep.subr.bf16.mxu0 %v11753_v50 }
 0x3e3   :  { %11756 = vmatpush3.bf16.msra.mxu0 %v11753_v50 }
 0x3e4   :  { %11758 = vmatprep.subr.bf16.mxu0 %v11757_v54 }
 0x3e7   :  { %11760 = vmatpush3.bf16.msra.mxu0 %v11757_v54  ;;  %v1687_v54 = vrot.slane %v13375_v53, %v13194_v62 }
 0x3e8   :  { %11762 = vmatprep.subr.bf16.mxu0 %v11761_v57 }
 0x3eb   :  { %11764 = vmatpush3.bf16.msra.mxu0 %v11761_v57 }
 0x3ec   :  { %11770 = vmatprep.subr.bf16.mxu0 %v11769_v60 }
 0x3ee   :  { %11109 = vmatmul.mubr.msk.f32.vlgmr.msra.gmra.mrb[12].mxu0 %vm155_vm1, %v13145_v38 }
 0x3ef   :  { %11772 = vmatpush3.bf16.msra.mxu0 %v11769_v60  ;;  %11154 = vmatprep.mubr.msk.f32.mxu0 %vm155_vm1, %v13143_v37 }
 0x3f0   :  { %11774 = vmatprep.subr.bf16.mxu0 %v11773_v0 }
 0x3f3   :  { %11776 = vmatpush3.bf16.msra.mxu0 %v11773_v0 }
 0x3f4   :  { %11778 = vmatprep.subr.bf16.mxu0 %v11777_v3 }
 0x3f7   :  { %11780 = vmatpush3.bf16.msra.mxu0 %v11777_v3 }
 0x3f8   :  { %11782 = vmatprep.subr.bf16.mxu0 %v11781_v6 }
 0x3fb   :  { %11784 = vmatpush3.bf16.msra.mxu0 %v11781_v6 }
 0x3fc   :  { %11802 = vmatprep.subr.bf16.mxu0 %v11801_v9 }
 0x3fe   :  { %11155 = vmatmul.mubr.msk.f32.vlgmr.msra.gmra.mrb[14].mxu0 %vm155_vm1, %v13145_v38 }
 0x3ff   :  { %11804 = vmatpush3.bf16.msra.mxu0 %v11801_v9  ;;  %11192 = vmatprep.mubr.msk.f32.mxu0 %vm155_vm1, %v13143_v37 }
 0x400   :  { %11806 = vmatprep.subr.bf16.mxu0 %v11805_v12 }
 0x403   :  { %11808 = vmatpush3.bf16.msra.mxu0 %v11805_v12 }
 0x404   :  { %11810 = vmatprep.subr.bf16.mxu0 %v11809_v15 }
 0x407   :  { %11812 = vmatpush3.bf16.msra.mxu0 %v11809_v15 }
 0x408   :  { %11814 = vmatprep.subr.bf16.mxu0 %v11813_v18 }
 0x40b   :  { %11816 = vmatpush3.bf16.msra.mxu0 %v11813_v18 }
 0x40c   :  { %11210 = vmatprep.subr.mxu0 %v12987_v46 }
 0x40e   :  { %11193 = vmatmul.mubr.msk.f32.vlgmr.msra.gmra.mrb[16].mxu0 %vm155_vm1, %v13145_v38 }
 0x40f   :  { %11212 = vmatprep.mubr.msk.f32.mxu0 %vm12988_vm2, %v12987_v46 }
 0x49d   :  { %v657_v25 = vpop.f32.mrb[6].mxu0 }
 0x49e   :  { %v11041_v28 = vpop.f32.mrb[7].mxu0  ;;  %11051 = vmatprep.mubr.msk.f32.mxu1 %vm59_vm0, %v657_v25 }
 0x4a1   :  { %v730_v30 = vpop.f32.mrb[8].mxu0 }
 0x4a2   :  { %v11046_v33 = vpop.f32.mrb[9].mxu0  ;;  %11052 = vmatmul.mubr.msk.f32.vlgmr.msra.gmra.mrb[6].mxu1 %vm59_vm0, %v730_v30  ;;  %v9336_v30 = vld [vmem:[%s16912_s7 + $0x18] sm:$0xff] }
 0x4a3   :  { %11736 = vmatpush3.bf16.msra.mxu1 %v11733_v24  ;;  %11089 = vmatprep.mubr.msk.f32.mxu1 %vm155_vm1, %v13143_v37  ;;  %v9351_v33 = vld [vmem:[%s16909_s4 + $0x88] sm:$0xff] }
 0x4a4   :  { %11738 = vmatprep.subr.bf16.mxu1 %v11737_v29 }
 0x4a7   :  { %11740 = vmatpush3.bf16.msra.mxu1 %v11737_v29  ;;  %v9335_v29 = vld [vmem:[%s16912_s7 + $0x10] sm:$0xff] }
 0x4a8   :  { %11742 = vmatprep.subr.bf16.mxu1 %v11741_v34  ;;  %v11765_v31 = vpack.c.bf16 %v9336_v30, %v9335_v29  ;;  %v9385_v29 = vld [vmem:[%s16908_s3 + $0xe0] sm:$0xff]  ;;  %v9386_v30 = vld [vmem:[%s16908_s3 + $0xe8] sm:$0xff] }
 0x4ab   :  { %11744 = vmatpush3.bf16.msra.mxu1 %v11741_v34  ;;  %v11785_v34 = vpack.c.bf16 %v9351_v33, %v9350_v32  ;;  %v9387_v32 = vld [vmem:[%s16908_s3 + $0xf0] sm:$0xff]  ;;  %v9388_v33 = vld [vmem:[%s16908_s3 + $0xf8] sm:$0xff] }
 0x4ac   :  { %11746 = vmatprep.subr.bf16.mxu1 %v11745_v39 }
 0x4af   :  { %11748 = vmatpush3.bf16.msra.mxu1 %v11745_v39  ;;  %v9353_v39 = vld [vmem:[%s16909_s4 + $0x98] sm:$0xff] }
 0x4b0   :  { %11111 = vmatprep.subr.mxu1 %v12987_v46 }
 0x4b1   :  { %v11072_v40 = vpop.f32.mrb[10].mxu0 }
 0x4b2   :  { %v904_v41 = vpop.f32.mrb[11].mxu0  ;;  %11090 = vmatmul.mubr.msk.f32.vlgmr.msra.gmra.mrb[8].mxu1 %vm155_vm1, %v13145_v38  ;;  %v910_v3 = vadd.f32 %v11072_v40, %v837_v61 }
 0x4b3   :  { %11113 = vmatprep.mubr.msk.f32.mxu1 %vm12988_vm2, %v12987_v46  ;;  %v905_v1 = vadd.f32 %v904_v41, %v837_v61  ;;  %v11789_v41 = vpack.c.bf16 %v9353_v39, %v9352_v36  ;;  %v9402_v36 = vld [vmem:[%s16910_s5 + $0xc8] sm:$0xff] }
 0x4c1   :  { %v11110_v44 = vpop.f32.mrb[12].mxu0 }
 0x4c2   :  { %v1086_v45 = vadd.f32 %v11110_v44, %v1013_v43  ;;  %v1080_v47 = vpop.f32.mrb[13].mxu0  ;;  %v9355_v44 = vld [vmem:[%s16909_s4 + $0xa8] sm:$0xff] }
 0x4c3   :  { %v1081_v4 = vadd.f32 %v1080_v47, %v1013_v43  ;;  %v9354_v43 = vld [vmem:[%s16909_s4 + $0xa0] sm:$0xff] }
 0x4c4   :  { %v11793_v47 = vpack.c.bf16 %v9355_v44, %v9354_v43  ;;  %v9405_v43 = vld [vmem:[%s16910_s5 + $0xe0] sm:$0xff]  ;;  %v9406_v44 = vld [vmem:[%s16910_s5 + $0xe8] sm:$0xff] }
 0x4d1   :  { %v13368_v50 = vpop.f32.mrb[14].mxu0 }
 0x4d2   :  { %v13370_v52 = vpop.f32.mrb[15].mxu0 }
 0x4e1   :  { %v11194_v55 = vpop.f32.mrb[16].mxu0 }
 0x4e2   :  { %v1760_v56 = vadd.f32 %v11194_v55, %v1687_v54  ;;  %v1754_v57 = vpop.f32.mrb[17].mxu0  ;;  %v9357_v55 = vld [vmem:[%s16909_s4 + $0xb8] sm:$0xff] }
 0x4e3   :  { %v13379_v58 = vadd.f32 %v1754_v57, %v1687_v54  ;;  %v9356_v54 = vld [vmem:[%s16909_s4 + $0xb0] sm:$0xff]  ;;  %v1599_v57 = vrot.slane %v13375_v53, %v13177_v49 }
 0x4e4   :  { %11211 = vmatpush3.msra.mxu0 %v1760_v56  ;;  %v11797_v56 = vpack.c.bf16 %v9357_v55, %v9356_v54  ;;  %v9408_v54 = vld [vmem:[%s16910_s5 + $0xf8] sm:$0xff] }
 0x585   :  { %v11091_v60 = vpop.f32.mrb[8].mxu1 }
 0x586   :  { %v992_v63 = vpop.f32.mrb[9].mxu1  ;;  %v998_v2 = vadd.f32 %v11091_v60, %v925_v59  ;;  %v1511_v60 = vrot.slane %v13375_v53, %v13183_v51 }
 0x587   :  { %v993_v0 = vadd.f32 %v992_v63, %v925_v59 }
 0x589   :  { %11112 = vmatpush3.xpose.msk.msra.mxu1 %vm59_vm0, %v993_v0  ;;  %v1579_v0 = vadd.f32 %v13370_v52, %v1511_v60 }
 0x58a   :  { %11116 = vmatprep.subr.mxu1 %v12987_v46 }
 0x58c   :  { %11114 = vmatmul.mubr.msk.f32.vlgmr.msra.gmra.mrb[10].mxu1 %vm59_vm0, %v905_v1 }
 0x58d   :  { %11117 = vmatpush3.xpose.msk.msra.mxu1 %vm59_vm0, %v998_v2  ;;  %11118 = vmatprep.mubr.msk.f32.mxu1 %vm12988_vm2, %v12987_v46  ;;  %v1584_v2 = vadd.f32 %v13368_v50, %v1511_v60  ;;  %v9391_v60 = vld [vmem:[%s16909_s4 + $0xc0] sm:$0xff] }
 0x58e   :  { %11121 = vmatprep.subr.mxu1 %v12987_v46 }
 0x590   :  { %11119 = vmatmul.mubr.msk.f32.vlgmr.msra.gmra.mrb[12].mxu1 %vm59_vm0, %v910_v3 }
 0x591   :  { %11122 = vmatpush3.msra.mxu1 %v1081_v4  ;;  %11123 = vmatprep.mubr.msk.f32.mxu1 %vm12988_vm2, %v12987_v46 }
 0x592   :  { %11126 = vmatprep.subr.mxu1 %v12987_v46 }
 0x65f   :  { %v1161_v5 = vpop.f32.mrb[10].mxu1 }
 0x660   :  { %v1241_v6 = vmul.f32 0.25, %v1161_v5  ;;  %v11115_v7 = vpop.f32.mrb[11].mxu1 }
 0x662   :  { %v1243_v8 = vsel %vm565_vm3, %v1241_v6, -inf }
 0x663   :  { %1244 = vmax.xlane.f32.xlu0 %v1243_v8  ;;  %v1237_v9 = vpop.f32.mrb[12].mxu1 }
 0x664   :  { %v1242_v10 = vmul.f32 0.25, %v1237_v9  ;;  %v11120_v11 = vpop.f32.mrb[13].mxu1 }
 0x666   :  { %v1246_v12 = vsel %vm565_vm3, %v1242_v10, -inf }
 0x667   :  { %1247 = vmax.xlane.f32.xlu1 %v1246_v12 }
 0x6f0   :  { %v1245_v13 = vpop.xlane.xlu0 %1244 }
 0x6f1   :  { %v1249_v14 = vsub.f32 %v1241_v6, %v1245_v13 }
 0x6f3   :  { %v1251_v15 = vmul.f32 1.442695, %v1249_v14 }
 0x6f4   :  { %v1248_v16 = vpop.xlane.xlu1 %1247 }
 0x6f5   :  { %12889 = vpow2.f32 %v1251_v15  ;;  %v1250_v17 = vsub.f32 %v1242_v10, %v1248_v16 }
 0x6f7   :  { %v1253_v18 = vmul.f32 1.442695, %v1250_v17  ;;  %v9381_v17 = vld [vmem:[%s16908_s3 + $0xc0] sm:$0xff] }
 0x6f9   :  { %12891 = vpow2.f32 %v1253_v18  ;;  %v9382_v18 = vld [vmem:[%s16908_s3 + $0xc8] sm:$0xff] }
 0x6ff   :  { %v12890_v19 = vpop.eup %12889 }
 0x700   :  { %v1255_v20 = vsel %vm565_vm3, %v12890_v19, 0.0 }
 0x701   :  { %1256 = vadd.xlane.f32.xlu0 %v1255_v20 }
 0x703   :  { %v12892_v21 = vpop.eup %12891 }
 0x704   :  { %v1258_v22 = vsel %vm565_vm3, %v12892_v21, 0.0 }
 0x705   :  { %1259 = vadd.xlane.f32.xlu1 %v1258_v22 }
 0x78e   :  { %v1257_v23 = vpop.xlane.xlu0 %1256 }
 0x78f   :  { %12893 = vrcp.f32 %v1257_v23 }
 0x792   :  { %v1260_v24 = vpop.xlane.xlu1 %1259 }
 0x793   :  { %12895 = vrcp.f32 %v1260_v24  ;;  %v9383_v24 = vld [vmem:[%s16908_s3 + $0xd0] sm:$0xff] }
 0x799   :  { %v12894_v25 = vpop.eup %12893 }
 0x79a   :  { %v1262_v26 = vmul.f32 %v12894_v25, %v12890_v19  ;;  %v11821_v19 = vpack.c.bf16 %v9382_v18, %v9381_v17  ;;  %v9384_v25 = vld [vmem:[%s16908_s3 + $0xd8] sm:$0xff] }
 0x79c   :  { %11124 = vmatmul.mubr.msk.f32.vlgmr.msra.gmra.mrb[14].mxu1 %vm565_vm3, %v1262_v26  ;;  %11822 = vmatprep.subr.bf16.mxu0 %v11821_v19 }
 0x79d   :  { %v12896_v27 = vpop.eup %12895  ;;  %11127 = vmatpush3.msra.mxu1 %v1086_v45  ;;  %11128 = vmatprep.mubr.msk.f32.mxu1 %vm12988_vm2, %v12987_v46 }
 0x79e   :  { %v1264_v28 = vmul.f32 %v12896_v27, %v12892_v21  ;;  %11766 = vmatprep.subr.bf16.mxu1 %v11765_v31 }
 0x7a0   :  { %11129 = vmatmul.mubr.msk.f32.vlgmr.msra.gmra.mrb[16].mxu1 %vm565_vm3, %v1264_v28  ;;  %v11825_v28 = vpack.c.bf16 %v9384_v25, %v9383_v24 }
 0x7a1   :  { %11768 = vmatpush3.bf16.msra.mxu1 %v11765_v31  ;;  %v11829_v31 = vpack.c.bf16 %v9386_v30, %v9385_v29 }
 0x7a2   :  { %11786 = vmatprep.subr.bf16.mxu1 %v11785_v34 }
 0x86f   :  { %v1334_v35 = vpop.f32.mrb[14].mxu1 }
 0x870   :  { %v11125_v40 = vpop.f32.mrb[15].mxu1  ;;  %11135 = vmatprep.mubr.msk.f32.mxu1 %vm59_vm0, %v1334_v35  ;;  %v9401_v35 = vld [vmem:[%s16910_s5 + $0xc0] sm:$0xff] }
 0x871   :  { %v11853_v39 = vpack.c.bf16 %v9402_v36, %v9401_v35  ;;  %v9403_v40 = vld [vmem:[%s16910_s5 + $0xd0] sm:$0xff] }
 0x873   :  { %v1407_v42 = vpop.f32.mrb[16].mxu1 }
 0x874   :  { %v11130_v45 = vpop.f32.mrb[17].mxu1  ;;  %11136 = vmatmul.mubr.msk.f32.vlgmr.msra.gmra.mrb[6].mxu1 %vm59_vm0, %v1407_v42 }
 0x875   :  { %11788 = vmatpush3.bf16.msra.mxu1 %v11785_v34  ;;  %11173 = vmatprep.mubr.msk.f32.mxu1 %vm155_vm1, %v13143_v37  ;;  %v11833_v34 = vpack.c.bf16 %v9388_v33, %v9387_v32  ;;  %v11861_v45 = vpack.c.bf16 %v9406_v44, %v9405_v43 }
 0x876   :  { %11790 = vmatprep.subr.bf16.mxu1 %v11789_v41 }
 0x879   :  { %11792 = vmatpush3.bf16.msra.mxu1 %v11789_v41  ;;  %v9404_v41 = vld [vmem:[%s16910_s5 + $0xd8] sm:$0xff] }
 0x87a   :  { %11794 = vmatprep.subr.bf16.mxu1 %v11793_v47  ;;  %v11857_v42 = vpack.c.bf16 %v9404_v41, %v9403_v40 }
 0x87d   :  { %11796 = vmatpush3.bf16.msra.mxu1 %v11793_v47  ;;  %v9407_v47 = vld [vmem:[%s16910_s5 + $0xf0] sm:$0xff] }
 0x87e   :  { %11798 = vmatprep.subr.bf16.mxu1 %v11797_v56  ;;  %v11865_v55 = vpack.c.bf16 %v9408_v54, %v9407_v47 }
 0x881   :  { %11800 = vmatpush3.bf16.msra.mxu1 %v11797_v56  ;;  %v9376_v56 = vld [vmem:[%s16912_s7 + $0x20] sm:$0xff] }
 0x882   :  { %11195 = vmatprep.subr.mxu1 %v12987_v46 }
 0x884   :  { %11174 = vmatmul.mubr.msk.f32.vlgmr.msra.gmra.mrb[18].mxu1 %vm155_vm1, %v13145_v38 }
 0x885   :  { %11197 = vmatprep.mubr.msk.f32.mxu1 %vm12988_vm2, %v12987_v46 }
 0x957   :  { %v11175_v59 = vpop.f32.mrb[18].mxu1 }
 0x958   :  { %v1666_v61 = vpop.f32.mrb[19].mxu1  ;;  %v1672_v1 = vadd.f32 %v11175_v59, %v1599_v57 }
 0x959   :  { %v1667_v63 = vadd.f32 %v1666_v61, %v1599_v57  ;;  %v9377_v57 = vld [vmem:[%s16912_s7 + $0x28] sm:$0xff] }
 0x95a   :  { %v11817_v59 = vpack.c.bf16 %v9377_v57, %v9376_v56  ;;  %v9392_v61 = vld [vmem:[%s16909_s4 + $0xc8] sm:$0xff] }
 0x95b   :  { %11196 = vmatpush3.xpose.msk.msra.mxu1 %vm59_vm0, %v1667_v63  ;;  %v11837_v63 = vpack.c.bf16 %v9392_v61, %v9391_v60  ;;  %v9418_v60 = vld [vmem:[%s16912_s7 + $0x38] sm:$0xff] }
 0x95c   :  { %11200 = vmatprep.subr.mxu1 %v12987_v46 }
 0x95e   :  { %11198 = vmatmul.mubr.msk.f32.vlgmr.msra.gmra.mrb[20].mxu1 %vm59_vm0, %v1579_v0 }
 0x95f   :  { %11201 = vmatpush3.xpose.msk.msra.mxu1 %vm59_vm0, %v1672_v1  ;;  %11202 = vmatprep.mubr.msk.f32.mxu1 %vm12988_vm2, %v12987_v46  ;;  %v9393_v1 = vld [vmem:[%s16909_s4 + $0xd0] sm:$0xff] }
 0x960   :  { %11205 = vmatprep.subr.mxu1 %v12987_v46 }
 0x962   :  { %11203 = vmatmul.mubr.msk.f32.vlgmr.msra.gmra.mrb[22].mxu1 %vm59_vm0, %v1584_v2  ;;  %v9394_v2 = vld [vmem:[%s16909_s4 + $0xd8] sm:$0xff] }
 0x963   :  { %11206 = vmatpush3.msra.mxu1 %v13379_v58  ;;  %11207 = vmatprep.mubr.msk.f32.mxu1 %vm12988_vm2, %v12987_v46 }
 0x964   :  { %11818 = vmatprep.subr.bf16.mxu1 %v11817_v59 }
 0xa31   :  { %v1835_v52 = vpop.f32.mrb[20].mxu1 }
 0xa32   :  { %v1915_v53 = vmul.f32 0.25, %v1835_v52  ;;  %v11199_v3 = vpop.f32.mrb[21].mxu1 }
 0xa34   :  { %v1917_v4 = vsel %vm565_vm3, %v1915_v53, -inf }
 0xa35   :  { %1918 = vmax.xlane.f32.xlu0 %v1917_v4  ;;  %v1911_v5 = vpop.f32.mrb[22].mxu1  ;;  %v9395_v4 = vld [vmem:[%s16909_s4 + $0xe0] sm:$0xff] }
 0xa36   :  { %v1916_v6 = vmul.f32 0.25, %v1911_v5  ;;  %v11204_v7 = vpop.f32.mrb[23].mxu1  ;;  %v9396_v5 = vld [vmem:[%s16909_s4 + $0xe8] sm:$0xff] }
 0xa37   :  { %v11845_v7 = vpack.c.bf16 %v9396_v5, %v9395_v4 }
 0xa38   :  { %v1920_v50 = vsel %vm565_vm3, %v1916_v6, -inf }
 0xa39   :  { %1921 = vmax.xlane.f32.xlu1 %v1920_v50  ;;  %v9397_v50 = vld [vmem:[%s16909_s4 + $0xf0] sm:$0xff] }
 0xac2   :  { %v1919_v8 = vpop.xlane.xlu0 %1918 }
 0xac3   :  { %v1923_v9 = vsub.f32 %v1915_v53, %v1919_v8  ;;  %v11841_v53 = vpack.c.bf16 %v9394_v2, %v9393_v1  ;;  %v9398_v8 = vld [vmem:[%s16909_s4 + $0xf8] sm:$0xff] }
 0xac5   :  { %v1925_v10 = vmul.f32 1.442695, %v1923_v9  ;;  %v11849_v9 = vpack.c.bf16 %v9398_v8, %v9397_v50 }
 0xac6   :  { %v1922_v11 = vpop.xlane.xlu1 %1921 }
 0xac7   :  { %12897 = vpow2.f32 %v1925_v10  ;;  %v1924_v58 = vsub.f32 %v1916_v6, %v1922_v11 }
 0xac9   :  { %v1927_v12 = vmul.f32 1.442695, %v1924_v58  ;;  %v9380_v58 = vld [vmem:[%s16911_s6 + $0xc] sm:$0x7] }
 0xaca   :  { %v2185_v18 = vrot.slane %v9380_v58, %v13183_v51 }
 0xacb   :  { %12899 = vpow2.f32 %v1927_v12  ;;  %v2361_v12 = vrot.slane %v9380_v58, %v13194_v62 }
 0xad1   :  { %v12898_v13 = vpop.eup %12897 }
 0xad2   :  { %v1929_v14 = vsel %vm565_vm3, %v12898_v13, 0.0 }
 0xad3   :  { %1930 = vadd.xlane.f32.xlu0 %v1929_v14 }
 0xad5   :  { %v12900_v15 = vpop.eup %12899 }
 0xad6   :  { %v1932_v16 = vsel %vm565_vm3, %v12900_v15, 0.0 }
 0xad7   :  { %1933 = vadd.xlane.f32.xlu1 %v1932_v16  ;;  %v2273_v16 = vrot.slane %v9380_v58, %v13177_v49 }
 0xb60   :  { %v1931_v20 = vpop.xlane.xlu0 %1930 }
 0xb61   :  { %12901 = vrcp.f32 %v1931_v20 }
 0xb64   :  { %v1934_v21 = vpop.xlane.xlu1 %1933 }
 0xb65   :  { %12903 = vrcp.f32 %v1934_v21 }
 0xb6b   :  { %v12902_v22 = vpop.eup %12901 }
 0xb6c   :  { %v1936_v23 = vmul.f32 %v12902_v22, %v12898_v13 }
 0xb6e   :  { %11208 = vmatmul.mubr.msk.f32.vlgmr.msra.gmra.mrb[24].mxu1 %vm565_vm3, %v1936_v23 }
 0xb6f   :  { %v12904_v26 = vpop.eup %12903  ;;  %11820 = vmatpush3.bf16.msra.mxu1 %v11817_v59  ;;  %v9417_v59 = vld [vmem:[%s16912_s7 + $0x30] sm:$0xff] }
 0xb70   :  { %v1938_v27 = vmul.f32 %v12904_v26, %v12900_v15  ;;  %11838 = vmatprep.subr.bf16.mxu1 %v11837_v63  ;;  %v11869_v61 = vpack.c.bf16 %v9418_v60, %v9417_v59  ;;  %v2952_v60 = vld [vmem:[%s16914_s9 + $0x210] sm:$0xff] }
 0xb72   :  { %11213 = vmatmul.mubr.msk.f32.vlgmr.msra.gmra.mrb[18].mxu0 %vm565_vm3, %v1938_v27 }
 0xb73   :  { %11824 = vmatpush3.bf16.msra.mxu0 %v11821_v19  ;;  %11238 = vmatprep.mubr.msk.f32.mxu0 %vm155_vm1, %v13143_v37 }
 0xb74   :  { %11826 = vmatprep.subr.bf16.mxu0 %v11825_v28 }
 0xb77   :  { %11828 = vmatpush3.bf16.msra.mxu0 %v11825_v28 }
 0xb78   :  { %11830 = vmatprep.subr.bf16.mxu0 %v11829_v31 }
 0xb7b   :  { %11832 = vmatpush3.bf16.msra.mxu0 %v11829_v31 }
 0xb7c   :  { %11834 = vmatprep.subr.bf16.mxu0 %v11833_v34 }
 0xb7f   :  { %11836 = vmatpush3.bf16.msra.mxu0 %v11833_v34 }
 0xb80   :  { %11854 = vmatprep.subr.bf16.mxu0 %v11853_v39 }
 0xb82   :  { %11239 = vmatmul.mubr.msk.f32.vlgmr.msra.gmra.mrb[20].mxu0 %vm155_vm1, %v13145_v38 }
 0xb83   :  { %11856 = vmatpush3.bf16.msra.mxu0 %v11853_v39  ;;  %11276 = vmatprep.mubr.msk.f32.mxu0 %vm155_vm1, %v13143_v37 }
 0xb84   :  { %11858 = vmatprep.subr.bf16.mxu0 %v11857_v42 }
 0xb87   :  { %11860 = vmatpush3.bf16.msra.mxu0 %v11857_v42 }
 0xb88   :  { %11862 = vmatprep.subr.bf16.mxu0 %v11861_v45 }
 0xb8b   :  { %11864 = vmatpush3.bf16.msra.mxu0 %v11861_v45 }
 0xb8c   :  { %11866 = vmatprep.subr.bf16.mxu0 %v11865_v55 }
 0xb8f   :  { %11868 = vmatpush3.bf16.msra.mxu0 %v11865_v55 }
 0xb92   :  { %11277 = vmatmul.mubr.msk.f32.vlgmr.msra.gmra.mrb[22].mxu0 %vm155_vm1, %v13145_v38 }
 0xb93   :  { %3168 = vmatprep.mubr.f32.mxu0 %v12987_v46 }
 0xc41   :  { %v2008_v0 = vpop.f32.mrb[24].mxu1 }
 0xc42   :  { %v11209_v52 = vpop.f32.mrb[25].mxu1  ;;  %11219 = vmatprep.mubr.msk.f32.mxu1 %vm59_vm0, %v2008_v0 }
 0xc43   :  { %v13597_v52 = vld [vmem:[%s16913_s8] sm:$0x3f] }
 0xc45   :  { %v2081_v3 = vpop.f32.mrb[18].mxu0 }
 0xc46   :  { %v11214_v6 = vpop.f32.mrb[19].mxu0  ;;  %11220 = vmatmul.mubr.msk.f32.vlgmr.msra.gmra.mrb[6].mxu1 %vm59_vm0, %v2081_v3 }
 0xc47   :  { %11840 = vmatpush3.bf16.msra.mxu1 %v11837_v63  ;;  %11257 = vmatprep.mubr.msk.f32.mxu1 %vm155_vm1, %v13143_v37 }
 0xc48   :  { %11842 = vmatprep.subr.bf16.mxu1 %v11841_v53 }
 0xc4b   :  { %11844 = vmatpush3.bf16.msra.mxu1 %v11841_v53  ;;  %v820_v53 = vrot.slane %v13597_v52, %v13183_v51 }
 0xc4c   :  { %11846 = vmatprep.subr.bf16.mxu1 %v11845_v7 }
 0xc4f   :  { %11848 = vmatpush3.bf16.msra.mxu1 %v11845_v7 }
 0xc50   :  { %11850 = vmatprep.subr.bf16.mxu1 %v11849_v9 }
 0xc53   :  { %11852 = vmatpush3.bf16.msra.mxu1 %v11849_v9 }
 0xc54   :  { %11279 = vmatprep.subr.mxu1 %v12987_v46 }
 0xc55   :  { %v11240_v10 = vpop.f32.mrb[20].mxu0 }
 0xc56   :  { %v2252_v11 = vpop.f32.mrb[21].mxu0  ;;  %11258 = vmatmul.mubr.msk.f32.vlgmr.msra.gmra.mrb[26].mxu1 %vm155_vm1, %v13145_v38  ;;  %v2258_v23 = vadd.f32 %v11240_v10, %v2185_v18 }
 0xc57   :  { %11281 = vmatprep.mubr.msk.f32.mxu1 %vm12988_vm2, %v12987_v46  ;;  %v2253_v21 = vadd.f32 %v2252_v11, %v2185_v18  ;;  %v2903_v18 = vld [vmem:[%s16914_s9 + $0x88] sm:$0xff] }
 0xc65   :  { %v11278_v13 = vpop.f32.mrb[22].mxu0 }
 0xc66   :  { %v2434_v14 = vadd.f32 %v11278_v13, %v2361_v12  ;;  %v2428_v15 = vpop.f32.mrb[23].mxu0 }
 0xc67   :  { %v2429_v24 = vadd.f32 %v2428_v15, %v2361_v12 }
 0xd29   :  { %v11259_v17 = vpop.f32.mrb[26].mxu1 }
 0xd2a   :  { %v2340_v19 = vpop.f32.mrb[27].mxu1  ;;  %v2346_v22 = vadd.f32 %v11259_v17, %v2273_v16  ;;  %v2887_v17 = vld [vmem:[%s16914_s9 + $0x8] sm:$0xff] }
 0xd2b   :  { %v2341_v20 = vadd.f32 %v2340_v19, %v2273_v16  ;;  %v2889_v19 = vld [vmem:[%s16914_s9 + $0x18] sm:$0xff] }
 0xd2d   :  { %11280 = vmatpush3.xpose.msk.msra.mxu1 %vm59_vm0, %v2341_v20  ;;  %v11873_v20 = vpack.c.bf16 %v2903_v18, %v2887_v17 }
 0xd2e   :  { %11284 = vmatprep.subr.mxu1 %v12987_v46 }
 0xd2f   :  { %11874 = vmatprep.subr.bf16.mxu0 %v11873_v20 }
 0xd30   :  { %11282 = vmatmul.mubr.msk.f32.vlgmr.msra.gmra.mrb[28].mxu1 %vm59_vm0, %v2253_v21  ;;  %v2905_v21 = vld [vmem:[%s16914_s9 + $0x98] sm:$0xff] }
 0xd31   :  { %11285 = vmatpush3.xpose.msk.msra.mxu1 %vm59_vm0, %v2346_v22  ;;  %11286 = vmatprep.mubr.msk.f32.mxu1 %vm12988_vm2, %v12987_v46  ;;  %v2886_v22 = vld [vmem:[%s16914_s9] sm:$0xff] }
 0xd32   :  { %11289 = vmatprep.subr.mxu1 %v12987_v46 }
 0xd34   :  { %11287 = vmatmul.mubr.msk.f32.vlgmr.msra.gmra.mrb[30].mxu1 %vm59_vm0, %v2258_v23  ;;  %v2902_v23 = vld [vmem:[%s16914_s9 + $0x80] sm:$0xff] }
 0xd35   :  { %11290 = vmatpush3.msra.mxu1 %v2429_v24  ;;  %11291 = vmatprep.mubr.msk.f32.mxu1 %vm12988_vm2, %v12987_v46  ;;  %v11889_v24 = vpack.c.bf16 %v2905_v21, %v2889_v19 }
 0xd36   :  { %11294 = vmatprep.subr.mxu1 %v12987_v46 }
 0xe03   :  { %v2509_v25 = vpop.f32.mrb[28].mxu1 }
 0xe04   :  { %v2589_v26 = vmul.f32 0.25, %v2509_v25  ;;  %v11283_v27 = vpop.f32.mrb[29].mxu1  ;;  %v11875_v25 = vpack.c.bf16 %v2902_v23, %v2886_v22  ;;  %v2877_v22 = vrot.slane %v13597_v52, %v13177_v49 }
 0xe05   :  { %v2904_v27 = vld [vmem:[%s16914_s9 + $0x90] sm:$0xff] }
 0xe06   :  { %v2591_v28 = vsel %vm565_vm3, %v2589_v26, -inf  ;;  %11876 = vmatpush1.bf16.msra.mxu0 %v11875_v25  ;;  %v2883_v25 = vrot.slane %v13597_v52, %v13194_v62  ;;  %v2923_v52 = vld [vmem:[%s16914_s9 + $0x128] sm:$0xff] }
 0xe07   :  { %2592 = vmax.xlane.f32.xlu0 %v2591_v28  ;;  %v2585_v29 = vpop.f32.mrb[30].mxu1 }
 0xe08   :  { %v2590_v30 = vmul.f32 0.25, %v2585_v29  ;;  %v11288_v31 = vpop.f32.mrb[31].mxu1  ;;  %v2919_v29 = vld [vmem:[%s16914_s9 + $0x108] sm:$0xff] }
 0xe09   :  { %v2921_v31 = vld [vmem:[%s16914_s9 + $0x118] sm:$0xff] }
 0xe0a   :  { %v2594_v32 = vsel %vm565_vm3, %v2590_v30, -inf }
 0xe0b   :  { %2595 = vmax.xlane.f32.xlu1 %v2594_v32 }
 0xe94   :  { %v2593_v33 = vpop.xlane.xlu0 %2592 }
 0xe95   :  { %v2597_v34 = vsub.f32 %v2589_v26, %v2593_v33  ;;  %v2888_v26 = vld [vmem:[%s16914_s9 + $0x10] sm:$0xff]  ;;  %v2937_v33 = vld [vmem:[%s16914_s9 + $0x198] sm:$0xff] }
 0xe96   :  { %v11891_v28 = vpack.c.bf16 %v2904_v27, %v2888_v26 }
 0xe97   :  { %v2599_v35 = vmul.f32 1.442695, %v2597_v34  ;;  %v2918_v34 = vld [vmem:[%s16914_s9 + $0x100] sm:$0xff] }
 0xe98   :  { %v2596_v36 = vpop.xlane.xlu1 %2595 }
 0xe99   :  { %12905 = vpow2.f32 %v2599_v35  ;;  %v2598_v39 = vsub.f32 %v2590_v30, %v2596_v36  ;;  %v2935_v30 = vld [vmem:[%s16914_s9 + $0x188] sm:$0xff]  ;;  %v2934_v35 = vld [vmem:[%s16914_s9 + $0x180] sm:$0xff]  ;;  %v11893_v36 = vpack.c.bf16 %v2937_v33, %v2921_v31 }
 0xe9a   :  { %v11877_v32 = vpack.c.bf16 %v2935_v30, %v2919_v29  ;;  %v2892_v29 = vld [vmem:[%s16914_s9 + $0x30] sm:$0xff] }
 0xe9b   :  { %v2601_v40 = vmul.f32 1.442695, %v2598_v39  ;;  %v11879_v39 = vpack.c.bf16 %v2934_v35, %v2918_v34  ;;  %v2908_v30 = vld [vmem:[%s16914_s9 + $0xb0] sm:$0xff]  ;;  %v2922_v35 = vld [vmem:[%s16914_s9 + $0x120] sm:$0xff] }
 0xe9c   :  { %11878 = vmatprep.subr.bf16.mxu0 %v11877_v32  ;;  %v2941_v32 = vld [vmem:[%s16914_s9 + $0x1b8] sm:$0xff]  ;;  %v11923_v34 = vpack.c.bf16 %v2908_v30, %v2892_v29  ;;  %v2926_v30 = vld [vmem:[%s16914_s9 + $0x140] sm:$0xff] }
 0xe9d   :  { %12907 = vpow2.f32 %v2601_v40  ;;  %v2920_v40 = vld [vmem:[%s16914_s9 + $0x110] sm:$0xff]  ;;  %11880 = vmatpush1.bf16.msra.mxu0 %v11879_v39 }
 0xea3   :  { %v12906_v41 = vpop.eup %12905 }
 0xea4   :  { %v2603_v42 = vsel %vm565_vm3, %v12906_v41, 0.0 }
 0xea5   :  { %2604 = vadd.xlane.f32.xlu0 %v2603_v42 }
 0xea7   :  { %v12908_v43 = vpop.eup %12907 }
 0xea8   :  { %v2606_v44 = vsel %vm565_vm3, %v12908_v43, 0.0 }
 0xea9   :  { %2607 = vadd.xlane.f32.xlu1 %v2606_v44  ;;  %v2967_v44 = vld [vmem:[%s16914_s9 + $0x288] sm:$0xff] }
 0xf32   :  { %v2605_v45 = vpop.xlane.xlu0 %2604 }
 0xf33   :  { %12909 = vrcp.f32 %v2605_v45  ;;  %v2953_v45 = vld [vmem:[%s16914_s9 + $0x218] sm:$0xff] }
 0xf36   :  { %v2608_v47 = vpop.xlane.xlu1 %2607 }
 0xf37   :  { %12911 = vrcp.f32 %v2608_v47 }
 0xf3d   :  { %v12910_v54 = vpop.eup %12909 }
 0xf3e   :  { %v2610_v55 = vmul.f32 %v12910_v54, %v12906_v41  ;;  %v2936_v41 = vld [vmem:[%s16914_s9 + $0x190] sm:$0xff]  ;;  %v2969_v54 = vld [vmem:[%s16914_s9 + $0x298] sm:$0xff] }
 0xf3f   :  { %v11895_v42 = vpack.c.bf16 %v2936_v41, %v2920_v40  ;;  %v2924_v41 = vld [vmem:[%s16914_s9 + $0x130] sm:$0xff] }
 0xf40   :  { %11292 = vmatmul.mubr.msk.f32.vlgmr.msra.gmra.mrb[32].mxu1 %vm565_vm3, %v2610_v55  ;;  %v2950_v55 = vld [vmem:[%s16914_s9 + $0x200] sm:$0xff] }
 0xf41   :  { %v12912_v56 = vpop.eup %12911  ;;  %11295 = vmatpush3.msra.mxu1 %v2434_v14  ;;  %11296 = vmatprep.mubr.msk.f32.mxu1 %vm12988_vm2, %v12987_v46 }
 0xf42   :  { %v2612_v57 = vmul.f32 %v12912_v56, %v12908_v43  ;;  %11870 = vmatprep.subr.bf16.mxu1 %v11869_v61  ;;  %v2951_v43 = vld [vmem:[%s16914_s9 + $0x208] sm:$0xff]  ;;  %v2966_v56 = vld [vmem:[%s16914_s9 + $0x280] sm:$0xff] }
 0xf43   :  { %v11881_v47 = vpack.c.bf16 %v2967_v44, %v2951_v43  ;;  %v11883_v59 = vpack.c.bf16 %v2966_v56, %v2950_v55  ;;  %v2955_v43 = vld [vmem:[%s16914_s9 + $0x228] sm:$0xff]  ;;  %v2973_v55 = vld [vmem:[%s16914_s9 + $0x2b8] sm:$0xff] }
 0xf44   :  { %11297 = vmatmul.mubr.msk.f32.vlgmr.msra.gmra.mrb[34].mxu1 %vm565_vm3, %v2612_v57  ;;  %v11897_v57 = vpack.c.bf16 %v2969_v54, %v2953_v45  ;;  %v2957_v54 = vld [vmem:[%s16914_s9 + $0x238] sm:$0xff] }
 0xf45   :  { %11872 = vmatpush3.bf16.msra.mxu1 %v11869_v61  ;;  %v2968_v61 = vld [vmem:[%s16914_s9 + $0x290] sm:$0xff]  ;;  %11882 = vmatprep.subr.bf16.mxu0 %v11881_v47  ;;  %v2971_v47 = vld [vmem:[%s16914_s9 + $0x2a8] sm:$0xff] }
 0xf46   :  { %11890 = vmatprep.subr.bf16.mxu1 %v11889_v24  ;;  %11884 = vmatpush1.bf16.msra.mxu0 %v11883_v59  ;;  %v2890_v24 = vld [vmem:[%s16914_s9 + $0x20] sm:$0xff] }
 0xf47   :  { %v2954_v59 = vld [vmem:[%s16914_s9 + $0x220] sm:$0xff] }
0x1013   :  { %v2682_v63 = vpop.f32.mrb[32].mxu1 }
0x1014   :  { %v11293_v0 = vpop.f32.mrb[33].mxu1  ;;  %11303 = vmatprep.mubr.msk.f32.mxu1 %vm59_vm0, %v2682_v63  ;;  %v11899_v63 = vpack.c.bf16 %v2968_v61, %v2952_v60  ;;  %v2970_v60 = vld [vmem:[%s16914_s9 + $0x2a0] sm:$0xff] }
0x1015   :  { %v2983_v0 = vld [vmem:[%s16914_s9 + $0x308] sm:$0xff] }
0x1017   :  { %v2755_v1 = vpop.f32.mrb[34].mxu1 }
0x1018   :  { %v11298_v2 = vpop.f32.mrb[35].mxu1  ;;  %11304 = vmatmul.mubr.msk.f32.vlgmr.msra.gmra.mrb[6].mxu1 %vm59_vm0, %v2755_v1  ;;  %v2999_v1 = vld [vmem:[%s16914_s9 + $0x388] sm:$0xff] }
0x1019   :  { %3245 = vmatprep.mubr.f32.mxu1 %v12987_v46  ;;  %11892 = vmatpush1.bf16.msra.mxu1 %v11891_v28  ;;  %v2985_v2 = vld [vmem:[%s16914_s9 + $0x318] sm:$0xff]  ;;  %v2906_v28 = vld [vmem:[%s16914_s9 + $0xa0] sm:$0xff] }
0x101a   :  { %11894 = vmatprep.subr.bf16.mxu1 %v11893_v36  ;;  %v11907_v33 = vpack.c.bf16 %v2906_v28, %v2890_v24  ;;  %v2938_v36 = vld [vmem:[%s16914_s9 + $0x1a0] sm:$0xff]  ;;  %v2927_v24 = vld [vmem:[%s16914_s9 + $0x148] sm:$0xff] }
0x101b   :  { %v11911_v56 = vpack.c.bf16 %v2938_v36, %v2922_v35  ;;  %v2961_v35 = vld [vmem:[%s16914_s9 + $0x258] sm:$0xff] }
0x101c   :  { %v2977_v36 = vld [vmem:[%s16914_s9 + $0x2d8] sm:$0xff] }
0x101d   :  { %11896 = vmatpush1.bf16.msra.mxu1 %v11895_v42  ;;  %v2940_v42 = vld [vmem:[%s16914_s9 + $0x1b0] sm:$0xff] }
0x101e   :  { %11898 = vmatprep.subr.bf16.mxu1 %v11897_v57  ;;  %v11927_v57 = vpack.c.bf16 %v2940_v42, %v2924_v41  ;;  %v2958_v42 = vld [vmem:[%s16914_s9 + $0x240] sm:$0xff] }
0x1021   :  { %11900 = vmatpush1.bf16.msra.mxu1 %v11899_v63  ;;  %v11913_v63 = vpack.c.bf16 %v2971_v47, %v2955_v43  ;;  %v2974_v43 = vld [vmem:[%s16914_s9 + $0x2c0] sm:$0xff]  ;;  %v2960_v47 = vld [vmem:[%s16914_s9 + $0x250] sm:$0xff] }
0x10eb   :  { %v11305_v3 = vpop.f32.mrb[6].mxu1 }
0x10ec   :  { %v12861_v4 = vadd.f32 %v11305_v3, %v820_v53  ;;  %v2834_v5 = vpop.f32.mrb[7].mxu1  ;;  %v3001_v3 = vld [vmem:[%s16914_s9 + $0x398] sm:$0xff] }
0x10ed   :  { %v12862_v6 = vadd.f32 %v2834_v5, %v820_v53  ;;  %v11885_v53 = vpack.c.bf16 %v2999_v1, %v2983_v0  ;;  %v2998_v5 = vld [vmem:[%s16914_s9 + $0x380] sm:$0xff]  ;;  %v11929_v0 = vpack.c.bf16 %v2973_v55, %v2957_v54  ;;  %v2956_v1 = vld [vmem:[%s16914_s9 + $0x230] sm:$0xff]  ;;  %v2991_v55 = vld [vmem:[%s16914_s9 + $0x348] sm:$0xff] }
0x10ee   :  { %v2846_v7 = vadd.f32 %v12861_v4, %v13145_v38  ;;  %v2982_v4 = vld [vmem:[%s16914_s9 + $0x300] sm:$0xff]  ;;  %v2976_v54 = vld [vmem:[%s16914_s9 + $0x2d0] sm:$0xff] }
0x10ef   :  { %v2845_v50 = vadd.f32 %v12862_v6, %v13143_v37  ;;  %v11901_v6 = vpack.c.bf16 %v3001_v3, %v2985_v2  ;;  %11886 = vmatprep.subr.bf16.mxu0 %v11885_v53  ;;  %v2972_v2 = vld [vmem:[%s16914_s9 + $0x2b0] sm:$0xff]  ;;  %v2987_v53 = vld [vmem:[%s16914_s9 + $0x328] sm:$0xff] }
0x10f0   :  { %v2850_v8 = vsel %vm155_vm1, %v2846_v7, 0.0  ;;  %v3003_v3 = vld [vmem:[%s16914_s9 + $0x3a8] sm:$0xff] }
0x10f1   :  { %2851 = vadd.xlane.f32.xlu1 %v2850_v8  ;;  %v2847_v9 = vsel %vm155_vm1, %v2845_v50, 0.0  ;;  %v3000_v8 = vld [vmem:[%s16914_s9 + $0x390] sm:$0xff]  ;;  %11902 = vmatprep.subr.bf16.mxu1 %v11901_v6  ;;  %v11915_v6 = vpack.c.bf16 %v2970_v60, %v2954_v59  ;;  %v3009_v59 = vld [vmem:[%s16914_s9 + $0x3d8] sm:$0xff]  ;;  %v11947_v60 = vpack.c.bf16 %v2974_v43, %v2958_v42 }
0x10f2   :  { %2848 = vadd.xlane.f32.xlu0 %v2847_v9  ;;  %v3013_v42 = vld [vmem:[%s16914_s9 + $0x3f8] sm:$0xff] }
0x117e   :  { %v2852_v10 = vpop.xlane.xlu1 %2851 }
0x117f   :  { %v2855_v11 = vmul.f32 0.015625, %v2852_v10  ;;  %v2849_v58 = vpop.xlane.xlu0 %2848  ;;  %v2891_v10 = vld [vmem:[%s16914_s9 + $0x28] sm:$0xff] }
0x1180   :  { %v2854_v12 = vmul.f32 0.015625, %v2849_v58  ;;  %v2893_v58 = vld [vmem:[%s16914_s9 + $0x38] sm:$0xff] }
0x1181   :  { %v13605_v13 = vsub.f32 %v2846_v7, %v2855_v11  ;;  %v11887_v7 = vpack.c.bf16 %v2998_v5, %v2982_v4  ;;  %v2907_v11 = vld [vmem:[%s16914_s9 + $0xa8] sm:$0xff]  ;;  %v2989_v4 = vld [vmem:[%s16914_s9 + $0x338] sm:$0xff] }
0x1182   :  { %v13607_v14 = vsub.f32 %v2845_v50, %v2854_v12  ;;  %v2984_v50 = vld [vmem:[%s16914_s9 + $0x310] sm:$0xff]  ;;  %v11905_v12 = vpack.c.bf16 %v2907_v11, %v2891_v10  ;;  %v3005_v5 = vld [vmem:[%s16914_s9 + $0x3b8] sm:$0xff] }
0x1183   :  { %v2859_v15 = vmul.f32 %v13605_v13, %v13605_v13  ;;  %v11903_v9 = vpack.c.bf16 %v3000_v8, %v2984_v50  ;;  %11888 = vmatpush1.bf16.msra.mxu0 %v11887_v7  ;;  %v11931_v7 = vpack.c.bf16 %v2972_v2, %v2956_v1  ;;  %v2986_v50 = vld [vmem:[%s16914_s9 + $0x320] sm:$0xff]  ;;  %v11933_v10 = vpack.c.bf16 %v3005_v5, %v2989_v4  ;;  %v2988_v11 = vld [vmem:[%s16914_s9 + $0x330] sm:$0xff]  ;;  %v2899_v5 = vld [vmem:[%s16914_s9 + $0x68] sm:$0xff] }
0x1184   :  { %v2858_v37 = vmul.f32 %v13607_v14, %v13607_v14  ;;  %11906 = vmatprep.subr.bf16.mxu0 %v11905_v12  ;;  %v3002_v8 = vld [vmem:[%s16914_s9 + $0x3a0] sm:$0xff]  ;;  %v2895_v12 = vld [vmem:[%s16914_s9 + $0x48] sm:$0xff]  ;;  %v3008_v4 = vld [vmem:[%s16914_s9 + $0x3d0] sm:$0xff] }
0x1185   :  { %v2863_v38 = vsel %vm155_vm1, %v2859_v15, 0.0  ;;  %11904 = vmatpush1.bf16.msra.mxu1 %v11903_v9  ;;  %v2909_v15 = vld [vmem:[%s16914_s9 + $0xb8] sm:$0xff]  ;;  %v11917_v9 = vpack.c.bf16 %v3003_v3, %v2987_v53  ;;  %v3006_v1 = vld [vmem:[%s16914_s9 + $0x3c0] sm:$0xff]  ;;  %v2992_v3 = vld [vmem:[%s16914_s9 + $0x350] sm:$0xff] }
0x1186   :  { %2864 = vadd.xlane.f32.xlu1 %v2863_v38  ;;  %v2860_v16 = vsel %vm155_vm1, %v2858_v37, 0.0  ;;  %v11921_v37 = vpack.c.bf16 %v2909_v15, %v2893_v58  ;;  %v3004_v58 = vld [vmem:[%s16914_s9 + $0x3b0] sm:$0xff]  ;;  %v2911_v15 = vld [vmem:[%s16914_s9 + $0xc8] sm:$0xff] }
0x1187   :  { %2861 = vadd.xlane.f32.xlu0 %v2860_v16 }
0x1188   :  { %11922 = vmatprep.subr.bf16.mxu1 %v11921_v37  ;;  %v2897_v37 = vld [vmem:[%s16914_s9 + $0x58] sm:$0xff] }
0x1213   :  { %v2865_v38 = vpop.xlane.xlu1 %2864 }
0x1214   :  { %v2867_v16 = vmul.f32 0.015625, %v2865_v38  ;;  %v2862_v17 = vpop.xlane.xlu0 %2861  ;;  %v2913_v38 = vld [vmem:[%s16914_s9 + $0xd8] sm:$0xff] }
0x1215   :  { %v2866_v18 = vmul.f32 0.015625, %v2862_v17  ;;  %v11935_v17 = vpack.c.bf16 %v3004_v58, %v2988_v11 }
0x1216   :  { %v2869_v19 = vadd.f32 1e-05, %v2867_v16  ;;  %v11919_v16 = vpack.c.bf16 %v3002_v8, %v2986_v50  ;;  %v2917_v50 = vld [vmem:[%s16914_s9 + $0xf8] sm:$0xff] }
0x1217   :  { %v2868_v20 = vadd.f32 1e-05, %v2866_v18  ;;  %v2894_v18 = vld [vmem:[%s16914_s9 + $0x40] sm:$0xff] }
0x1218   :  { %12913 = vrsqrt.f32 %v2869_v19  ;;  %v11937_v19 = vpack.c.bf16 %v2911_v15, %v2895_v12  ;;  %v2914_v12 = vld [vmem:[%s16914_s9 + $0xe0] sm:$0xff]  ;;  %v2900_v15 = vld [vmem:[%s16914_s9 + $0x70] sm:$0xff] }
0x1219   :  { %12915 = vrsqrt.f32 %v2868_v20  ;;  %v11953_v20 = vpack.c.bf16 %v2913_v38, %v2897_v37  ;;  %v2916_v37 = vld [vmem:[%s16914_s9 + $0xf0] sm:$0xff]  ;;  %v2931_v38 = vld [vmem:[%s16914_s9 + $0x168] sm:$0xff] }
0x1222   :  { %v12914_v21 = vpop.eup %12913 }
0x1223   :  { %v12916_v23 = vpop.eup %12915  ;;  %v2873_v26 = vmul.f32 %v12914_v21, %v13605_v13  ;;  %v2939_v13 = vld [vmem:[%s16914_s9 + $0x1a8] sm:$0xff]  ;;  %v2910_v21 = vld [vmem:[%s16914_s9 + $0xc0] sm:$0xff] }
0x1224   :  { %v2872_v27 = vmul.f32 %v12916_v23, %v13607_v14  ;;  %v2925_v14 = vld [vmem:[%s16914_s9 + $0x138] sm:$0xff]  ;;  %v11909_v44 = vpack.c.bf16 %v2939_v13, %v2923_v52  ;;  %v2912_v23 = vld [vmem:[%s16914_s9 + $0xd0] sm:$0xff]  ;;  %v11939_v28 = vpack.c.bf16 %v2910_v21, %v2894_v18  ;;  %v2942_v52 = vld [vmem:[%s16914_s9 + $0x1c0] sm:$0xff] }
0x1225   :  { %v2879_v39 = vmul.f32 %v2877_v22, %v2873_v26  ;;  %v11925_v45 = vpack.c.bf16 %v2941_v32, %v2925_v14  ;;  %v2929_v26 = vld [vmem:[%s16914_s9 + $0x158] sm:$0xff]  ;;  %v2944_v13 = vld [vmem:[%s16914_s9 + $0x1d0] sm:$0xff]  ;;  %v2959_v14 = vld [vmem:[%s16914_s9 + $0x248] sm:$0xff] }
0x1226   :  { %v2878_v31 = vmul.f32 %v2877_v22, %v2872_v27  ;;  %v2896_v22 = vld [vmem:[%s16914_s9 + $0x50] sm:$0xff]  ;;  %v2945_v27 = vld [vmem:[%s16914_s9 + $0x1d8] sm:$0xff]  ;;  %v2930_v21 = vld [vmem:[%s16914_s9 + $0x160] sm:$0xff] }
0x1227   :  { %v13789_v61 = vadd.f32 %v2883_v25, %v2879_v39  ;;  %v11955_v29 = vpack.c.bf16 %v2912_v23, %v2896_v22  ;;  %v11943_v39 = vpack.c.bf16 %v2942_v52, %v2926_v30  ;;  %v2949_v18 = vld [vmem:[%s16914_s9 + $0x1f8] sm:$0xff]  ;;  %v2946_v22 = vld [vmem:[%s16914_s9 + $0x1e0] sm:$0xff]  ;;  %v2932_v23 = vld [vmem:[%s16914_s9 + $0x170] sm:$0xff] }
0x1228   :  { %v13759_v40 = vadd.f32 %v2883_v25, %v2878_v31  ;;  %v2943_v25 = vld [vmem:[%s16914_s9 + $0x1c8] sm:$0xff]  ;;  %v2928_v31 = vld [vmem:[%s16914_s9 + $0x150] sm:$0xff]  ;;  %v2981_v30 = vld [vmem:[%s16914_s9 + $0x2f8] sm:$0xff]  ;;  %v11975_v52 = vpack.c.bf16 %v2946_v22, %v2930_v21 }
0x1229   :  { %v11941_v32 = vpack.c.bf16 %v2943_v25, %v2927_v24  ;;  %v11959_v41 = vpack.c.bf16 %v2944_v13, %v2928_v31  ;;  %v2948_v24 = vld [vmem:[%s16914_s9 + $0x1f0] sm:$0xff]  ;;  %v2963_v25 = vld [vmem:[%s16914_s9 + $0x268] sm:$0xff]  ;;  %v2962_v13 = vld [vmem:[%s16914_s9 + $0x260] sm:$0xff] }
0x122a   :  { %9421 = vmatmul.mubr.msk.f32.vlgmr.msra.gmra.mrb[24].mxu0 %vm155_vm1, %v13759_v40  ;;  %9423 = vmatmul.mubr.msk.f32.vlgmr.msra.gmra.mrb[36].mxu1 %vm155_vm1, %v13759_v40  ;;  %v11991_v31 = vpack.c.bf16 %v2948_v24, %v2932_v23  ;;  %v3805_v21 = vld [vmem:[%s16916_s11 + $0x1a8] sm:$0xff]  ;;  %v3756_v24 = vld [vmem:[%s16916_s11 + $0x20] sm:$0xff] }
0x122b   :  { %11908 = vmatpush1.bf16.msra.mxu0 %v11907_v33  ;;  %11924 = vmatpush1.bf16.msra.mxu1 %v11923_v34  ;;  %v11957_v33 = vpack.c.bf16 %v2945_v27, %v2929_v26  ;;  %v2975_v34 = vld [vmem:[%s16914_s9 + $0x2c8] sm:$0xff] }
0x122c   :  { %3174 = vmatprep.mubr.f32.mxu0 %v12987_v46  ;;  %3251 = vmatprep.mubr.f32.mxu1 %v12987_v46 }
0x122d   :  { %11910 = vmatprep.subr.bf16.mxu0 %v11909_v44  ;;  %11926 = vmatprep.subr.bf16.mxu1 %v11925_v45  ;;  %v11945_v44 = vpack.c.bf16 %v2975_v34, %v2959_v14  ;;  %v11961_v45 = vpack.c.bf16 %v2977_v36, %v2961_v35  ;;  %v2978_v14 = vld [vmem:[%s16914_s9 + $0x2e0] sm:$0xff]  ;;  %v2964_v34 = vld [vmem:[%s16914_s9 + $0x270] sm:$0xff]  ;;  %v2995_v36 = vld [vmem:[%s16914_s9 + $0x368] sm:$0xff] }
0x122e   :  { %9422 = vmatmul.mubr.msk.f32.gmra.mrb[26].mxu0 %vm155_vm1, %v13789_v61  ;;  %9424 = vmatmul.mubr.msk.f32.gmra.mrb[38].mxu1 %vm155_vm1, %v13789_v61  ;;  %v2980_v35 = vld [vmem:[%s16914_s9 + $0x2f0] sm:$0xff]  ;;  %v11979_v43 = vpack.c.bf16 %v2978_v14, %v2962_v13  ;;  %v3807_v13 = vld [vmem:[%s16916_s11 + $0x1b8] sm:$0xff] }
0x122f   :  { %11912 = vmatpush1.bf16.msra.mxu0 %v11911_v56  ;;  %11928 = vmatpush1.bf16.msra.mxu1 %v11927_v57  ;;  %v3007_v56 = vld [vmem:[%s16914_s9 + $0x3c8] sm:$0xff]  ;;  %v2993_v57 = vld [vmem:[%s16914_s9 + $0x358] sm:$0xff] }
0x1230   :  { %11914 = vmatprep.subr.bf16.mxu0 %v11913_v63  ;;  %11930 = vmatprep.subr.bf16.mxu1 %v11929_v0  ;;  %v11963_v63 = vpack.c.bf16 %v2976_v54, %v2960_v47  ;;  %v2990_v0 = vld [vmem:[%s16914_s9 + $0x340] sm:$0xff]  ;;  %v11949_v2 = vpack.c.bf16 %v3007_v56, %v2991_v55  ;;  %v11965_v53 = vpack.c.bf16 %v3009_v59, %v2993_v57  ;;  %v2996_v56 = vld [vmem:[%s16914_s9 + $0x370] sm:$0xff] }
0x1231   :  { %3322 = vmatprep.mubr.f32.mxu0 %v12987_v46  ;;  %3399 = vmatprep.mubr.f32.mxu1 %v12987_v46  ;;  %v11951_v8 = vpack.c.bf16 %v3006_v1, %v2990_v0  ;;  %v3010_v47 = vld [vmem:[%s16914_s9 + $0x3e0] sm:$0xff]  ;;  %v3012_v57 = vld [vmem:[%s16914_s9 + $0x3f0] sm:$0xff]  ;;  %v3801_v0 = vld [vmem:[%s16916_s11 + $0x188] sm:$0xff] }
0x1232   :  { %v3768_v59 = vld [vmem:[%s16916_s11 + $0x80] sm:$0xff] }
0x1233   :  { %11916 = vmatpush1.bf16.msra.mxu0 %v11915_v6  ;;  %11932 = vmatpush1.bf16.msra.mxu1 %v11931_v7  ;;  %v2915_v6 = vld [vmem:[%s16914_s9 + $0xe8] sm:$0xff]  ;;  %v2901_v7 = vld [vmem:[%s16914_s9 + $0x78] sm:$0xff] }
0x1234   :  { %11918 = vmatprep.subr.bf16.mxu0 %v11917_v9  ;;  %11934 = vmatprep.subr.bf16.mxu1 %v11933_v10  ;;  %v11967_v9 = vpack.c.bf16 %v3008_v4, %v2992_v3  ;;  %v2898_v10 = vld [vmem:[%s16914_s9 + $0x60] sm:$0xff]  ;;  %v11969_v11 = vpack.c.bf16 %v2915_v6, %v2899_v5  ;;  %v11985_v58 = vpack.c.bf16 %v2917_v50, %v2901_v7  ;;  %v3753_v5 = vld [vmem:[%s16916_s11 + $0x8] sm:$0xff]  ;;  %v3770_v50 = vld [vmem:[%s16916_s11 + $0x90] sm:$0xff] }
0x1235   :  { %v3752_v4 = vld [vmem:[%s16916_s11] sm:$0xff]  ;;  %v3785_v7 = vld [vmem:[%s16916_s11 + $0x108] sm:$0xff] }
0x1236   :  { %v3784_v6 = vld [vmem:[%s16916_s11 + $0x100] sm:$0xff] }
0x1237   :  { %11920 = vmatpush1.bf16.msra.mxu0 %v11919_v16  ;;  %11936 = vmatpush1.bf16.msra.mxu1 %v11935_v17  ;;  %v2947_v16 = vld [vmem:[%s16914_s9 + $0x1e8] sm:$0xff]  ;;  %v2933_v17 = vld [vmem:[%s16914_s9 + $0x178] sm:$0xff] }
0x1238   :  { %11938 = vmatprep.subr.bf16.mxu0 %v11937_v19  ;;  %11954 = vmatprep.subr.bf16.mxu1 %v11953_v20  ;;  %v11971_v19 = vpack.c.bf16 %v2914_v12, %v2898_v10  ;;  %v11987_v20 = vpack.c.bf16 %v2916_v37, %v2900_v15  ;;  %v11973_v26 = vpack.c.bf16 %v2947_v16, %v2931_v38  ;;  %v3803_v10 = vld [vmem:[%s16916_s11 + $0x198] sm:$0xff]  ;;  %v3754_v12 = vld [vmem:[%s16916_s11 + $0x10] sm:$0xff] }
0x1239   :  { %v11989_v27 = vpack.c.bf16 %v2949_v18, %v2933_v17  ;;  %v3755_v15 = vld [vmem:[%s16916_s11 + $0x18] sm:$0xff]  ;;  %v3786_v16 = vld [vmem:[%s16916_s11 + $0x110] sm:$0xff]  ;;  %v3772_v18 = vld [vmem:[%s16916_s11 + $0xa0] sm:$0xff] }
0x123a   :  { %9425 = vmatmul.mubr.msk.f32.vlgmr.msra.gmra.mrb[28].mxu0 %vm155_vm1, %v13759_v40  ;;  %9427 = vmatmul.mubr.msk.f32.vlgmr.msra.gmra.mrb[40].mxu1 %vm155_vm1, %v13759_v40  ;;  %v3787_v17 = vld [vmem:[%s16916_s11 + $0x118] sm:$0xff]  ;;  %v12007_v22 = vpack.c.bf16 %v3755_v15, %v3754_v12  ;;  %v3813_v12 = vld [vmem:[%s16916_s11 + $0x1e8] sm:$0xff] }
0x123b   :  { %11940 = vmatpush1.bf16.msra.mxu0 %v11939_v28  ;;  %11956 = vmatpush1.bf16.msra.mxu1 %v11955_v29  ;;  %v2979_v28 = vld [vmem:[%s16914_s9 + $0x2e8] sm:$0xff]  ;;  %v2965_v29 = vld [vmem:[%s16914_s9 + $0x278] sm:$0xff]  ;;  %v12039_v23 = vpack.c.bf16 %v3787_v17, %v3786_v16 }
0x123c   :  { %3328 = vmatprep.mubr.f32.mxu0 %v12987_v46  ;;  %3405 = vmatprep.mubr.f32.mxu1 %v12987_v46 }
0x123d   :  { %11942 = vmatprep.subr.bf16.mxu0 %v11941_v32  ;;  %11958 = vmatprep.subr.bf16.mxu1 %v11957_v33  ;;  %v11977_v32 = vpack.c.bf16 %v2979_v28, %v2963_v25  ;;  %v11993_v33 = vpack.c.bf16 %v2981_v30, %v2965_v29  ;;  %v3757_v25 = vld [vmem:[%s16916_s11 + $0x28] sm:$0xff]  ;;  %v3788_v28 = vld [vmem:[%s16916_s11 + $0x120] sm:$0xff]  ;;  %v3774_v30 = vld [vmem:[%s16916_s11 + $0xb0] sm:$0xff] }
0x123e   :  { %9426 = vmatmul.mubr.msk.f32.gmra.mrb[30].mxu0 %vm155_vm1, %v13789_v61  ;;  %9428 = vmatmul.mubr.msk.f32.gmra.mrb[42].mxu1 %vm155_vm1, %v13789_v61  ;;  %v3789_v29 = vld [vmem:[%s16916_s11 + $0x128] sm:$0xff]  ;;  %v12011_v14 = vpack.c.bf16 %v3757_v25, %v3756_v24  ;;  %v3783_v24 = vld [vmem:[%s16916_s11 + $0xf8] sm:$0xff]  ;;  %v3814_v25 = vld [vmem:[%s16916_s11 + $0x1f0] sm:$0xff] }
0x123f   :  { %11944 = vmatpush1.bf16.msra.mxu0 %v11943_v39  ;;  %11960 = vmatpush1.bf16.msra.mxu1 %v11959_v41  ;;  %v3011_v39 = vld [vmem:[%s16914_s9 + $0x3e8] sm:$0xff]  ;;  %v2997_v41 = vld [vmem:[%s16914_s9 + $0x378] sm:$0xff] }
0x1240   :  { %11946 = vmatprep.subr.bf16.mxu0 %v11945_v44  ;;  %11962 = vmatprep.subr.bf16.mxu1 %v11961_v45  ;;  %v11995_v44 = vpack.c.bf16 %v2980_v35, %v2964_v34  ;;  %v2994_v45 = vld [vmem:[%s16914_s9 + $0x360] sm:$0xff]  ;;  %v11981_v54 = vpack.c.bf16 %v3011_v39, %v2995_v36  ;;  %v11997_v55 = vpack.c.bf16 %v3013_v42, %v2997_v41  ;;  %v3759_v34 = vld [vmem:[%s16916_s11 + $0x38] sm:$0xff]  ;;  %v3790_v39 = vld [vmem:[%s16916_s11 + $0x130] sm:$0xff] }
0x1241   :  { %3476 = vmatprep.mubr.f32.mxu0 %v12987_v46  ;;  %3553 = vmatprep.mubr.f32.mxu1 %v12987_v46  ;;  %v11983_v1 = vpack.c.bf16 %v3010_v47, %v2994_v45  ;;  %v3791_v41 = vld [vmem:[%s16916_s11 + $0x138] sm:$0xff]  ;;  %v3776_v42 = vld [vmem:[%s16916_s11 + $0xc0] sm:$0xff]  ;;  %v3809_v45 = vld [vmem:[%s16916_s11 + $0x1c8] sm:$0xff] }
0x1243   :  { %11948 = vmatpush1.bf16.msra.mxu0 %v11947_v60  ;;  %11964 = vmatpush1.bf16.msra.mxu1 %v11963_v63  ;;  %v3769_v60 = vld [vmem:[%s16916_s11 + $0x88] sm:$0xff]  ;;  %v3800_v63 = vld [vmem:[%s16916_s11 + $0x180] sm:$0xff] }
0x1244   :  { %11950 = vmatprep.subr.bf16.mxu0 %v11949_v2  ;;  %11966 = vmatprep.subr.bf16.mxu1 %v11965_v53  ;;  %v11999_v2 = vpack.c.bf16 %v3012_v57, %v2996_v56  ;;  %v12001_v53 = vpack.c.bf16 %v3769_v60, %v3768_v59  ;;  %v12033_v3 = vpack.c.bf16 %v3801_v0, %v3800_v63  ;;  %v3761_v56 = vld [vmem:[%s16916_s11 + $0x48] sm:$0xff]  ;;  %v3792_v60 = vld [vmem:[%s16916_s11 + $0x140] sm:$0xff]  ;;  %v3778_v0 = vld [vmem:[%s16916_s11 + $0xd0] sm:$0xff] }
0x1245   :  { %v3793_v63 = vld [vmem:[%s16916_s11 + $0x148] sm:$0xff] }
0x1247   :  { %11952 = vmatpush1.bf16.msra.mxu0 %v11951_v8  ;;  %11968 = vmatpush1.bf16.msra.mxu1 %v11967_v9  ;;  %v3771_v8 = vld [vmem:[%s16916_s11 + $0x98] sm:$0xff]  ;;  %v3802_v9 = vld [vmem:[%s16916_s11 + $0x190] sm:$0xff] }
0x1248   :  { %11970 = vmatprep.subr.bf16.mxu0 %v11969_v11  ;;  %11986 = vmatprep.subr.bf16.mxu1 %v11985_v58  ;;  %v12003_v11 = vpack.c.bf16 %v3753_v5, %v3752_v4  ;;  %v12035_v58 = vpack.c.bf16 %v3785_v7, %v3784_v6  ;;  %v12005_v37 = vpack.c.bf16 %v3771_v8, %v3770_v50  ;;  %v3762_v5 = vld [vmem:[%s16916_s11 + $0x50] sm:$0xff]  ;;  %v3763_v6 = vld [vmem:[%s16916_s11 + $0x58] sm:$0xff] }
0x1249   :  { %v12037_v38 = vpack.c.bf16 %v3803_v10, %v3802_v9  ;;  %v12051_v4 = vpack.c.bf16 %v3793_v63, %v3792_v60  ;;  %v3794_v8 = vld [vmem:[%s16916_s11 + $0x150] sm:$0xff]  ;;  %v3795_v9 = vld [vmem:[%s16916_s11 + $0x158] sm:$0xff]  ;;  %v3780_v10 = vld [vmem:[%s16916_s11 + $0xe0] sm:$0xff]  ;;  %v12023_v15 = vpack.c.bf16 %v3763_v6, %v3762_v5 }
0x124a   :  { %9429 = vmatmul.mubr.msk.f32.vlgmr.msra.gmra.mrb[32].mxu0 %vm155_vm1, %v13759_v40  ;;  %9431 = vmatmul.mubr.msk.f32.vlgmr.msra.gmra.mrb[44].mxu1 %vm155_vm1, %v13759_v40  ;;  %v3849_v60 = vld [vmem:[%s16916_s11 + $0x308] sm:$0xff]  ;;  %v3834_v63 = vld [vmem:[%s16916_s11 + $0x290] sm:$0xff]  ;;  %v3867_v5 = vld [vmem:[%s16916_s11 + $0x398] sm:$0xff] }
0x124b   :  { %11972 = vmatpush1.bf16.msra.mxu0 %v11971_v19  ;;  %11988 = vmatpush1.bf16.msra.mxu1 %v11987_v20  ;;  %v3773_v19 = vld [vmem:[%s16916_s11 + $0xa8] sm:$0xff]  ;;  %v3804_v20 = vld [vmem:[%s16916_s11 + $0x1a0] sm:$0xff] }
0x124c   :  { %3482 = vmatprep.mubr.f32.mxu0 %v12987_v46  ;;  %3559 = vmatprep.mubr.f32.mxu1 %v12987_v46 }
0x124d   :  { %11974 = vmatprep.subr.bf16.mxu0 %v11973_v26  ;;  %11990 = vmatprep.subr.bf16.mxu1 %v11989_v27  ;;  %v12009_v26 = vpack.c.bf16 %v3773_v19, %v3772_v18  ;;  %v12041_v27 = vpack.c.bf16 %v3805_v21, %v3804_v20  ;;  %v3765_v18 = vld [vmem:[%s16916_s11 + $0x68] sm:$0xff]  ;;  %v3796_v19 = vld [vmem:[%s16916_s11 + $0x160] sm:$0xff] }
0x124e   :  { %9430 = vmatmul.mubr.msk.f32.gmra.mrb[34].mxu0 %vm155_vm1, %v13789_v61  ;;  %9432 = vmatmul.mubr.msk.f32.gmra.mrb[46].mxu1 %vm155_vm1, %v13789_v61  ;;  %v3797_v20 = vld [vmem:[%s16916_s11 + $0x168] sm:$0xff] }
0x124f   :  { %11976 = vmatpush1.bf16.msra.mxu0 %v11975_v52  ;;  %11992 = vmatpush1.bf16.msra.mxu1 %v11991_v31  ;;  %v3775_v52 = vld [vmem:[%s16916_s11 + $0xb8] sm:$0xff]  ;;  %v3806_v31 = vld [vmem:[%s16916_s11 + $0x1b0] sm:$0xff] }
0x1250   :  { %11978 = vmatprep.subr.bf16.mxu0 %v11977_v32  ;;  %11994 = vmatprep.subr.bf16.mxu1 %v11993_v33  ;;  %v12043_v32 = vpack.c.bf16 %v3789_v29, %v3788_v28  ;;  %v3758_v33 = vld [vmem:[%s16916_s11 + $0x30] sm:$0xff]  ;;  %v12013_v35 = vpack.c.bf16 %v3775_v52, %v3774_v30  ;;  %v12045_v36 = vpack.c.bf16 %v3807_v13, %v3806_v31  ;;  %v3767_v29 = vld [vmem:[%s16916_s11 + $0x78] sm:$0xff] }
0x1251   :  { %3630 = vmatprep.mubr.f32.mxu0 %v12987_v46  ;;  %3707 = vmatprep.mubr.f32.mxu1 %v12987_v46  ;;  %v12015_v47 = vpack.c.bf16 %v3759_v34, %v3758_v33  ;;  %v3766_v28 = vld [vmem:[%s16916_s11 + $0x70] sm:$0xff]  ;;  %v3799_v13 = vld [vmem:[%s16916_s11 + $0x178] sm:$0xff]  ;;  %v3833_v33 = vld [vmem:[%s16916_s11 + $0x288] sm:$0xff] }
0x1252   :  { %v12031_v52 = vpack.c.bf16 %v3767_v29, %v3766_v28  ;;  %v3798_v31 = vld [vmem:[%s16916_s11 + $0x170] sm:$0xff]  ;;  %v3864_v34 = vld [vmem:[%s16916_s11 + $0x380] sm:$0xff]  ;;  %v3869_v29 = vld [vmem:[%s16916_s11 + $0x3a8] sm:$0xff] }
0x1253   :  { %11980 = vmatpush1.bf16.msra.mxu0 %v11979_v43  ;;  %11996 = vmatpush1.bf16.msra.mxu1 %v11995_v44  ;;  %v3777_v43 = vld [vmem:[%s16916_s11 + $0xc8] sm:$0xff]  ;;  %v3808_v44 = vld [vmem:[%s16916_s11 + $0x1c0] sm:$0xff] }
0x1254   :  { %11982 = vmatprep.subr.bf16.mxu0 %v11981_v54  ;;  %11998 = vmatprep.subr.bf16.mxu1 %v11997_v55  ;;  %v12047_v54 = vpack.c.bf16 %v3791_v41, %v3790_v39  ;;  %v3760_v55 = vld [vmem:[%s16916_s11 + $0x40] sm:$0xff]  ;;  %v12017_v57 = vpack.c.bf16 %v3777_v43, %v3776_v42  ;;  %v12049_v59 = vpack.c.bf16 %v3809_v45, %v3808_v44  ;;  %v14265_v42 = vsub.s32 3, %v13174_v48 }
0x1255   :  { %v14262_v41 = vld [vmem:[%s16915_s10] sm:$0xff] }
0x1256   :  { %v3021_v43 = vrot.slane %v14262_v41, %v13183_v51  ;;  %v3029_v44 = vrot.slane %v14262_v41, %v13194_v62  ;;  %v3025_v45 = vrot.slane %v14262_v41, %v13177_v49  ;;  %v3868_v28 = vld [vmem:[%s16916_s11 + $0x3a0] sm:$0xff] }
0x1257   :  { %11984 = vmatpush1.bf16.msra.mxu0 %v11983_v1  ;;  %12000 = vmatpush1.bf16.msra.mxu1 %v11999_v2  ;;  %v3779_v1 = vld [vmem:[%s16916_s11 + $0xd8] sm:$0xff]  ;;  %v3810_v2 = vld [vmem:[%s16916_s11 + $0x1d0] sm:$0xff] }
0x1258   :  { %12002 = vmatprep.subr.bf16.mxu0 %v12001_v53  ;;  %12034 = vmatprep.subr.bf16.mxu1 %v12033_v3  ;;  %v3811_v53 = vld [vmem:[%s16916_s11 + $0x1d8] sm:$0xff]  ;;  %v12019_v3 = vpack.c.bf16 %v3761_v56, %v3760_v55  ;;  %v12021_v7 = vpack.c.bf16 %v3779_v1, %v3778_v0  ;;  %v3817_v55 = vld [vmem:[%s16916_s11 + $0x208] sm:$0xff] }
0x1259   :  { %v12053_v50 = vpack.c.bf16 %v3811_v53, %v3810_v2 }
0x125a   :  { %9433 = vmatmul.mubr.msk.f32.vlgmr.msra.gmra.mrb[36].mxu0 %vm155_vm1, %v13759_v40  ;;  %9435 = vmatmul.mubr.msk.f32.vlgmr.msra.gmra.mrb[48].mxu1 %vm155_vm1, %v13759_v40 }
0x125b   :  { %3636 = vmatprep.mubr.f32.mxu0 %v12987_v46  ;;  %3713 = vmatprep.mubr.f32.mxu1 %v12987_v46 }
0x125c   :  { %12004 = vmatpush3.bf16.msra.mxu0 %v12003_v11  ;;  %12036 = vmatpush3.bf16.msra.mxu1 %v12035_v58  ;;  %v3781_v11 = vld [vmem:[%s16916_s11 + $0xe8] sm:$0xff]  ;;  %v3812_v58 = vld [vmem:[%s16916_s11 + $0x1e0] sm:$0xff] }
0x125d   :  { %12006 = vmatprep.subr.bf16.mxu0 %v12005_v37  ;;  %12038 = vmatprep.subr.bf16.mxu1 %v12037_v38  ;;  %v12055_v37 = vpack.c.bf16 %v3795_v9, %v3794_v8  ;;  %v3764_v38 = vld [vmem:[%s16916_s11 + $0x60] sm:$0xff]  ;;  %v12025_v16 = vpack.c.bf16 %v3781_v11, %v3780_v10  ;;  %v12057_v17 = vpack.c.bf16 %v3813_v12, %v3812_v58  ;;  %v3818_v9 = vld [vmem:[%s16916_s11 + $0x210] sm:$0xff] }
0x125e   :  { %9434 = vmatmul.mubr.msk.f32.gmra.mrb[38].mxu0 %vm155_vm1, %v13789_v61  ;;  %9436 = vmatmul.mubr.msk.f32.gmra.mrb[50].mxu1 %vm155_vm1, %v13789_v61  ;;  %v12027_v21 = vpack.c.bf16 %v3765_v18, %v3764_v38  ;;  %v3819_v38 = vld [vmem:[%s16916_s11 + $0x218] sm:$0xff] }
0x1260   :  { %12008 = vmatpush3.bf16.msra.mxu0 %v12007_v22  ;;  %12040 = vmatpush3.bf16.msra.mxu1 %v12039_v23  ;;  %v12059_v22 = vpack.c.bf16 %v3797_v20, %v3796_v19  ;;  %v3782_v23 = vld [vmem:[%s16916_s11 + $0xf0] sm:$0xff] }
0x1261   :  { %12010 = vmatprep.subr.bf16.mxu0 %v12009_v26  ;;  %12042 = vmatprep.subr.bf16.mxu1 %v12041_v27  ;;  %v12029_v26 = vpack.c.bf16 %v3783_v24, %v3782_v23  ;;  %v3815_v27 = vld [vmem:[%s16916_s11 + $0x1f8] sm:$0xff]  ;;  %v3836_v24 = vld [vmem:[%s16916_s11 + $0x2a0] sm:$0xff] }
0x1262   :  { %v12061_v30 = vpack.c.bf16 %v3815_v27, %v3814_v25  ;;  %v3851_v23 = vld [vmem:[%s16916_s11 + $0x318] sm:$0xff]  ;;  %v3837_v27 = vld [vmem:[%s16916_s11 + $0x2a8] sm:$0xff] }
0x1264   :  { %12012 = vmatpush3.bf16.msra.mxu0 %v12011_v14  ;;  %12044 = vmatpush3.bf16.msra.mxu1 %v12043_v32  ;;  %v12063_v14 = vpack.c.bf16 %v3799_v13, %v3798_v31  ;;  %v3832_v32 = vld [vmem:[%s16916_s11 + $0x280] sm:$0xff]  ;;  %v12071_v31 = vpack.c.bf16 %v3819_v38, %v3818_v9 }
0x1265   :  { %12014 = vmatprep.subr.bf16.mxu0 %v12013_v35  ;;  %12046 = vmatprep.subr.bf16.mxu1 %v12045_v36  ;;  %v12065_v35 = vpack.c.bf16 %v3833_v33, %v3832_v32  ;;  %v3865_v36 = vld [vmem:[%s16916_s11 + $0x388] sm:$0xff] }
0x1266   :  { %v12097_v39 = vpack.c.bf16 %v3865_v36, %v3864_v34  ;;  %v3821_v32 = vld [vmem:[%s16916_s11 + $0x228] sm:$0xff]  ;;  %v12105_v36 = vpack.c.bf16 %v3869_v29, %v3868_v28 }
0x1268   :  { %12016 = vmatpush3.bf16.msra.mxu0 %v12015_v47  ;;  %12048 = vmatpush3.bf16.msra.mxu1 %v12047_v54  ;;  %v3033_v47 = vrot.slane %v14262_v41, %v14265_v42  ;;  %v3816_v54 = vld [vmem:[%s16916_s11 + $0x200] sm:$0xff] }
0x1269   :  { %12018 = vmatprep.subr.bf16.mxu0 %v12017_v57  ;;  %12050 = vmatprep.subr.bf16.mxu1 %v12049_v59  ;;  %v3848_v59 = vld [vmem:[%s16916_s11 + $0x300] sm:$0xff] }
0x126a   :  { %v12099_v8 = vpack.c.bf16 %v3849_v60, %v3848_v59  ;;  %v3822_v60 = vld [vmem:[%s16916_s11 + $0x230] sm:$0xff] }
0x126c   :  { %12020 = vmatpush3.bf16.msra.mxu0 %v12019_v3  ;;  %12052 = vmatpush3.bf16.msra.mxu1 %v12051_v4  ;;  %v3835_v3 = vld [vmem:[%s16916_s11 + $0x298] sm:$0xff]  ;;  %v3866_v4 = vld [vmem:[%s16916_s11 + $0x390] sm:$0xff] }
0x126d   :  { %12022 = vmatprep.subr.bf16.mxu0 %v12021_v7  ;;  %12054 = vmatprep.subr.bf16.mxu1 %v12053_v50  ;;  %v12067_v50 = vpack.c.bf16 %v3817_v55, %v3816_v54  ;;  %v3839_v54 = vld [vmem:[%s16916_s11 + $0x2b8] sm:$0xff]  ;;  %v3870_v55 = vld [vmem:[%s16916_s11 + $0x3b0] sm:$0xff] }
0x1270   :  { %12024 = vmatpush3.bf16.msra.mxu0 %v12023_v15  ;;  %12056 = vmatpush3.bf16.msra.mxu1 %v12055_v37  ;;  %v12069_v15 = vpack.c.bf16 %v3835_v3, %v3834_v63  ;;  %v12101_v37 = vpack.c.bf16 %v3867_v5, %v3866_v4  ;;  %v3823_v63 = vld [vmem:[%s16916_s11 + $0x238] sm:$0xff]  ;;  %v3840_v3 = vld [vmem:[%s16916_s11 + $0x2c0] sm:$0xff] }
0x1271   :  { %12026 = vmatprep.subr.bf16.mxu0 %v12025_v16  ;;  %12058 = vmatprep.subr.bf16.mxu1 %v12057_v17  ;;  %v3850_v16 = vld [vmem:[%s16916_s11 + $0x310] sm:$0xff] }
0x1272   :  { %v12103_v13 = vpack.c.bf16 %v3851_v23, %v3850_v16  ;;  %v3874_v23 = vld [vmem:[%s16916_s11 + $0x3d0] sm:$0xff] }
0x1274   :  { %12028 = vmatpush3.bf16.msra.mxu0 %v12027_v21  ;;  %12060 = vmatpush3.bf16.msra.mxu1 %v12059_v22 }
0x1275   :  { %12030 = vmatprep.subr.bf16.mxu0 %v12029_v26  ;;  %12062 = vmatprep.subr.bf16.mxu1 %v12061_v30 }
0x1278   :  { %12032 = vmatpush3.bf16.msra.mxu0 %v12031_v52  ;;  %12064 = vmatpush3.bf16.msra.mxu1 %v12063_v14  ;;  %v3820_v14 = vld [vmem:[%s16916_s11 + $0x220] sm:$0xff] }
0x1279   :  { %12066 = vmatprep.subr.bf16.mxu0 %v12065_v35  ;;  %12098 = vmatprep.subr.bf16.mxu1 %v12097_v39  ;;  %v12073_v35 = vpack.c.bf16 %v3837_v27, %v3836_v24  ;;  %v3852_v39 = vld [vmem:[%s16916_s11 + $0x320] sm:$0xff]  ;;  %v3875_v24 = vld [vmem:[%s16916_s11 + $0x3d8] sm:$0xff] }
0x12fd   :  { %v3170_v56 = vpop.f32.mrb[24].mxu0  ;;  %v3247_v57 = vpop.f32.mrb[36].mxu1 }
0x12fe   :  { %v3171_v0 = vadd.f32 %v3170_v56, %v3021_v43  ;;  %v3248_v1 = vadd.f32 %v3247_v57, %v3029_v44  ;;  %v3172_v2 = vpop.f32.mrb[25].mxu0  ;;  %v3249_v53 = vpop.f32.mrb[37].mxu1  ;;  %v3871_v56 = vld [vmem:[%s16916_s11 + $0x3b8] sm:$0xff]  ;;  %v12075_v57 = vpack.c.bf16 %v3821_v32, %v3820_v14 }
0x12ff   :  { %v3173_v6 = vadd.f32 %v3172_v2, %v3025_v45  ;;  %v3250_v7 = vadd.f32 %v3249_v53, %v3033_v47  ;;  %v3854_v2 = vld [vmem:[%s16916_s11 + $0x330] sm:$0xff]  ;;  %v3855_v53 = vld [vmem:[%s16916_s11 + $0x338] sm:$0xff] }
0x1300   :  { %v3720_v17 = vmax.f32 %v3171_v0, 0.0  ;;  %v3722_v18 = vmax.f32 %v3248_v1, 0.0  ;;  %v12109_v1 = vpack.c.bf16 %v3871_v56, %v3870_v55 }
0x1301   :  { %v3721_v10 = vmax.f32 %v3173_v6, 0.0  ;;  %v3723_v11 = vmax.f32 %v3250_v7, 0.0  ;;  %v3176_v58 = vpop.f32.mrb[26].mxu0  ;;  %v3253_v12 = vpop.f32.mrb[38].mxu1  ;;  %v3841_v6 = vld [vmem:[%s16916_s11 + $0x2c8] sm:$0xff]  ;;  %v3872_v7 = vld [vmem:[%s16916_s11 + $0x3c0] sm:$0xff] }
0x1302   :  { %v3177_v19 = vadd.f32 %v3176_v58, %v3021_v43  ;;  %v3254_v20 = vadd.f32 %v3253_v12, %v3029_v44  ;;  %v3178_v21 = vpop.f32.mrb[27].mxu0  ;;  %v3255_v22 = vpop.f32.mrb[39].mxu1  ;;  %v3853_v43 = vld [vmem:[%s16916_s11 + $0x328] sm:$0xff]  ;;  %v3838_v44 = vld [vmem:[%s16916_s11 + $0x2b0] sm:$0xff]  ;;  %v3824_v58 = vld [vmem:[%s16916_s11 + $0x240] sm:$0xff]  ;;  %v12081_v38 = vpack.c.bf16 %v3841_v6, %v3840_v3 }
0x1303   :  { %v3179_v25 = vadd.f32 %v3178_v21, %v3025_v45  ;;  %v3256_v26 = vadd.f32 %v3255_v22, %v3033_v47  ;;  %4076 = vmatprep.mubr.f32.mxu0 %v3721_v10  ;;  %4151 = vmatprep.mubr.f32.mxu1 %v3723_v11  ;;  %v14339_v45 = vsub.s32 5, %v13174_v48  ;;  %v14342_v47 = vsub.s32 7, %v13174_v48  ;;  %v3825_v12 = vld [vmem:[%s16916_s11 + $0x248] sm:$0xff]  ;;  %v3843_v22 = vld [vmem:[%s16916_s11 + $0x2d8] sm:$0xff]  ;;  %v3878_v3 = vld [vmem:[%s16916_s11 + $0x3f0] sm:$0xff] }
0x1304   :  { %4077 = vmatmul.mubr.f32.vlgmr.msra.gmra.mrb[40].mxu0 %v3720_v17  ;;  %4152 = vmatmul.mubr.f32.vlgmr.msra.gmra.mrb[52].mxu1 %v3722_v18  ;;  %v3736_v33 = vmax.f32 %v3177_v19, 0.0  ;;  %v3738_v34 = vmax.f32 %v3254_v20, 0.0  ;;  %v12107_v59 = vpack.c.bf16 %v3853_v43, %v3852_v39  ;;  %v12077_v0 = vpack.c.bf16 %v3839_v54, %v3838_v44  ;;  %v3856_v17 = vld [vmem:[%s16916_s11 + $0x340] sm:$0xff]  ;;  %v3857_v18 = vld [vmem:[%s16916_s11 + $0x348] sm:$0xff]  ;;  %v3842_v19 = vld [vmem:[%s16916_s11 + $0x2d0] sm:$0xff] }
0x1305   :  { %v3737_v30 = vmax.f32 %v3179_v25, 0.0  ;;  %v3739_v52 = vmax.f32 %v3256_v26, 0.0  ;;  %12068 = vmatpush3.bf16.msra.mxu0 %v12067_v50  ;;  %12100 = vmatpush3.bf16.msra.mxu1 %v12099_v8  ;;  %v14370_v4 = vrot.slane %v14262_v41, %v14339_v45  ;;  %v14374_v5 = vrot.slane %v14262_v41, %v14342_v47  ;;  %v3873_v50 = vld [vmem:[%s16916_s11 + $0x3c8] sm:$0xff]  ;;  %v3876_v43 = vld [vmem:[%s16916_s11 + $0x3e0] sm:$0xff]  ;;  %v3879_v6 = vld [vmem:[%s16916_s11 + $0x3f8] sm:$0xff] }
0x1306   :  { %12070 = vmatprep.subr.bf16.mxu0 %v12069_v15  ;;  %12102 = vmatprep.subr.bf16.mxu1 %v12101_v37  ;;  %v12079_v10 = vpack.c.bf16 %v3823_v63, %v3822_v60  ;;  %v12111_v11 = vpack.c.bf16 %v3855_v53, %v3854_v2  ;;  %v12113_v16 = vpack.c.bf16 %v3873_v50, %v3872_v7  ;;  %v3845_v39 = vld [vmem:[%s16916_s11 + $0x2e8] sm:$0xff]  ;;  %v14448_v54 = vsub.s32 4, %v13174_v48  ;;  %v3846_v53 = vld [vmem:[%s16916_s11 + $0x2f0] sm:$0xff] }
0x1307   :  { %4081 = vmatprep.mubr.f32.mxu0 %v3737_v30  ;;  %4156 = vmatprep.mubr.f32.mxu1 %v3739_v52  ;;  %v12083_v29 = vpack.c.bf16 %v3825_v12, %v3824_v58  ;;  %v12115_v30 = vpack.c.bf16 %v3857_v18, %v3856_v17  ;;  %v3826_v52 = vld [vmem:[%s16916_s11 + $0x250] sm:$0xff]  ;;  %v12085_v32 = vpack.c.bf16 %v3843_v22, %v3842_v19  ;;  %v3877_v44 = vld [vmem:[%s16916_s11 + $0x3e8] sm:$0xff]  ;;  %v14457_v60 = vsub.s32 6, %v13174_v48  ;;  %v3847_v48 = vld [vmem:[%s16916_s11 + $0x2f8] sm:$0xff] }
0x1308   :  { %4082 = vmatmul.mubr.f32.gmra.mrb[42].mxu0 %v3736_v33  ;;  %4157 = vmatmul.mubr.f32.gmra.mrb[54].mxu1 %v3738_v34  ;;  %v12117_v33 = vpack.c.bf16 %v3875_v24, %v3874_v23  ;;  %v3858_v34 = vld [vmem:[%s16916_s11 + $0x350] sm:$0xff]  ;;  %v3861_v2 = vld [vmem:[%s16916_s11 + $0x368] sm:$0xff]  ;;  %v3037_v7 = vrot.slane %v14262_v41, %v14448_v54  ;;  %v3831_v58 = vld [vmem:[%s16916_s11 + $0x278] sm:$0xff] }
0x1309   :  { %12072 = vmatpush3.bf16.msra.mxu0 %v12071_v31  ;;  %12104 = vmatpush3.bf16.msra.mxu1 %v12103_v13  ;;  %v3827_v31 = vld [vmem:[%s16916_s11 + $0x258] sm:$0xff]  ;;  %v3862_v12 = vld [vmem:[%s16916_s11 + $0x370] sm:$0xff]  ;;  %v3896_v17 = vld [vmem:[%s16916_s11 + $0x480] sm:$0xff] }
0x130a   :  { %12074 = vmatprep.subr.bf16.mxu0 %v12073_v35  ;;  %12106 = vmatprep.subr.bf16.mxu1 %v12105_v36  ;;  %v3859_v35 = vld [vmem:[%s16916_s11 + $0x358] sm:$0xff]  ;;  %v3844_v36 = vld [vmem:[%s16916_s11 + $0x2e0] sm:$0xff]  ;;  %v12087_v55 = vpack.c.bf16 %v3827_v31, %v3826_v52  ;;  %v3897_v18 = vld [vmem:[%s16916_s11 + $0x488] sm:$0xff] }
0x130b   :  { %v12119_v56 = vpack.c.bf16 %v3859_v35, %v3858_v34  ;;  %v12089_v63 = vpack.c.bf16 %v3845_v39, %v3844_v36  ;;  %v3929_v19 = vld [vmem:[%s16916_s11 + $0x588] sm:$0xff]  ;;  %v3898_v31 = vld [vmem:[%s16916_s11 + $0x490] sm:$0xff]  ;;  %v3899_v39 = vld [vmem:[%s16916_s11 + $0x498] sm:$0xff] }
0x130c   :  { %v3881_v22 = vld [vmem:[%s16916_s11 + $0x408] sm:$0xff] }
0x130d   :  { %v14385_v8 = vpop.f32.mrb[28].mxu0  ;;  %v14387_v9 = vpop.f32.mrb[40].mxu1  ;;  %12076 = vmatpush3.bf16.msra.mxu0 %v12075_v57  ;;  %12108 = vmatpush3.bf16.msra.mxu1 %v12107_v59  ;;  %v3828_v57 = vld [vmem:[%s16916_s11 + $0x260] sm:$0xff]  ;;  %v3829_v59 = vld [vmem:[%s16916_s11 + $0x268] sm:$0xff] }
0x130e   :  { %v3326_v15 = vpop.f32.mrb[29].mxu0  ;;  %v3403_v37 = vpop.f32.mrb[41].mxu1  ;;  %12078 = vmatprep.subr.bf16.mxu0 %v12077_v0  ;;  %12110 = vmatprep.subr.bf16.mxu1 %v12109_v1  ;;  %v12121_v0 = vpack.c.bf16 %v3877_v44, %v3876_v43  ;;  %v3860_v1 = vld [vmem:[%s16916_s11 + $0x360] sm:$0xff]  ;;  %v12091_v50 = vpack.c.bf16 %v3829_v59, %v3828_v57  ;;  %v3913_v52 = vld [vmem:[%s16916_s11 + $0x508] sm:$0xff]  ;;  %v3930_v43 = vld [vmem:[%s16916_s11 + $0x590] sm:$0xff] }
0x130f   :  { %v3327_v20 = vadd.f32 %v3326_v15, %v14370_v4  ;;  %v3404_v21 = vadd.f32 %v3403_v37, %v14374_v5  ;;  %v3045_v15 = vrot.slane %v14262_v41, %v14457_v60  ;;  %v12093_v37 = vpack.c.bf16 %v3847_v48, %v3846_v53  ;;  %v3928_v41 = vld [vmem:[%s16916_s11 + $0x580] sm:$0xff]  ;;  %v3931_v44 = vld [vmem:[%s16916_s11 + $0x598] sm:$0xff] }
0x1310   :  { %v12161_v36 = vpack.c.bf16 %v3929_v19, %v3928_v41  ;;  %v3884_v41 = vld [vmem:[%s16916_s11 + $0x420] sm:$0xff]  ;;  %v3885_v19 = vld [vmem:[%s16916_s11 + $0x428] sm:$0xff] }
0x1311   :  { %v3725_v25 = vmax.f32 %v3327_v20, 0.0  ;;  %v3727_v26 = vmax.f32 %v3404_v21, 0.0  ;;  %v14415_v27 = vpop.f32.mrb[30].mxu0  ;;  %v14417_v28 = vpop.f32.mrb[42].mxu1  ;;  %12080 = vmatpush3.bf16.msra.mxu0 %v12079_v10  ;;  %12112 = vmatpush3.bf16.msra.mxu1 %v12111_v11  ;;  %v12123_v10 = vpack.c.bf16 %v3861_v2, %v3860_v1  ;;  %v3830_v11 = vld [vmem:[%s16916_s11 + $0x270] sm:$0xff]  ;;  %v14508_v20 = vld [vmem:[%s16915_s10 + $0x8] sm:$0xff] }
0x1312   :  { %v14425_v13 = vpop.f32.mrb[31].mxu0  ;;  %v14427_v14 = vpop.f32.mrb[43].mxu1  ;;  %12082 = vmatprep.subr.bf16.mxu0 %v12081_v38  ;;  %12114 = vmatprep.subr.bf16.mxu1 %v12113_v16  ;;  %v12125_v38 = vpack.c.bf16 %v3879_v6, %v3878_v3  ;;  %v3863_v16 = vld [vmem:[%s16916_s11 + $0x378] sm:$0xff]  ;;  %v3880_v21 = vld [vmem:[%s16916_s11 + $0x400] sm:$0xff]  ;;  %v3408_v2 = vadd.f32 %v14417_v28, %v3045_v15  ;;  %v3882_v3 = vld [vmem:[%s16916_s11 + $0x410] sm:$0xff] }
0x1313   :  { %4226 = vmatprep.mubr.f32.mxu0 %v3725_v25  ;;  %4301 = vmatprep.mubr.f32.mxu1 %v3727_v26  ;;  %v12095_v25 = vpack.c.bf16 %v3831_v58, %v3830_v11  ;;  %v12127_v26 = vpack.c.bf16 %v3863_v16, %v3862_v12  ;;  %v12131_v57 = vpack.c.bf16 %v3881_v22, %v3880_v21  ;;  %v3883_v6 = vld [vmem:[%s16916_s11 + $0x418] sm:$0xff]  ;;  %v3900_v58 = vld [vmem:[%s16916_s11 + $0x4a0] sm:$0xff]  ;;  %v3901_v12 = vld [vmem:[%s16916_s11 + $0x4a8] sm:$0xff] }
0x1314   :  { %v3915_v11 = vld [vmem:[%s16916_s11 + $0x518] sm:$0xff]  ;;  %v3742_v16 = vmax.f32 %v3408_v2, 0.0 }
0x1315   :  { %12084 = vmatpush3.bf16.msra.mxu0 %v12083_v29  ;;  %12116 = vmatpush3.bf16.msra.mxu1 %v12115_v30  ;;  %v12129_v29 = vpack.c.bf16 %v3897_v18, %v3896_v17  ;;  %v3912_v30 = vld [vmem:[%s16916_s11 + $0x500] sm:$0xff]  ;;  %v12135_v17 = vpack.c.bf16 %v3883_v6, %v3882_v3 }
0x1316   :  { %12086 = vmatprep.subr.bf16.mxu0 %v12085_v32  ;;  %12118 = vmatprep.subr.bf16.mxu1 %v12117_v33  ;;  %v3325_v32 = vadd.f32 %v14385_v8, %v3037_v7  ;;  %v3402_v33 = vadd.f32 %v14387_v9, %v3045_v15  ;;  %v3333_v8 = vadd.f32 %v14425_v13, %v14370_v4  ;;  %v3932_v15 = vld [vmem:[%s16916_s11 + $0x5a0] sm:$0xff] }
0x1317   :  { %v3410_v9 = vadd.f32 %v14427_v14, %v14374_v5  ;;  %v12133_v4 = vpack.c.bf16 %v3899_v39, %v3898_v31  ;;  %v12165_v13 = vpack.c.bf16 %v3931_v44, %v3930_v43  ;;  %v3331_v14 = vadd.f32 %v14415_v27, %v3037_v7  ;;  %v3914_v7 = vld [vmem:[%s16916_s11 + $0x510] sm:$0xff]  ;;  %v3903_v31 = vld [vmem:[%s16916_s11 + $0x4b8] sm:$0xff] }
0x1318   :  { %v3724_v1 = vmax.f32 %v3325_v32, 0.0  ;;  %v3726_v5 = vmax.f32 %v3402_v33, 0.0  ;;  %v12167_v18 = vpack.c.bf16 %v3915_v11, %v3914_v7  ;;  %v3934_v32 = vld [vmem:[%s16916_s11 + $0x5b0] sm:$0xff]  ;;  %v3935_v33 = vld [vmem:[%s16916_s11 + $0x5b8] sm:$0xff]  ;;  %v3920_v7 = vld [vmem:[%s16916_s11 + $0x540] sm:$0xff] }
0x1319   :  { %12088 = vmatpush3.bf16.msra.mxu0 %v12087_v55  ;;  %12120 = vmatpush3.bf16.msra.mxu1 %v12119_v56  ;;  %v14546_v55 = vrot.slane %v14508_v20, %v13177_v49  ;;  %v14550_v56 = vrot.slane %v14508_v20, %v14265_v42  ;;  %v3887_v39 = vld [vmem:[%s16916_s11 + $0x438] sm:$0xff]  ;;  %v12173_v44 = vpack.c.bf16 %v3935_v33, %v3934_v32  ;;  %v3921_v11 = vld [vmem:[%s16916_s11 + $0x548] sm:$0xff]  ;;  %v3940_v32 = vld [vmem:[%s16916_s11 + $0x5e0] sm:$0xff] }
0x131a   :  { %12090 = vmatprep.subr.bf16.mxu0 %v12089_v63  ;;  %12122 = vmatprep.subr.bf16.mxu1 %v12121_v0  ;;  %v12163_v0 = vpack.c.bf16 %v3913_v52, %v3912_v30  ;;  %v3917_v30 = vld [vmem:[%s16916_s11 + $0x528] sm:$0xff]  ;;  %v3902_v52 = vld [vmem:[%s16916_s11 + $0x4b0] sm:$0xff] }
0x131b   :  { %v12141_v43 = vpack.c.bf16 %v3903_v31, %v3902_v52  ;;  %v3908_v52 = vld [vmem:[%s16916_s11 + $0x4e0] sm:$0xff]  ;;  %v3909_v31 = vld [vmem:[%s16916_s11 + $0x4e8] sm:$0xff] }
0x131c   :  { %v3941_v33 = vld [vmem:[%s16916_s11 + $0x5e8] sm:$0xff] }
0x131d   :  { %v14516_v23 = vpop.f32.mrb[32].mxu0  ;;  %v14518_v24 = vpop.f32.mrb[44].mxu1  ;;  %12092 = vmatpush3.bf16.msra.mxu0 %v12091_v50  ;;  %12124 = vmatpush3.bf16.msra.mxu1 %v12123_v10  ;;  %v3741_v50 = vmax.f32 %v3333_v8, 0.0  ;;  %v3743_v10 = vmax.f32 %v3410_v9, 0.0  ;;  %v3918_v8 = vld [vmem:[%s16916_s11 + $0x530] sm:$0xff]  ;;  %v3919_v9 = vld [vmem:[%s16916_s11 + $0x538] sm:$0xff] }
0x131e   :  { %v3480_v34 = vpop.f32.mrb[33].mxu0  ;;  %v3557_v35 = vpop.f32.mrb[45].mxu1  ;;  %12094 = vmatprep.subr.bf16.mxu0 %v12093_v37  ;;  %12126 = vmatprep.subr.bf16.mxu1 %v12125_v38  ;;  %v3933_v37 = vld [vmem:[%s16916_s11 + $0x5a8] sm:$0xff]  ;;  %v3740_v38 = vmax.f32 %v3331_v14, 0.0  ;;  %v12175_v6 = vpack.c.bf16 %v3919_v9, %v3918_v8  ;;  %v3924_v8 = vld [vmem:[%s16916_s11 + $0x560] sm:$0xff] }
0x131f   :  { %v3481_v27 = vadd.f32 %v3480_v34, %v14546_v55  ;;  %v3558_v28 = vadd.f32 %v3557_v35, %v14550_v56  ;;  %v12139_v34 = vpack.c.bf16 %v3885_v19, %v3884_v41  ;;  %v12179_v19 = vpack.c.bf16 %v3921_v11, %v3920_v7  ;;  %v3925_v9 = vld [vmem:[%s16916_s11 + $0x568] sm:$0xff] }
0x1320   :  { %v3061_v7 = vrot.slane %v14508_v20, %v13194_v62 }
0x1321   :  { %v14552_v59 = vpop.f32.mrb[34].mxu0  ;;  %v14554_v63 = vpop.f32.mrb[46].mxu1  ;;  %12096 = vmatpush3.bf16.msra.mxu0 %v12095_v25  ;;  %12128 = vmatpush3.bf16.msra.mxu1 %v12127_v26  ;;  %v3729_v21 = vmax.f32 %v3481_v27, 0.0  ;;  %v3731_v22 = vmax.f32 %v3558_v28, 0.0  ;;  %v12137_v25 = vpack.c.bf16 %v3901_v12, %v3900_v58  ;;  %v12169_v26 = vpack.c.bf16 %v3933_v37, %v3932_v15  ;;  %v3906_v58 = vld [vmem:[%s16916_s11 + $0x4d0] sm:$0xff]  ;;  %v3907_v12 = vld [vmem:[%s16916_s11 + $0x4d8] sm:$0xff] }
0x1322   :  { %v14558_v53 = vpop.f32.mrb[35].mxu0  ;;  %v14560_v48 = vpop.f32.mrb[47].mxu1  ;;  %12130 = vmatprep.subr.bf16.mxu0 %v12129_v29  ;;  %12162 = vmatprep.subr.bf16.mxu1 %v12161_v36  ;;  %v3916_v29 = vld [vmem:[%s16916_s11 + $0x520] sm:$0xff]  ;;  %v3886_v36 = vld [vmem:[%s16916_s11 + $0x430] sm:$0xff]  ;;  %v3939_v37 = vld [vmem:[%s16916_s11 + $0x5d8] sm:$0xff] }
0x1323   :  { %v12171_v35 = vpack.c.bf16 %v3917_v30, %v3916_v29  ;;  %v12143_v3 = vpack.c.bf16 %v3887_v39, %v3886_v36  ;;  %v3938_v15 = vld [vmem:[%s16916_s11 + $0x5d0] sm:$0xff]  ;;  %v3923_v30 = vld [vmem:[%s16916_s11 + $0x558] sm:$0xff]  ;;  %v3892_v36 = vld [vmem:[%s16916_s11 + $0x460] sm:$0xff] }
0x1324   :  { %4227 = vmatmul.mubr.f32.vlgmr.msra.gmra.mrb[44].mxu0 %v3724_v1  ;;  %4302 = vmatmul.mubr.f32.vlgmr.msra.gmra.mrb[56].mxu1 %v3726_v5  ;;  %v3922_v29 = vld [vmem:[%s16916_s11 + $0x550] sm:$0xff]  ;;  %v3893_v39 = vld [vmem:[%s16916_s11 + $0x468] sm:$0xff] }
0x1325   :  { %4231 = vmatprep.mubr.f32.mxu0 %v3741_v50  ;;  %4306 = vmatprep.mubr.f32.mxu1 %v3743_v10  ;;  %v3888_v50 = vld [vmem:[%s16916_s11 + $0x440] sm:$0xff]  ;;  %v3889_v10 = vld [vmem:[%s16916_s11 + $0x448] sm:$0xff] }
0x1326   :  { %12132 = vmatpush3.bf16.msra.mxu0 %v12131_v57  ;;  %12164 = vmatpush3.bf16.msra.mxu1 %v12163_v0  ;;  %v3904_v57 = vld [vmem:[%s16916_s11 + $0x4c0] sm:$0xff]  ;;  %v3905_v0 = vld [vmem:[%s16916_s11 + $0x4c8] sm:$0xff]  ;;  %v12147_v41 = vpack.c.bf16 %v3889_v10, %v3888_v50  ;;  %v12187_v50 = vpack.c.bf16 %v3925_v9, %v3924_v8  ;;  %v3894_v10 = vld [vmem:[%s16916_s11 + $0x470] sm:$0xff] }
0x1327   :  { %12134 = vmatprep.subr.bf16.mxu0 %v12133_v4  ;;  %12166 = vmatprep.subr.bf16.mxu1 %v12165_v13  ;;  %v3936_v4 = vld [vmem:[%s16916_s11 + $0x5c0] sm:$0xff]  ;;  %v3937_v13 = vld [vmem:[%s16916_s11 + $0x5c8] sm:$0xff]  ;;  %v12145_v27 = vpack.c.bf16 %v3905_v0, %v3904_v57  ;;  %v3910_v57 = vld [vmem:[%s16916_s11 + $0x4f0] sm:$0xff] }
0x1328   :  { %4232 = vmatmul.mubr.f32.gmra.mrb[46].mxu0 %v3740_v38  ;;  %4307 = vmatmul.mubr.f32.gmra.mrb[58].mxu1 %v3742_v16  ;;  %v12177_v28 = vpack.c.bf16 %v3937_v13, %v3936_v4  ;;  %v3911_v0 = vld [vmem:[%s16916_s11 + $0x4f8] sm:$0xff]  ;;  %v3942_v4 = vld [vmem:[%s16916_s11 + $0x5f0] sm:$0xff] }
0x1329   :  { %4376 = vmatprep.mubr.f32.mxu0 %v3729_v21  ;;  %4451 = vmatprep.mubr.f32.mxu1 %v3731_v22  ;;  %v3890_v21 = vld [vmem:[%s16916_s11 + $0x450] sm:$0xff]  ;;  %v3891_v22 = vld [vmem:[%s16916_s11 + $0x458] sm:$0xff]  ;;  %v12157_v11 = vpack.c.bf16 %v3911_v0, %v3910_v57 }
0x132a   :  { %12136 = vmatpush3.bf16.msra.mxu0 %v12135_v17  ;;  %12168 = vmatpush3.bf16.msra.mxu1 %v12167_v18  ;;  %v3943_v13 = vld [vmem:[%s16916_s11 + $0x5f8] sm:$0xff] }
0x132b   :  { %12138 = vmatprep.subr.bf16.mxu0 %v12137_v25  ;;  %12170 = vmatprep.subr.bf16.mxu1 %v12169_v26  ;;  %v12149_v25 = vpack.c.bf16 %v3907_v12, %v3906_v58  ;;  %v12181_v26 = vpack.c.bf16 %v3939_v37, %v3938_v15  ;;  %v12189_v58 = vpack.c.bf16 %v3943_v13, %v3942_v4  ;;  %v3927_v12 = vld [vmem:[%s16916_s11 + $0x578] sm:$0xff]  ;;  %v3960_v15 = vld [vmem:[%s16916_s11 + $0x680] sm:$0xff]  ;;  %v3961_v37 = vld [vmem:[%s16916_s11 + $0x688] sm:$0xff] }
0x132d   :  { %v14636_v1 = vpop.f32.mrb[36].mxu0  ;;  %v14638_v5 = vpop.f32.mrb[48].mxu1 }
0x132e   :  { %12140 = vmatpush3.bf16.msra.mxu0 %v12139_v34  ;;  %12172 = vmatpush3.bf16.msra.mxu1 %v12171_v35  ;;  %v14640_v14 = vpop.f32.mrb[37].mxu0  ;;  %v14642_v2 = vpop.f32.mrb[49].mxu1  ;;  %v12151_v34 = vpack.c.bf16 %v3891_v22, %v3890_v21  ;;  %v12183_v35 = vpack.c.bf16 %v3923_v30, %v3922_v29  ;;  %v3944_v21 = vld [vmem:[%s16916_s11 + $0x600] sm:$0xff]  ;;  %v3945_v22 = vld [vmem:[%s16916_s11 + $0x608] sm:$0xff]  ;;  %v12193_v29 = vpack.c.bf16 %v3961_v37, %v3960_v15 }
0x132f   :  { %12142 = vmatprep.subr.bf16.mxu0 %v12141_v43  ;;  %12174 = vmatprep.subr.bf16.mxu1 %v12173_v44  ;;  %v12153_v43 = vpack.c.bf16 %v3909_v31, %v3908_v52  ;;  %v12185_v44 = vpack.c.bf16 %v3941_v33, %v3940_v32  ;;  %v3976_v30 = vld [vmem:[%s16916_s11 + $0x700] sm:$0xff]  ;;  %v3977_v52 = vld [vmem:[%s16916_s11 + $0x708] sm:$0xff]  ;;  %v3962_v31 = vld [vmem:[%s16916_s11 + $0x690] sm:$0xff]  ;;  %v3556_v33 = vadd.f32 %v14518_v24, %v3061_v7 }
0x1330   :  { %v3564_v24 = vadd.f32 %v14560_v48, %v14550_v56  ;;  %v12195_v8 = vpack.c.bf16 %v3945_v22, %v3944_v21  ;;  %v12227_v9 = vpack.c.bf16 %v3977_v52, %v3976_v30  ;;  %v3562_v56 = vadd.f32 %v14554_v63, %v3061_v7  ;;  %v3947_v48 = vld [vmem:[%s16916_s11 + $0x618] sm:$0xff]  ;;  %v3978_v63 = vld [vmem:[%s16916_s11 + $0x710] sm:$0xff]  ;;  %v3948_v15 = vld [vmem:[%s16916_s11 + $0x620] sm:$0xff] }
0x1331   :  { %v14668_v38 = vpop.f32.mrb[38].mxu0  ;;  %v14670_v16 = vpop.f32.mrb[50].mxu1  ;;  %v3730_v13 = vmax.f32 %v3556_v33, 0.0  ;;  %v3949_v37 = vld [vmem:[%s16916_s11 + $0x628] sm:$0xff]  ;;  %v3967_v30 = vld [vmem:[%s16916_s11 + $0x6b8] sm:$0xff]  ;;  %v3998_v52 = vld [vmem:[%s16916_s11 + $0x7b0] sm:$0xff] }
0x1332   :  { %12144 = vmatpush3.bf16.msra.mxu0 %v12143_v3  ;;  %12176 = vmatpush3.bf16.msra.mxu1 %v12175_v6  ;;  %v14672_v17 = vpop.f32.mrb[39].mxu0  ;;  %v14674_v18 = vpop.f32.mrb[51].mxu1  ;;  %v3053_v3 = vrot.slane %v14508_v20, %v13183_v51  ;;  %v12155_v6 = vpack.c.bf16 %v3893_v39, %v3892_v36  ;;  %v3994_v36 = vld [vmem:[%s16916_s11 + $0x790] sm:$0xff]  ;;  %v3995_v39 = vld [vmem:[%s16916_s11 + $0x798] sm:$0xff] }
0x1333   :  { %12146 = vmatprep.subr.bf16.mxu0 %v12145_v27  ;;  %12178 = vmatprep.subr.bf16.mxu1 %v12177_v28  ;;  %v3895_v27 = vld [vmem:[%s16916_s11 + $0x478] sm:$0xff]  ;;  %v3926_v28 = vld [vmem:[%s16916_s11 + $0x570] sm:$0xff]  ;;  %v12229_v0 = vpack.c.bf16 %v3995_v39, %v3994_v36 }
0x1334   :  { %v3479_v32 = vadd.f32 %v14516_v23, %v3053_v3  ;;  %v3487_v23 = vadd.f32 %v14558_v53, %v14546_v55  ;;  %v3485_v55 = vadd.f32 %v14552_v59, %v3053_v3  ;;  %v3946_v53 = vld [vmem:[%s16916_s11 + $0x610] sm:$0xff]  ;;  %v3979_v3 = vld [vmem:[%s16916_s11 + $0x718] sm:$0xff] }
0x1336   :  { %12148 = vmatpush3.bf16.msra.mxu0 %v12147_v41  ;;  %12180 = vmatpush3.bf16.msra.mxu1 %v12179_v19  ;;  %v3992_v41 = vld [vmem:[%s16916_s11 + $0x780] sm:$0xff]  ;;  %v3993_v19 = vld [vmem:[%s16916_s11 + $0x788] sm:$0xff]  ;;  %v3728_v4 = vmax.f32 %v3479_v32, 0.0  ;;  %v3744_v7 = vmax.f32 %v3485_v55, 0.0  ;;  %v12203_v32 = vpack.c.bf16 %v3949_v37, %v3948_v15 }
0x1337   :  { %12150 = vmatprep.subr.bf16.mxu0 %v12149_v25  ;;  %12182 = vmatprep.subr.bf16.mxu1 %v12181_v26  ;;  %v12159_v25 = vpack.c.bf16 %v3895_v27, %v3894_v10  ;;  %v12191_v26 = vpack.c.bf16 %v3927_v12, %v3926_v28  ;;  %v3964_v27 = vld [vmem:[%s16916_s11 + $0x6a0] sm:$0xff]  ;;  %v3997_v28 = vld [vmem:[%s16916_s11 + $0x7a8] sm:$0xff]  ;;  %v12231_v12 = vpack.c.bf16 %v3979_v3, %v3978_v63  ;;  %v4002_v63 = vld [vmem:[%s16916_s11 + $0x7d0] sm:$0xff] }
0x1338   :  { %v3952_v55 = vld [vmem:[%s16916_s11 + $0x640] sm:$0xff]  ;;  %v4003_v3 = vld [vmem:[%s16916_s11 + $0x7d8] sm:$0xff]  ;;  %v3973_v37 = vld [vmem:[%s16916_s11 + $0x6e8] sm:$0xff] }
0x1339   :  { %v3972_v15 = vld [vmem:[%s16916_s11 + $0x6e0] sm:$0xff] }
0x133a   :  { %12152 = vmatpush3.bf16.msra.mxu0 %v12151_v34  ;;  %12184 = vmatpush3.bf16.msra.mxu1 %v12183_v35  ;;  %v12225_v34 = vpack.c.bf16 %v3993_v19, %v3992_v41  ;;  %v3963_v35 = vld [vmem:[%s16916_s11 + $0x698] sm:$0xff] }
0x133b   :  { %12154 = vmatprep.subr.bf16.mxu0 %v12153_v43  ;;  %12186 = vmatprep.subr.bf16.mxu1 %v12185_v44  ;;  %v14784_v43 = vrot.slane %v14508_v20, %v14339_v45  ;;  %v14788_v44 = vrot.slane %v14508_v20, %v14342_v47  ;;  %v12197_v57 = vpack.c.bf16 %v3963_v35, %v3962_v31  ;;  %v3999_v31 = vld [vmem:[%s16916_s11 + $0x7b8] sm:$0xff] }
0x133c   :  { %v3951_v35 = vld [vmem:[%s16916_s11 + $0x638] sm:$0xff]  ;;  %v12237_v39 = vpack.c.bf16 %v3999_v31, %v3998_v52  ;;  %v3988_v52 = vld [vmem:[%s16916_s11 + $0x760] sm:$0xff]  ;;  %v3989_v31 = vld [vmem:[%s16916_s11 + $0x768] sm:$0xff] }
0x133d   :  { %v3635_v10 = vadd.f32 %v14640_v14, %v14784_v43  ;;  %v3712_v59 = vadd.f32 %v14642_v2, %v14788_v44  ;;  %v3965_v14 = vld [vmem:[%s16916_s11 + $0x6a8] sm:$0xff]  ;;  %v3996_v2 = vld [vmem:[%s16916_s11 + $0x7a0] sm:$0xff] }
0x133e   :  { %12156 = vmatpush3.bf16.msra.mxu0 %v12155_v6  ;;  %12188 = vmatpush3.bf16.msra.mxu1 %v12187_v50  ;;  %v3745_v6 = vmax.f32 %v3487_v23, 0.0  ;;  %v3747_v50 = vmax.f32 %v3564_v24, 0.0  ;;  %v12201_v21 = vpack.c.bf16 %v3965_v14, %v3964_v27  ;;  %v12233_v22 = vpack.c.bf16 %v3997_v28, %v3996_v2  ;;  %v3982_v23 = vld [vmem:[%s16916_s11 + $0x730] sm:$0xff]  ;;  %v3983_v24 = vld [vmem:[%s16916_s11 + $0x738] sm:$0xff] }
0x133f   :  { %12158 = vmatprep.subr.bf16.mxu0 %v12157_v11  ;;  %12190 = vmatprep.subr.bf16.mxu1 %v12189_v58  ;;  %v3746_v11 = vmax.f32 %v3562_v56, 0.0  ;;  %v12199_v58 = vpack.c.bf16 %v3947_v48, %v3946_v53  ;;  %v3733_v41 = vmax.f32 %v3635_v10, 0.0  ;;  %v3735_v19 = vmax.f32 %v3712_v59, 0.0  ;;  %v3953_v56 = vld [vmem:[%s16916_s11 + $0x648] sm:$0xff]  ;;  %v3970_v10 = vld [vmem:[%s16916_s11 + $0x6d0] sm:$0xff]  ;;  %v3971_v59 = vld [vmem:[%s16916_s11 + $0x6d8] sm:$0xff] }
0x1340   :  { %v12211_v27 = vpack.c.bf16 %v3953_v56, %v3952_v55  ;;  %v3954_v2 = vld [vmem:[%s16916_s11 + $0x650] sm:$0xff]  ;;  %v3955_v28 = vld [vmem:[%s16916_s11 + $0x658] sm:$0xff] }
0x1342   :  { %12160 = vmatpush3.bf16.msra.mxu0 %v12159_v25  ;;  %12192 = vmatpush3.bf16.msra.mxu1 %v12191_v26  ;;  %v3980_v25 = vld [vmem:[%s16916_s11 + $0x720] sm:$0xff]  ;;  %v3981_v26 = vld [vmem:[%s16916_s11 + $0x728] sm:$0xff] }
0x1343   :  { %12194 = vmatprep.subr.bf16.mxu0 %v12193_v29  ;;  %12226 = vmatprep.subr.bf16.mxu1 %v12225_v34  ;;  %v3966_v29 = vld [vmem:[%s16916_s11 + $0x6b0] sm:$0xff]  ;;  %v12235_v33 = vpack.c.bf16 %v3981_v26, %v3980_v25  ;;  %v3956_v25 = vld [vmem:[%s16916_s11 + $0x660] sm:$0xff]  ;;  %v3957_v26 = vld [vmem:[%s16916_s11 + $0x668] sm:$0xff] }
0x1344   :  { %v3950_v34 = vld [vmem:[%s16916_s11 + $0x630] sm:$0xff]  ;;  %v12205_v36 = vpack.c.bf16 %v3967_v30, %v3966_v29  ;;  %v12217_v29 = vpack.c.bf16 %v3973_v37, %v3972_v15 }
0x1345   :  { %4377 = vmatmul.mubr.f32.vlgmr.msra.gmra.mrb[48].mxu0 %v3728_v4  ;;  %4452 = vmatmul.mubr.f32.vlgmr.msra.gmra.mrb[60].mxu1 %v3730_v13  ;;  %v12207_v4 = vpack.c.bf16 %v3951_v35, %v3950_v34  ;;  %v12239_v13 = vpack.c.bf16 %v3983_v24, %v3982_v23  ;;  %v4006_v34 = vld [vmem:[%s16916_s11 + $0x7f0] sm:$0xff]  ;;  %v4007_v35 = vld [vmem:[%s16916_s11 + $0x7f8] sm:$0xff]  ;;  %v12251_v23 = vpack.c.bf16 %v3989_v31, %v3988_v52 }
0x1346   :  { %4381 = vmatprep.mubr.f32.mxu0 %v3745_v6  ;;  %4456 = vmatprep.mubr.f32.mxu1 %v3747_v50  ;;  %v3984_v6 = vld [vmem:[%s16916_s11 + $0x740] sm:$0xff]  ;;  %v3985_v50 = vld [vmem:[%s16916_s11 + $0x748] sm:$0xff]  ;;  %v3958_v24 = vld [vmem:[%s16916_s11 + $0x670] sm:$0xff] }
0x1347   :  { %12196 = vmatpush3.bf16.msra.mxu0 %v12195_v8  ;;  %12228 = vmatpush3.bf16.msra.mxu1 %v12227_v9  ;;  %v3968_v8 = vld [vmem:[%s16916_s11 + $0x6c0] sm:$0xff]  ;;  %v3969_v9 = vld [vmem:[%s16916_s11 + $0x6c8] sm:$0xff]  ;;  %v12243_v14 = vpack.c.bf16 %v3985_v50, %v3984_v6  ;;  %v3718_v6 = vadd.f32 %v14674_v18, %v14788_v44 }
0x1348   :  { %12198 = vmatprep.subr.bf16.mxu0 %v12197_v57  ;;  %12230 = vmatprep.subr.bf16.mxu1 %v12229_v0  ;;  %v4000_v57 = vld [vmem:[%s16916_s11 + $0x7c0] sm:$0xff]  ;;  %v4001_v0 = vld [vmem:[%s16916_s11 + $0x7c8] sm:$0xff]  ;;  %v12209_v53 = vpack.c.bf16 %v3969_v9, %v3968_v8  ;;  %v3077_v8 = vrot.slane %v14508_v20, %v14457_v60 }
0x1349   :  { %4382 = vmatmul.mubr.f32.gmra.mrb[50].mxu0 %v3744_v7  ;;  %4457 = vmatmul.mubr.f32.gmra.mrb[62].mxu1 %v3746_v11  ;;  %v12241_v48 = vpack.c.bf16 %v4001_v0, %v4000_v57  ;;  %v12213_v7 = vpack.c.bf16 %v3971_v59, %v3970_v10  ;;  %v12245_v11 = vpack.c.bf16 %v4003_v3, %v4002_v63  ;;  %v3959_v0 = vld [vmem:[%s16916_s11 + $0x678] sm:$0xff] }
0x134a   :  { %4526 = vmatprep.mubr.f32.mxu0 %v3733_v41  ;;  %4601 = vmatprep.mubr.f32.mxu1 %v3735_v19  ;;  %v4004_v41 = vld [vmem:[%s16916_s11 + $0x7e0] sm:$0xff]  ;;  %v4005_v19 = vld [vmem:[%s16916_s11 + $0x7e8] sm:$0xff]  ;;  %v12253_v57 = vpack.c.bf16 %v4007_v35, %v4006_v34  ;;  %v12223_v55 = vpack.c.bf16 %v3959_v0, %v3958_v24  ;;  %v3716_v63 = vadd.f32 %v14670_v16, %v3077_v8 }
0x134b   :  { %12200 = vmatpush3.bf16.msra.mxu0 %v12199_v58  ;;  %12232 = vmatpush3.bf16.msra.mxu1 %v12231_v12  ;;  %v3986_v58 = vld [vmem:[%s16916_s11 + $0x750] sm:$0xff]  ;;  %v3987_v12 = vld [vmem:[%s16916_s11 + $0x758] sm:$0xff]  ;;  %v12249_v30 = vpack.c.bf16 %v4005_v19, %v4004_v41 }
0x134c   :  { %12202 = vmatprep.subr.bf16.mxu0 %v12201_v21  ;;  %12234 = vmatprep.subr.bf16.mxu1 %v12233_v22  ;;  %v12215_v21 = vpack.c.bf16 %v3955_v28, %v3954_v2  ;;  %v12247_v22 = vpack.c.bf16 %v3987_v12, %v3986_v58 }
0x134f   :  { %12204 = vmatpush3.bf16.msra.mxu0 %v12203_v32  ;;  %12236 = vmatpush3.bf16.msra.mxu1 %v12235_v33  ;;  %v3974_v32 = vld [vmem:[%s16916_s11 + $0x6f0] sm:$0xff]  ;;  %v3975_v33 = vld [vmem:[%s16916_s11 + $0x6f8] sm:$0xff] }
0x1350   :  { %12206 = vmatprep.subr.bf16.mxu0 %v12205_v36  ;;  %12238 = vmatprep.subr.bf16.mxu1 %v12237_v39  ;;  %v3069_v36 = vrot.slane %v14508_v20, %v14448_v54  ;;  %v12219_v39 = vpack.c.bf16 %v3957_v26, %v3956_v25  ;;  %v12221_v9 = vpack.c.bf16 %v3975_v33, %v3974_v32 }
0x1352   :  { %v3633_v56 = vadd.f32 %v14636_v1, %v3069_v36  ;;  %v3639_v59 = vadd.f32 %v14668_v38, %v3069_v36  ;;  %v3751_v1 = vmax.f32 %v3718_v6, 0.0 }
0x1353   :  { %12208 = vmatpush3.bf16.msra.mxu0 %v12207_v4  ;;  %12240 = vmatpush3.bf16.msra.mxu1 %v12239_v13  ;;  %v3990_v4 = vld [vmem:[%s16916_s11 + $0x770] sm:$0xff]  ;;  %v3991_v13 = vld [vmem:[%s16916_s11 + $0x778] sm:$0xff] }
0x1354   :  { %12210 = vmatprep.subr.bf16.mxu0 %v12209_v53  ;;  %12242 = vmatprep.subr.bf16.mxu1 %v12241_v48  ;;  %v12255_v20 = vpack.c.bf16 %v3991_v13, %v3990_v4  ;;  %v3710_v53 = vadd.f32 %v14638_v5, %v3077_v8  ;;  %v3641_v48 = vadd.f32 %v14672_v17, %v14784_v43  ;;  %v3732_v50 = vmax.f32 %v3633_v56, 0.0  ;;  %v14967_v43 = vld [vmem:[%s16913_s8] sm:$0x3f] }
0x1355   :  { %v3748_v5 = vmax.f32 %v3639_v59, 0.0  ;;  %v4011_v38 = vrot.slane %v14967_v43, %v14265_v42 }
0x1356   :  { %v3734_v10 = vmax.f32 %v3710_v53, 0.0  ;;  %v3749_v3 = vmax.f32 %v3641_v48, 0.0 }
0x1357   :  { %12212 = vmatpush3.bf16.msra.mxu0 %v12211_v27  ;;  %12244 = vmatpush3.bf16.msra.mxu1 %v12243_v14  ;;  %v3750_v27 = vmax.f32 %v3716_v63, 0.0 }
0x1358   :  { %12214 = vmatprep.subr.bf16.mxu0 %v12213_v7  ;;  %12246 = vmatprep.subr.bf16.mxu1 %v12245_v11 }
0x135b   :  { %12216 = vmatpush3.bf16.msra.mxu0 %v12215_v21  ;;  %12248 = vmatpush3.bf16.msra.mxu1 %v12247_v22 }
0x135c   :  { %12218 = vmatprep.subr.bf16.mxu0 %v12217_v29  ;;  %12250 = vmatprep.subr.bf16.mxu1 %v12249_v30 }
0x135f   :  { %12220 = vmatpush3.bf16.msra.mxu0 %v12219_v39  ;;  %12252 = vmatpush3.bf16.msra.mxu1 %v12251_v23 }
0x1360   :  { %12222 = vmatprep.subr.bf16.mxu0 %v12221_v9  ;;  %12254 = vmatprep.subr.bf16.mxu1 %v12253_v57 }
0x1363   :  { %12224 = vmatpush3.bf16.msra.mxu0 %v12223_v55  ;;  %12256 = vmatpush3.bf16.msra.mxu1 %v12255_v20 }
0x1366   :  { %4527 = vmatmul.mubr.f32.vlgmr.msra.gmra.mrb[52].mxu0 %v3732_v50  ;;  %4602 = vmatmul.mubr.f32.vlgmr.msra.gmra.mrb[64].mxu1 %v3734_v10 }
0x1367   :  { %4531 = vmatprep.mubr.f32.mxu0 %v3749_v3  ;;  %4606 = vmatprep.mubr.f32.mxu1 %v3751_v1 }
0x136a   :  { %4532 = vmatmul.mubr.f32.gmra.mrb[54].mxu0 %v3748_v5  ;;  %4607 = vmatmul.mubr.f32.gmra.mrb[66].mxu1 %v3750_v27 }
0x13d7   :  { %v10210_v17 = vpop.f32.mrb[40].mxu0  ;;  %v10248_v18 = vpop.f32.mrb[52].mxu1 }
0x13d8   :  { %v10211_v16 = vpop.f32.mrb[41].mxu0  ;;  %v10249_v44 = vpop.f32.mrb[53].mxu1 }
0x13d9   :  { %v10212_v14 = vadd.f32 %v10211_v16, %v10210_v17  ;;  %v10250_v2 = vadd.f32 %v10249_v44, %v10248_v18 }
0x13db   :  { %v4079_v28 = vadd.f32 %v10212_v14, %v4011_v38  ;;  %v10213_v7 = vpop.f32.mrb[42].mxu0  ;;  %v10251_v11 = vpop.f32.mrb[54].mxu1 }
0x13dc   :  { %v10214_v58 = vpop.f32.mrb[43].mxu0  ;;  %v10252_v12 = vpop.f32.mrb[55].mxu1 }
0x13dd   :  { %v4154_v15 = vadd.f32 %v10250_v2, %v4079_v28  ;;  %v10215_v37 = vadd.f32 %v10214_v58, %v10213_v7  ;;  %v10253_v41 = vadd.f32 %v10252_v12, %v10251_v11 }
0x13df   :  { %v4084_v19 = vadd.f32 %v10215_v37, %v4011_v38 }
0x13e1   :  { %v4159_v21 = vadd.f32 %v10253_v41, %v4084_v19 }
0x13f7   :  { %v10286_v22 = vpop.f32.mrb[44].mxu0  ;;  %v10324_v25 = vpop.f32.mrb[56].mxu1 }
0x13f8   :  { %v10287_v26 = vpop.f32.mrb[45].mxu0  ;;  %v10325_v29 = vpop.f32.mrb[57].mxu1 }
0x13f9   :  { %v10288_v30 = vadd.f32 %v10287_v26, %v10286_v22  ;;  %v10326_v52 = vadd.f32 %v10325_v29, %v10324_v25 }
0x13fb   :  { %v4229_v31 = vadd.f32 %v10288_v30, %v4154_v15  ;;  %v10289_v32 = vpop.f32.mrb[46].mxu0  ;;  %v10327_v33 = vpop.f32.mrb[58].mxu1 }
0x13fc   :  { %v10290_v34 = vpop.f32.mrb[47].mxu0  ;;  %v10328_v35 = vpop.f32.mrb[59].mxu1 }
0x13fd   :  { %v4304_v36 = vadd.f32 %v10326_v52, %v4229_v31  ;;  %v10291_v39 = vadd.f32 %v10290_v34, %v10289_v32  ;;  %v10329_v23 = vadd.f32 %v10328_v35, %v10327_v33  ;;  %v9439_v33 = vld [vmem:[%s16908_s3 + $0x100] sm:$0xff]  ;;  %v9440_v34 = vld [vmem:[%s16908_s3 + $0x108] sm:$0xff] }
0x13fe   :  { %v12257_v35 = vpack.c.bf16 %v9440_v34, %v9439_v33 }
0x13ff   :  { %v4234_v24 = vadd.f32 %v10291_v39, %v4159_v21  ;;  %v9450_v39 = vld [vmem:[%s16909_s4 + $0x108] sm:$0xff] }
0x1400   :  { %12258 = vmatprep.subr.bf16.mxu0 %v12257_v35 }
0x1401   :  { %v4309_v8 = vadd.f32 %v10329_v23, %v4234_v24  ;;  %12260 = vmatpush3.bf16.msra.mxu0 %v12257_v35  ;;  %v9441_v24 = vld [vmem:[%s16908_s3 + $0x110] sm:$0xff] }
0x1418   :  { %v10362_v9 = vpop.f32.mrb[48].mxu0  ;;  %v10400_v57 = vpop.f32.mrb[60].mxu1 }
0x1419   :  { %v10363_v0 = vpop.f32.mrb[49].mxu0  ;;  %v10401_v4 = vpop.f32.mrb[61].mxu1 }
0x141a   :  { %v10364_v13 = vadd.f32 %v10363_v0, %v10362_v9  ;;  %v10402_v55 = vadd.f32 %v10401_v4, %v10400_v57  ;;  %v9451_v57 = vld [vmem:[%s16909_s4 + $0x110] sm:$0xff]  ;;  %v9452_v0 = vld [vmem:[%s16909_s4 + $0x118] sm:$0xff] }
0x141b   :  { %v12277_v4 = vpack.c.bf16 %v9452_v0, %v9451_v57 }
0x141c   :  { %v4379_v20 = vadd.f32 %v10364_v13, %v4304_v36  ;;  %v10365_v56 = vpop.f32.mrb[50].mxu0  ;;  %v10403_v53 = vpop.f32.mrb[62].mxu1  ;;  %v9449_v36 = vld [vmem:[%s16909_s4 + $0x100] sm:$0xff] }
0x141d   :  { %v10366_v48 = vpop.f32.mrb[51].mxu0  ;;  %v10404_v6 = vpop.f32.mrb[63].mxu1  ;;  %v12273_v23 = vpack.c.bf16 %v9450_v39, %v9449_v36  ;;  %v9443_v13 = vld [vmem:[%s16908_s3 + $0x120] sm:$0xff] }
0x141e   :  { %v4454_v50 = vadd.f32 %v10402_v55, %v4379_v20  ;;  %v10367_v10 = vadd.f32 %v10366_v48, %v10365_v56  ;;  %v10405_v59 = vadd.f32 %v10404_v6, %v10403_v53  ;;  %v9444_v55 = vld [vmem:[%s16908_s3 + $0x128] sm:$0xff]  ;;  %v9453_v56 = vld [vmem:[%s16909_s4 + $0x120] sm:$0xff]  ;;  %v9445_v6 = vld [vmem:[%s16908_s3 + $0x130] sm:$0xff] }
0x141f   :  { %12274 = vmatprep.subr.bf16.mxu1 %v12273_v23  ;;  %v12265_v20 = vpack.c.bf16 %v9444_v55, %v9443_v13  ;;  %v9454_v53 = vld [vmem:[%s16909_s4 + $0x128] sm:$0xff] }
0x1420   :  { %v4384_v63 = vadd.f32 %v10367_v10, %v4309_v8  ;;  %v9442_v8 = vld [vmem:[%s16908_s3 + $0x118] sm:$0xff]  ;;  %12276 = vmatpush3.bf16.msra.mxu1 %v12273_v23  ;;  %v12281_v48 = vpack.c.bf16 %v9454_v53, %v9453_v56 }
0x1421   :  { %v12261_v9 = vpack.c.bf16 %v9442_v8, %v9441_v24  ;;  %12278 = vmatprep.subr.bf16.mxu1 %v12277_v4 }
0x1422   :  { %v4459_v3 = vadd.f32 %v10405_v59, %v4384_v63  ;;  %v9455_v59 = vld [vmem:[%s16909_s4 + $0x130] sm:$0xff]  ;;  %v9456_v63 = vld [vmem:[%s16909_s4 + $0x138] sm:$0xff] }
0x1423   :  { %12262 = vmatprep.subr.bf16.mxu0 %v12261_v9 }
0x1424   :  { %12264 = vmatpush3.bf16.msra.mxu0 %v12261_v9  ;;  %12280 = vmatpush3.bf16.msra.mxu1 %v12277_v4 }
0x1425   :  { %12266 = vmatprep.subr.bf16.mxu0 %v12265_v20  ;;  %12282 = vmatprep.subr.bf16.mxu1 %v12281_v48 }
0x1428   :  { %12268 = vmatpush3.bf16.msra.mxu0 %v12265_v20  ;;  %12284 = vmatpush3.bf16.msra.mxu1 %v12281_v48 }
0x1439   :  { %v10438_v1 = vpop.f32.mrb[52].mxu0  ;;  %v10476_v5 = vpop.f32.mrb[64].mxu1 }
0x143a   :  { %v10439_v27 = vpop.f32.mrb[53].mxu0  ;;  %v10477_v17 = vpop.f32.mrb[65].mxu1 }
0x143b   :  { %v10440_v18 = vadd.f32 %v10439_v27, %v10438_v1  ;;  %v10478_v38 = vadd.f32 %v10477_v17, %v10476_v5  ;;  %v9459_v1 = vld [vmem:[%s16910_s5 + $0x100] sm:$0xff]  ;;  %v9460_v5 = vld [vmem:[%s16910_s5 + $0x108] sm:$0xff] }
0x143c   :  { %v12289_v27 = vpack.c.bf16 %v9460_v5, %v9459_v1 }
0x143d   :  { %v4529_v16 = vadd.f32 %v10440_v18, %v4454_v50  ;;  %v10441_v44 = vpop.f32.mrb[54].mxu0  ;;  %v10479_v14 = vpop.f32.mrb[66].mxu1  ;;  %v9446_v50 = vld [vmem:[%s16908_s3 + $0x138] sm:$0xff] }
0x143e   :  { %v10442_v2 = vpop.f32.mrb[55].mxu0  ;;  %v10480_v28 = vpop.f32.mrb[67].mxu1  ;;  %v12269_v10 = vpack.c.bf16 %v9446_v50, %v9445_v6 }
0x143f   :  { %v4604_v7 = vadd.f32 %v10478_v38, %v4529_v16  ;;  %v10443_v11 = vadd.f32 %v10442_v2, %v10441_v44  ;;  %v10481_v58 = vadd.f32 %v10480_v28, %v10479_v14  ;;  %v4643_v2 = vrot.slane %v14967_v43, %v14448_v54 }
0x1440   :  { %12270 = vmatprep.subr.bf16.mxu0 %v12269_v10 }
0x1441   :  { %v4534_v12 = vadd.f32 %v10443_v11, %v4459_v3  ;;  %v4612_v15 = vadd.f32 %v4604_v7, %v13759_v40  ;;  %v12285_v3 = vpack.c.bf16 %v9456_v63, %v9455_v59  ;;  %12272 = vmatpush3.bf16.msra.mxu0 %v12269_v10  ;;  %v4649_v7 = vrot.slane %v14967_v43, %v14339_v45 }
0x1442   :  { %12290 = vmatprep.subr.bf16.mxu0 %v12289_v27 }
0x1443   :  { %v4609_v37 = vadd.f32 %v10481_v58, %v4534_v12  ;;  %v4614_v41 = vsel %vm155_vm1, %v4612_v15, 0.0  ;;  %12286 = vmatprep.subr.bf16.mxu1 %v12285_v3 }
0x1444   :  { %4615 = vadd.xlane.f32.xlu0 %v4614_v41  ;;  %12288 = vmatpush3.bf16.msra.mxu1 %v12285_v3  ;;  %v9461_v41 = vld [vmem:[%s16910_s5 + $0x110] sm:$0xff] }
0x1445   :  { %v4613_v19 = vadd.f32 %v4609_v37, %v13789_v61  ;;  %11363 = vmatprep.subr.mxu1 %v12987_v46 }
0x1447   :  { %v4617_v21 = vsel %vm155_vm1, %v4613_v19, 0.0 }
0x1448   :  { %4618 = vadd.xlane.f32.xlu1 %v4617_v21 }
0x14d1   :  { %v4616_v22 = vpop.xlane.xlu0 %4615 }
0x14d2   :  { %v4620_v25 = vmul.f32 0.015625, %v4616_v22 }
0x14d4   :  { %v14975_v26 = vsub.f32 %v4612_v15, %v4620_v25  ;;  %v9463_v25 = vld [vmem:[%s16910_s5 + $0x120] sm:$0xff] }
0x14d5   :  { %v4619_v29 = vpop.xlane.xlu1 %4618 }
0x14d6   :  { %v4621_v30 = vmul.f32 0.015625, %v4619_v29  ;;  %v4624_v52 = vmul.f32 %v14975_v26, %v14975_v26 }
0x14d8   :  { %v14979_v31 = vsub.f32 %v4613_v19, %v4621_v30  ;;  %v4626_v40 = vsel %vm155_vm1, %v4624_v52, 0.0  ;;  %v9462_v19 = vld [vmem:[%s16910_s5 + $0x118] sm:$0xff]  ;;  %v9465_v30 = vld [vmem:[%s16910_s5 + $0x130] sm:$0xff] }
0x14d9   :  { %4627 = vadd.xlane.f32.xlu0 %v4626_v40  ;;  %v12293_v22 = vpack.c.bf16 %v9462_v19, %v9461_v41  ;;  %v9466_v52 = vld [vmem:[%s16910_s5 + $0x138] sm:$0xff]  ;;  %v9438_v40 = vld [vmem:[%s16911_s6 + $0x10] sm:$0x7] }
0x14da   :  { %v4625_v61 = vmul.f32 %v14979_v31, %v14979_v31  ;;  %v4668_v34 = vrot.slane %v9438_v40, %v13183_v51  ;;  %v4850_v9 = vrot.slane %v9438_v40, %v13194_v62 }
0x14dc   :  { %v4629_v32 = vsel %vm155_vm1, %v4625_v61, 0.0  ;;  %v4762_v61 = vrot.slane %v9438_v40, %v13177_v49  ;;  %v9501_v40 = vld [vmem:[%s16910_s5 + $0x148] sm:$0xff] }
0x14dd   :  { %4630 = vadd.xlane.f32.xlu1 %v4629_v32 }
0x1566   :  { %v4628_v17 = vpop.xlane.xlu0 %4627 }
0x1567   :  { %v4632_v18 = vmul.f32 0.015625, %v4628_v17 }
0x1569   :  { %v4634_v38 = vadd.f32 1e-05, %v4632_v18 }
0x156a   :  { %v4631_v16 = vpop.xlane.xlu1 %4630 }
0x156b   :  { %12917 = vrsqrt.f32 %v4634_v38  ;;  %v4633_v44 = vmul.f32 0.015625, %v4631_v16 }
0x156d   :  { %v4635_v14 = vadd.f32 1e-05, %v4633_v44  ;;  %v9480_v44 = vld [vmem:[%s16908_s3 + $0x140] sm:$0xff] }
0x156f   :  { %12919 = vrsqrt.f32 %v4635_v14  ;;  %v9481_v14 = vld [vmem:[%s16908_s3 + $0x148] sm:$0xff] }
0x1575   :  { %v12918_v28 = vpop.eup %12917 }
0x1576   :  { %v4638_v11 = vmul.f32 %v12918_v28, %v14975_v26  ;;  %v9464_v26 = vld [vmem:[%s16910_s5 + $0x128] sm:$0xff] }
0x1577   :  { %v12297_v29 = vpack.c.bf16 %v9464_v26, %v9463_v25  ;;  %v9485_v25 = vld [vmem:[%s16908_s3 + $0x168] sm:$0xff] }
0x1578   :  { %v4644_v58 = vmul.f32 %v4643_v2, %v4638_v11 }
0x1579   :  { %v12920_v12 = vpop.eup %12919 }
0x157a   :  { %v15045_v15 = vadd.f32 %v4649_v7, %v4644_v58  ;;  %v4639_v37 = vmul.f32 %v12920_v12, %v14979_v31  ;;  %v12301_v31 = vpack.c.bf16 %v9466_v52, %v9465_v30  ;;  %v9482_v12 = vld [vmem:[%s16908_s3 + $0x150] sm:$0xff]  ;;  %v9487_v30 = vld [vmem:[%s16908_s3 + $0x178] sm:$0xff] }
0x157c   :  { %v4645_v21 = vmul.f32 %v4643_v2, %v4639_v37  ;;  %11322 = vmatprep.mubr.msk.f32.mxu0 %vm155_vm1, %v15045_v15  ;;  %11341 = vmatprep.mubr.msk.f32.mxu1 %vm155_vm1, %v15045_v15  ;;  %v12309_v2 = vpack.c.bf16 %v9481_v14, %v9480_v44  ;;  %v9483_v37 = vld [vmem:[%s16908_s3 + $0x158] sm:$0xff]  ;;  %v9475_v14 = vld [vmem:[%s16912_s7 + $0x40] sm:$0xff] }
0x157e   :  { %v15058_v43 = vadd.f32 %v4649_v7, %v4645_v21  ;;  %v12313_v21 = vpack.c.bf16 %v9483_v37, %v9482_v12  ;;  %v9492_v37 = vld [vmem:[%s16909_s4 + $0x150] sm:$0xff] }
0x1580   :  { %11323 = vmatmul.mubr.msk.f32.vlgmr.msra.gmra.mrb[56].mxu0 %vm155_vm1, %v15058_v43  ;;  %11342 = vmatmul.mubr.msk.f32.vlgmr.msra.gmra.mrb[68].mxu1 %vm155_vm1, %v15058_v43 }
0x1581   :  { %12292 = vmatpush3.bf16.msra.mxu0 %v12289_v27  ;;  %11360 = vmatprep.mubr.msk.f32.mxu0 %vm155_vm1, %v15045_v15 }
0x1582   :  { %12294 = vmatprep.subr.bf16.mxu0 %v12293_v22  ;;  %11365 = vmatprep.mubr.msk.f32.mxu1 %vm12988_vm2, %v12987_v46 }
0x1585   :  { %12296 = vmatpush3.bf16.msra.mxu0 %v12293_v22  ;;  %v9484_v22 = vld [vmem:[%s16908_s3 + $0x160] sm:$0xff] }
0x1586   :  { %12298 = vmatprep.subr.bf16.mxu0 %v12297_v29  ;;  %v12317_v26 = vpack.c.bf16 %v9485_v25, %v9484_v22  ;;  %v9494_v25 = vld [vmem:[%s16909_s4 + $0x160] sm:$0xff] }
0x1589   :  { %12300 = vmatpush3.bf16.msra.mxu0 %v12297_v29  ;;  %v9486_v29 = vld [vmem:[%s16908_s3 + $0x170] sm:$0xff] }
0x158a   :  { %12302 = vmatprep.subr.bf16.mxu0 %v12301_v31  ;;  %v12321_v52 = vpack.c.bf16 %v9487_v30, %v9486_v29 }
0x158d   :  { %12304 = vmatpush3.bf16.msra.mxu0 %v12301_v31  ;;  %v9500_v31 = vld [vmem:[%s16910_s5 + $0x140] sm:$0xff] }
0x158e   :  { %11378 = vmatprep.subr.mxu0 %v12987_v46 }
0x1590   :  { %11361 = vmatmul.mubr.msk.f32.vlgmr.msra.gmra.mrb[58].mxu0 %vm155_vm1, %v15058_v43 }
0x1591   :  { %11380 = vmatprep.mubr.msk.f32.mxu0 %vm12988_vm2, %v12987_v46 }
0x1653   :  { %v11324_v32 = vpop.f32.mrb[56].mxu0  ;;  %v11343_v33 = vpop.f32.mrb[68].mxu1 }
0x1654   :  { %v4741_v35 = vpop.f32.mrb[57].mxu0  ;;  %v4829_v36 = vpop.f32.mrb[69].mxu1  ;;  %v4835_v24 = vadd.f32 %v11343_v33, %v4762_v61  ;;  %v4747_v8 = vadd.f32 %v11324_v32, %v4668_v34  ;;  %v9502_v32 = vld [vmem:[%s16910_s5 + $0x150] sm:$0xff]  ;;  %v9503_v33 = vld [vmem:[%s16910_s5 + $0x158] sm:$0xff] }
0x1655   :  { %v4830_v39 = vadd.f32 %v4829_v36, %v4762_v61  ;;  %v4742_v23 = vadd.f32 %v4741_v35, %v4668_v34  ;;  %v12341_v61 = vpack.c.bf16 %v9501_v40, %v9500_v31  ;;  %v12345_v34 = vpack.c.bf16 %v9503_v33, %v9502_v32  ;;  %v9504_v35 = vld [vmem:[%s16910_s5 + $0x160] sm:$0xff]  ;;  %v9505_v36 = vld [vmem:[%s16910_s5 + $0x168] sm:$0xff]  ;;  %v9497_v31 = vld [vmem:[%s16909_s4 + $0x178] sm:$0xff] }
0x1656   :  { %v9479_v33 = vld [vmem:[%s16911_s6 + $0x14] sm:$0x7] }
0x1657   :  { %11364 = vmatpush3.xpose.msk.msra.mxu1 %vm59_vm0, %v4830_v39  ;;  %v12349_v39 = vpack.c.bf16 %v9505_v36, %v9504_v35 }
0x1658   :  { %11368 = vmatprep.subr.mxu1 %v12987_v46 }
0x165a   :  { %11366 = vmatmul.mubr.msk.f32.vlgmr.msra.gmra.mrb[70].mxu1 %vm59_vm0, %v4742_v23  ;;  %v9506_v23 = vld [vmem:[%s16910_s5 + $0x170] sm:$0xff] }
0x165b   :  { %11369 = vmatpush3.xpose.msk.msra.mxu1 %vm59_vm0, %v4835_v24  ;;  %11370 = vmatprep.mubr.msk.f32.mxu1 %vm12988_vm2, %v12987_v46  ;;  %v9507_v24 = vld [vmem:[%s16910_s5 + $0x178] sm:$0xff] }
0x165c   :  { %11373 = vmatprep.subr.mxu1 %v12987_v46 }
0x165e   :  { %11371 = vmatmul.mubr.msk.f32.vlgmr.msra.gmra.mrb[72].mxu1 %vm59_vm0, %v4747_v8  ;;  %v12353_v8 = vpack.c.bf16 %v9507_v24, %v9506_v23 }
0x165f   :  { %11375 = vmatprep.mubr.msk.f32.mxu1 %vm12988_vm2, %v12987_v46 }
0x1663   :  { %v11362_v57 = vpop.f32.mrb[58].mxu0 }
0x1664   :  { %v4923_v0 = vadd.f32 %v11362_v57, %v4850_v9  ;;  %v4917_v4 = vpop.f32.mrb[59].mxu0  ;;  %v9522_v57 = vld [vmem:[%s16908_s3 + $0x188] sm:$0xff] }
0x1665   :  { %v4918_v13 = vadd.f32 %v4917_v4, %v4850_v9  ;;  %v9521_v9 = vld [vmem:[%s16908_s3 + $0x180] sm:$0xff]  ;;  %v9523_v4 = vld [vmem:[%s16908_s3 + $0x190] sm:$0xff] }
0x1666   :  { %11379 = vmatpush3.msra.mxu0 %v4923_v0  ;;  %v12361_v0 = vpack.c.bf16 %v9522_v57, %v9521_v9 }
0x1667   :  { %11374 = vmatpush3.msra.mxu1 %v4918_v13  ;;  %12310 = vmatprep.subr.bf16.mxu0 %v12309_v2  ;;  %v9524_v13 = vld [vmem:[%s16908_s3 + $0x198] sm:$0xff] }
0x172d   :  { %v4998_v55 = vpop.f32.mrb[70].mxu1 }
0x172e   :  { %v5078_v20 = vmul.f32 0.25, %v4998_v55  ;;  %v11367_v56 = vpop.f32.mrb[71].mxu1  ;;  %v12365_v55 = vpack.c.bf16 %v9524_v13, %v9523_v4 }
0x172f   :  { %v9526_v56 = vld [vmem:[%s16908_s3 + $0x1a8] sm:$0xff] }
0x1730   :  { %v5080_v53 = vsel %vm565_vm3, %v5078_v20, -inf }
0x1731   :  { %5081 = vmax.xlane.f32.xlu0 %v5080_v53  ;;  %v5074_v48 = vpop.f32.mrb[72].mxu1 }
0x1732   :  { %v5079_v6 = vmul.f32 0.25, %v5074_v48  ;;  %v11372_v50 = vpop.f32.mrb[73].mxu1  ;;  %v9527_v48 = vld [vmem:[%s16908_s3 + $0x1b0] sm:$0xff] }
0x1734   :  { %v5083_v10 = vsel %vm565_vm3, %v5079_v6, -inf }
0x1735   :  { %5084 = vmax.xlane.f32.xlu1 %v5083_v10  ;;  %v9541_v10 = vld [vmem:[%s16910_s5 + $0x180] sm:$0xff] }
0x17be   :  { %v5082_v59 = vpop.xlane.xlu0 %5081 }
0x17bf   :  { %v5086_v63 = vsub.f32 %v5078_v20, %v5082_v59  ;;  %v9525_v20 = vld [vmem:[%s16908_s3 + $0x1a0] sm:$0xff]  ;;  %v9542_v59 = vld [vmem:[%s16910_s5 + $0x188] sm:$0xff] }
0x17c0   :  { %v12369_v53 = vpack.c.bf16 %v9526_v56, %v9525_v20  ;;  %v5352_v56 = vrot.slane %v9479_v33, %v13183_v51 }
0x17c1   :  { %v5088_v3 = vmul.f32 1.442695, %v5086_v63  ;;  %v12393_v63 = vpack.c.bf16 %v9542_v59, %v9541_v10 }
0x17c2   :  { %v5085_v1 = vpop.xlane.xlu1 %5084 }
0x17c3   :  { %12921 = vpow2.f32 %v5088_v3  ;;  %v5087_v5 = vsub.f32 %v5079_v6, %v5085_v1  ;;  %v9528_v6 = vld [vmem:[%s16908_s3 + $0x1b8] sm:$0xff]  ;;  %v9543_v3 = vld [vmem:[%s16910_s5 + $0x190] sm:$0xff] }
0x17c4   :  { %v12373_v50 = vpack.c.bf16 %v9528_v6, %v9527_v48  ;;  %v9544_v1 = vld [vmem:[%s16910_s5 + $0x198] sm:$0xff] }
0x17c5   :  { %v5090_v27 = vmul.f32 1.442695, %v5087_v5  ;;  %v12397_v5 = vpack.c.bf16 %v9544_v1, %v9543_v3 }
0x17c7   :  { %12923 = vpow2.f32 %v5090_v27  ;;  %v9545_v27 = vld [vmem:[%s16910_s5 + $0x1a0] sm:$0xff] }
0x17cd   :  { %v12922_v17 = vpop.eup %12921 }
0x17ce   :  { %v5092_v18 = vsel %vm565_vm3, %v12922_v17, 0.0 }
0x17cf   :  { %5093 = vadd.xlane.f32.xlu0 %v5092_v18 }
0x17d1   :  { %v12924_v38 = vpop.eup %12923 }
0x17d2   :  { %v5095_v16 = vsel %vm565_vm3, %v12924_v38, 0.0 }
0x17d3   :  { %5096 = vadd.xlane.f32.xlu1 %v5095_v16  ;;  %v9548_v16 = vld [vmem:[%s16910_s5 + $0x1b8] sm:$0xff] }
0x185c   :  { %v5094_v28 = vpop.xlane.xlu0 %5093 }
0x185d   :  { %12925 = vrcp.f32 %v5094_v28 }
0x1860   :  { %v5097_v7 = vpop.xlane.xlu1 %5096 }
0x1861   :  { %12927 = vrcp.f32 %v5097_v7  ;;  %v9490_v7 = vld [vmem:[%s16909_s4 + $0x140] sm:$0xff] }
0x1867   :  { %v12926_v11 = vpop.eup %12925 }
0x1868   :  { %v5099_v58 = vmul.f32 %v12926_v11, %v12922_v17  ;;  %v9546_v17 = vld [vmem:[%s16910_s5 + $0x1a8] sm:$0xff] }
0x1869   :  { %v12401_v18 = vpack.c.bf16 %v9546_v17, %v9545_v27  ;;  %v9491_v11 = vld [vmem:[%s16909_s4 + $0x148] sm:$0xff] }
0x186a   :  { %11376 = vmatmul.mubr.msk.f32.vlgmr.msra.gmra.mrb[74].mxu1 %vm565_vm3, %v5099_v58  ;;  %v12325_v58 = vpack.c.bf16 %v9491_v11, %v9490_v7 }
0x186b   :  { %v12928_v41 = vpop.eup %12927 }
0x186c   :  { %v5101_v19 = vmul.f32 %v12928_v41, %v12924_v38  ;;  %v9547_v38 = vld [vmem:[%s16910_s5 + $0x1b0] sm:$0xff]  ;;  %v9493_v41 = vld [vmem:[%s16909_s4 + $0x158] sm:$0xff] }
0x186d   :  { %v12405_v44 = vpack.c.bf16 %v9548_v16, %v9547_v38 }
0x186e   :  { %11381 = vmatmul.mubr.msk.f32.vlgmr.msra.gmra.mrb[60].mxu0 %vm565_vm3, %v5101_v19 }
0x186f   :  { %12312 = vmatpush3.bf16.msra.mxu0 %v12309_v2  ;;  %11406 = vmatprep.mubr.msk.f32.mxu0 %vm155_vm1, %v15045_v15  ;;  %v9476_v2 = vld [vmem:[%s16912_s7 + $0x48] sm:$0xff] }
0x1870   :  { %12314 = vmatprep.subr.bf16.mxu0 %v12313_v21  ;;  %v12305_v28 = vpack.c.bf16 %v9476_v2, %v9475_v14 }
0x1872   :  { %12306 = vmatprep.subr.bf16.mxu1 %v12305_v28 }
0x1873   :  { %12316 = vmatpush3.bf16.msra.mxu0 %v12313_v21  ;;  %12308 = vmatpush3.bf16.msra.mxu1 %v12305_v28  ;;  %v12329_v21 = vpack.c.bf16 %v9493_v41, %v9492_v37 }
0x1874   :  { %12318 = vmatprep.subr.bf16.mxu0 %v12317_v26  ;;  %12326 = vmatprep.subr.bf16.mxu1 %v12325_v58 }
0x1877   :  { %12320 = vmatpush3.bf16.msra.mxu0 %v12317_v26  ;;  %v9495_v26 = vld [vmem:[%s16909_s4 + $0x168] sm:$0xff] }
0x1878   :  { %12322 = vmatprep.subr.bf16.mxu0 %v12321_v52  ;;  %v12333_v30 = vpack.c.bf16 %v9495_v26, %v9494_v25 }
0x187b   :  { %12324 = vmatpush3.bf16.msra.mxu0 %v12321_v52  ;;  %v9496_v52 = vld [vmem:[%s16909_s4 + $0x170] sm:$0xff] }
0x187c   :  { %12342 = vmatprep.subr.bf16.mxu0 %v12341_v61  ;;  %v12337_v40 = vpack.c.bf16 %v9497_v31, %v9496_v52  ;;  %v9531_v31 = vld [vmem:[%s16909_s4 + $0x180] sm:$0xff] }
0x187e   :  { %11407 = vmatmul.mubr.msk.f32.vlgmr.msra.gmra.mrb[62].mxu0 %vm155_vm1, %v15058_v43 }
0x187f   :  { %12344 = vmatpush3.bf16.msra.mxu0 %v12341_v61  ;;  %11444 = vmatprep.mubr.msk.f32.mxu0 %vm155_vm1, %v15045_v15 }
0x1880   :  { %12346 = vmatprep.subr.bf16.mxu0 %v12345_v34 }
0x1883   :  { %12348 = vmatpush3.bf16.msra.mxu0 %v12345_v34  ;;  %v5528_v34 = vrot.slane %v9479_v33, %v13194_v62 }
0x1884   :  { %12350 = vmatprep.subr.bf16.mxu0 %v12349_v39 }
0x1887   :  { %12352 = vmatpush3.bf16.msra.mxu0 %v12349_v39 }
0x1888   :  { %12354 = vmatprep.subr.bf16.mxu0 %v12353_v8 }
0x188b   :  { %12356 = vmatpush3.bf16.msra.mxu0 %v12353_v8  ;;  %v15272_v8 = vld [vmem:[%s16911_s6 + $0x18] sm:$0x7] }
0x188c   :  { %12362 = vmatprep.subr.bf16.mxu0 %v12361_v0  ;;  %v6202_v9 = vrot.slane %v15272_v8, %v13194_v62 }
0x188e   :  { %11445 = vmatmul.mubr.msk.f32.vlgmr.msra.gmra.mrb[64].mxu0 %vm155_vm1, %v15058_v43 }
0x188f   :  { %12364 = vmatpush3.bf16.msra.mxu0 %v12361_v0  ;;  %11490 = vmatprep.mubr.msk.f32.mxu0 %vm155_vm1, %v15045_v15 }
0x1890   :  { %12366 = vmatprep.subr.bf16.mxu0 %v12365_v55 }
0x1893   :  { %12368 = vmatpush3.bf16.msra.mxu0 %v12365_v55  ;;  %v5440_v55 = vrot.slane %v9479_v33, %v13177_v49  ;;  %v9533_v33 = vld [vmem:[%s16909_s4 + $0x190] sm:$0xff] }
0x1894   :  { %12370 = vmatprep.subr.bf16.mxu0 %v12369_v53 }
0x1897   :  { %12372 = vmatpush3.bf16.msra.mxu0 %v12369_v53 }
0x1898   :  { %12374 = vmatprep.subr.bf16.mxu0 %v12373_v50 }
0x189b   :  { %12376 = vmatpush3.bf16.msra.mxu0 %v12373_v50 }
0x189c   :  { %12394 = vmatprep.subr.bf16.mxu0 %v12393_v63 }
0x189e   :  { %11491 = vmatmul.mubr.msk.f32.vlgmr.msra.gmra.mrb[66].mxu0 %vm155_vm1, %v15058_v43 }
0x189f   :  { %12396 = vmatpush3.bf16.msra.mxu0 %v12393_v63  ;;  %11528 = vmatprep.mubr.msk.f32.mxu0 %vm155_vm1, %v15045_v15 }
0x18a0   :  { %12398 = vmatprep.subr.bf16.mxu0 %v12397_v5 }
0x18a3   :  { %12400 = vmatpush3.bf16.msra.mxu0 %v12397_v5 }
0x18a4   :  { %12402 = vmatprep.subr.bf16.mxu0 %v12401_v18 }
0x18a7   :  { %12404 = vmatpush3.bf16.msra.mxu0 %v12401_v18 }
0x18a8   :  { %12406 = vmatprep.subr.bf16.mxu0 %v12405_v44 }
0x18ab   :  { %12408 = vmatpush3.bf16.msra.mxu0 %v12405_v44 }
0x18ac   :  { %11546 = vmatprep.subr.mxu0 %v12987_v46 }
0x18ae   :  { %11529 = vmatmul.mubr.msk.f32.vlgmr.msra.gmra.mrb[68].mxu0 %vm155_vm1, %v15058_v43 }
0x18af   :  { %11548 = vmatprep.mubr.msk.f32.mxu0 %vm12988_vm2, %v12987_v46 }
0x193d   :  { %v5171_v12 = vpop.f32.mrb[74].mxu1 }
0x193e   :  { %v11377_v19 = vpop.f32.mrb[75].mxu1  ;;  %11387 = vmatprep.mubr.msk.f32.mxu1 %vm59_vm0, %v5171_v12 }
0x1941   :  { %v5244_v22 = vpop.f32.mrb[60].mxu0 }
0x1942   :  { %v11382_v29 = vpop.f32.mrb[61].mxu0  ;;  %11388 = vmatmul.mubr.msk.f32.vlgmr.msra.gmra.mrb[76].mxu1 %vm59_vm0, %v5244_v22 }
0x1943   :  { %12328 = vmatpush3.bf16.msra.mxu1 %v12325_v58  ;;  %11425 = vmatprep.mubr.msk.f32.mxu1 %vm155_vm1, %v15045_v15  ;;  %v9516_v29 = vld [vmem:[%s16912_s7 + $0x50] sm:$0xff] }
0x1944   :  { %12330 = vmatprep.subr.bf16.mxu1 %v12329_v21 }
0x1947   :  { %12332 = vmatpush3.bf16.msra.mxu1 %v12329_v21 }
0x1948   :  { %12334 = vmatprep.subr.bf16.mxu1 %v12333_v30 }
0x194b   :  { %12336 = vmatpush3.bf16.msra.mxu1 %v12333_v30  ;;  %v9517_v30 = vld [vmem:[%s16912_s7 + $0x58] sm:$0xff] }
0x194c   :  { %12338 = vmatprep.subr.bf16.mxu1 %v12337_v40  ;;  %v12357_v52 = vpack.c.bf16 %v9517_v30, %v9516_v29  ;;  %v9565_v29 = vld [vmem:[%s16908_s3 + $0x1d8] sm:$0xff] }
0x194f   :  { %12340 = vmatpush3.bf16.msra.mxu1 %v12337_v40  ;;  %v9532_v40 = vld [vmem:[%s16909_s4 + $0x188] sm:$0xff] }
0x1950   :  { %11447 = vmatprep.subr.mxu1 %v12987_v46 }
0x1951   :  { %v11408_v61 = vpop.f32.mrb[62].mxu0 }
0x1952   :  { %v5419_v32 = vpop.f32.mrb[63].mxu0  ;;  %11426 = vmatmul.mubr.msk.f32.vlgmr.msra.gmra.mrb[78].mxu1 %vm155_vm1, %v15058_v43  ;;  %v5425_v10 = vadd.f32 %v11408_v61, %v5352_v56  ;;  %v12377_v61 = vpack.c.bf16 %v9532_v40, %v9531_v31  ;;  %v9566_v40 = vld [vmem:[%s16908_s3 + $0x1e0] sm:$0xff] }
0x1953   :  { %11449 = vmatprep.mubr.msk.f32.mxu1 %vm12988_vm2, %v12987_v46  ;;  %v5420_v6 = vadd.f32 %v5419_v32, %v5352_v56 }
0x1961   :  { %v11446_v35 = vpop.f32.mrb[64].mxu0 }
0x1962   :  { %v5601_v36 = vadd.f32 %v11446_v35, %v5528_v34  ;;  %v5595_v39 = vpop.f32.mrb[65].mxu0 }
0x1963   :  { %v5596_v59 = vadd.f32 %v5595_v39, %v5528_v34  ;;  %v9534_v34 = vld [vmem:[%s16909_s4 + $0x198] sm:$0xff] }
0x1971   :  { %v15265_v23 = vpop.f32.mrb[66].mxu0 }
0x1972   :  { %v15267_v24 = vpop.f32.mrb[67].mxu0 }
0x1981   :  { %v11530_v57 = vpop.f32.mrb[68].mxu0 }
0x1982   :  { %v6275_v0 = vadd.f32 %v11530_v57, %v6202_v9  ;;  %v6269_v4 = vpop.f32.mrb[69].mxu0  ;;  %v9536_v57 = vld [vmem:[%s16909_s4 + $0x1a8] sm:$0xff] }
0x1983   :  { %v15276_v13 = vadd.f32 %v6269_v4, %v6202_v9  ;;  %v9535_v9 = vld [vmem:[%s16909_s4 + $0x1a0] sm:$0xff] }
0x1984   :  { %11547 = vmatpush3.msra.mxu0 %v6275_v0  ;;  %v12385_v4 = vpack.c.bf16 %v9536_v57, %v9535_v9  ;;  %v9584_v57 = vld [vmem:[%s16910_s5 + $0x1d0] sm:$0xff] }
0x1a25   :  { %v11427_v20 = vpop.f32.mrb[78].mxu1 }
0x1a26   :  { %v5507_v53 = vpop.f32.mrb[79].mxu1  ;;  %v5513_v50 = vadd.f32 %v11427_v20, %v5440_v55  ;;  %v9538_v20 = vld [vmem:[%s16909_s4 + $0x1b8] sm:$0xff] }
0x1a27   :  { %v5508_v48 = vadd.f32 %v5507_v53, %v5440_v55  ;;  %v9537_v55 = vld [vmem:[%s16909_s4 + $0x1b0] sm:$0xff]  ;;  %v6114_v53 = vrot.slane %v15272_v8, %v13177_v49 }
0x1a28   :  { %v12389_v56 = vpack.c.bf16 %v9538_v20, %v9537_v55  ;;  %v9586_v55 = vld [vmem:[%s16910_s5 + $0x1e0] sm:$0xff]  ;;  %v9587_v20 = vld [vmem:[%s16910_s5 + $0x1e8] sm:$0xff] }
0x1a29   :  { %11448 = vmatpush3.xpose.msk.msra.mxu1 %vm59_vm0, %v5508_v48 }
0x1a2a   :  { %11452 = vmatprep.subr.mxu1 %v12987_v46 }
0x1a2c   :  { %11450 = vmatmul.mubr.msk.f32.vlgmr.msra.gmra.mrb[80].mxu1 %vm59_vm0, %v5420_v6  ;;  %v6026_v6 = vrot.slane %v15272_v8, %v13183_v51 }
0x1a2d   :  { %11453 = vmatpush3.xpose.msk.msra.mxu1 %vm59_vm0, %v5513_v50  ;;  %11454 = vmatprep.mubr.msk.f32.mxu1 %vm12988_vm2, %v12987_v46 }
0x1a2e   :  { %11457 = vmatprep.subr.mxu1 %v12987_v46 }
0x1a30   :  { %11455 = vmatmul.mubr.msk.f32.vlgmr.msra.gmra.mrb[82].mxu1 %vm59_vm0, %v5425_v10 }
0x1a31   :  { %11458 = vmatpush3.msra.mxu1 %v5596_v59  ;;  %11459 = vmatprep.mubr.msk.f32.mxu1 %vm12988_vm2, %v12987_v46  ;;  %v6094_v59 = vadd.f32 %v15267_v24, %v6026_v6 }
0x1a32   :  { %11462 = vmatprep.subr.mxu1 %v12987_v46 }
0x1aff   :  { %v5676_v63 = vpop.f32.mrb[80].mxu1 }
0x1b00   :  { %v5756_v3 = vmul.f32 0.25, %v5676_v63  ;;  %v11451_v1 = vpop.f32.mrb[81].mxu1 }
0x1b02   :  { %v5758_v5 = vsel %vm565_vm3, %v5756_v3, -inf }
0x1b03   :  { %5759 = vmax.xlane.f32.xlu0 %v5758_v5  ;;  %v5752_v27 = vpop.f32.mrb[82].mxu1 }
0x1b04   :  { %v5757_v17 = vmul.f32 0.25, %v5752_v27  ;;  %v11456_v18 = vpop.f32.mrb[83].mxu1 }
0x1b06   :  { %v5761_v38 = vsel %vm565_vm3, %v5757_v17, -inf }
0x1b07   :  { %5762 = vmax.xlane.f32.xlu1 %v5761_v38 }
0x1b90   :  { %v5760_v16 = vpop.xlane.xlu0 %5759 }
0x1b91   :  { %v5764_v44 = vsub.f32 %v5756_v3, %v5760_v16  ;;  %v6099_v3 = vadd.f32 %v15265_v23, %v6026_v6 }
0x1b93   :  { %v5766_v14 = vmul.f32 1.442695, %v5764_v44 }
0x1b94   :  { %v5763_v2 = vpop.xlane.xlu1 %5762 }
0x1b95   :  { %12929 = vpow2.f32 %v5766_v14  ;;  %v5765_v28 = vsub.f32 %v5757_v17, %v5763_v2 }
0x1b97   :  { %v5768_v7 = vmul.f32 1.442695, %v5765_v28 }
0x1b99   :  { %12931 = vpow2.f32 %v5768_v7 }
0x1b9f   :  { %v12930_v11 = vpop.eup %12929 }
0x1ba0   :  { %v5770_v58 = vsel %vm565_vm3, %v12930_v11, 0.0 }
0x1ba1   :  { %5771 = vadd.xlane.f32.xlu0 %v5770_v58 }
0x1ba3   :  { %v12932_v12 = vpop.eup %12931 }
0x1ba4   :  { %v5773_v37 = vsel %vm565_vm3, %v12932_v12, 0.0 }
0x1ba5   :  { %5774 = vadd.xlane.f32.xlu1 %v5773_v37  ;;  %v9563_v37 = vld [vmem:[%s16908_s3 + $0x1c8] sm:$0xff] }
0x1c2e   :  { %v5772_v41 = vpop.xlane.xlu0 %5771 }
0x1c2f   :  { %12933 = vrcp.f32 %v5772_v41 }
0x1c32   :  { %v5775_v19 = vpop.xlane.xlu1 %5774 }
0x1c33   :  { %12935 = vrcp.f32 %v5775_v19 }
0x1c39   :  { %v12934_v21 = vpop.eup %12933 }
0x1c3a   :  { %v5777_v22 = vmul.f32 %v12934_v21, %v12930_v11 }
0x1c3c   :  { %11460 = vmatmul.mubr.msk.f32.vlgmr.msra.gmra.mrb[84].mxu1 %vm565_vm3, %v5777_v22 }
0x1c3d   :  { %v12936_v25 = vpop.eup %12935  ;;  %11463 = vmatpush3.msra.mxu1 %v5601_v36  ;;  %11464 = vmatprep.mubr.msk.f32.mxu1 %vm12988_vm2, %v12987_v46  ;;  %v12381_v36 = vpack.c.bf16 %v9534_v34, %v9533_v33  ;;  %v9568_v33 = vld [vmem:[%s16908_s3 + $0x1f0] sm:$0xff]  ;;  %v9569_v34 = vld [vmem:[%s16908_s3 + $0x1f8] sm:$0xff] }
0x1c3e   :  { %v5779_v26 = vmul.f32 %v12936_v25, %v12932_v12  ;;  %12358 = vmatprep.subr.bf16.mxu1 %v12357_v52  ;;  %v9562_v12 = vld [vmem:[%s16908_s3 + $0x1c0] sm:$0xff] }
0x1c3f   :  { %v12413_v41 = vpack.c.bf16 %v9563_v37, %v9562_v12 }
0x1c40   :  { %11465 = vmatmul.mubr.msk.f32.vlgmr.msra.gmra.mrb[86].mxu1 %vm565_vm3, %v5779_v26  ;;  %v9564_v26 = vld [vmem:[%s16908_s3 + $0x1d0] sm:$0xff] }
0x1c41   :  { %12360 = vmatpush3.bf16.msra.mxu1 %v12357_v52  ;;  %12414 = vmatprep.subr.bf16.mxu0 %v12413_v41  ;;  %v12417_v31 = vpack.c.bf16 %v9565_v29, %v9564_v26 }
0x1c42   :  { %12378 = vmatprep.subr.bf16.mxu1 %v12377_v61 }
0x1d0f   :  { %v5849_v32 = vpop.f32.mrb[84].mxu1 }
0x1d10   :  { %v11461_v35 = vpop.f32.mrb[85].mxu1  ;;  %11471 = vmatprep.mubr.msk.f32.mxu1 %vm59_vm0, %v5849_v32 }
0x1d11   :  { %v12425_v35 = vpack.c.bf16 %v9569_v34, %v9568_v33 }
0x1d13   :  { %v5922_v39 = vpop.f32.mrb[86].mxu1 }
0x1d14   :  { %v11466_v0 = vpop.f32.mrb[87].mxu1  ;;  %11472 = vmatmul.mubr.msk.f32.vlgmr.msra.gmra.mrb[76].mxu1 %vm59_vm0, %v5922_v39  ;;  %v9583_v39 = vld [vmem:[%s16910_s5 + $0x1c8] sm:$0xff] }
0x1d15   :  { %12380 = vmatpush3.bf16.msra.mxu1 %v12377_v61  ;;  %11509 = vmatprep.mubr.msk.f32.mxu1 %vm155_vm1, %v15045_v15  ;;  %v9567_v61 = vld [vmem:[%s16908_s3 + $0x1e8] sm:$0xff]  ;;  %v9585_v0 = vld [vmem:[%s16910_s5 + $0x1d8] sm:$0xff] }
0x1d16   :  { %12382 = vmatprep.subr.bf16.mxu1 %v12381_v36  ;;  %v12421_v32 = vpack.c.bf16 %v9567_v61, %v9566_v40 }
0x1d19   :  { %12384 = vmatpush3.bf16.msra.mxu1 %v12381_v36  ;;  %v9582_v36 = vld [vmem:[%s16910_s5 + $0x1c0] sm:$0xff] }
0x1d1a   :  { %12386 = vmatprep.subr.bf16.mxu1 %v12385_v4  ;;  %v12445_v9 = vpack.c.bf16 %v9583_v39, %v9582_v36 }
0x1d1d   :  { %12388 = vmatpush3.bf16.msra.mxu1 %v12385_v4  ;;  %v12449_v4 = vpack.c.bf16 %v9585_v0, %v9584_v57 }
0x1d1e   :  { %12390 = vmatprep.subr.bf16.mxu1 %v12389_v56 }
0x1d21   :  { %12392 = vmatpush3.bf16.msra.mxu1 %v12389_v56  ;;  %v12453_v56 = vpack.c.bf16 %v9587_v20, %v9586_v55 }
0x1d22   :  { %11531 = vmatprep.subr.mxu1 %v12987_v46 }
0x1d24   :  { %11510 = vmatmul.mubr.msk.f32.vlgmr.msra.gmra.mrb[88].mxu1 %vm155_vm1, %v15058_v43 }
0x1d25   :  { %11533 = vmatprep.mubr.msk.f32.mxu1 %vm12988_vm2, %v12987_v46 }
0x1df7   :  { %v11511_v48 = vpop.f32.mrb[88].mxu1 }
0x1df8   :  { %v6181_v50 = vpop.f32.mrb[89].mxu1  ;;  %v6187_v63 = vadd.f32 %v11511_v48, %v6114_v53  ;;  %v9589_v48 = vld [vmem:[%s16910_s5 + $0x1f8] sm:$0xff] }
0x1df9   :  { %v6182_v10 = vadd.f32 %v6181_v50, %v6114_v53  ;;  %v9588_v53 = vld [vmem:[%s16910_s5 + $0x1f0] sm:$0xff]  ;;  %v9557_v50 = vld [vmem:[%s16912_s7 + $0x60] sm:$0xff] }
0x1dfa   :  { %v12457_v6 = vpack.c.bf16 %v9589_v48, %v9588_v53 }
0x1dfb   :  { %11532 = vmatpush3.xpose.msk.msra.mxu1 %vm59_vm0, %v6182_v10  ;;  %v9558_v10 = vld [vmem:[%s16912_s7 + $0x68] sm:$0xff] }
0x1dfc   :  { %11536 = vmatprep.subr.mxu1 %v12987_v46 }
0x1dfe   :  { %11534 = vmatmul.mubr.msk.f32.vlgmr.msra.gmra.mrb[90].mxu1 %vm59_vm0, %v6094_v59  ;;  %v12409_v59 = vpack.c.bf16 %v9558_v10, %v9557_v50 }
0x1dff   :  { %11537 = vmatpush3.xpose.msk.msra.mxu1 %vm59_vm0, %v6187_v63  ;;  %11538 = vmatprep.mubr.msk.f32.mxu1 %vm12988_vm2, %v12987_v46  ;;  %v9572_v63 = vld [vmem:[%s16909_s4 + $0x1c0] sm:$0xff] }
0x1e00   :  { %11541 = vmatprep.subr.mxu1 %v12987_v46 }
0x1e02   :  { %11539 = vmatmul.mubr.msk.f32.vlgmr.msra.gmra.mrb[92].mxu1 %vm59_vm0, %v6099_v3  ;;  %v9573_v3 = vld [vmem:[%s16909_s4 + $0x1c8] sm:$0xff] }
0x1e03   :  { %11542 = vmatpush3.msra.mxu1 %v15276_v13  ;;  %11543 = vmatprep.mubr.msk.f32.mxu1 %vm12988_vm2, %v12987_v46 }
0x1e04   :  { %12410 = vmatprep.subr.bf16.mxu1 %v12409_v59 }
0x1ed1   :  { %v6350_v24 = vpop.f32.mrb[90].mxu1 }
0x1ed2   :  { %v6430_v8 = vmul.f32 0.25, %v6350_v24  ;;  %v11535_v1 = vpop.f32.mrb[91].mxu1  ;;  %v12429_v24 = vpack.c.bf16 %v9573_v3, %v9572_v63 }
0x1ed3   :  { %v9574_v1 = vld [vmem:[%s16909_s4 + $0x1d0] sm:$0xff] }
0x1ed4   :  { %v6432_v5 = vsel %vm565_vm3, %v6430_v8, -inf }
0x1ed5   :  { %6433 = vmax.xlane.f32.xlu0 %v6432_v5  ;;  %v6426_v27 = vpop.f32.mrb[92].mxu1  ;;  %v9575_v5 = vld [vmem:[%s16909_s4 + $0x1d8] sm:$0xff] }
0x1ed6   :  { %v6431_v17 = vmul.f32 0.25, %v6426_v27  ;;  %v11540_v18 = vpop.f32.mrb[93].mxu1 }
0x1ed8   :  { %v6435_v23 = vsel %vm565_vm3, %v6431_v17, -inf }
0x1ed9   :  { %6436 = vmax.xlane.f32.xlu1 %v6435_v23  ;;  %v9576_v23 = vld [vmem:[%s16909_s4 + $0x1e0] sm:$0xff] }
0x1f62   :  { %v6434_v38 = vpop.xlane.xlu0 %6433 }
0x1f63   :  { %v6438_v16 = vsub.f32 %v6430_v8, %v6434_v38  ;;  %v9577_v38 = vld [vmem:[%s16909_s4 + $0x1e8] sm:$0xff] }
0x1f65   :  { %v6440_v44 = vmul.f32 1.442695, %v6438_v16 }
0x1f66   :  { %v6437_v14 = vpop.xlane.xlu1 %6436 }
0x1f67   :  { %12937 = vpow2.f32 %v6440_v44  ;;  %v6439_v13 = vsub.f32 %v6431_v17, %v6437_v14  ;;  %v12433_v17 = vpack.c.bf16 %v9575_v5, %v9574_v1  ;;  %v12437_v44 = vpack.c.bf16 %v9577_v38, %v9576_v23  ;;  %v9578_v14 = vld [vmem:[%s16909_s4 + $0x1f0] sm:$0xff]  ;;  %v9599_v1 = vld [vmem:[%s16912_s7 + $0x78] sm:$0xff]  ;;  %v15494_v38 = vld [vmem:[%s16913_s8 + $0x8] sm:$0x3f] }
0x1f69   :  { %v6442_v2 = vmul.f32 1.442695, %v6439_v13  ;;  %v9579_v13 = vld [vmem:[%s16909_s4 + $0x1f8] sm:$0xff] }
0x1f6b   :  { %12939 = vpow2.f32 %v6442_v2  ;;  %v12441_v2 = vpack.c.bf16 %v9579_v13, %v9578_v14 }
0x1f71   :  { %v12938_v28 = vpop.eup %12937 }
0x1f72   :  { %v6444_v7 = vsel %vm565_vm3, %v12938_v28, 0.0 }
0x1f73   :  { %6445 = vadd.xlane.f32.xlu0 %v6444_v7 }
0x1f75   :  { %v12940_v11 = vpop.eup %12939 }
0x1f76   :  { %v6447_v58 = vsel %vm565_vm3, %v12940_v11, 0.0 }
0x1f77   :  { %6448 = vadd.xlane.f32.xlu1 %v6447_v58 }
0x2000   :  { %v6446_v19 = vpop.xlane.xlu0 %6445 }
0x2001   :  { %12941 = vrcp.f32 %v6446_v19 }
0x2004   :  { %v6449_v21 = vpop.xlane.xlu1 %6448 }
0x2005   :  { %12943 = vrcp.f32 %v6449_v21 }
0x200b   :  { %v12942_v22 = vpop.eup %12941 }
0x200c   :  { %v6451_v25 = vmul.f32 %v12942_v22, %v12938_v28 }
0x200e   :  { %11544 = vmatmul.mubr.msk.f32.vlgmr.msra.gmra.mrb[94].mxu1 %vm565_vm3, %v6451_v25 }
0x200f   :  { %v12944_v30 = vpop.eup %12943  ;;  %12412 = vmatpush3.bf16.msra.mxu1 %v12409_v59 }
0x2010   :  { %v6453_v52 = vmul.f32 %v12944_v30, %v12940_v11  ;;  %12430 = vmatprep.subr.bf16.mxu1 %v12429_v24  ;;  %v9561_v11 = vld [vmem:[%s16911_s6 + $0x1c] sm:$0x7] }
0x2011   :  { %v6876_v58 = vrot.slane %v9561_v11, %v13194_v62  ;;  %v6788_v19 = vrot.slane %v9561_v11, %v13177_v49  ;;  %v6700_v22 = vrot.slane %v9561_v11, %v13183_v51 }
0x2012   :  { %11549 = vmatmul.mubr.msk.f32.vlgmr.msra.gmra.mrb[70].mxu0 %vm565_vm3, %v6453_v52 }
0x2013   :  { %12416 = vmatpush3.bf16.msra.mxu0 %v12413_v41  ;;  %11574 = vmatprep.mubr.msk.f32.mxu0 %vm155_vm1, %v15045_v15 }
0x2014   :  { %12418 = vmatprep.subr.bf16.mxu0 %v12417_v31 }
0x2017   :  { %12420 = vmatpush3.bf16.msra.mxu0 %v12417_v31 }
0x2018   :  { %12422 = vmatprep.subr.bf16.mxu0 %v12421_v32 }
0x201b   :  { %12424 = vmatpush3.bf16.msra.mxu0 %v12421_v32 }
0x201c   :  { %12426 = vmatprep.subr.bf16.mxu0 %v12425_v35 }
0x201f   :  { %12428 = vmatpush3.bf16.msra.mxu0 %v12425_v35 }
0x2020   :  { %12446 = vmatprep.subr.bf16.mxu0 %v12445_v9 }
0x2022   :  { %11575 = vmatmul.mubr.msk.f32.vlgmr.msra.gmra.mrb[72].mxu0 %vm155_vm1, %v15058_v43 }
0x2023   :  { %12448 = vmatpush3.bf16.msra.mxu0 %v12445_v9  ;;  %11612 = vmatprep.mubr.msk.f32.mxu0 %vm155_vm1, %v15045_v15 }
0x2024   :  { %12450 = vmatprep.subr.bf16.mxu0 %v12449_v4 }
0x2027   :  { %12452 = vmatpush3.bf16.msra.mxu0 %v12449_v4 }
0x2028   :  { %12454 = vmatprep.subr.bf16.mxu0 %v12453_v56 }
0x202b   :  { %12456 = vmatpush3.bf16.msra.mxu0 %v12453_v56 }
0x202c   :  { %12458 = vmatprep.subr.bf16.mxu0 %v12457_v6 }
0x202f   :  { %12460 = vmatpush3.bf16.msra.mxu0 %v12457_v6 }
0x2032   :  { %11613 = vmatmul.mubr.msk.f32.vlgmr.msra.gmra.mrb[74].mxu0 %vm155_vm1, %v15058_v43 }
0x2033   :  { %7684 = vmatprep.mubr.f32.mxu0 %v12987_v46 }
0x20e1   :  { %v6523_v8 = vpop.f32.mrb[94].mxu1 }
0x20e2   :  { %v11545_v27 = vpop.f32.mrb[95].mxu1  ;;  %11555 = vmatprep.mubr.msk.f32.mxu1 %vm59_vm0, %v6523_v8  ;;  %v9598_v8 = vld [vmem:[%s16912_s7 + $0x70] sm:$0xff] }
0x20e3   :  { %v12461_v5 = vpack.c.bf16 %v9599_v1, %v9598_v8  ;;  %v9685_v8 = vld [vmem:[%s16914_s9 + $0x698] sm:$0xff]  ;;  %v9666_v1 = vld [vmem:[%s16914_s9 + $0x600] sm:$0xff] }
0x20e5   :  { %v6596_v18 = vpop.f32.mrb[70].mxu0 }
0x20e6   :  { %v11550_v16 = vpop.f32.mrb[71].mxu0  ;;  %11556 = vmatmul.mubr.msk.f32.vlgmr.msra.gmra.mrb[76].mxu1 %vm59_vm0, %v6596_v18 }
0x20e7   :  { %12432 = vmatpush3.bf16.msra.mxu1 %v12429_v24  ;;  %11593 = vmatprep.mubr.msk.f32.mxu1 %vm155_vm1, %v15045_v15  ;;  %v5335_v16 = vrot.slane %v15494_v38, %v13183_v51 }
0x20e8   :  { %12434 = vmatprep.subr.bf16.mxu1 %v12433_v17 }
0x20eb   :  { %12436 = vmatpush3.bf16.msra.mxu1 %v12433_v17 }
0x20ec   :  { %12438 = vmatprep.subr.bf16.mxu1 %v12437_v44 }
0x20ef   :  { %12440 = vmatpush3.bf16.msra.mxu1 %v12437_v44 }
0x20f0   :  { %12442 = vmatprep.subr.bf16.mxu1 %v12441_v2 }
0x20f3   :  { %12444 = vmatpush3.bf16.msra.mxu1 %v12441_v2 }
0x20f4   :  { %11615 = vmatprep.subr.mxu1 %v12987_v46 }
0x20f5   :  { %v11576_v28 = vpop.f32.mrb[72].mxu0 }
0x20f6   :  { %v6767_v7 = vpop.f32.mrb[73].mxu0  ;;  %11594 = vmatmul.mubr.msk.f32.vlgmr.msra.gmra.mrb[96].mxu1 %vm155_vm1, %v15058_v43  ;;  %v6773_v52 = vadd.f32 %v11576_v28, %v6700_v22 }
0x20f7   :  { %11617 = vmatprep.mubr.msk.f32.mxu1 %vm12988_vm2, %v12987_v46  ;;  %v6768_v29 = vadd.f32 %v6767_v7, %v6700_v22 }
0x2105   :  { %v11614_v12 = vpop.f32.mrb[74].mxu0 }
0x2106   :  { %v6949_v37 = vadd.f32 %v11614_v12, %v6876_v58  ;;  %v6943_v41 = vpop.f32.mrb[75].mxu0 }
0x2107   :  { %v6944_v31 = vadd.f32 %v6943_v41, %v6876_v58 }
0x21c9   :  { %v11595_v21 = vpop.f32.mrb[96].mxu1 }
0x21ca   :  { %v6855_v25 = vpop.f32.mrb[97].mxu1  ;;  %v6861_v30 = vadd.f32 %v11595_v21, %v6788_v19 }
0x21cb   :  { %v6856_v26 = vadd.f32 %v6855_v25, %v6788_v19 }
0x21cd   :  { %11616 = vmatpush3.xpose.msk.msra.mxu1 %vm59_vm0, %v6856_v26 }
0x21ce   :  { %11620 = vmatprep.subr.mxu1 %v12987_v46 }
0x21d0   :  { %11618 = vmatmul.mubr.msk.f32.vlgmr.msra.gmra.mrb[98].mxu1 %vm59_vm0, %v6768_v29  ;;  %v9603_v29 = vld [vmem:[%s16914_s9 + $0x408] sm:$0xff] }
0x21d1   :  { %11621 = vmatpush3.xpose.msk.msra.mxu1 %vm59_vm0, %v6861_v30  ;;  %11622 = vmatprep.mubr.msk.f32.mxu1 %vm12988_vm2, %v12987_v46  ;;  %v9619_v30 = vld [vmem:[%s16914_s9 + $0x488] sm:$0xff] }
0x21d2   :  { %11625 = vmatprep.subr.mxu1 %v12987_v46 }
0x21d4   :  { %11623 = vmatmul.mubr.msk.f32.vlgmr.msra.gmra.mrb[100].mxu1 %vm59_vm0, %v6773_v52  ;;  %v9605_v52 = vld [vmem:[%s16914_s9 + $0x418] sm:$0xff] }
0x21d5   :  { %11626 = vmatpush3.msra.mxu1 %v6944_v31  ;;  %11627 = vmatprep.mubr.msk.f32.mxu1 %vm12988_vm2, %v12987_v46  ;;  %v12465_v31 = vpack.c.bf16 %v9619_v30, %v9603_v29  ;;  %v9625_v29 = vld [vmem:[%s16914_s9 + $0x4b8] sm:$0xff] }
0x21d6   :  { %11630 = vmatprep.subr.mxu1 %v12987_v46 }
0x21d7   :  { %12466 = vmatprep.subr.bf16.mxu0 %v12465_v31 }
0x22a3   :  { %v7024_v40 = vpop.f32.mrb[98].mxu1 }
0x22a4   :  { %v7104_v61 = vmul.f32 0.25, %v7024_v40  ;;  %v11619_v32 = vpop.f32.mrb[99].mxu1  ;;  %v9621_v40 = vld [vmem:[%s16914_s9 + $0x498] sm:$0xff] }
0x22a5   :  { %v9618_v32 = vld [vmem:[%s16914_s9 + $0x480] sm:$0xff] }
0x22a6   :  { %v7106_v33 = vsel %vm565_vm3, %v7104_v61, -inf }
0x22a7   :  { %7107 = vmax.xlane.f32.xlu0 %v7106_v33  ;;  %v7100_v34 = vpop.f32.mrb[100].mxu1  ;;  %v12481_v33 = vpack.c.bf16 %v9621_v40, %v9605_v52 }
0x22a8   :  { %v7105_v35 = vmul.f32 0.25, %v7100_v34  ;;  %v11624_v36 = vpop.f32.mrb[101].mxu1 }
0x22a9   :  { %v9620_v36 = vld [vmem:[%s16914_s9 + $0x490] sm:$0xff] }
0x22aa   :  { %v7109_v39 = vsel %vm565_vm3, %v7105_v35, -inf }
0x22ab   :  { %7110 = vmax.xlane.f32.xlu1 %v7109_v39 }
0x2334   :  { %v7108_v9 = vpop.xlane.xlu0 %7107 }
0x2335   :  { %v7112_v57 = vsub.f32 %v7104_v61, %v7108_v9  ;;  %v9602_v61 = vld [vmem:[%s16914_s9 + $0x400] sm:$0xff]  ;;  %v9635_v9 = vld [vmem:[%s16914_s9 + $0x508] sm:$0xff] }
0x2336   :  { %v12467_v34 = vpack.c.bf16 %v9618_v32, %v9602_v61 }
0x2337   :  { %v7114_v0 = vmul.f32 1.442695, %v7112_v57  ;;  %v9651_v57 = vld [vmem:[%s16914_s9 + $0x588] sm:$0xff] }
0x2338   :  { %v7111_v4 = vpop.xlane.xlu1 %7110  ;;  %12468 = vmatpush1.bf16.msra.mxu0 %v12467_v34 }
0x2339   :  { %12945 = vpow2.f32 %v7114_v0  ;;  %v7113_v55 = vsub.f32 %v7105_v35, %v7111_v4  ;;  %v9604_v35 = vld [vmem:[%s16914_s9 + $0x410] sm:$0xff]  ;;  %v9637_v0 = vld [vmem:[%s16914_s9 + $0x518] sm:$0xff]  ;;  %v12469_v4 = vpack.c.bf16 %v9651_v57, %v9635_v9  ;;  %v7397_v9 = vrot.slane %v15494_v38, %v13194_v62 }
0x233a   :  { %v12483_v39 = vpack.c.bf16 %v9620_v36, %v9604_v35  ;;  %v7391_v35 = vrot.slane %v15494_v38, %v13177_v49  ;;  %v9639_v38 = vld [vmem:[%s16914_s9 + $0x528] sm:$0xff] }
0x233b   :  { %v7116_v20 = vmul.f32 1.442695, %v7113_v55  ;;  %v9653_v55 = vld [vmem:[%s16914_s9 + $0x598] sm:$0xff]  ;;  %12470 = vmatprep.subr.bf16.mxu0 %v12469_v4  ;;  %v9622_v4 = vld [vmem:[%s16914_s9 + $0x4a0] sm:$0xff] }
0x233d   :  { %12947 = vpow2.f32 %v7116_v20  ;;  %v9634_v20 = vld [vmem:[%s16914_s9 + $0x500] sm:$0xff] }
0x2343   :  { %v12946_v56 = vpop.eup %12945 }
0x2344   :  { %v7118_v53 = vsel %vm565_vm3, %v12946_v56, 0.0 }
0x2345   :  { %7119 = vadd.xlane.f32.xlu0 %v7118_v53  ;;  %v12485_v53 = vpack.c.bf16 %v9653_v55, %v9637_v0  ;;  %v9608_v55 = vld [vmem:[%s16914_s9 + $0x430] sm:$0xff] }
0x2347   :  { %v12948_v48 = vpop.eup %12947 }
0x2348   :  { %v7121_v6 = vsel %vm565_vm3, %v12948_v48, 0.0 }
0x2349   :  { %7122 = vadd.xlane.f32.xlu1 %v7121_v6  ;;  %v9636_v6 = vld [vmem:[%s16914_s9 + $0x510] sm:$0xff] }
0x23d2   :  { %v7120_v50 = vpop.xlane.xlu0 %7119 }
0x23d3   :  { %12949 = vrcp.f32 %v7120_v50  ;;  %v9652_v50 = vld [vmem:[%s16914_s9 + $0x590] sm:$0xff] }
0x23d6   :  { %v7123_v10 = vpop.xlane.xlu1 %7122 }
0x23d7   :  { %12951 = vrcp.f32 %v7123_v10  ;;  %v12487_v10 = vpack.c.bf16 %v9652_v50, %v9636_v6  ;;  %v9638_v50 = vld [vmem:[%s16914_s9 + $0x520] sm:$0xff] }
0x23dd   :  { %v12950_v59 = vpop.eup %12949 }
0x23de   :  { %v7125_v63 = vmul.f32 %v12950_v59, %v12946_v56  ;;  %v9650_v56 = vld [vmem:[%s16914_s9 + $0x580] sm:$0xff]  ;;  %v9667_v59 = vld [vmem:[%s16914_s9 + $0x608] sm:$0xff] }
0x23e0   :  { %11628 = vmatmul.mubr.msk.f32.vlgmr.msra.gmra.mrb[102].mxu1 %vm565_vm3, %v7125_v63  ;;  %v9683_v63 = vld [vmem:[%s16914_s9 + $0x688] sm:$0xff] }
0x23e1   :  { %v12952_v3 = vpop.eup %12951  ;;  %11631 = vmatpush3.msra.mxu1 %v6949_v37  ;;  %11632 = vmatprep.mubr.msk.f32.mxu1 %vm12988_vm2, %v12987_v46 }
0x23e2   :  { %v7127_v24 = vmul.f32 %v12952_v3, %v12948_v48  ;;  %12462 = vmatprep.subr.bf16.mxu1 %v12461_v5  ;;  %v12471_v48 = vpack.c.bf16 %v9650_v56, %v9634_v20  ;;  %v9669_v3 = vld [vmem:[%s16914_s9 + $0x618] sm:$0xff]  ;;  %v9624_v20 = vld [vmem:[%s16914_s9 + $0x4b0] sm:$0xff] }
0x23e3   :  { %v12515_v6 = vpack.c.bf16 %v9624_v20, %v9608_v55  ;;  %v9659_v55 = vld [vmem:[%s16914_s9 + $0x5c8] sm:$0xff]  ;;  %v9645_v20 = vld [vmem:[%s16914_s9 + $0x558] sm:$0xff] }
0x23e4   :  { %11633 = vmatmul.mubr.msk.f32.vlgmr.msra.gmra.mrb[104].mxu1 %vm565_vm3, %v7127_v24  ;;  %12472 = vmatpush1.bf16.msra.mxu0 %v12471_v48  ;;  %v12473_v24 = vpack.c.bf16 %v9683_v63, %v9667_v59 }
0x23e5   :  { %12464 = vmatpush3.bf16.msra.mxu1 %v12461_v5  ;;  %v9682_v5 = vld [vmem:[%s16914_s9 + $0x680] sm:$0xff] }
0x23e6   :  { %12482 = vmatprep.subr.bf16.mxu1 %v12481_v33  ;;  %12474 = vmatprep.subr.bf16.mxu0 %v12473_v24  ;;  %v9656_v24 = vld [vmem:[%s16914_s9 + $0x5b0] sm:$0xff] }
0x24b3   :  { %v7197_v27 = vpop.f32.mrb[102].mxu1 }
0x24b4   :  { %v11629_v17 = vpop.f32.mrb[103].mxu1  ;;  %11639 = vmatprep.mubr.msk.f32.mxu1 %vm59_vm0, %v7197_v27  ;;  %v12489_v27 = vpack.c.bf16 %v9685_v8, %v9669_v3  ;;  %v9640_v3 = vld [vmem:[%s16914_s9 + $0x530] sm:$0xff]  ;;  %v9671_v8 = vld [vmem:[%s16914_s9 + $0x628] sm:$0xff] }
0x24b5   :  { %v12475_v17 = vpack.c.bf16 %v9682_v5, %v9666_v1 }
0x24b7   :  { %v7270_v18 = vpop.f32.mrb[104].mxu1  ;;  %12476 = vmatpush1.bf16.msra.mxu0 %v12475_v17  ;;  %v9673_v17 = vld [vmem:[%s16914_s9 + $0x638] sm:$0xff] }
0x24b8   :  { %v11634_v23 = vpop.f32.mrb[105].mxu1  ;;  %11640 = vmatmul.mubr.msk.f32.vlgmr.msra.gmra.mrb[76].mxu1 %vm59_vm0, %v7270_v18  ;;  %v9668_v18 = vld [vmem:[%s16914_s9 + $0x610] sm:$0xff] }
0x24b9   :  { %7761 = vmatprep.mubr.f32.mxu1 %v12987_v46  ;;  %12484 = vmatpush1.bf16.msra.mxu1 %v12483_v39  ;;  %v9684_v23 = vld [vmem:[%s16914_s9 + $0x690] sm:$0xff]  ;;  %v9606_v39 = vld [vmem:[%s16914_s9 + $0x420] sm:$0xff] }
0x24ba   :  { %12486 = vmatprep.subr.bf16.mxu1 %v12485_v53  ;;  %v9657_v53 = vld [vmem:[%s16914_s9 + $0x5b8] sm:$0xff]  ;;  %v12499_v48 = vpack.c.bf16 %v9622_v4, %v9606_v39  ;;  %v9643_v4 = vld [vmem:[%s16914_s9 + $0x548] sm:$0xff] }
0x24bd   :  { %12488 = vmatpush1.bf16.msra.mxu1 %v12487_v10  ;;  %v9654_v10 = vld [vmem:[%s16914_s9 + $0x5a0] sm:$0xff] }
0x24be   :  { %12490 = vmatprep.subr.bf16.mxu1 %v12489_v27  ;;  %v9687_v27 = vld [vmem:[%s16914_s9 + $0x6a8] sm:$0xff] }
0x258b   :  { %v11641_v44 = vpop.f32.mrb[76].mxu1 }
0x258c   :  { %v12863_v14 = vadd.f32 %v11641_v44, %v5335_v16  ;;  %v7349_v13 = vpop.f32.mrb[77].mxu1  ;;  %v9699_v44 = vld [vmem:[%s16914_s9 + $0x708] sm:$0xff] }
0x258d   :  { %v12864_v2 = vadd.f32 %v7349_v13, %v5335_v16  ;;  %v12491_v16 = vpack.c.bf16 %v9684_v23, %v9668_v18  ;;  %v9701_v13 = vld [vmem:[%s16914_s9 + $0x718] sm:$0xff]  ;;  %v12503_v23 = vpack.c.bf16 %v9654_v10, %v9638_v50  ;;  %v9675_v50 = vld [vmem:[%s16914_s9 + $0x648] sm:$0xff]  ;;  %v12533_v10 = vpack.c.bf16 %v9659_v55, %v9643_v4  ;;  %v9646_v55 = vld [vmem:[%s16914_s9 + $0x560] sm:$0xff] }
0x258e   :  { %v7361_v28 = vadd.f32 %v12863_v14, %v15058_v43  ;;  %v9715_v14 = vld [vmem:[%s16914_s9 + $0x788] sm:$0xff]  ;;  %v9689_v18 = vld [vmem:[%s16914_s9 + $0x6b8] sm:$0xff] }
0x258f   :  { %v7360_v7 = vadd.f32 %v12864_v2, %v15045_v15  ;;  %12492 = vmatpush1.bf16.msra.mxu1 %v12491_v16  ;;  %v12477_v2 = vpack.c.bf16 %v9715_v14, %v9699_v44  ;;  %v12519_v16 = vpack.c.bf16 %v9656_v24, %v9640_v3  ;;  %v9670_v44 = vld [vmem:[%s16914_s9 + $0x620] sm:$0xff]  ;;  %v9691_v3 = vld [vmem:[%s16914_s9 + $0x6c8] sm:$0xff]  ;;  %v9677_v24 = vld [vmem:[%s16914_s9 + $0x658] sm:$0xff] }
0x2590   :  { %v7365_v11 = vsel %vm155_vm1, %v7361_v28, 0.0  ;;  %v9686_v14 = vld [vmem:[%s16914_s9 + $0x6a0] sm:$0xff] }
0x2591   :  { %7366 = vadd.xlane.f32.xlu1 %v7365_v11  ;;  %v7362_v58 = vsel %vm155_vm1, %v7360_v7, 0.0  ;;  %v9714_v11 = vld [vmem:[%s16914_s9 + $0x780] sm:$0xff]  ;;  %12478 = vmatprep.subr.bf16.mxu0 %v12477_v2  ;;  %v12505_v2 = vpack.c.bf16 %v9687_v27, %v9671_v8  ;;  %v9693_v8 = vld [vmem:[%s16914_s9 + $0x6d8] sm:$0xff] }
0x2592   :  { %7363 = vadd.xlane.f32.xlu0 %v7362_v58  ;;  %v9674_v27 = vld [vmem:[%s16914_s9 + $0x640] sm:$0xff] }
0x261e   :  { %v7367_v12 = vpop.xlane.xlu1 %7366 }
0x261f   :  { %v7369_v37 = vmul.f32 0.015625, %v7367_v12  ;;  %v7364_v41 = vpop.xlane.xlu0 %7363 }
0x2620   :  { %v7368_v19 = vmul.f32 0.015625, %v7364_v41  ;;  %v9716_v41 = vld [vmem:[%s16914_s9 + $0x790] sm:$0xff] }
0x2621   :  { %v15502_v21 = vsub.f32 %v7361_v28, %v7369_v37  ;;  %v9717_v28 = vld [vmem:[%s16914_s9 + $0x798] sm:$0xff]  ;;  %v9700_v37 = vld [vmem:[%s16914_s9 + $0x710] sm:$0xff] }
0x2622   :  { %v15504_v22 = vsub.f32 %v7360_v7, %v7368_v19  ;;  %v9698_v7 = vld [vmem:[%s16914_s9 + $0x700] sm:$0xff]  ;;  %v12493_v58 = vpack.c.bf16 %v9717_v28, %v9701_v13  ;;  %v12495_v19 = vpack.c.bf16 %v9716_v41, %v9700_v37  ;;  %v12521_v28 = vpack.c.bf16 %v9689_v18, %v9673_v17  ;;  %v9705_v37 = vld [vmem:[%s16914_s9 + $0x738] sm:$0xff] }
0x2623   :  { %v7373_v25 = vmul.f32 %v15502_v21, %v15502_v21  ;;  %v12479_v12 = vpack.c.bf16 %v9714_v11, %v9698_v7  ;;  %v9672_v7 = vld [vmem:[%s16914_s9 + $0x630] sm:$0xff]  ;;  %v9721_v41 = vld [vmem:[%s16914_s9 + $0x7b8] sm:$0xff]  ;;  %v9690_v17 = vld [vmem:[%s16914_s9 + $0x6c0] sm:$0xff]  ;;  %v12537_v18 = vpack.c.bf16 %v9691_v3, %v9675_v50 }
0x2624   :  { %v7372_v15 = vmul.f32 %v15504_v22, %v15504_v22  ;;  %12494 = vmatprep.subr.bf16.mxu1 %v12493_v58  ;;  %v9688_v11 = vld [vmem:[%s16914_s9 + $0x6b0] sm:$0xff]  ;;  %v9703_v58 = vld [vmem:[%s16914_s9 + $0x728] sm:$0xff]  ;;  %v9697_v50 = vld [vmem:[%s16914_s9 + $0x6f8] sm:$0xff] }
0x2625   :  { %v7377_v43 = vsel %vm155_vm1, %v7373_v25, 0.0  ;;  %12480 = vmatpush1.bf16.msra.mxu0 %v12479_v12  ;;  %v9607_v25 = vld [vmem:[%s16914_s9 + $0x428] sm:$0xff]  ;;  %12496 = vmatpush1.bf16.msra.mxu1 %v12495_v19  ;;  %v12507_v19 = vpack.c.bf16 %v9686_v14, %v9670_v44  ;;  %v9692_v44 = vld [vmem:[%s16914_s9 + $0x6d0] sm:$0xff]  ;;  %v9678_v3 = vld [vmem:[%s16914_s9 + $0x660] sm:$0xff] }
0x2626   :  { %7378 = vadd.xlane.f32.xlu1 %v7377_v43  ;;  %v7374_v26 = vsel %vm155_vm1, %v7372_v15, 0.0  ;;  %v9623_v15 = vld [vmem:[%s16914_s9 + $0x4a8] sm:$0xff]  ;;  %v9609_v43 = vld [vmem:[%s16914_s9 + $0x438] sm:$0xff] }
0x2627   :  { %7375 = vadd.xlane.f32.xlu0 %v7374_v26  ;;  %v12497_v26 = vpack.c.bf16 %v9623_v15, %v9607_v25  ;;  %v12513_v30 = vpack.c.bf16 %v9625_v29, %v9609_v43  ;;  %v9719_v12 = vld [vmem:[%s16914_s9 + $0x7a8] sm:$0xff]  ;;  %v12523_v25 = vpack.c.bf16 %v9688_v11, %v9672_v7  ;;  %v9702_v15 = vld [vmem:[%s16914_s9 + $0x720] sm:$0xff]  ;;  %v12525_v29 = vpack.c.bf16 %v9721_v41, %v9705_v37  ;;  %v9725_v7 = vld [vmem:[%s16914_s9 + $0x7d8] sm:$0xff] }
0x2628   :  { %v9718_v43 = vld [vmem:[%s16914_s9 + $0x7a0] sm:$0xff]  ;;  %v9707_v14 = vld [vmem:[%s16914_s9 + $0x748] sm:$0xff]  ;;  %v12539_v11 = vpack.c.bf16 %v9690_v17, %v9674_v27  ;;  %v9696_v27 = vld [vmem:[%s16914_s9 + $0x6f0] sm:$0xff] }
0x2629   :  { %12498 = vmatprep.subr.bf16.mxu0 %v12497_v26  ;;  %12514 = vmatprep.subr.bf16.mxu1 %v12513_v30  ;;  %v12509_v26 = vpack.c.bf16 %v9719_v12, %v9703_v58  ;;  %v9704_v30 = vld [vmem:[%s16914_s9 + $0x730] sm:$0xff]  ;;  %v9706_v12 = vld [vmem:[%s16914_s9 + $0x740] sm:$0xff]  ;;  %v9711_v17 = vld [vmem:[%s16914_s9 + $0x768] sm:$0xff] }
0x262a   :  { %v9722_v37 = vld [vmem:[%s16914_s9 + $0x7c0] sm:$0xff] }
0x26b3   :  { %v7379_v52 = vpop.xlane.xlu1 %7378 }
0x26b4   :  { %v7381_v31 = vmul.f32 0.015625, %v7379_v52  ;;  %v7376_v40 = vpop.xlane.xlu0 %7375  ;;  %v9720_v52 = vld [vmem:[%s16914_s9 + $0x7b0] sm:$0xff] }
0x26b5   :  { %v7380_v61 = vmul.f32 0.015625, %v7376_v40  ;;  %v9627_v40 = vld [vmem:[%s16914_s9 + $0x4c8] sm:$0xff] }
0x26b6   :  { %v7383_v32 = vadd.f32 1e-05, %v7381_v31  ;;  %v9611_v31 = vld [vmem:[%s16914_s9 + $0x448] sm:$0xff] }
0x26b7   :  { %v7382_v33 = vadd.f32 1e-05, %v7380_v61  ;;  %v9613_v61 = vld [vmem:[%s16914_s9 + $0x458] sm:$0xff] }
0x26b8   :  { %12953 = vrsqrt.f32 %v7383_v32  ;;  %v9629_v32 = vld [vmem:[%s16914_s9 + $0x4d8] sm:$0xff] }
0x26b9   :  { %12955 = vrsqrt.f32 %v7382_v33  ;;  %v12511_v33 = vpack.c.bf16 %v9718_v43, %v9702_v15  ;;  %v12545_v39 = vpack.c.bf16 %v9629_v32, %v9613_v61  ;;  %v9724_v15 = vld [vmem:[%s16914_s9 + $0x7d0] sm:$0xff]  ;;  %v9615_v43 = vld [vmem:[%s16914_s9 + $0x468] sm:$0xff] }
0x26c2   :  { %v12954_v34 = vpop.eup %12953 }
0x26c3   :  { %v12956_v36 = vpop.eup %12955  ;;  %v7387_v57 = vmul.f32 %v12954_v34, %v15502_v21  ;;  %v9655_v21 = vld [vmem:[%s16914_s9 + $0x5a8] sm:$0xff]  ;;  %v12527_v34 = vpack.c.bf16 %v9720_v52, %v9704_v30  ;;  %v9633_v30 = vld [vmem:[%s16914_s9 + $0x4f8] sm:$0xff]  ;;  %v12543_v52 = vpack.c.bf16 %v9722_v37, %v9706_v12  ;;  %v9728_v12 = vld [vmem:[%s16914_s9 + $0x7f0] sm:$0xff] }
0x26c4   :  { %v7386_v0 = vmul.f32 %v12956_v36, %v15504_v22  ;;  %v9641_v22 = vld [vmem:[%s16914_s9 + $0x538] sm:$0xff]  ;;  %v12501_v1 = vpack.c.bf16 %v9655_v21, %v9639_v38  ;;  %v12529_v36 = vpack.c.bf16 %v9627_v40, %v9611_v31  ;;  %v9614_v40 = vld [vmem:[%s16914_s9 + $0x460] sm:$0xff] }
0x26c5   :  { %v7393_v59 = vmul.f32 %v7391_v35, %v7387_v57  ;;  %v12517_v5 = vpack.c.bf16 %v9657_v53, %v9641_v22  ;;  %v9612_v57 = vld [vmem:[%s16914_s9 + $0x450] sm:$0xff]  ;;  %v9661_v38 = vld [vmem:[%s16914_s9 + $0x5d8] sm:$0xff]  ;;  %v9642_v22 = vld [vmem:[%s16914_s9 + $0x540] sm:$0xff] }
0x26c6   :  { %v7392_v56 = vmul.f32 %v7391_v35, %v7386_v0  ;;  %v9610_v35 = vld [vmem:[%s16914_s9 + $0x440] sm:$0xff]  ;;  %v9628_v0 = vld [vmem:[%s16914_s9 + $0x4d0] sm:$0xff] }
0x26c7   :  { %v15686_v13 = vadd.f32 %v7397_v9, %v7393_v59  ;;  %v12547_v21 = vpack.c.bf16 %v9628_v0, %v9612_v57  ;;  %v9658_v53 = vld [vmem:[%s16914_s9 + $0x5c0] sm:$0xff]  ;;  %v12549_v59 = vpack.c.bf16 %v9661_v38, %v9645_v20  ;;  %v9665_v57 = vld [vmem:[%s16914_s9 + $0x5f8] sm:$0xff]  ;;  %v9648_v38 = vld [vmem:[%s16914_s9 + $0x570] sm:$0xff] }
0x26c8   :  { %v15656_v63 = vadd.f32 %v7397_v9, %v7392_v56  ;;  %v9626_v9 = vld [vmem:[%s16914_s9 + $0x4c0] sm:$0xff] }
0x26c9   :  { %v12531_v56 = vpack.c.bf16 %v9626_v9, %v9610_v35  ;;  %v9632_v35 = vld [vmem:[%s16914_s9 + $0x4f0] sm:$0xff]  ;;  %v9649_v9 = vld [vmem:[%s16914_s9 + $0x578] sm:$0xff]  ;;  %v9662_v20 = vld [vmem:[%s16914_s9 + $0x5e0] sm:$0xff] }
0x26ca   :  { %9732 = vmatmul.mubr.msk.f32.vlgmr.msra.gmra.mrb[76].mxu0 %vm155_vm1, %v15656_v63  ;;  %9734 = vmatmul.mubr.msk.f32.vlgmr.msra.gmra.mrb[106].mxu1 %vm155_vm1, %v15656_v63  ;;  %v9764_v37 = vld [vmem:[%s16916_s11 + $0x880] sm:$0xff] }
0x26cb   :  { %12500 = vmatpush1.bf16.msra.mxu0 %v12499_v48  ;;  %12516 = vmatpush1.bf16.msra.mxu1 %v12515_v6  ;;  %v9644_v48 = vld [vmem:[%s16914_s9 + $0x550] sm:$0xff] }
0x26cc   :  { %7690 = vmatprep.mubr.f32.mxu0 %v12987_v46  ;;  %7767 = vmatprep.mubr.f32.mxu1 %v12987_v46  ;;  %v9660_v6 = vld [vmem:[%s16914_s9 + $0x5d0] sm:$0xff] }
0x26cd   :  { %12502 = vmatprep.subr.bf16.mxu0 %v12501_v1  ;;  %12518 = vmatprep.subr.bf16.mxu1 %v12517_v5  ;;  %v12535_v1 = vpack.c.bf16 %v9658_v53, %v9642_v22  ;;  %v12551_v5 = vpack.c.bf16 %v9660_v6, %v9644_v48  ;;  %v12581_v53 = vpack.c.bf16 %v9665_v57, %v9649_v9  ;;  %v9695_v48 = vld [vmem:[%s16914_s9 + $0x6e8] sm:$0xff]  ;;  %v9681_v6 = vld [vmem:[%s16914_s9 + $0x678] sm:$0xff] }
0x26ce   :  { %9733 = vmatmul.mubr.msk.f32.gmra.mrb[78].mxu0 %vm155_vm1, %v15686_v13  ;;  %9735 = vmatmul.mubr.msk.f32.gmra.mrb[108].mxu1 %vm155_vm1, %v15686_v13  ;;  %v9751_v9 = vld [vmem:[%s16916_s11 + $0x818] sm:$0xff] }
0x26cf   :  { %12504 = vmatpush1.bf16.msra.mxu0 %v12503_v23  ;;  %12520 = vmatpush1.bf16.msra.mxu1 %v12519_v16  ;;  %v12553_v23 = vpack.c.bf16 %v9693_v8, %v9677_v24  ;;  %v9676_v16 = vld [vmem:[%s16914_s9 + $0x650] sm:$0xff]  ;;  %v9694_v24 = vld [vmem:[%s16914_s9 + $0x6e0] sm:$0xff] }
0x26d0   :  { %12506 = vmatprep.subr.bf16.mxu0 %v12505_v2  ;;  %12522 = vmatprep.subr.bf16.mxu1 %v12521_v28  ;;  %v9723_v2 = vld [vmem:[%s16914_s9 + $0x7c8] sm:$0xff]  ;;  %v9709_v28 = vld [vmem:[%s16914_s9 + $0x758] sm:$0xff]  ;;  %v12555_v58 = vpack.c.bf16 %v9692_v44, %v9676_v16  ;;  %v12571_v44 = vpack.c.bf16 %v9694_v24, %v9678_v3  ;;  %v9770_v24 = vld [vmem:[%s16916_s11 + $0x8b0] sm:$0xff] }
0x26d1   :  { %7838 = vmatprep.mubr.f32.mxu0 %v12987_v46  ;;  %7915 = vmatprep.mubr.f32.mxu1 %v12987_v46  ;;  %v12541_v41 = vpack.c.bf16 %v9723_v2, %v9707_v14  ;;  %v9729_v16 = vld [vmem:[%s16914_s9 + $0x7f8] sm:$0xff]  ;;  %v9710_v2 = vld [vmem:[%s16914_s9 + $0x760] sm:$0xff]  ;;  %v9785_v3 = vld [vmem:[%s16916_s11 + $0x928] sm:$0xff] }
0x26d3   :  { %12508 = vmatpush1.bf16.msra.mxu0 %v12507_v19  ;;  %12524 = vmatpush1.bf16.msra.mxu1 %v12523_v25  ;;  %v12557_v19 = vpack.c.bf16 %v9725_v7, %v9709_v28  ;;  %v9708_v25 = vld [vmem:[%s16914_s9 + $0x750] sm:$0xff]  ;;  %v9726_v28 = vld [vmem:[%s16914_s9 + $0x7e0] sm:$0xff] }
0x26d4   :  { %12510 = vmatprep.subr.bf16.mxu0 %v12509_v26  ;;  %12526 = vmatprep.subr.bf16.mxu1 %v12525_v29  ;;  %v9631_v26 = vld [vmem:[%s16914_s9 + $0x4e8] sm:$0xff]  ;;  %v9617_v29 = vld [vmem:[%s16914_s9 + $0x478] sm:$0xff]  ;;  %v12559_v31 = vpack.c.bf16 %v9724_v15, %v9708_v25  ;;  %v12575_v15 = vpack.c.bf16 %v9726_v28, %v9710_v2  ;;  %v9772_v28 = vld [vmem:[%s16916_s11 + $0x8c0] sm:$0xff] }
0x26d5   :  { %v12561_v61 = vpack.c.bf16 %v9631_v26, %v9615_v43  ;;  %v12577_v32 = vpack.c.bf16 %v9633_v30, %v9617_v29  ;;  %v9797_v25 = vld [vmem:[%s16916_s11 + $0x988] sm:$0xff]  ;;  %v9748_v30 = vld [vmem:[%s16916_s11 + $0x800] sm:$0xff]  ;;  %v9787_v2 = vld [vmem:[%s16916_s11 + $0x938] sm:$0xff] }
0x26d7   :  { %12512 = vmatpush1.bf16.msra.mxu0 %v12511_v33  ;;  %12528 = vmatpush1.bf16.msra.mxu1 %v12527_v34  ;;  %v9630_v33 = vld [vmem:[%s16914_s9 + $0x4e0] sm:$0xff]  ;;  %v9616_v34 = vld [vmem:[%s16914_s9 + $0x470] sm:$0xff] }
0x26d8   :  { %12530 = vmatprep.subr.bf16.mxu0 %v12529_v36  ;;  %12546 = vmatprep.subr.bf16.mxu1 %v12545_v39  ;;  %v9647_v36 = vld [vmem:[%s16914_s9 + $0x568] sm:$0xff]  ;;  %v12563_v0 = vpack.c.bf16 %v9630_v33, %v9614_v40  ;;  %v12579_v4 = vpack.c.bf16 %v9632_v35, %v9616_v34  ;;  %v9798_v33 = vld [vmem:[%s16916_s11 + $0x990] sm:$0xff]  ;;  %v9799_v34 = vld [vmem:[%s16916_s11 + $0x998] sm:$0xff] }
0x26d9   :  { %v9663_v39 = vld [vmem:[%s16914_s9 + $0x5e8] sm:$0xff] }
0x26da   :  { %9736 = vmatmul.mubr.msk.f32.vlgmr.msra.gmra.mrb[80].mxu0 %vm155_vm1, %v15656_v63  ;;  %9738 = vmatmul.mubr.msk.f32.vlgmr.msra.gmra.mrb[110].mxu1 %vm155_vm1, %v15656_v63  ;;  %v12565_v22 = vpack.c.bf16 %v9663_v39, %v9647_v36  ;;  %v9781_v40 = vld [vmem:[%s16916_s11 + $0x908] sm:$0xff]  ;;  %v9750_v39 = vld [vmem:[%s16916_s11 + $0x810] sm:$0xff] }
0x26db   :  { %12532 = vmatpush1.bf16.msra.mxu0 %v12531_v56  ;;  %12548 = vmatpush1.bf16.msra.mxu1 %v12547_v21  ;;  %v9664_v56 = vld [vmem:[%s16914_s9 + $0x5f0] sm:$0xff]  ;;  %v9679_v21 = vld [vmem:[%s16914_s9 + $0x668] sm:$0xff] }
0x26dc   :  { %7844 = vmatprep.mubr.f32.mxu0 %v12987_v46  ;;  %7921 = vmatprep.mubr.f32.mxu1 %v12987_v46  ;;  %v12569_v8 = vpack.c.bf16 %v9695_v48, %v9679_v21  ;;  %v9801_v21 = vld [vmem:[%s16916_s11 + $0x9a8] sm:$0xff]  ;;  %v9752_v48 = vld [vmem:[%s16916_s11 + $0x820] sm:$0xff] }
0x26dd   :  { %12534 = vmatprep.subr.bf16.mxu0 %v12533_v10  ;;  %12550 = vmatprep.subr.bf16.mxu1 %v12549_v59  ;;  %v12567_v10 = vpack.c.bf16 %v9662_v20, %v9646_v55  ;;  %v12583_v59 = vpack.c.bf16 %v9664_v56, %v9648_v38  ;;  %v9783_v55 = vld [vmem:[%s16916_s11 + $0x918] sm:$0xff]  ;;  %v9768_v20 = vld [vmem:[%s16916_s11 + $0x8a0] sm:$0xff]  ;;  %v9769_v38 = vld [vmem:[%s16916_s11 + $0x8a8] sm:$0xff] }
0x26de   :  { %9737 = vmatmul.mubr.msk.f32.gmra.mrb[82].mxu0 %vm155_vm1, %v15686_v13  ;;  %9739 = vmatmul.mubr.msk.f32.gmra.mrb[112].mxu1 %vm155_vm1, %v15686_v13  ;;  %v9800_v56 = vld [vmem:[%s16916_s11 + $0x9a0] sm:$0xff] }
0x26df   :  { %12536 = vmatpush1.bf16.msra.mxu0 %v12535_v1  ;;  %12552 = vmatpush1.bf16.msra.mxu1 %v12551_v5  ;;  %v12585_v1 = vpack.c.bf16 %v9697_v50, %v9681_v6  ;;  %v9680_v5 = vld [vmem:[%s16914_s9 + $0x670] sm:$0xff]  ;;  %v9753_v6 = vld [vmem:[%s16916_s11 + $0x828] sm:$0xff]  ;;  %v12601_v50 = vpack.c.bf16 %v9769_v38, %v9768_v20  ;;  %v9760_v38 = vld [vmem:[%s16916_s11 + $0x860] sm:$0xff] }
0x26e0   :  { %12538 = vmatprep.subr.bf16.mxu0 %v12537_v18  ;;  %12554 = vmatprep.subr.bf16.mxu1 %v12553_v23  ;;  %v9727_v18 = vld [vmem:[%s16914_s9 + $0x7e8] sm:$0xff]  ;;  %v9713_v23 = vld [vmem:[%s16914_s9 + $0x778] sm:$0xff]  ;;  %v12587_v14 = vpack.c.bf16 %v9696_v27, %v9680_v5  ;;  %v12603_v27 = vpack.c.bf16 %v9753_v6, %v9752_v48 }
0x26e1   :  { %7992 = vmatprep.mubr.f32.mxu0 %v12987_v46  ;;  %8069 = vmatprep.mubr.f32.mxu1 %v12987_v46  ;;  %v12573_v7 = vpack.c.bf16 %v9727_v18, %v9711_v17  ;;  %v9803_v5 = vld [vmem:[%s16916_s11 + $0x9b8] sm:$0xff]  ;;  %v9754_v18 = vld [vmem:[%s16916_s11 + $0x830] sm:$0xff]  ;;  %v9793_v48 = vld [vmem:[%s16916_s11 + $0x968] sm:$0xff] }
0x26e3   :  { %12540 = vmatpush1.bf16.msra.mxu0 %v12539_v11  ;;  %12556 = vmatpush1.bf16.msra.mxu1 %v12555_v58  ;;  %v12589_v11 = vpack.c.bf16 %v9729_v16, %v9713_v23  ;;  %v9712_v58 = vld [vmem:[%s16914_s9 + $0x770] sm:$0xff]  ;;  %v9755_v23 = vld [vmem:[%s16916_s11 + $0x838] sm:$0xff] }
0x26e4   :  { %12542 = vmatprep.subr.bf16.mxu0 %v12541_v41  ;;  %12558 = vmatprep.subr.bf16.mxu1 %v12557_v19  ;;  %v9765_v41 = vld [vmem:[%s16916_s11 + $0x888] sm:$0xff]  ;;  %v9796_v19 = vld [vmem:[%s16916_s11 + $0x980] sm:$0xff]  ;;  %v12591_v43 = vpack.c.bf16 %v9728_v12, %v9712_v58  ;;  %v12607_v12 = vpack.c.bf16 %v9755_v23, %v9754_v18  ;;  %v9794_v18 = vld [vmem:[%s16916_s11 + $0x970] sm:$0xff] }
0x26e5   :  { %v12593_v26 = vpack.c.bf16 %v9765_v41, %v9764_v37  ;;  %v12625_v29 = vpack.c.bf16 %v9797_v25, %v9796_v19  ;;  %v9805_v58 = vld [vmem:[%s16916_s11 + $0x9c8] sm:$0xff]  ;;  %v9756_v41 = vld [vmem:[%s16916_s11 + $0x840] sm:$0xff]  ;;  %v9795_v23 = vld [vmem:[%s16916_s11 + $0x978] sm:$0xff] }
0x26e6   :  { %v9757_v19 = vld [vmem:[%s16916_s11 + $0x848] sm:$0xff] }
0x26e7   :  { %12544 = vmatpush1.bf16.msra.mxu0 %v12543_v52  ;;  %12560 = vmatpush1.bf16.msra.mxu1 %v12559_v31  ;;  %v9749_v52 = vld [vmem:[%s16916_s11 + $0x808] sm:$0xff]  ;;  %v9780_v31 = vld [vmem:[%s16916_s11 + $0x900] sm:$0xff] }
0x26e8   :  { %12562 = vmatprep.subr.bf16.mxu0 %v12561_v61  ;;  %12578 = vmatprep.subr.bf16.mxu1 %v12577_v32  ;;  %v9766_v61 = vld [vmem:[%s16916_s11 + $0x890] sm:$0xff]  ;;  %v9767_v32 = vld [vmem:[%s16916_s11 + $0x898] sm:$0xff]  ;;  %v12595_v35 = vpack.c.bf16 %v9749_v52, %v9748_v30  ;;  %v12627_v36 = vpack.c.bf16 %v9781_v40, %v9780_v31  ;;  %v12611_v40 = vpack.c.bf16 %v9757_v19, %v9756_v41 }
0x26e9   :  { %v12597_v57 = vpack.c.bf16 %v9767_v32, %v9766_v61  ;;  %v9775_v30 = vld [vmem:[%s16916_s11 + $0x8d8] sm:$0xff]  ;;  %v9806_v52 = vld [vmem:[%s16916_s11 + $0x9d0] sm:$0xff] }
0x26ea   :  { %9740 = vmatmul.mubr.msk.f32.vlgmr.msra.gmra.mrb[84].mxu0 %vm155_vm1, %v15656_v63  ;;  %9742 = vmatmul.mubr.msk.f32.vlgmr.msra.gmra.mrb[114].mxu1 %vm155_vm1, %v15656_v63  ;;  %v9807_v31 = vld [vmem:[%s16916_s11 + $0x9d8] sm:$0xff]  ;;  %v9758_v32 = vld [vmem:[%s16916_s11 + $0x850] sm:$0xff] }
0x26eb   :  { %12564 = vmatpush1.bf16.msra.mxu0 %v12563_v0  ;;  %12580 = vmatpush1.bf16.msra.mxu1 %v12579_v4  ;;  %v12629_v0 = vpack.c.bf16 %v9799_v34, %v9798_v33  ;;  %v9782_v4 = vld [vmem:[%s16916_s11 + $0x910] sm:$0xff]  ;;  %v9759_v33 = vld [vmem:[%s16916_s11 + $0x858] sm:$0xff] }
0x26ec   :  { %7998 = vmatprep.mubr.f32.mxu0 %v12987_v46  ;;  %8075 = vmatprep.mubr.f32.mxu1 %v12987_v46 }
0x26ed   :  { %12566 = vmatprep.subr.bf16.mxu0 %v12565_v22  ;;  %12582 = vmatprep.subr.bf16.mxu1 %v12581_v53  ;;  %v12599_v22 = vpack.c.bf16 %v9751_v9, %v9750_v39  ;;  %v12631_v53 = vpack.c.bf16 %v9783_v55, %v9782_v4  ;;  %v9791_v39 = vld [vmem:[%s16916_s11 + $0x958] sm:$0xff]  ;;  %v9776_v9 = vld [vmem:[%s16916_s11 + $0x8e0] sm:$0xff]  ;;  %v9809_v4 = vld [vmem:[%s16916_s11 + $0x9e8] sm:$0xff]  ;;  %v12615_v55 = vpack.c.bf16 %v9759_v33, %v9758_v32 }
0x26ee   :  { %9741 = vmatmul.mubr.msk.f32.gmra.mrb[86].mxu0 %vm155_vm1, %v15686_v13  ;;  %9743 = vmatmul.mubr.msk.f32.gmra.mrb[116].mxu1 %vm155_vm1, %v15686_v13  ;;  %v9831_v33 = vld [vmem:[%s16916_s11 + $0xa98] sm:$0xff] }
0x26ef   :  { %12568 = vmatpush1.bf16.msra.mxu0 %v12567_v10  ;;  %12584 = vmatpush1.bf16.msra.mxu1 %v12583_v59  ;;  %v12633_v10 = vpack.c.bf16 %v9801_v21, %v9800_v56  ;;  %v9784_v59 = vld [vmem:[%s16916_s11 + $0x920] sm:$0xff] }
0x26f0   :  { %12570 = vmatprep.subr.bf16.mxu0 %v12569_v8  ;;  %12586 = vmatprep.subr.bf16.mxu1 %v12585_v1  ;;  %v9771_v8 = vld [vmem:[%s16916_s11 + $0x8b8] sm:$0xff]  ;;  %v9802_v1 = vld [vmem:[%s16916_s11 + $0x9b0] sm:$0xff]  ;;  %v12635_v17 = vpack.c.bf16 %v9785_v3, %v9784_v59 }
0x26f1   :  { %8146 = vmatprep.mubr.f32.mxu0 %v12987_v46  ;;  %8223 = vmatprep.mubr.f32.mxu1 %v12987_v46  ;;  %v12605_v16 = vpack.c.bf16 %v9771_v8, %v9770_v24  ;;  %v9779_v59 = vld [vmem:[%s16916_s11 + $0x8f8] sm:$0xff]  ;;  %v9810_v3 = vld [vmem:[%s16916_s11 + $0x9f0] sm:$0xff] }
0x26f2   :  { %v9811_v8 = vld [vmem:[%s16916_s11 + $0x9f8] sm:$0xff] }
0x26f3   :  { %12572 = vmatpush1.bf16.msra.mxu0 %v12571_v44  ;;  %12588 = vmatpush1.bf16.msra.mxu1 %v12587_v14  ;;  %v12637_v44 = vpack.c.bf16 %v9803_v5, %v9802_v1  ;;  %v9786_v14 = vld [vmem:[%s16916_s11 + $0x930] sm:$0xff]  ;;  %v9763_v5 = vld [vmem:[%s16916_s11 + $0x878] sm:$0xff] }
0x26f4   :  { %12574 = vmatprep.subr.bf16.mxu0 %v12573_v7  ;;  %12590 = vmatprep.subr.bf16.mxu1 %v12589_v11  ;;  %v9773_v7 = vld [vmem:[%s16916_s11 + $0x8c8] sm:$0xff]  ;;  %v9804_v11 = vld [vmem:[%s16916_s11 + $0x9c0] sm:$0xff]  ;;  %v12639_v37 = vpack.c.bf16 %v9787_v2, %v9786_v14  ;;  %v9762_v1 = vld [vmem:[%s16916_s11 + $0x870] sm:$0xff] }
0x26f5   :  { %v12609_v25 = vpack.c.bf16 %v9773_v7, %v9772_v28  ;;  %v9829_v14 = vld [vmem:[%s16916_s11 + $0xa88] sm:$0xff]  ;;  %v9860_v2 = vld [vmem:[%s16916_s11 + $0xb80] sm:$0xff] }
0x26f6   :  { %v9861_v7 = vld [vmem:[%s16916_s11 + $0xb88] sm:$0xff] }
0x26f7   :  { %12576 = vmatpush1.bf16.msra.mxu0 %v12575_v15  ;;  %12592 = vmatpush1.bf16.msra.mxu1 %v12591_v43  ;;  %v12641_v15 = vpack.c.bf16 %v9805_v58, %v9804_v11  ;;  %v9788_v43 = vld [vmem:[%s16916_s11 + $0x940] sm:$0xff]  ;;  %v12689_v11 = vpack.c.bf16 %v9861_v7, %v9860_v2  ;;  %v16159_v58 = vld [vmem:[%s16915_s10 + $0x10] sm:$0xff] }
0x26f8   :  { %12594 = vmatprep.subr.bf16.mxu0 %v12593_v26  ;;  %12626 = vmatprep.subr.bf16.mxu1 %v12625_v29  ;;  %v9789_v26 = vld [vmem:[%s16916_s11 + $0x948] sm:$0xff]  ;;  %v9774_v29 = vld [vmem:[%s16916_s11 + $0x8d0] sm:$0xff]  ;;  %v7541_v41 = vrot.slane %v16159_v58, %v13177_v49  ;;  %v7549_v19 = vrot.slane %v16159_v58, %v14265_v42  ;;  %v9816_v2 = vld [vmem:[%s16916_s11 + $0xa20] sm:$0xff] }
0x26f9   :  { %v12643_v61 = vpack.c.bf16 %v9789_v26, %v9788_v43  ;;  %v12613_v34 = vpack.c.bf16 %v9775_v30, %v9774_v29  ;;  %v9844_v29 = vld [vmem:[%s16916_s11 + $0xb00] sm:$0xff]  ;;  %v9845_v30 = vld [vmem:[%s16916_s11 + $0xb08] sm:$0xff] }
0x26fa   :  { %9744 = vmatmul.mubr.msk.f32.vlgmr.msra.gmra.mrb[88].mxu0 %vm155_vm1, %v15656_v63  ;;  %9746 = vmatmul.mubr.msk.f32.vlgmr.msra.gmra.mrb[118].mxu1 %vm155_vm1, %v15656_v63 }
0x26fb   :  { %8152 = vmatprep.mubr.f32.mxu0 %v12987_v46  ;;  %8229 = vmatprep.mubr.f32.mxu1 %v12987_v46 }
0x26fc   :  { %12596 = vmatpush3.bf16.msra.mxu0 %v12595_v35  ;;  %12628 = vmatpush3.bf16.msra.mxu1 %v12627_v36  ;;  %v12645_v35 = vpack.c.bf16 %v9807_v31, %v9806_v52  ;;  %v9790_v36 = vld [vmem:[%s16916_s11 + $0x950] sm:$0xff] }
0x26fd   :  { %12598 = vmatprep.subr.bf16.mxu0 %v12597_v57  ;;  %12630 = vmatprep.subr.bf16.mxu1 %v12629_v0  ;;  %v9777_v57 = vld [vmem:[%s16916_s11 + $0x8e8] sm:$0xff]  ;;  %v9808_v0 = vld [vmem:[%s16916_s11 + $0x9e0] sm:$0xff]  ;;  %v12647_v20 = vpack.c.bf16 %v9791_v39, %v9790_v36  ;;  %v9830_v52 = vld [vmem:[%s16916_s11 + $0xa90] sm:$0xff] }
0x26fe   :  { %9745 = vmatmul.mubr.msk.f32.gmra.mrb[90].mxu0 %vm155_vm1, %v15686_v13  ;;  %9747 = vmatmul.mubr.msk.f32.gmra.mrb[120].mxu1 %vm155_vm1, %v15686_v13  ;;  %v12617_v56 = vpack.c.bf16 %v9777_v57, %v9776_v9  ;;  %v12649_v21 = vpack.c.bf16 %v9809_v4, %v9808_v0  ;;  %v12691_v57 = vpack.c.bf16 %v9845_v30, %v9844_v29  ;;  %v9814_v0 = vld [vmem:[%s16916_s11 + $0xa10] sm:$0xff] }
0x2700   :  { %12600 = vmatpush3.bf16.msra.mxu0 %v12599_v22  ;;  %12632 = vmatpush3.bf16.msra.mxu1 %v12631_v53  ;;  %v9761_v22 = vld [vmem:[%s16916_s11 + $0x868] sm:$0xff]  ;;  %v9792_v53 = vld [vmem:[%s16916_s11 + $0x960] sm:$0xff] }
0x2701   :  { %12602 = vmatprep.subr.bf16.mxu0 %v12601_v50  ;;  %12634 = vmatprep.subr.bf16.mxu1 %v12633_v10  ;;  %v12619_v6 = vpack.c.bf16 %v9761_v22, %v9760_v38  ;;  %v12651_v50 = vpack.c.bf16 %v9793_v48, %v9792_v53  ;;  %v9778_v10 = vld [vmem:[%s16916_s11 + $0x8f0] sm:$0xff]  ;;  %v9815_v22 = vld [vmem:[%s16916_s11 + $0xa18] sm:$0xff] }
0x2702   :  { %v12621_v24 = vpack.c.bf16 %v9779_v59, %v9778_v10  ;;  %v9846_v53 = vld [vmem:[%s16916_s11 + $0xb10] sm:$0xff] }
0x2704   :  { %12604 = vmatpush3.bf16.msra.mxu0 %v12603_v27  ;;  %12636 = vmatpush3.bf16.msra.mxu1 %v12635_v17  ;;  %v12653_v27 = vpack.c.bf16 %v9811_v8, %v9810_v3  ;;  %v12623_v17 = vpack.c.bf16 %v9763_v5, %v9762_v1  ;;  %v9832_v8 = vld [vmem:[%s16916_s11 + $0xaa0] sm:$0xff] }
0x2705   :  { %12606 = vmatprep.subr.bf16.mxu0 %v12605_v16  ;;  %12638 = vmatprep.subr.bf16.mxu1 %v12637_v44  ;;  %v12655_v16 = vpack.c.bf16 %v9795_v23, %v9794_v18  ;;  %v9828_v44 = vld [vmem:[%s16916_s11 + $0xa80] sm:$0xff]  ;;  %v9865_v18 = vld [vmem:[%s16916_s11 + $0xba8] sm:$0xff] }
0x2706   :  { %v12657_v28 = vpack.c.bf16 %v9829_v14, %v9828_v44  ;;  %v12663_v44 = vpack.c.bf16 %v9815_v22, %v9814_v0 }
0x2708   :  { %12608 = vmatpush3.bf16.msra.mxu0 %v12607_v12  ;;  %12640 = vmatpush3.bf16.msra.mxu1 %v12639_v37  ;;  %v7537_v12 = vrot.slane %v16159_v58, %v13183_v51  ;;  %v7545_v37 = vrot.slane %v16159_v58, %v13194_v62 }
0x2709   :  { %12610 = vmatprep.subr.bf16.mxu0 %v12609_v25  ;;  %12642 = vmatprep.subr.bf16.mxu1 %v12641_v15  ;;  %v9812_v25 = vld [vmem:[%s16916_s11 + $0xa00] sm:$0xff]  ;;  %v9813_v15 = vld [vmem:[%s16916_s11 + $0xa08] sm:$0xff] }
0x270a   :  { %v12659_v9 = vpack.c.bf16 %v9813_v15, %v9812_v25  ;;  %v9834_v25 = vld [vmem:[%s16916_s11 + $0xab0] sm:$0xff]  ;;  %v9835_v15 = vld [vmem:[%s16916_s11 + $0xab8] sm:$0xff] }
0x270c   :  { %12612 = vmatpush3.bf16.msra.mxu0 %v12611_v40  ;;  %12644 = vmatpush3.bf16.msra.mxu1 %v12643_v61 }
0x270d   :  { %12614 = vmatprep.subr.bf16.mxu0 %v12613_v34  ;;  %12646 = vmatprep.subr.bf16.mxu1 %v12645_v35  ;;  %v9862_v34 = vld [vmem:[%s16916_s11 + $0xb90] sm:$0xff]  ;;  %v9863_v35 = vld [vmem:[%s16916_s11 + $0xb98] sm:$0xff] }
0x2710   :  { %12616 = vmatpush3.bf16.msra.mxu0 %v12615_v55  ;;  %12648 = vmatpush3.bf16.msra.mxu1 %v12647_v20 }
0x2711   :  { %12618 = vmatprep.subr.bf16.mxu0 %v12617_v56  ;;  %12650 = vmatprep.subr.bf16.mxu1 %v12649_v21  ;;  %v12661_v56 = vpack.c.bf16 %v9831_v33, %v9830_v52  ;;  %v12693_v21 = vpack.c.bf16 %v9863_v35, %v9862_v34  ;;  %v9818_v52 = vld [vmem:[%s16916_s11 + $0xa30] sm:$0xff]  ;;  %v9851_v33 = vld [vmem:[%s16916_s11 + $0xb38] sm:$0xff]  ;;  %v9836_v34 = vld [vmem:[%s16916_s11 + $0xac0] sm:$0xff]  ;;  %v16258_v35 = vrot.slane %v16159_v58, %v14339_v45 }
0x2714   :  { %12620 = vmatpush3.bf16.msra.mxu0 %v12619_v6  ;;  %12652 = vmatpush3.bf16.msra.mxu1 %v12651_v50 }
0x2715   :  { %12622 = vmatprep.subr.bf16.mxu0 %v12621_v24  ;;  %12654 = vmatprep.subr.bf16.mxu1 %v12653_v27  ;;  %v9847_v24 = vld [vmem:[%s16916_s11 + $0xb18] sm:$0xff]  ;;  %v9833_v27 = vld [vmem:[%s16916_s11 + $0xaa8] sm:$0xff] }
0x2716   :  { %v12695_v14 = vpack.c.bf16 %v9847_v24, %v9846_v53  ;;  %v9839_v24 = vld [vmem:[%s16916_s11 + $0xad8] sm:$0xff] }
0x2718   :  { %12624 = vmatpush3.bf16.msra.mxu0 %v12623_v17  ;;  %12656 = vmatpush3.bf16.msra.mxu1 %v12655_v16  ;;  %v9864_v17 = vld [vmem:[%s16916_s11 + $0xba0] sm:$0xff] }
0x2719   :  { %12658 = vmatprep.subr.bf16.mxu0 %v12657_v28  ;;  %12690 = vmatprep.subr.bf16.mxu1 %v12689_v11  ;;  %v9817_v28 = vld [vmem:[%s16916_s11 + $0xa28] sm:$0xff] }
0x271a   :  { %v12667_v29 = vpack.c.bf16 %v9817_v28, %v9816_v2 }
0x279d   :  { %v7686_v43 = vpop.f32.mrb[76].mxu0  ;;  %v7763_v26 = vpop.f32.mrb[106].mxu1 }
0x279e   :  { %v7687_v31 = vadd.f32 %v7686_v43, %v7537_v12  ;;  %v7764_v40 = vadd.f32 %v7763_v26, %v7545_v37  ;;  %v7688_v61 = vpop.f32.mrb[77].mxu0  ;;  %v7765_v32 = vpop.f32.mrb[107].mxu1  ;;  %v9866_v43 = vld [vmem:[%s16916_s11 + $0xbb0] sm:$0xff]  ;;  %v9867_v26 = vld [vmem:[%s16916_s11 + $0xbb8] sm:$0xff] }
0x279f   :  { %v7689_v36 = vadd.f32 %v7688_v61, %v7541_v41  ;;  %v7766_v39 = vadd.f32 %v7765_v32, %v7549_v19  ;;  %v12701_v61 = vpack.c.bf16 %v9867_v26, %v9866_v43  ;;  %v9850_v32 = vld [vmem:[%s16916_s11 + $0xb30] sm:$0xff] }
0x27a0   :  { %v8236_v48 = vmax.f32 %v7687_v31, 0.0  ;;  %v8238_v6 = vmax.f32 %v7764_v40, 0.0  ;;  %v9819_v31 = vld [vmem:[%s16916_s11 + $0xa38] sm:$0xff]  ;;  %v12669_v40 = vpack.c.bf16 %v9835_v15, %v9834_v25  ;;  %v9872_v25 = vld [vmem:[%s16916_s11 + $0xbe0] sm:$0xff]  ;;  %v9873_v15 = vld [vmem:[%s16916_s11 + $0xbe8] sm:$0xff] }
0x27a1   :  { %v8237_v4 = vmax.f32 %v7689_v36, 0.0  ;;  %v8239_v55 = vmax.f32 %v7766_v39, 0.0  ;;  %v7692_v20 = vpop.f32.mrb[78].mxu0  ;;  %v7769_v38 = vpop.f32.mrb[108].mxu1  ;;  %v16262_v36 = vrot.slane %v16159_v58, %v14342_v47  ;;  %v9837_v39 = vld [vmem:[%s16916_s11 + $0xac8] sm:$0xff] }
0x27a2   :  { %v7693_v50 = vadd.f32 %v7692_v20, %v7537_v12  ;;  %v7770_v10 = vadd.f32 %v7769_v38, %v7545_v37  ;;  %v7694_v59 = vpop.f32.mrb[79].mxu0  ;;  %v7771_v3 = vpop.f32.mrb[109].mxu1  ;;  %v12665_v12 = vpack.c.bf16 %v9833_v27, %v9832_v8  ;;  %v12697_v37 = vpack.c.bf16 %v9865_v18, %v9864_v17  ;;  %v9820_v38 = vld [vmem:[%s16916_s11 + $0xa40] sm:$0xff]  ;;  %v9870_v8 = vld [vmem:[%s16916_s11 + $0xbd0] sm:$0xff] }
0x27a3   :  { %v7695_v1 = vadd.f32 %v7694_v59, %v7541_v41  ;;  %v7772_v5 = vadd.f32 %v7771_v3, %v7549_v19  ;;  %8593 = vmatprep.mubr.f32.mxu0 %v8237_v4  ;;  %8668 = vmatprep.mubr.f32.mxu1 %v8239_v55  ;;  %v9848_v41 = vld [vmem:[%s16916_s11 + $0xb20] sm:$0xff]  ;;  %v9849_v19 = vld [vmem:[%s16916_s11 + $0xb28] sm:$0xff]  ;;  %v12671_v55 = vpack.c.bf16 %v9819_v31, %v9818_v52 }
0x27a4   :  { %8594 = vmatmul.mubr.f32.vlgmr.msra.gmra.mrb[92].mxu0 %v8236_v48  ;;  %8669 = vmatmul.mubr.f32.vlgmr.msra.gmra.mrb[122].mxu1 %v8238_v6  ;;  %v8252_v7 = vmax.f32 %v7693_v50, 0.0  ;;  %v8254_v11 = vmax.f32 %v7770_v10, 0.0  ;;  %v12699_v30 = vpack.c.bf16 %v9849_v19, %v9848_v41  ;;  %v12703_v20 = vpack.c.bf16 %v9851_v33, %v9850_v32  ;;  %v9852_v6 = vld [vmem:[%s16916_s11 + $0xb40] sm:$0xff]  ;;  %v9853_v50 = vld [vmem:[%s16916_s11 + $0xb48] sm:$0xff]  ;;  %v9838_v10 = vld [vmem:[%s16916_s11 + $0xad0] sm:$0xff] }
0x27a5   :  { %v8253_v23 = vmax.f32 %v7695_v1, 0.0  ;;  %v8255_v16 = vmax.f32 %v7772_v5, 0.0  ;;  %12660 = vmatpush3.bf16.msra.mxu0 %v12659_v9  ;;  %12692 = vmatpush3.bf16.msra.mxu1 %v12691_v57  ;;  %v9868_v9 = vld [vmem:[%s16916_s11 + $0xbc0] sm:$0xff]  ;;  %v9869_v57 = vld [vmem:[%s16916_s11 + $0xbc8] sm:$0xff]  ;;  %v12673_v53 = vpack.c.bf16 %v9837_v39, %v9836_v34  ;;  %v9871_v1 = vld [vmem:[%s16916_s11 + $0xbd8] sm:$0xff]  ;;  %v12713_v31 = vpack.c.bf16 %v9873_v15, %v9872_v25 }
0x27a6   :  { %12662 = vmatprep.subr.bf16.mxu0 %v12661_v56  ;;  %12694 = vmatprep.subr.bf16.mxu1 %v12693_v21  ;;  %v9821_v56 = vld [vmem:[%s16916_s11 + $0xa48] sm:$0xff]  ;;  %v12705_v48 = vpack.c.bf16 %v9869_v57, %v9868_v9  ;;  %v9840_v41 = vld [vmem:[%s16916_s11 + $0xae0] sm:$0xff]  ;;  %v9842_v32 = vld [vmem:[%s16916_s11 + $0xaf0] sm:$0xff]  ;;  %v7553_v9 = vrot.slane %v16159_v58, %v14448_v54 }
0x27a7   :  { %8598 = vmatprep.mubr.f32.mxu0 %v8253_v23  ;;  %8673 = vmatprep.mubr.f32.mxu1 %v8255_v16  ;;  %v12675_v23 = vpack.c.bf16 %v9821_v56, %v9820_v38  ;;  %v12707_v16 = vpack.c.bf16 %v9853_v50, %v9852_v6  ;;  %v9841_v19 = vld [vmem:[%s16916_s11 + $0xae8] sm:$0xff]  ;;  %v9843_v33 = vld [vmem:[%s16916_s11 + $0xaf8] sm:$0xff]  ;;  %v9874_v34 = vld [vmem:[%s16916_s11 + $0xbf0] sm:$0xff] }
0x27a8   :  { %8599 = vmatmul.mubr.f32.gmra.mrb[94].mxu0 %v8252_v7  ;;  %8674 = vmatmul.mubr.f32.gmra.mrb[124].mxu1 %v8254_v11  ;;  %v12677_v7 = vpack.c.bf16 %v9839_v24, %v9838_v10  ;;  %v12709_v11 = vpack.c.bf16 %v9871_v1, %v9870_v8  ;;  %v12681_v52 = vpack.c.bf16 %v9841_v19, %v9840_v41  ;;  %v9875_v39 = vld [vmem:[%s16916_s11 + $0xbf8] sm:$0xff]  ;;  %v9858_v56 = vld [vmem:[%s16916_s11 + $0xb70] sm:$0xff]  ;;  %v9892_v6 = vld [vmem:[%s16916_s11 + $0xc80] sm:$0xff] }
0x27a9   :  { %12664 = vmatpush3.bf16.msra.mxu0 %v12663_v44  ;;  %12696 = vmatpush3.bf16.msra.mxu1 %v12695_v14  ;;  %v9822_v44 = vld [vmem:[%s16916_s11 + $0xa50] sm:$0xff]  ;;  %v9823_v14 = vld [vmem:[%s16916_s11 + $0xa58] sm:$0xff]  ;;  %v9893_v50 = vld [vmem:[%s16916_s11 + $0xc88] sm:$0xff] }
0x27aa   :  { %12666 = vmatprep.subr.bf16.mxu0 %v12665_v12  ;;  %12698 = vmatprep.subr.bf16.mxu1 %v12697_v37  ;;  %v9854_v12 = vld [vmem:[%s16916_s11 + $0xb50] sm:$0xff]  ;;  %v9855_v37 = vld [vmem:[%s16916_s11 + $0xb58] sm:$0xff]  ;;  %v12679_v43 = vpack.c.bf16 %v9823_v14, %v9822_v44  ;;  %v9925_v10 = vld [vmem:[%s16916_s11 + $0xd88] sm:$0xff] }
0x27ab   :  { %v12711_v26 = vpack.c.bf16 %v9855_v37, %v9854_v12  ;;  %v9827_v38 = vld [vmem:[%s16916_s11 + $0xa78] sm:$0xff]  ;;  %v9877_v24 = vld [vmem:[%s16916_s11 + $0xc08] sm:$0xff]  ;;  %v9894_v14 = vld [vmem:[%s16916_s11 + $0xc90] sm:$0xff] }
0x27ac   :  { %v9909_v44 = vld [vmem:[%s16916_s11 + $0xd08] sm:$0xff]  ;;  %v9895_v19 = vld [vmem:[%s16916_s11 + $0xc98] sm:$0xff]  ;;  %v9926_v25 = vld [vmem:[%s16916_s11 + $0xd90] sm:$0xff] }
0x27ad   :  { %v16273_v0 = vpop.f32.mrb[80].mxu0  ;;  %v16275_v4 = vpop.f32.mrb[110].mxu1  ;;  %12668 = vmatpush3.bf16.msra.mxu0 %v12667_v29  ;;  %12700 = vmatpush3.bf16.msra.mxu1 %v12699_v30  ;;  %v9824_v29 = vld [vmem:[%s16916_s11 + $0xa60] sm:$0xff]  ;;  %v9825_v30 = vld [vmem:[%s16916_s11 + $0xa68] sm:$0xff]  ;;  %v9927_v15 = vld [vmem:[%s16916_s11 + $0xd98] sm:$0xff] }
0x27ae   :  { %v7842_v21 = vpop.f32.mrb[81].mxu0  ;;  %v7919_v22 = vpop.f32.mrb[111].mxu1  ;;  %12670 = vmatprep.subr.bf16.mxu0 %v12669_v40  ;;  %12702 = vmatprep.subr.bf16.mxu1 %v12701_v61  ;;  %v9856_v40 = vld [vmem:[%s16916_s11 + $0xb60] sm:$0xff]  ;;  %v9857_v61 = vld [vmem:[%s16916_s11 + $0xb68] sm:$0xff]  ;;  %v12683_v57 = vpack.c.bf16 %v9825_v30, %v9824_v29 }
0x27af   :  { %v7843_v59 = vadd.f32 %v7842_v21, %v16258_v35  ;;  %v7920_v3 = vadd.f32 %v7919_v22, %v16262_v36  ;;  %v7561_v21 = vrot.slane %v16159_v58, %v14457_v60  ;;  %v12685_v22 = vpack.c.bf16 %v9843_v33, %v9842_v32  ;;  %v9924_v58 = vld [vmem:[%s16916_s11 + $0xd80] sm:$0xff]  ;;  %v9878_v33 = vld [vmem:[%s16916_s11 + $0xc10] sm:$0xff] }
0x27b0   :  { %v12753_v41 = vpack.c.bf16 %v9925_v10, %v9924_v58  ;;  %v9881_v58 = vld [vmem:[%s16916_s11 + $0xc28] sm:$0xff] }
0x27b1   :  { %v8241_v5 = vmax.f32 %v7843_v59, 0.0  ;;  %v8243_v27 = vmax.f32 %v7920_v3, 0.0  ;;  %v16303_v17 = vpop.f32.mrb[82].mxu0  ;;  %v16305_v18 = vpop.f32.mrb[112].mxu1  ;;  %12672 = vmatpush3.bf16.msra.mxu0 %v12671_v55  ;;  %12704 = vmatpush3.bf16.msra.mxu1 %v12703_v20  ;;  %v12715_v55 = vpack.c.bf16 %v9857_v61, %v9856_v40  ;;  %v9826_v20 = vld [vmem:[%s16916_s11 + $0xa70] sm:$0xff]  ;;  %v16390_v59 = vld [vmem:[%s16915_s10 + $0x18] sm:$0xff] }
0x27b2   :  { %v16313_v2 = vpop.f32.mrb[83].mxu0  ;;  %v16315_v28 = vpop.f32.mrb[113].mxu1  ;;  %12674 = vmatprep.subr.bf16.mxu0 %v12673_v53  ;;  %12706 = vmatprep.subr.bf16.mxu1 %v12705_v48  ;;  %v12717_v53 = vpack.c.bf16 %v9875_v39, %v9874_v34  ;;  %v9859_v48 = vld [vmem:[%s16916_s11 + $0xb78] sm:$0xff]  ;;  %v9876_v3 = vld [vmem:[%s16916_s11 + $0xc00] sm:$0xff]  ;;  %s12990_s10 = smov [#allocation2]  }
0x27b3   :  { %8743 = vmatprep.mubr.f32.mxu0 %v8241_v5  ;;  %8818 = vmatprep.mubr.f32.mxu1 %v8243_v27  ;;  %v12687_v5 = vpack.c.bf16 %v9827_v38, %v9826_v20  ;;  %v12719_v27 = vpack.c.bf16 %v9859_v48, %v9858_v56  ;;  %v12723_v29 = vpack.c.bf16 %v9877_v24, %v9876_v3  ;;  %v9879_v34 = vld [vmem:[%s16916_s11 + $0xc18] sm:$0xff]  ;;  %v9896_v20 = vld [vmem:[%s16916_s11 + $0xca0] sm:$0xff]  ;;  %v9897_v38 = vld [vmem:[%s16916_s11 + $0xca8] sm:$0xff]  ;;  %s9273_s25 = sshll.u32 %s12990_s10, 4  ;;  %s9274_s25 = int_to_ptr.vmem [resolvable:$true] %s9273_s25 }
0x27b4   :  { %v9928_v56 = vld [vmem:[%s16916_s11 + $0xda0] sm:$0xff]  ;;  %v12727_v48 = vpack.c.bf16 %v9879_v34, %v9878_v33  ;;  %v12729_v24 = vpack.c.bf16 %v9897_v38, %v9896_v20  ;;  %v9903_v20 = vld [vmem:[%s16916_s11 + $0xcd8] sm:$0xff]  ;;  %v9934_v38 = vld [vmem:[%s16916_s11 + $0xdd0] sm:$0xff]  ;;  %s12963_s0 = scalar_lea.vmem %s9274_s25, 32  ;;  %p12968_p1 = scmp.lt.s32.totalorder %s9274_s25, %s9274_s25 }
0x27b5   :  { %12676 = vmatpush3.bf16.msra.mxu0 %v12675_v23  ;;  %12708 = vmatpush3.bf16.msra.mxu1 %v12707_v16  ;;  %v12721_v23 = vpack.c.bf16 %v9893_v50, %v9892_v6  ;;  %v9908_v16 = vld [vmem:[%s16916_s11 + $0xd00] sm:$0xff]  ;;  %p12964_p0 = scmp.ne.s32.totalorder %s9274_s25, %s12963_s0  ;;  %p12969_p2 = scmp.lt.s32.totalorder %s12963_s0, %s12963_s0 }
0x27b6   :  { %12678 = vmatprep.subr.bf16.mxu0 %v12677_v7  ;;  %12710 = vmatprep.subr.bf16.mxu1 %v12709_v11  ;;  %v7841_v7 = vadd.f32 %v16273_v0, %v7553_v9  ;;  %v7918_v11 = vadd.f32 %v16275_v4, %v7561_v21  ;;  %v7849_v0 = vadd.f32 %v16313_v2, %v16258_v35  ;;  %v9880_v50 = vld [vmem:[%s16916_s11 + $0xc20] sm:$0xff] }
0x27b7   :  { %v7926_v4 = vadd.f32 %v16315_v28, %v16262_v36  ;;  %v12725_v35 = vpack.c.bf16 %v9895_v19, %v9894_v14  ;;  %v12757_v2 = vpack.c.bf16 %v9927_v15, %v9926_v25  ;;  %v7847_v28 = vadd.f32 %v16303_v17, %v7553_v9  ;;  %v9910_v9 = vld [vmem:[%s16916_s11 + $0xd10] sm:$0xff]  ;;  %v9884_v34 = vld [vmem:[%s16916_s11 + $0xc40] sm:$0xff]  ;;  %p12970_p3 = por %p12969_p2, %p12968_p1 }
0x27b8   :  { %v8240_v40 = vmax.f32 %v7841_v7, 0.0  ;;  %v8242_v36 = vmax.f32 %v7918_v11, 0.0  ;;  %v8257_v39 = vmax.f32 %v7849_v0, 0.0  ;;  %v9930_v14 = vld [vmem:[%s16916_s11 + $0xdb0] sm:$0xff]  ;;  %v9931_v7 = vld [vmem:[%s16916_s11 + $0xdb8] sm:$0xff]  ;;  %v12731_v11 = vpack.c.bf16 %v9881_v58, %v9880_v50 }
0x27b9   :  { %12680 = vmatpush3.bf16.msra.mxu0 %v12679_v43  ;;  %12712 = vmatpush3.bf16.msra.mxu1 %v12711_v26  ;;  %v16428_v43 = vrot.slane %v16390_v59, %v13177_v49  ;;  %v16432_v26 = vrot.slane %v16390_v59, %v14265_v42  ;;  %v7924_v49 = vadd.f32 %v16305_v18, %v7561_v21  ;;  %v9929_v21 = vld [vmem:[%s16916_s11 + $0xda8] sm:$0xff]  ;;  %v9914_v15 = vld [vmem:[%s16916_s11 + $0xd30] sm:$0xff]  ;;  %v9915_v0 = vld [vmem:[%s16916_s11 + $0xd38] sm:$0xff]  ;;  %p12971_p4 = pnand %p12970_p3, %p12964_p0 }
0x27ba   :  { %12682 = vmatprep.subr.bf16.mxu0 %v12681_v52  ;;  %12714 = vmatprep.subr.bf16.mxu1 %v12713_v31  ;;  %v12755_v31 = vpack.c.bf16 %v9909_v44, %v9908_v16  ;;  %v9898_v16 = vld [vmem:[%s16916_s11 + $0xcb0] sm:$0xff]  ;;  %v9899_v44 = vld [vmem:[%s16916_s11 + $0xcb8] sm:$0xff]  ;;  %v12765_v25 = vpack.c.bf16 %v9931_v7, %v9930_v14  ;;  %v12767_v33 = vpack.c.bf16 %v9915_v0, %v9914_v15  ;;  %v9937_v14 = vld [vmem:[%s16916_s11 + $0xde8] sm:$0xff] }
0x27bb   :  { %v12733_v19 = vpack.c.bf16 %v9899_v44, %v9898_v16  ;;  %v9886_v58 = vld [vmem:[%s16916_s11 + $0xc50] sm:$0xff]  ;;  %v9905_v16 = vld [vmem:[%s16916_s11 + $0xce8] sm:$0xff]  ;;  %v9936_v44 = vld [vmem:[%s16916_s11 + $0xde0] sm:$0xff] }
0x27bc   :  { %v9921_v15 = vld [vmem:[%s16916_s11 + $0xd68] sm:$0xff]  ;;  %v9906_v0 = vld [vmem:[%s16916_s11 + $0xcf0] sm:$0xff] }
0x27bd   :  { %v16398_v8 = vpop.f32.mrb[84].mxu0  ;;  %v16400_v1 = vpop.f32.mrb[114].mxu1  ;;  %12684 = vmatpush3.bf16.msra.mxu0 %v12683_v57  ;;  %12716 = vmatpush3.bf16.msra.mxu1 %v12715_v55  ;;  %v8259_v57 = vmax.f32 %v7926_v4, 0.0  ;;  %v9911_v55 = vld [vmem:[%s16916_s11 + $0xd18] sm:$0xff]  ;;  %v9900_v4 = vld [vmem:[%s16916_s11 + $0xcc0] sm:$0xff] }
0x27be   :  { %v7996_v12 = vpop.f32.mrb[85].mxu0  ;;  %v8073_v37 = vpop.f32.mrb[115].mxu1  ;;  %12686 = vmatprep.subr.bf16.mxu0 %v12685_v22  ;;  %12718 = vmatprep.subr.bf16.mxu1 %v12717_v53  ;;  %v8256_v22 = vmax.f32 %v7847_v28, 0.0  ;;  %v8258_v53 = vmax.f32 %v7924_v49, 0.0  ;;  %v12759_v6 = vpack.c.bf16 %v9911_v55, %v9910_v9  ;;  %v9917_v9 = vld [vmem:[%s16916_s11 + $0xd48] sm:$0xff]  ;;  %v9902_v55 = vld [vmem:[%s16916_s11 + $0xcd0] sm:$0xff] }
0x27bf   :  { %v7997_v17 = vadd.f32 %v7996_v12, %v16428_v43  ;;  %v8074_v18 = vadd.f32 %v8073_v37, %v16432_v26  ;;  %v9882_v37 = vld [vmem:[%s16916_s11 + $0xc30] sm:$0xff] }
0x27c1   :  { %v16434_v30 = vpop.f32.mrb[86].mxu0  ;;  %v16436_v52 = vpop.f32.mrb[116].mxu1  ;;  %12688 = vmatpush3.bf16.msra.mxu0 %v12687_v5  ;;  %12720 = vmatpush3.bf16.msra.mxu1 %v12719_v27  ;;  %v8245_v10 = vmax.f32 %v7997_v17, 0.0  ;;  %v8247_v3 = vmax.f32 %v8074_v18, 0.0  ;;  %v12761_v5 = vpack.c.bf16 %v9929_v21, %v9928_v56  ;;  %v9912_v27 = vld [vmem:[%s16916_s11 + $0xd20] sm:$0xff]  ;;  %v9935_v56 = vld [vmem:[%s16916_s11 + $0xdd8] sm:$0xff] }
0x27c2   :  { %v16440_v61 = vpop.f32.mrb[87].mxu0  ;;  %v16442_v32 = vpop.f32.mrb[117].mxu1  ;;  %12722 = vmatprep.subr.bf16.mxu0 %v12721_v23  ;;  %12754 = vmatprep.subr.bf16.mxu1 %v12753_v41  ;;  %v9913_v23 = vld [vmem:[%s16916_s11 + $0xd28] sm:$0xff]  ;;  %v9883_v41 = vld [vmem:[%s16916_s11 + $0xc38] sm:$0xff]  ;;  %v9916_v18 = vld [vmem:[%s16916_s11 + $0xd40] sm:$0xff] }
0x27c3   :  { %v12763_v12 = vpack.c.bf16 %v9913_v23, %v9912_v27  ;;  %v12735_v49 = vpack.c.bf16 %v9883_v41, %v9882_v37  ;;  %v12771_v50 = vpack.c.bf16 %v9917_v9, %v9916_v18  ;;  %v9919_v27 = vld [vmem:[%s16916_s11 + $0xd58] sm:$0xff]  ;;  %v9904_v23 = vld [vmem:[%s16916_s11 + $0xce0] sm:$0xff]  ;;  %v9889_v37 = vld [vmem:[%s16916_s11 + $0xc68] sm:$0xff] }
0x27c4   :  { %8744 = vmatmul.mubr.f32.vlgmr.msra.gmra.mrb[96].mxu0 %v8240_v40  ;;  %8819 = vmatmul.mubr.f32.vlgmr.msra.gmra.mrb[126].mxu1 %v8242_v36  ;;  %v12745_v41 = vpack.c.bf16 %v9905_v16, %v9904_v23  ;;  %v9923_v9 = vld [vmem:[%s16916_s11 + $0xd78] sm:$0xff] }
0x27c5   :  { %8748 = vmatprep.mubr.f32.mxu0 %v8257_v39  ;;  %8823 = vmatprep.mubr.f32.mxu1 %v8259_v57  ;;  %v9885_v39 = vld [vmem:[%s16916_s11 + $0xc48] sm:$0xff] }
0x27c6   :  { %12724 = vmatpush3.bf16.msra.mxu0 %v12723_v29  ;;  %12756 = vmatpush3.bf16.msra.mxu1 %v12755_v31  ;;  %v9901_v29 = vld [vmem:[%s16916_s11 + $0xcc8] sm:$0xff]  ;;  %v9932_v31 = vld [vmem:[%s16916_s11 + $0xdc0] sm:$0xff] }
0x27c7   :  { %12726 = vmatprep.subr.bf16.mxu0 %v12725_v35  ;;  %12758 = vmatprep.subr.bf16.mxu1 %v12757_v2  ;;  %v9933_v35 = vld [vmem:[%s16916_s11 + $0xdc8] sm:$0xff]  ;;  %v12737_v57 = vpack.c.bf16 %v9901_v29, %v9900_v4  ;;  %v9907_v4 = vld [vmem:[%s16916_s11 + $0xcf8] sm:$0xff]  ;;  %v9938_v29 = vld [vmem:[%s16916_s11 + $0xdf0] sm:$0xff] }
0x27c8   :  { %8749 = vmatmul.mubr.f32.gmra.mrb[98].mxu0 %v8256_v22  ;;  %8824 = vmatmul.mubr.f32.gmra.mrb[128].mxu1 %v8258_v53  ;;  %v12769_v17 = vpack.c.bf16 %v9933_v35, %v9932_v31  ;;  %v9939_v31 = vld [vmem:[%s16916_s11 + $0xdf8] sm:$0xff]  ;;  %v7569_v35 = vrot.slane %v16390_v59, %v13183_v51  ;;  %v12749_v51 = vpack.c.bf16 %v9907_v4, %v9906_v0 }
0x27c9   :  { %8893 = vmatprep.mubr.f32.mxu0 %v8245_v10  ;;  %8968 = vmatprep.mubr.f32.mxu1 %v8247_v3  ;;  %v9887_v10 = vld [vmem:[%s16916_s11 + $0xc58] sm:$0xff]  ;;  %v12741_v3 = vpack.c.bf16 %v9903_v20, %v9902_v55  ;;  %v12781_v18 = vpack.c.bf16 %v9939_v31, %v9938_v29  ;;  %v9956_v55 = vld [vmem:[%s16916_s11 + $0xe80] sm:$0xff]  ;;  %v9957_v20 = vld [vmem:[%s16916_s11 + $0xe88] sm:$0xff] }
0x27ca   :  { %12728 = vmatpush3.bf16.msra.mxu0 %v12727_v48  ;;  %12760 = vmatpush3.bf16.msra.mxu1 %v12759_v6  ;;  %v12739_v6 = vpack.c.bf16 %v9885_v39, %v9884_v34  ;;  %v12743_v7 = vpack.c.bf16 %v9887_v10, %v9886_v58  ;;  %v9890_v34 = vld [vmem:[%s16916_s11 + $0xc70] sm:$0xff]  ;;  %v9891_v39 = vld [vmem:[%s16916_s11 + $0xc78] sm:$0xff]  ;;  %v12785_v10 = vpack.c.bf16 %v9957_v20, %v9956_v55 }
0x27cb   :  { %12730 = vmatprep.subr.bf16.mxu0 %v12729_v24  ;;  %12762 = vmatprep.subr.bf16.mxu1 %v12761_v5  ;;  %v12773_v24 = vpack.c.bf16 %v9935_v56, %v9934_v38  ;;  %v9918_v5 = vld [vmem:[%s16916_s11 + $0xd50] sm:$0xff]  ;;  %v9989_v38 = vld [vmem:[%s16916_s11 + $0xf88] sm:$0xff]  ;;  %v9940_v56 = vld [vmem:[%s16916_s11 + $0xe00] sm:$0xff] }
0x27cc   :  { %v9975_v31 = vld [vmem:[%s16916_s11 + $0xf18] sm:$0xff] }
0x27cd   :  { %v16518_v2 = vpop.f32.mrb[88].mxu0  ;;  %v16520_v40 = vpop.f32.mrb[118].mxu1 }
0x27ce   :  { %12732 = vmatpush3.bf16.msra.mxu0 %v12731_v11  ;;  %12764 = vmatpush3.bf16.msra.mxu1 %v12763_v12  ;;  %v16522_v36 = vpop.f32.mrb[89].mxu0  ;;  %v16524_v28 = vpop.f32.mrb[119].mxu1  ;;  %v12775_v11 = vpack.c.bf16 %v9919_v27, %v9918_v5  ;;  %v9888_v12 = vld [vmem:[%s16916_s11 + $0xc60] sm:$0xff]  ;;  %v9958_v5 = vld [vmem:[%s16916_s11 + $0xe90] sm:$0xff]  ;;  %v7995_v27 = vadd.f32 %v16398_v8, %v7569_v35  ;;  %v8003_v8 = vadd.f32 %v16440_v61, %v16428_v43 }
0x27cf   :  { %12734 = vmatprep.subr.bf16.mxu0 %v12733_v19  ;;  %12766 = vmatprep.subr.bf16.mxu1 %v12765_v25  ;;  %v12777_v19 = vpack.c.bf16 %v9937_v14, %v9936_v44  ;;  %v9920_v25 = vld [vmem:[%s16916_s11 + $0xd60] sm:$0xff]  ;;  %v9959_v44 = vld [vmem:[%s16916_s11 + $0xe98] sm:$0xff]  ;;  %v9990_v14 = vld [vmem:[%s16916_s11 + $0xf90] sm:$0xff]  ;;  %v8001_v43 = vadd.f32 %v16434_v30, %v7569_v35 }
0x27d0   :  { %v9942_v61 = vld [vmem:[%s16916_s11 + $0xe10] sm:$0xff]  ;;  %v9960_v35 = vld [vmem:[%s16916_s11 + $0xea0] sm:$0xff] }
0x27d1   :  { %v16550_v21 = vpop.f32.mrb[90].mxu0  ;;  %v16552_v22 = vpop.f32.mrb[120].mxu1 }
0x27d2   :  { %12736 = vmatpush3.bf16.msra.mxu0 %v12735_v49  ;;  %12768 = vmatpush3.bf16.msra.mxu1 %v12767_v33  ;;  %v16554_v53 = vpop.f32.mrb[91].mxu0  ;;  %v16556_v48 = vpop.f32.mrb[121].mxu1  ;;  %v12747_v49 = vpack.c.bf16 %v9889_v37, %v9888_v12  ;;  %v12779_v33 = vpack.c.bf16 %v9921_v15, %v9920_v25  ;;  %v16670_v12 = vrot.slane %v16390_v59, %v14342_v47  ;;  %v8244_v15 = vmax.f32 %v7995_v27, 0.0  ;;  %v9943_v47 = vld [vmem:[%s16916_s11 + $0xe18] sm:$0xff] }
0x27d3   :  { %12738 = vmatprep.subr.bf16.mxu0 %v12737_v57  ;;  %12770 = vmatprep.subr.bf16.mxu1 %v12769_v17  ;;  %v9922_v57 = vld [vmem:[%s16916_s11 + $0xd70] sm:$0xff]  ;;  %v7577_v17 = vrot.slane %v16390_v59, %v13194_v62  ;;  %v9988_v62 = vld [vmem:[%s16916_s11 + $0xf80] sm:$0xff] }
0x27d4   :  { %v12783_v58 = vpack.c.bf16 %v9923_v9, %v9922_v57  ;;  %v12817_v16 = vpack.c.bf16 %v9989_v38, %v9988_v62  ;;  %v8228_v30 = vadd.f32 %v16524_v28, %v16670_v12  ;;  %v9992_v28 = vld [vmem:[%s16916_s11 + $0xfa0] sm:$0xff]  ;;  %v9977_v38 = vld [vmem:[%s16916_s11 + $0xf28] sm:$0xff] }
0x27d5   :  { %v8072_v23 = vadd.f32 %v16400_v1, %v7577_v17  ;;  %v8080_v1 = vadd.f32 %v16442_v32, %v16432_v26  ;;  %v8078_v26 = vadd.f32 %v16436_v52, %v7577_v17  ;;  %v8261_v32 = vmax.f32 %v8003_v8, 0.0  ;;  %v9974_v52 = vld [vmem:[%s16916_s11 + $0xf10] sm:$0xff]  ;;  %v9944_v17 = vld [vmem:[%s16916_s11 + $0xe20] sm:$0xff] }
0x27d6   :  { %12740 = vmatpush3.bf16.msra.mxu0 %v12739_v6  ;;  %12772 = vmatpush3.bf16.msra.mxu1 %v12771_v50  ;;  %v9941_v6 = vld [vmem:[%s16916_s11 + $0xe08] sm:$0xff]  ;;  %v12751_v50 = vpack.c.bf16 %v9891_v39, %v9890_v34  ;;  %v12791_v39 = vpack.c.bf16 %v9943_v47, %v9942_v61  ;;  %v12823_v57 = vpack.c.bf16 %v9975_v31, %v9974_v52  ;;  %v8251_v9 = vmax.f32 %v8228_v30, 0.0  ;;  %v9976_v62 = vld [vmem:[%s16916_s11 + $0xf20] sm:$0xff]  ;;  %v9966_v61 = vld [vmem:[%s16916_s11 + $0xed0] sm:$0xff] }
0x27d7   :  { %12742 = vmatprep.subr.bf16.mxu0 %v12741_v3  ;;  %12774 = vmatprep.subr.bf16.mxu1 %v12773_v24  ;;  %v9972_v3 = vld [vmem:[%s16916_s11 + $0xf00] sm:$0xff]  ;;  %v9973_v24 = vld [vmem:[%s16916_s11 + $0xf08] sm:$0xff]  ;;  %v12787_v37 = vpack.c.bf16 %v9941_v6, %v9940_v56  ;;  %v8246_v0 = vmax.f32 %v8072_v23, 0.0  ;;  %v8263_v4 = vmax.f32 %v8080_v1, 0.0  ;;  %v8262_v34 = vmax.f32 %v8078_v26, 0.0  ;;  %v9962_v56 = vld [vmem:[%s16916_s11 + $0xeb0] sm:$0xff] }
0x27d8   :  { %v9963_v6 = vld [vmem:[%s16916_s11 + $0xeb8] sm:$0xff]  ;;  %v9996_v8 = vld [vmem:[%s16916_s11 + $0xfc0] sm:$0xff]  ;;  %v9997_v1 = vld [vmem:[%s16916_s11 + $0xfc8] sm:$0xff] }
0x27d9   :  { %v12797_v27 = vpack.c.bf16 %v9963_v6, %v9962_v56  ;;  %v9981_v26 = vld [vmem:[%s16916_s11 + $0xf48] sm:$0xff]  ;;  %v9967_v47 = vld [vmem:[%s16916_s11 + $0xed8] sm:$0xff]  ;;  %v9950_v52 = vld [vmem:[%s16916_s11 + $0xe50] sm:$0xff] }
0x27da   :  { %12744 = vmatpush3.bf16.msra.mxu0 %v12743_v7  ;;  %12776 = vmatpush3.bf16.msra.mxu1 %v12775_v11  ;;  %v9991_v7 = vld [vmem:[%s16916_s11 + $0xf98] sm:$0xff]  ;;  %v16666_v11 = vrot.slane %v16390_v59, %v14339_v45  ;;  %v9970_v56 = vld [vmem:[%s16916_s11 + $0xef0] sm:$0xff] }
0x27db   :  { %12746 = vmatprep.subr.bf16.mxu0 %v12745_v41  ;;  %12778 = vmatprep.subr.bf16.mxu1 %v12777_v19  ;;  %v12819_v41 = vpack.c.bf16 %v9973_v24, %v9972_v3  ;;  %v12789_v19 = vpack.c.bf16 %v9959_v44, %v9958_v5  ;;  %v12821_v25 = vpack.c.bf16 %v9991_v7, %v9990_v14  ;;  %v9946_v24 = vld [vmem:[%s16916_s11 + $0xe30] sm:$0xff]  ;;  %v9947_v5 = vld [vmem:[%s16916_s11 + $0xe38] sm:$0xff]  ;;  %v9964_v14 = vld [vmem:[%s16916_s11 + $0xec0] sm:$0xff] }
0x27dc   :  { %v8151_v29 = vadd.f32 %v16522_v36, %v16666_v11  ;;  %v9961_v36 = vld [vmem:[%s16916_s11 + $0xea8] sm:$0xff]  ;;  %v12827_v3 = vpack.c.bf16 %v9977_v38, %v9976_v62  ;;  %v9979_v44 = vld [vmem:[%s16916_s11 + $0xf38] sm:$0xff]  ;;  %v9984_v62 = vld [vmem:[%s16916_s11 + $0xf60] sm:$0xff] }
0x27dd   :  { %v12793_v55 = vpack.c.bf16 %v9961_v36, %v9960_v35  ;;  %v9965_v7 = vld [vmem:[%s16916_s11 + $0xec8] sm:$0xff]  ;;  %v9951_v31 = vld [vmem:[%s16916_s11 + $0xe58] sm:$0xff]  ;;  %v12805_v35 = vpack.c.bf16 %v9967_v47, %v9966_v61 }
0x27de   :  { %12748 = vmatpush3.bf16.msra.mxu0 %v12747_v49  ;;  %12780 = vmatpush3.bf16.msra.mxu1 %v12779_v33  ;;  %v9993_v49 = vld [vmem:[%s16916_s11 + $0xfa8] sm:$0xff]  ;;  %v8260_v33 = vmax.f32 %v8001_v43, 0.0  ;;  %v9980_v43 = vld [vmem:[%s16916_s11 + $0xf40] sm:$0xff]  ;;  %v9971_v6 = vld [vmem:[%s16916_s11 + $0xef8] sm:$0xff] }
0x27df   :  { %12750 = vmatprep.subr.bf16.mxu0 %v12749_v51  ;;  %12782 = vmatprep.subr.bf16.mxu1 %v12781_v18  ;;  %v9945_v51 = vld [vmem:[%s16916_s11 + $0xe28] sm:$0xff]  ;;  %v8249_v18 = vmax.f32 %v8151_v29, 0.0  ;;  %v12825_v20 = vpack.c.bf16 %v9993_v49, %v9992_v28  ;;  %v12835_v30 = vpack.c.bf16 %v9981_v26, %v9980_v43  ;;  %v9982_v28 = vld [vmem:[%s16916_s11 + $0xf50] sm:$0xff]  ;;  %v9983_v49 = vld [vmem:[%s16916_s11 + $0xf58] sm:$0xff] }
0x27e0   :  { %v9985_v38 = vld [vmem:[%s16916_s11 + $0xf68] sm:$0xff] }
0x27e2   :  { %12752 = vmatpush3.bf16.msra.mxu0 %v12751_v50  ;;  %12784 = vmatpush3.bf16.msra.mxu1 %v12783_v58  ;;  %v9994_v50 = vld [vmem:[%s16916_s11 + $0xfb0] sm:$0xff]  ;;  %v9995_v58 = vld [vmem:[%s16916_s11 + $0xfb8] sm:$0xff] }
0x27e3   :  { %12786 = vmatprep.subr.bf16.mxu0 %v12785_v10  ;;  %12818 = vmatprep.subr.bf16.mxu1 %v12817_v16  ;;  %v12795_v10 = vpack.c.bf16 %v9945_v51, %v9944_v17  ;;  %v12829_v23 = vpack.c.bf16 %v9995_v58, %v9994_v50  ;;  %v9978_v16 = vld [vmem:[%s16916_s11 + $0xf30] sm:$0xff]  ;;  %v12807_v17 = vpack.c.bf16 %v9951_v31, %v9950_v52  ;;  %v10003_v58 = vld [vmem:[%s16916_s11 + $0xff8] sm:$0xff] }
0x27e4   :  { %v12839_v51 = vpack.c.bf16 %v9983_v49, %v9982_v28  ;;  %v10002_v50 = vld [vmem:[%s16916_s11 + $0xff0] sm:$0xff] }
0x27e5   :  { %8894 = vmatmul.mubr.f32.vlgmr.msra.gmra.mrb[100].mxu0 %v8244_v15  ;;  %8969 = vmatmul.mubr.f32.vlgmr.msra.gmra.mrb[130].mxu1 %v8246_v0  ;;  %v12801_v15 = vpack.c.bf16 %v9965_v7, %v9964_v14  ;;  %v12833_v0 = vpack.c.bf16 %v9997_v1, %v9996_v8  ;;  %v9986_v14 = vld [vmem:[%s16916_s11 + $0xf70] sm:$0xff]  ;;  %v9987_v7 = vld [vmem:[%s16916_s11 + $0xf78] sm:$0xff] }
0x27e6   :  { %8898 = vmatprep.mubr.f32.mxu0 %v8261_v32  ;;  %8973 = vmatprep.mubr.f32.mxu1 %v8263_v4  ;;  %v9998_v32 = vld [vmem:[%s16916_s11 + $0xfd0] sm:$0xff]  ;;  %v9999_v4 = vld [vmem:[%s16916_s11 + $0xfd8] sm:$0xff] }
0x27e7   :  { %12788 = vmatpush3.bf16.msra.mxu0 %v12787_v37  ;;  %12820 = vmatpush3.bf16.msra.mxu1 %v12819_v41  ;;  %v12799_v37 = vpack.c.bf16 %v9947_v5, %v9946_v24  ;;  %v12831_v41 = vpack.c.bf16 %v9979_v44, %v9978_v16  ;;  %v12837_v36 = vpack.c.bf16 %v9999_v4, %v9998_v32  ;;  %v9954_v5 = vld [vmem:[%s16916_s11 + $0xe70] sm:$0xff]  ;;  %v9955_v44 = vld [vmem:[%s16916_s11 + $0xe78] sm:$0xff] }
0x27e8   :  { %12790 = vmatprep.subr.bf16.mxu0 %v12789_v19  ;;  %12822 = vmatprep.subr.bf16.mxu1 %v12821_v25  ;;  %v9948_v19 = vld [vmem:[%s16916_s11 + $0xe40] sm:$0xff]  ;;  %v9949_v25 = vld [vmem:[%s16916_s11 + $0xe48] sm:$0xff]  ;;  %v12843_v24 = vpack.c.bf16 %v9985_v38, %v9984_v62  ;;  %v12845_v16 = vpack.c.bf16 %v10003_v58, %v10002_v50  ;;  %v12815_v8 = vpack.c.bf16 %v9955_v44, %v9954_v5 }
0x27e9   :  { %8899 = vmatmul.mubr.f32.gmra.mrb[102].mxu0 %v8260_v33  ;;  %8974 = vmatmul.mubr.f32.gmra.mrb[132].mxu1 %v8262_v34  ;;  %v12803_v29 = vpack.c.bf16 %v9949_v25, %v9948_v19  ;;  %v9968_v33 = vld [vmem:[%s16916_s11 + $0xee0] sm:$0xff]  ;;  %v9969_v34 = vld [vmem:[%s16916_s11 + $0xee8] sm:$0xff] }
0x27ea   :  { %9043 = vmatprep.mubr.f32.mxu0 %v8249_v18  ;;  %9118 = vmatprep.mubr.f32.mxu1 %v8251_v9  ;;  %v9952_v18 = vld [vmem:[%s16916_s11 + $0xe60] sm:$0xff]  ;;  %v9953_v9 = vld [vmem:[%s16916_s11 + $0xe68] sm:$0xff] }
0x27eb   :  { %12792 = vmatpush3.bf16.msra.mxu0 %v12791_v39  ;;  %12824 = vmatpush3.bf16.msra.mxu1 %v12823_v57  ;;  %v10000_v39 = vld [vmem:[%s16916_s11 + $0xfe0] sm:$0xff]  ;;  %v10001_v57 = vld [vmem:[%s16916_s11 + $0xfe8] sm:$0xff] }
0x27ec   :  { %12794 = vmatprep.subr.bf16.mxu0 %v12793_v55  ;;  %12826 = vmatprep.subr.bf16.mxu1 %v12825_v20  ;;  %v12809_v55 = vpack.c.bf16 %v9969_v34, %v9968_v33  ;;  %v12841_v20 = vpack.c.bf16 %v10001_v57, %v10000_v39 }
0x27ef   :  { %12796 = vmatpush3.bf16.msra.mxu0 %v12795_v10  ;;  %12828 = vmatpush3.bf16.msra.mxu1 %v12827_v3  ;;  %v7585_v10 = vrot.slane %v16390_v59, %v14448_v54  ;;  %v12811_v3 = vpack.c.bf16 %v9953_v9, %v9952_v18 }
0x27f0   :  { %12798 = vmatprep.subr.bf16.mxu0 %v12797_v27  ;;  %12830 = vmatprep.subr.bf16.mxu1 %v12829_v23  ;;  %v7593_v27 = vrot.slane %v16390_v59, %v14457_v60  ;;  %v12813_v23 = vpack.c.bf16 %v9971_v6, %v9970_v56  ;;  %v12847_v60 = vpack.c.bf16 %v9987_v7, %v9986_v14 }
0x27f1   :  { %v8149_v59 = vadd.f32 %v16518_v2, %v7585_v10 }
0x27f2   :  { %v8226_v1 = vadd.f32 %v16520_v40, %v7593_v27 }
0x27f3   :  { %12800 = vmatpush3.bf16.msra.mxu0 %v12799_v37  ;;  %12832 = vmatpush3.bf16.msra.mxu1 %v12831_v41  ;;  %v8157_v37 = vadd.f32 %v16554_v53, %v16666_v11  ;;  %v8234_v41 = vadd.f32 %v16556_v48, %v16670_v12  ;;  %v8248_v19 = vmax.f32 %v8149_v59, 0.0 }
0x27f4   :  { %12802 = vmatprep.subr.bf16.mxu0 %v12801_v15  ;;  %12834 = vmatprep.subr.bf16.mxu1 %v12833_v0  ;;  %v8250_v25 = vmax.f32 %v8226_v1, 0.0  ;;  %v8155_v15 = vadd.f32 %v16550_v21, %v7585_v10  ;;  %v8232_v0 = vadd.f32 %v16552_v22, %v7593_v27  ;;  %v16851_v21 = vld [vmem:[%s16913_s8 + $0x8] sm:$0x3f] }
0x27f5   :  { %v8265_v43 = vmax.f32 %v8157_v37, 0.0  ;;  %v8267_v2 = vmax.f32 %v8234_v41, 0.0  ;;  %v8528_v22 = vrot.slane %v16851_v21, %v14265_v42 }
0x27f6   :  { %v8264_v40 = vmax.f32 %v8155_v15, 0.0  ;;  %v8266_v26 = vmax.f32 %v8232_v0, 0.0 }
0x27f7   :  { %12804 = vmatpush3.bf16.msra.mxu0 %v12803_v29  ;;  %12836 = vmatpush3.bf16.msra.mxu1 %v12835_v30 }
0x27f8   :  { %12806 = vmatprep.subr.bf16.mxu0 %v12805_v35  ;;  %12838 = vmatprep.subr.bf16.mxu1 %v12837_v36 }
0x27fb   :  { %12808 = vmatpush3.bf16.msra.mxu0 %v12807_v17  ;;  %12840 = vmatpush3.bf16.msra.mxu1 %v12839_v51 }
0x27fc   :  { %12810 = vmatprep.subr.bf16.mxu0 %v12809_v55  ;;  %12842 = vmatprep.subr.bf16.mxu1 %v12841_v20 }
0x27ff   :  { %12812 = vmatpush3.bf16.msra.mxu0 %v12811_v3  ;;  %12844 = vmatpush3.bf16.msra.mxu1 %v12843_v24 }
0x2800   :  { %12814 = vmatprep.subr.bf16.mxu0 %v12813_v23  ;;  %12846 = vmatprep.subr.bf16.mxu1 %v12845_v16 }
0x2803   :  { %12816 = vmatpush3.bf16.msra.mxu0 %v12815_v8  ;;  %12848 = vmatpush3.bf16.msra.mxu1 %v12847_v60 }
0x2806   :  { %9044 = vmatmul.mubr.f32.vlgmr.msra.gmra.mrb[104].mxu0 %v8248_v19  ;;  %9119 = vmatmul.mubr.f32.vlgmr.msra.gmra.mrb[134].mxu1 %v8250_v25 }
0x2807   :  { %9048 = vmatprep.mubr.f32.mxu0 %v8265_v43  ;;  %9123 = vmatprep.mubr.f32.mxu1 %v8267_v2 }
0x280a   :  { %9049 = vmatmul.mubr.f32.gmra.mrb[106].mxu0 %v8264_v40  ;;  %9124 = vmatmul.mubr.f32.gmra.mrb[136].mxu1 %v8266_v26 }
0x280b   :  { %11658 = vmatprep.mubr.msk.f32.mxu0 %vm12988_vm2, %v12987_v46 }
0x2877   :  { %v10682_v53 = vpop.f32.mrb[92].mxu0  ;;  %v10720_v48 = vpop.f32.mrb[122].mxu1 }
0x2878   :  { %v10683_v11 = vpop.f32.mrb[93].mxu0  ;;  %v10721_v12 = vpop.f32.mrb[123].mxu1 }
0x2879   :  { %v10684_v61 = vadd.f32 %v10683_v11, %v10682_v53  ;;  %v10722_v47 = vadd.f32 %v10721_v12, %v10720_v48 }
0x287b   :  { %v8596_v32 = vadd.f32 %v10684_v61, %v8528_v22  ;;  %v10685_v4 = vpop.f32.mrb[94].mxu0  ;;  %v10723_v29 = vpop.f32.mrb[124].mxu1 }
0x287c   :  { %v10686_v30 = vpop.f32.mrb[95].mxu0  ;;  %v10724_v52 = vpop.f32.mrb[125].mxu1 }
0x287d   :  { %v8671_v46 = vadd.f32 %v10722_v47, %v8596_v32  ;;  %v10687_v31 = vadd.f32 %v10686_v30, %v10685_v4  ;;  %v10725_v35 = vadd.f32 %v10724_v52, %v10723_v29 }
0x287f   :  { %v8601_v36 = vadd.f32 %v10687_v31, %v8528_v22 }
0x2881   :  { %v8676_v28 = vadd.f32 %v10725_v35, %v8601_v36 }
0x2897   :  { %v10758_v49 = vpop.f32.mrb[96].mxu0  ;;  %v10796_v33 = vpop.f32.mrb[126].mxu1 }
0x2898   :  { %v10759_v34 = vpop.f32.mrb[97].mxu0  ;;  %v10797_v39 = vpop.f32.mrb[127].mxu1 }
0x2899   :  { %v10760_v57 = vadd.f32 %v10759_v34, %v10758_v49  ;;  %v10798_v42 = vadd.f32 %v10797_v39, %v10796_v33  ;;  %v9178_v34 = vld [vmem:[%s16917_s12 + $0x8] sm:$0xff] }
0x289b   :  { %v8746_v17 = vadd.f32 %v10760_v57, %v8671_v46  ;;  %v10761_v51 = vpop.f32.mrb[98].mxu0  ;;  %v10799_v18 = vpop.f32.mrb[128].mxu1  ;;  %v12989_v57 = vmov 0.0|0.0  }
0x289c   :  { %v10762_v9 = vpop.f32.mrb[99].mxu0  ;;  %v10800_v55 = vpop.f32.mrb[129].mxu1  ;;  %12849 = vmatprep.subr.bf16.mxu0 %v12989_v57 }
0x289d   :  { %v8821_v20 = vadd.f32 %v10798_v42, %v8746_v17  ;;  %v10763_v62 = vadd.f32 %v10762_v9, %v10761_v51  ;;  %v10801_v38 = vadd.f32 %v10800_v55, %v10799_v18  ;;  %v9179_v42 = vld [vmem:[%s16917_s12 + $0x10] sm:$0xff]  ;;  %v9180_v17 = vld [vmem:[%s16917_s12 + $0x18] sm:$0xff]  ;;  %v9181_v18 = vld [vmem:[%s16917_s12 + $0x20] sm:$0xff] }
0x289e   :  { %v12853_v51 = vpack.c.bf16 %v9180_v17, %v9179_v42  ;;  %v9182_v9 = vld [vmem:[%s16917_s12 + $0x28] sm:$0xff] }
0x289f   :  { %v8751_v56 = vadd.f32 %v10763_v62, %v8676_v28  ;;  %v12856_v55 = vpack.c.bf16 %v9182_v9, %v9181_v18  ;;  %v9184_v62 = vld [vmem:[%s16917_s12 + $0x38] sm:$0xff] }
0x28a1   :  { %v8826_v6 = vadd.f32 %v10801_v38, %v8751_v56 }
0x28b8   :  { %v10834_v50 = vpop.f32.mrb[100].mxu0  ;;  %v10872_v58 = vpop.f32.mrb[130].mxu1 }
0x28b9   :  { %v10835_v10 = vpop.f32.mrb[101].mxu0  ;;  %v10873_v3 = vpop.f32.mrb[131].mxu1 }
0x28ba   :  { %v10836_v24 = vadd.f32 %v10835_v10, %v10834_v50  ;;  %v10874_v5 = vadd.f32 %v10873_v3, %v10872_v58 }
0x28bc   :  { %v8896_v27 = vadd.f32 %v10836_v24, %v8821_v20  ;;  %v10837_v23 = vpop.f32.mrb[102].mxu0  ;;  %v10875_v16 = vpop.f32.mrb[132].mxu1  ;;  %v9183_v20 = vld [vmem:[%s16917_s12 + $0x30] sm:$0xff]  ;;  %v9160_v24 = vrot.slane %v16851_v21, %v14448_v54  ;;  %v10004_v54 = vld [vmem:[%s16918_s13] ss:$0 sm:$0xff] }
0x28bd   :  { %v10838_v44 = vpop.f32.mrb[103].mxu0  ;;  %v10876_v14 = vpop.f32.mrb[133].mxu1  ;;  %v12859_v38 = vpack.c.bf16 %v9184_v62, %v9183_v20 }
0x28be   :  { %v8971_v7 = vadd.f32 %v10874_v5, %v8896_v27  ;;  %v10839_v8 = vadd.f32 %v10838_v44, %v10837_v23  ;;  %v10877_v60 = vadd.f32 %v10876_v14, %v10875_v16  ;;  %v9166_v16 = vrot.slane %v16851_v21, %v14339_v45 }
0x28c0   :  { %v8901_v59 = vadd.f32 %v10839_v8, %v8826_v6 }
0x28c2   :  { %v8976_v1 = vadd.f32 %v10877_v60, %v8901_v59 }
0x28d9   :  { %v10910_v37 = vpop.f32.mrb[104].mxu0  ;;  %v10948_v41 = vpop.f32.mrb[134].mxu1 }
0x28da   :  { %v10911_v19 = vpop.f32.mrb[105].mxu0  ;;  %v10949_v25 = vpop.f32.mrb[135].mxu1 }
0x28db   :  { %v10912_v15 = vadd.f32 %v10911_v19, %v10910_v37  ;;  %v10950_v0 = vadd.f32 %v10949_v25, %v10948_v41 }
0x28dd   :  { %v9046_v43 = vadd.f32 %v10912_v15, %v8971_v7  ;;  %v10913_v2 = vpop.f32.mrb[106].mxu0  ;;  %v10951_v40 = vpop.f32.mrb[136].mxu1 }
0x28de   :  { %v10914_v26 = vpop.f32.mrb[107].mxu0  ;;  %v10952_v53 = vpop.f32.mrb[137].mxu1 }
0x28df   :  { %v9121_v48 = vadd.f32 %v10950_v0, %v9046_v43  ;;  %v10915_v22 = vadd.f32 %v10914_v26, %v10913_v2  ;;  %v10953_v11 = vadd.f32 %v10952_v53, %v10951_v40 }
0x28e1   :  { %v9051_v12 = vadd.f32 %v10915_v22, %v8976_v1  ;;  %v9129_v61 = vadd.f32 %v9121_v48, %v15656_v63 }
0x28e3   :  { %v9126_v47 = vadd.f32 %v10953_v11, %v9051_v12  ;;  %v9131_v32 = vsel %vm155_vm1, %v9129_v61, 0.0 }
0x28e4   :  { %9132 = vadd.xlane.f32.xlu0 %v9131_v32 }
0x28e5   :  { %v9130_v4 = vadd.f32 %v9126_v47, %v15686_v13  ;;  %v9177_v13 = vld [vmem:[%s16917_s12] sm:$0xff] }
0x28e6   :  { %v12850_v39 = vpack.c.bf16 %v9178_v34, %v9177_v13 }
0x28e7   :  { %v9134_v29 = vsel %vm155_vm1, %v9130_v4, 0.0 }
0x28e8   :  { %9135 = vadd.xlane.f32.xlu1 %v9134_v29  ;;  %12851 = vmatpush3.bf16.msra.mxu0 %v12850_v39 }
0x28e9   :  { %12852 = vmatprep.subr.bf16.mxu0 %v12989_v57 }
0x28ec   :  { %12854 = vmatpush3.bf16.msra.mxu0 %v12853_v51 }
0x28ed   :  { %12855 = vmatprep.subr.bf16.mxu0 %v12989_v57 }
0x28f0   :  { %12857 = vmatpush3.bf16.msra.mxu0 %v12856_v55 }
0x28f1   :  { %12858 = vmatprep.subr.bf16.mxu0 %v12989_v57 }
0x28f4   :  { %12860 = vmatpush3.bf16.msra.mxu0 %v12859_v38 }
0x2971   :  { %v9133_v30 = vpop.xlane.xlu0 %9132 }
0x2972   :  { %v9137_v52 = vmul.f32 0.015625, %v9133_v30 }
0x2974   :  { %v9139_v46 = vsub.f32 %v9129_v61, %v9137_v52 }
0x2975   :  { %v9136_v31 = vpop.xlane.xlu1 %9135 }
0x2976   :  { %v9138_v35 = vmul.f32 0.015625, %v9136_v31  ;;  %v9141_v36 = vmul.f32 %v9139_v46, %v9139_v46 }
0x2978   :  { %v9140_v28 = vsub.f32 %v9130_v4, %v9138_v35  ;;  %v9143_v49 = vsel %vm155_vm1, %v9141_v36, 0.0 }
0x2979   :  { %9144 = vadd.xlane.f32.xlu0 %v9143_v49 }
0x297a   :  { %v9142_v63 = vmul.f32 %v9140_v28, %v9140_v28 }
0x297c   :  { %v9146_v33 = vsel %vm155_vm1, %v9142_v63, 0.0 }
0x297d   :  { %9147 = vadd.xlane.f32.xlu1 %v9146_v33 }
0x2a06   :  { %v9145_v56 = vpop.xlane.xlu0 %9144 }
0x2a07   :  { %v9149_v6 = vmul.f32 0.015625, %v9145_v56 }
0x2a09   :  { %v9151_v50 = vadd.f32 1e-05, %v9149_v6 }
0x2a0a   :  { %v9148_v58 = vpop.xlane.xlu1 %9147 }
0x2a0b   :  { %12957 = vrsqrt.f32 %v9151_v50  ;;  %v9150_v10 = vmul.f32 0.015625, %v9148_v58 }
0x2a0d   :  { %v9152_v3 = vadd.f32 1e-05, %v9150_v10 }
0x2a0f   :  { %12959 = vrsqrt.f32 %v9152_v3 }
0x2a15   :  { %v12958_v5 = vpop.eup %12957 }
0x2a16   :  { %v9155_v27 = vmul.f32 %v12958_v5, %v9139_v46 }
0x2a18   :  { %v9161_v23 = vmul.f32 %v9160_v24, %v9155_v27 }
0x2a19   :  { %v12960_v44 = vpop.eup %12959 }
0x2a1a   :  { %v9156_v14 = vmul.f32 %v12960_v44, %v9140_v28  ;;  %v9167_v8 = vadd.f32 %v9166_v16, %v9161_v23 }
0x2a1c   :  { %v9162_v7 = vmul.f32 %v9160_v24, %v9156_v14  ;;  %v9170_v59 = vrot.slane %v9167_v8, 7 }
0x2a1e   :  { %v9168_v60 = vadd.f32 %v9166_v16, %v9162_v7 }
0x2a20   :  { %v9173_v1 = vrot.slane %v9168_v60, 6 }
0x2a22   :  { %v9176_v37 = vsel %vm9175_vm4, %v9170_v59, %v9173_v1 }
0x2a23   :  { %11659 = vmatmul.mubr.msk.f32.vlgmr.msra.gmra.mrb[108].mxu0 %vm155_vm1, %v9176_v37 }
0x2af6   :  { %v9261_v41 = vpop.f32.mrb[108].mxu0 }
0x2af7   :  { %v9262_v45 = vadd.f32 %v10004_v54, %v9261_v41  ;;  %v11660_v21 = vpop.f32.mrb[109].mxu0 }
0x2af9   :  { %9266 = vst.msk [vmem:[#allocation2] sm:$0x3] %vm9265_vm5, %v9262_v45 }
0x2afa   :  { %12974 = shalt.err (!%p12971_p4)
}
0x2afb   :  { %s12975_s4 = scalar_lea.hbm %s16919_s14, 32 }
0x2afc   :  { %p12976_p5 = scmp.ne.s32.totalorder %s16919_s14, %s12975_s4  ;;  %p12979_p6 = scmp.lt.u32.totalorder %s12975_s4, %s16919_s14 }
0x2afe   :  { %p12981_p7 = pnand %p12979_p6, %p12976_p5 }
0x2b00   :  { %12984 = shalt.err (!%p12981_p7)
}
0x2b01   :  { %9276 = dma.vmem_to_hbm [thread:$0]  %s9274_s25, 32, %s16919_s14, [#allocation3]  }
0x2b02   :  { %12985 = dma.done.wait [#allocation3], 32  }
0x2b03   :  { %12986 = vsyncadd [#allocation3], 4294967264 }
0x2b04   :  { %9280 = vsyncpa [#allocation3], 1 }

</bundles_post_ra>
